<compile_context>
chip_gen: v7x
topology: tpu7x:2x2x1
jax: 0.10.0
libtpu: 0.0.40
codegen_flags: <defaults>
</compile_context>

<pallas_src>
import numpy as np
import jax
import jax.numpy as jnp
from jax.experimental import pallas as pl
from jax.experimental.pallas import tpu as pltpu

B = 2              # batch
H = W = 7          # MiniGrid image is 7x7
C_IN = 3
C1 = 32            # conv1 out channels
C2 = 64            # conv2 out channels (real)
C2P = 128          # conv2 out channels padded to a full lane group
HID = 128
N_ACT = 7          # MiniGrid action space
HEADS = 128        # fused policy+value head width (lane group)
OUT_W = HID + HEADS
NPIX = B * H * W   # 98 rows (row = b*49 + h*7 + w)
PAD = 8            # row halo for the shifted-window conv (|shift| <= 8)
EXT = NPIX + 2 * PAD
K_FC = H * W * C2P # 6272

# fc K-dim streamed in 4 chunks (~400 KB bf16 each); all boundaries are
# multiples of 128 so both the flat-activation lane slices and the VMEM
# destination row slices stay tile-aligned.
_FC_CHUNKS = ((0, 1664), (1664, 3200), (3200, 4736), (4736, 6272))


# ----------------------------------------------------------------------------
# Deterministic parameter init (mirrors torch orthogonal_ + zero bias)
# ----------------------------------------------------------------------------
def _orthogonal(rng, shape, gain):
    rows = shape[0]
    cols = int(np.prod(shape[1:]))
    a = rng.standard_normal((rows, cols)).astype(np.float32)
    transpose = rows < cols
    if transpose:
        a = a.T
    q, r = np.linalg.qr(a)
    q = q * np.sign(np.diag(r))
    if transpose:
        q = q.T
    return (gain * q).reshape(shape).astype(np.float32)


def init_params(seed=0):
    rng = np.random.default_rng(seed)
    g = float(np.sqrt(2.0))
    # torch layouts: conv (out, in, kh, kw); linear (out, in)
    w1_t = _orthogonal(rng, (C1, C_IN, 3, 3), g)
    w2_t = _orthogonal(rng, (C2, C1, 3, 3), g)
    wfc_t = _orthogonal(rng, (HID, C2 * H * W), g)   # torch col = c*49 + h*7 + w
    wp_t = _orthogonal(rng, (N_ACT, HID), 0.01)
    wv_t = _orthogonal(rng, (1, HID), 1.0)
    raw = dict(w1_t=w1_t, w2_t=w2_t, wfc_t=wfc_t, wp_t=wp_t, wv_t=wv_t)

    # conv1 tap-major: (9, 3, 32), [dy*3+dx, cin, cout]; /255 folded in.
    w1 = np.transpose(w1_t, (2, 3, 1, 0)).reshape(9, C_IN, C1) / 255.0
    # conv2 tap-major: (9, 32, 64) -> output channels zero-padded to 128.
    w2 = np.zeros((9, C1, C2P), np.float32)
    w2[:, :, :C2] = np.transpose(w2_t, (2, 3, 1, 0)).reshape(9, C1, C2)
    # fc: permute torch's NCHW flatten to (h, w, c) rows, pad c 64->128.
    wfc = wfc_t.T.reshape(C2, H, W, HID).transpose(1, 2, 0, 3)   # (7,7,64,128)
    wfcp = np.zeros((H, W, C2P, HID), np.float32)
    wfcp[:, :, :C2, :] = wfc
    wfcp = wfcp.reshape(K_FC, HID)                               # (6272, 128)
    # fused policy/value heads, padded to 128 output lanes (col 7 = value).
    wph = np.zeros((HID, HEADS), np.float32)
    wph[:, :N_ACT] = wp_t.T
    wph[:, N_ACT] = wv_t[0]

    # {0,1} border mask per (row, tap): row r=(b,h,w) is valid for tap (dy,dx)
    # iff the source pixel (h+dy-1, w+dx-1) is inside the 7x7 image.
    mask = np.zeros((NPIX, 9), np.float32)
    for r in range(NPIX):
        p = r % (H * W)
        hh, ww = divmod(p, W)
        for t in range(9):
            dy, dx = divmod(t, 3)
            if 0 <= hh + dy - 1 < H and 0 <= ww + dx - 1 < W:
                mask[r, t] = 1.0

    params = dict(
        w1=jnp.asarray(w1, jnp.bfloat16), b1=jnp.zeros((1, C1), jnp.float32),
        w2=jnp.asarray(w2, jnp.bfloat16), b2=jnp.zeros((1, C2P), jnp.float32),
        wfc=jnp.asarray(wfcp, jnp.bfloat16), bfc=jnp.zeros((1, HID), jnp.float32),
        wph=jnp.asarray(wph, jnp.bfloat16), bph=jnp.zeros((1, HEADS), jnp.float32),
        mask=jnp.asarray(mask, jnp.float32),
    )
    return params, raw


# ----------------------------------------------------------------------------
# In-kernel helper: 3x3 same-padded conv as 9 shifted-row masked matmuls.
# ext_ref: (EXT, cin) f32 with rows [PAD, PAD+98) = activation, halos = 0.
# w_ref:   (9, cin, cout) bf16 tap-major weights.
# ----------------------------------------------------------------------------
def _conv3x3_taps(ext_ref, w_ref, mask_ref, bias):
    cout = w_ref.shape[2]
    acc = jnp.zeros((NPIX, cout), jnp.float32)
    for t in range(9):
        dy, dx = divmod(t, 3)
        s = (dy - 1) * W + (dx - 1)                   # row shift, |s| <= 8
        win = ext_ref[PAD + s:PAD + s + NPIX, :]      # (98, cin) f32, lane off 0
        if not (dy == 1 and dx == 1):                 # center tap needs no mask
            win = win * mask_ref[:, t:t + 1]          # zero border/wrap rows
        acc = acc + jnp.dot(win.astype(jnp.bfloat16), w_ref[t],
                            preferred_element_type=jnp.float32)
    return jnp.maximum(acc + bias, 0.0)


# ----------------------------------------------------------------------------
# Pallas kernel: conv1 -> relu -> conv2 -> relu -> fc (streamed wfc) -> relu
#                -> fused policy/value heads.  Single invocation, no grid.
# ----------------------------------------------------------------------------
def _forward_kernel(x_ref, mask_ref, w1_ref, b1_ref, w2_ref, b2_ref,
                    wfc_hbm, bfc_ref, wph_ref, bph_ref, out_ref,
                    wfc_vmem, dma_sem, xext_ref, hext_ref):
    # 0) kick off all wfc chunk copies HBM->VMEM immediately so they overlap
    #    the whole conv phase (wfc is the dominant 1.6 MB DMA).
    for i, (r0, r1) in enumerate(_FC_CHUNKS):
        pltpu.make_async_copy(wfc_hbm.at[pl.ds(r0, r1 - r0)],
                              wfc_vmem.at[pl.ds(r0, r1 - r0)],
                              dma_sem.at[i]).start()

    # 1) conv1: zero the 8-row halos only, store obs once, 9 tap matmuls.
    zx = jnp.zeros((PAD, C_IN), jnp.float32)
    xext_ref[0:PAD, :] = zx
    xext_ref[PAD + NPIX:, :] = zx
    xext_ref[PAD:PAD + NPIX, :] = x_ref[...]
    h1 = _conv3x3_taps(xext_ref, w1_ref, mask_ref, b1_ref[...])   # (98,32) f32

    # 2) conv2: same structure; output channels padded 64->128 (zero weights).
    zh = jnp.zeros((PAD, C1), jnp.float32)
    hext_ref[0:PAD, :] = zh
    hext_ref[PAD + NPIX:, :] = zh
    hext_ref[PAD:PAD + NPIX, :] = h1
    h2 = _conv3x3_taps(hext_ref, w2_ref, mask_ref, b2_ref[...])   # (98,128) f32

    # 3) fc: lane-aligned flatten (B, 49*128) and chunk-wise accumulation
    #    against the streamed wfc (the reshape overlaps the in-flight DMAs).
    flat = h2.reshape(B, K_FC).astype(jnp.bfloat16)                # (B, 6272)
    acc = jnp.zeros((B, HID), jnp.float32)
    for i, (r0, r1) in enumerate(_FC_CHUNKS):
        pltpu.make_async_copy(wfc_hbm.at[pl.ds(r0, r1 - r0)],
                              wfc_vmem.at[pl.ds(r0, r1 - r0)],
                              dma_sem.at[i]).wait()
        acc = acc + jnp.dot(flat[:, r0:r1], wfc_vmem[r0:r1, :],
                            preferred_element_type=jnp.float32)
    hidden = jnp.maximum(acc + bfc_ref[...], 0.0)                  # (B,128) f32

    # 4) fused policy + value heads (128 lanes -> unmasked lane store).
    heads = jnp.dot(hidden.astype(jnp.bfloat16), wph_ref[...],
                    preferred_element_type=jnp.float32) + bph_ref[...]

    # lane-dense (B, 256) output slab: [hidden | logits, value, pad].
    out_ref[:, :HID] = hidden
    out_ref[:, HID:] = heads


# ----------------------------------------------------------------------------
# Wrapper: host side is just astype + reshape (one fused op) + output split.
# ----------------------------------------------------------------------------
@jax.jit
def minigrid_ppo_forward(obs, params):
    # obs: (B, 7, 7, 3), raw values in [0, 255] (NHWC, like MiniGrid 'image').
    x2d = obs.astype(jnp.float32).reshape(NPIX, C_IN)   # /255 folded into w1

    vmem = pl.BlockSpec(memory_space=pltpu.MemorySpace.VMEM)
    out = pl.pallas_call(
        _forward_kernel,
        out_shape=jax.ShapeDtypeStruct((B, OUT_W), jnp.float32),
        in_specs=[vmem, vmem, vmem, vmem, vmem, vmem,
                  pl.BlockSpec(memory_space=pl.ANY),   # wfc stays in HBM
                  vmem, vmem, vmem],
        out_specs=vmem,
        scratch_shapes=[
            pltpu.VMEM((K_FC, HID), jnp.bfloat16),     # streamed wfc buffer
            pltpu.SemaphoreType.DMA((len(_FC_CHUNKS),)),
            pltpu.VMEM((EXT, C_IN), jnp.float32),      # conv1 zero-halo buffer
            pltpu.VMEM((EXT, C1), jnp.float32),        # conv2 zero-halo buffer
        ],
        cost_estimate=pl.CostEstimate(
            flops=10_700_000, transcendentals=0, bytes_accessed=1_750_000),
    )(x2d, params['mask'], params['w1'], params['b1'], params['w2'],
      params['b2'], params['wfc'], params['bfc'], params['wph'], params['bph'])

    hidden = out[:, :HID]
    logits = out[:, HID:HID + N_ACT]
    value = out[:, HID + N_ACT]
    # PPOModelOutput(logits, value, hidden)
    return logits, value, hidden


# ----------------------------------------------------------------------------
# NumPy reference (torch semantics, f32) for a parity check.
# ----------------------------------------------------------------------------
def _reference_forward(obs_np, raw):
    x = obs_np.astype(np.float32) / 255.0
    x = np.transpose(x, (0, 3, 1, 2))                         # NCHW

    def conv(inp, w):                                         # w: (Co,Ci,3,3)
        b_, ci, hh, ww = inp.shape
        xp = np.pad(inp, ((0, 0), (0, 0), (1, 1), (1, 1)))
        out = np.zeros((b_, w.shape[0], hh, ww), np.float32)
        for dy in range(3):
            for dx in range(3):
                out += np.einsum('bchw,oc->bohw',
                                 xp[:, :, dy:dy + hh, dx:dx + ww],
                                 w[:, :, dy, dx])
        return out

    h = np.maximum(conv(x, raw['w1_t']), 0.0)
    h = np.maximum(conv(h, raw['w2_t']), 0.0)
    flat = h.reshape(h.shape[0], -1)                          # c*49 + h*7 + w
    hid = np.maximum(flat @ raw['wfc_t'].T, 0.0)
    logits = hid @ raw['wp_t'].T
    value = (hid @ raw['wv_t'].T)[:, 0]
    return logits, value, hid


if __name__ == "__main__":
    key = jax.random.PRNGKey(0)
    obs = jax.random.randint(key, (B, H, W, C_IN), 0, 256,
                             dtype=jnp.int32).astype(jnp.uint8)
    params, raw = init_params(seed=0)

    logits, value, hidden = minigrid_ppo_forward(obs, params)
    jax.block_until_ready((logits, value, hidden))

    assert logits.shape == (B, N_ACT)
    assert value.shape == (B,)
    assert hidden.shape == (B, HID)
    assert bool(jnp.all(jnp.isfinite(logits)))

    # torch-parity check (loose tolerance: weights/activations are bf16 on MXU).
    l_ref, v_ref, h_ref = _reference_forward(np.asarray(obs), raw)
    assert np.allclose(np.asarray(logits), l_ref, atol=5e-2, rtol=5e-2)
    assert np.allclose(np.asarray(value), v_ref, atol=5e-2, rtol=5e-2)
    assert np.allclose(np.asarray(hidden), h_ref, atol=5e-2, rtol=5e-2)

    print("KERNEL_OK")
</pallas_src>

<mosaic_0001>
module attributes {stable_mosaic.version = 11 : i64} {
  func.func @_forward_kernel(%arg0: memref<98x3xf32, #tpu.memory_space<vmem>>, %arg1: memref<98x9xf32, #tpu.memory_space<vmem>>, %arg2: memref<9x3x32xbf16, #tpu.memory_space<vmem>>, %arg3: memref<1x32xf32, #tpu.memory_space<vmem>>, %arg4: memref<9x32x128xbf16, #tpu.memory_space<vmem>>, %arg5: memref<1x128xf32, #tpu.memory_space<vmem>>, %arg6: memref<6272x128xbf16, #tpu.memory_space<any>>, %arg7: memref<1x128xf32, #tpu.memory_space<vmem>>, %arg8: memref<128x128xbf16, #tpu.memory_space<vmem>>, %arg9: memref<1x128xf32, #tpu.memory_space<vmem>>, %arg10: memref<2x256xf32, #tpu.memory_space<vmem>>, %arg11: memref<6272x128xbf16, #tpu.memory_space<vmem>>, %arg12: memref<4x!tpu.dma_semaphore, #tpu.memory_space<semaphore_mem>>, %arg13: memref<114x3xf32, #tpu.memory_space<vmem>>, %arg14: memref<114x32xf32, #tpu.memory_space<vmem>>) attributes {dimension_semantics = [], scalar_prefetch = 0 : i64, scratch_operands = 4 : i64, tpu.core_type = #tpu.core_type<tc>} {
    %c0_i32 = arith.constant 0 : i32
    %c0_i32_0 = arith.constant 0 : i32
    %c0_i32_1 = arith.constant 0 : i32
    %0 = tpu.memref_slice %arg6[%c0_i32_0, %c0_i32_1] : memref<6272x128xbf16, #tpu.memory_space<any>> -> memref<1664x128xbf16, #tpu.memory_space<any>>
    %c0_i32_2 = arith.constant 0 : i32
    %c0_i32_3 = arith.constant 0 : i32
    %1 = tpu.memref_slice %arg11[%c0_i32_2, %c0_i32_3] : memref<6272x128xbf16, #tpu.memory_space<vmem>> -> memref<1664x128xbf16, #tpu.memory_space<vmem>>
    %2 = tpu.memref_slice %arg12[%c0_i32] : memref<4x!tpu.dma_semaphore, #tpu.memory_space<semaphore_mem>> -> memref<1x!tpu.dma_semaphore, #tpu.memory_space<semaphore_mem>>
    %3 = tpu.memref_squeeze %2 : memref<1x!tpu.dma_semaphore, #tpu.memory_space<semaphore_mem>> -> memref<!tpu.dma_semaphore, #tpu.memory_space<semaphore_mem>>
    tpu.enqueue_dma source(%0 : memref<1664x128xbf16, #tpu.memory_space<any>>) target(%1 : memref<1664x128xbf16, #tpu.memory_space<vmem>>) target_semaphore(%3 : memref<!tpu.dma_semaphore, #tpu.memory_space<semaphore_mem>>)
    %c1_i32 = arith.constant 1 : i32
    %c1664_i32 = arith.constant 1664 : i32
    %c0_i32_4 = arith.constant 0 : i32
    %4 = tpu.memref_slice %arg6[%c1664_i32, %c0_i32_4] : memref<6272x128xbf16, #tpu.memory_space<any>> -> memref<1536x128xbf16, #tpu.memory_space<any>>
    %c1664_i32_5 = arith.constant 1664 : i32
    %c0_i32_6 = arith.constant 0 : i32
    %5 = tpu.memref_slice %arg11[%c1664_i32_5, %c0_i32_6] : memref<6272x128xbf16, #tpu.memory_space<vmem>> -> memref<1536x128xbf16, #tpu.memory_space<vmem>>
    %6 = tpu.memref_slice %arg12[%c1_i32] : memref<4x!tpu.dma_semaphore, #tpu.memory_space<semaphore_mem>> -> memref<1x!tpu.dma_semaphore, #tpu.memory_space<semaphore_mem>>
    %7 = tpu.memref_squeeze %6 : memref<1x!tpu.dma_semaphore, #tpu.memory_space<semaphore_mem>> -> memref<!tpu.dma_semaphore, #tpu.memory_space<semaphore_mem>>
    tpu.enqueue_dma source(%4 : memref<1536x128xbf16, #tpu.memory_space<any>>) target(%5 : memref<1536x128xbf16, #tpu.memory_space<vmem>>) target_semaphore(%7 : memref<!tpu.dma_semaphore, #tpu.memory_space<semaphore_mem>>)
    %c2_i32 = arith.constant 2 : i32
    %c3200_i32 = arith.constant 3200 : i32
    %c0_i32_7 = arith.constant 0 : i32
    %8 = tpu.memref_slice %arg6[%c3200_i32, %c0_i32_7] : memref<6272x128xbf16, #tpu.memory_space<any>> -> memref<1536x128xbf16, #tpu.memory_space<any>>
    %c3200_i32_8 = arith.constant 3200 : i32
    %c0_i32_9 = arith.constant 0 : i32
    %9 = tpu.memref_slice %arg11[%c3200_i32_8, %c0_i32_9] : memref<6272x128xbf16, #tpu.memory_space<vmem>> -> memref<1536x128xbf16, #tpu.memory_space<vmem>>
    %10 = tpu.memref_slice %arg12[%c2_i32] : memref<4x!tpu.dma_semaphore, #tpu.memory_space<semaphore_mem>> -> memref<1x!tpu.dma_semaphore, #tpu.memory_space<semaphore_mem>>
    %11 = tpu.memref_squeeze %10 : memref<1x!tpu.dma_semaphore, #tpu.memory_space<semaphore_mem>> -> memref<!tpu.dma_semaphore, #tpu.memory_space<semaphore_mem>>
    tpu.enqueue_dma source(%8 : memref<1536x128xbf16, #tpu.memory_space<any>>) target(%9 : memref<1536x128xbf16, #tpu.memory_space<vmem>>) target_semaphore(%11 : memref<!tpu.dma_semaphore, #tpu.memory_space<semaphore_mem>>)
    %c3_i32 = arith.constant 3 : i32
    %c4736_i32 = arith.constant 4736 : i32
    %c0_i32_10 = arith.constant 0 : i32
    %12 = tpu.memref_slice %arg6[%c4736_i32, %c0_i32_10] : memref<6272x128xbf16, #tpu.memory_space<any>> -> memref<1536x128xbf16, #tpu.memory_space<any>>
    %c4736_i32_11 = arith.constant 4736 : i32
    %c0_i32_12 = arith.constant 0 : i32
    %13 = tpu.memref_slice %arg11[%c4736_i32_11, %c0_i32_12] : memref<6272x128xbf16, #tpu.memory_space<vmem>> -> memref<1536x128xbf16, #tpu.memory_space<vmem>>
    %14 = tpu.memref_slice %arg12[%c3_i32] : memref<4x!tpu.dma_semaphore, #tpu.memory_space<semaphore_mem>> -> memref<1x!tpu.dma_semaphore, #tpu.memory_space<semaphore_mem>>
    %15 = tpu.memref_squeeze %14 : memref<1x!tpu.dma_semaphore, #tpu.memory_space<semaphore_mem>> -> memref<!tpu.dma_semaphore, #tpu.memory_space<semaphore_mem>>
    tpu.enqueue_dma source(%12 : memref<1536x128xbf16, #tpu.memory_space<any>>) target(%13 : memref<1536x128xbf16, #tpu.memory_space<vmem>>) target_semaphore(%15 : memref<!tpu.dma_semaphore, #tpu.memory_space<semaphore_mem>>)
    %cst = arith.constant 0.000000e+00 : f32
    %16 = vector.broadcast %cst : f32 to vector<8x3xf32>
    %c0 = arith.constant 0 : index
    %c0_13 = arith.constant 0 : index
    %17 = vector.load %arg13[%c0, %c0_13] : memref<114x3xf32, #tpu.memory_space<vmem>>, vector<8x3xf32>
    tpu.vector_store %arg13[%c0, %c0_13], %16 {strides = array<i32>} : memref<114x3xf32, #tpu.memory_space<vmem>>, vector<8x3xf32>,
    %c106 = arith.constant 106 : index
    %c0_14 = arith.constant 0 : index
    %18 = vector.load %arg13[%c106, %c0_14] : memref<114x3xf32, #tpu.memory_space<vmem>>, vector<8x3xf32>
    tpu.vector_store %arg13[%c106, %c0_14], %16 {strides = array<i32>} : memref<114x3xf32, #tpu.memory_space<vmem>>, vector<8x3xf32>,
    %c0_15 = arith.constant 0 : index
    %c0_16 = arith.constant 0 : index
    %19 = vector.load %arg0[%c0_15, %c0_16] : memref<98x3xf32, #tpu.memory_space<vmem>>, vector<98x3xf32>
    %c8 = arith.constant 8 : index
    %c0_17 = arith.constant 0 : index
    %20 = vector.load %arg13[%c8, %c0_17] : memref<114x3xf32, #tpu.memory_space<vmem>>, vector<98x3xf32>
    tpu.vector_store %arg13[%c8, %c0_17], %19 {strides = array<i32>} : memref<114x3xf32, #tpu.memory_space<vmem>>, vector<98x3xf32>,
    %c0_18 = arith.constant 0 : index
    %c0_19 = arith.constant 0 : index
    %21 = vector.load %arg3[%c0_18, %c0_19] : memref<1x32xf32, #tpu.memory_space<vmem>>, vector<1x32xf32>
    %cst_20 = arith.constant 0.000000e+00 : f32
    %22 = vector.broadcast %cst_20 : f32 to vector<98x32xf32>
    %c0_21 = arith.constant 0 : index
    %c0_22 = arith.constant 0 : index
    %23 = vector.load %arg13[%c0_21, %c0_22] : memref<114x3xf32, #tpu.memory_space<vmem>>, vector<98x3xf32>
    %c0_23 = arith.constant 0 : index
    %c0_24 = arith.constant 0 : index
    %24 = vector.load %arg1[%c0_23, %c0_24] : memref<98x9xf32, #tpu.memory_space<vmem>>, vector<98x1xf32>
    %25 = vector.broadcast %24 : vector<98x1xf32> to vector<98x3xf32>
    %26 = arith.mulf %23, %25 : vector<98x3xf32>
    %27 = arith.truncf %26 : vector<98x3xf32> to vector<98x3xbf16>
    %c0_25 = arith.constant 0 : index
    %c0_26 = arith.constant 0 : index
    %c0_27 = arith.constant 0 : index
    %28 = vector.load %arg2[%c0_25, %c0_26, %c0_27] : memref<9x3x32xbf16, #tpu.memory_space<vmem>>, vector<1x3x32xbf16>
    %29 = vector.shape_cast %28 : vector<1x3x32xbf16> to vector<3x32xbf16>
    %cst_28 = arith.constant dense<0.000000e+00> : vector<98x32xf32>
    %30 = tpu.matmul %27, %29, %cst_28 {dimension_numbers = #tpu.dot_dimension_numbers<[1], [0], [0], [1], [0, 0, 1, 1], [], []>} : vector<98x3xbf16>, vector<3x32xbf16>, vector<98x32xf32> -> vector<98x32xf32>
    %31 = arith.addf %22, %30 : vector<98x32xf32>
    %c1 = arith.constant 1 : index
    %c0_29 = arith.constant 0 : index
    %32 = vector.load %arg13[%c1, %c0_29] : memref<114x3xf32, #tpu.memory_space<vmem>>, vector<98x3xf32>
    %c0_30 = arith.constant 0 : index
    %c1_31 = arith.constant 1 : index
    %33 = vector.load %arg1[%c0_30, %c1_31] : memref<98x9xf32, #tpu.memory_space<vmem>>, vector<98x1xf32>
    %34 = vector.broadcast %33 : vector<98x1xf32> to vector<98x3xf32>
    %35 = arith.mulf %32, %34 : vector<98x3xf32>
    %36 = arith.truncf %35 : vector<98x3xf32> to vector<98x3xbf16>
    %c1_32 = arith.constant 1 : index
    %c0_33 = arith.constant 0 : index
    %c0_34 = arith.constant 0 : index
    %37 = vector.load %arg2[%c1_32, %c0_33, %c0_34] : memref<9x3x32xbf16, #tpu.memory_space<vmem>>, vector<1x3x32xbf16>
    %38 = vector.shape_cast %37 : vector<1x3x32xbf16> to vector<3x32xbf16>
    %cst_35 = arith.constant dense<0.000000e+00> : vector<98x32xf32>
    %39 = tpu.matmul %36, %38, %cst_35 {dimension_numbers = #tpu.dot_dimension_numbers<[1], [0], [0], [1], [0, 0, 1, 1], [], []>} : vector<98x3xbf16>, vector<3x32xbf16>, vector<98x32xf32> -> vector<98x32xf32>
    %40 = arith.addf %31, %39 : vector<98x32xf32>
    %c2 = arith.constant 2 : index
    %c0_36 = arith.constant 0 : index
    %41 = vector.load %arg13[%c2, %c0_36] : memref<114x3xf32, #tpu.memory_space<vmem>>, vector<98x3xf32>
    %c0_37 = arith.constant 0 : index
    %c2_38 = arith.constant 2 : index
    %42 = vector.load %arg1[%c0_37, %c2_38] : memref<98x9xf32, #tpu.memory_space<vmem>>, vector<98x1xf32>
    %43 = vector.broadcast %42 : vector<98x1xf32> to vector<98x3xf32>
    %44 = arith.mulf %41, %43 : vector<98x3xf32>
    %45 = arith.truncf %44 : vector<98x3xf32> to vector<98x3xbf16>
    %c2_39 = arith.constant 2 : index
    %c0_40 = arith.constant 0 : index
    %c0_41 = arith.constant 0 : index
    %46 = vector.load %arg2[%c2_39, %c0_40, %c0_41] : memref<9x3x32xbf16, #tpu.memory_space<vmem>>, vector<1x3x32xbf16>
    %47 = vector.shape_cast %46 : vector<1x3x32xbf16> to vector<3x32xbf16>
    %cst_42 = arith.constant dense<0.000000e+00> : vector<98x32xf32>
    %48 = tpu.matmul %45, %47, %cst_42 {dimension_numbers = #tpu.dot_dimension_numbers<[1], [0], [0], [1], [0, 0, 1, 1], [], []>} : vector<98x3xbf16>, vector<3x32xbf16>, vector<98x32xf32> -> vector<98x32xf32>
    %49 = arith.addf %40, %48 : vector<98x32xf32>
    %c7 = arith.constant 7 : index
    %c0_43 = arith.constant 0 : index
    %50 = vector.load %arg13[%c7, %c0_43] : memref<114x3xf32, #tpu.memory_space<vmem>>, vector<98x3xf32>
    %c0_44 = arith.constant 0 : index
    %c3 = arith.constant 3 : index
    %51 = vector.load %arg1[%c0_44, %c3] : memref<98x9xf32, #tpu.memory_space<vmem>>, vector<98x1xf32>
    %52 = vector.broadcast %51 : vector<98x1xf32> to vector<98x3xf32>
    %53 = arith.mulf %50, %52 : vector<98x3xf32>
    %54 = arith.truncf %53 : vector<98x3xf32> to vector<98x3xbf16>
    %c3_45 = arith.constant 3 : index
    %c0_46 = arith.constant 0 : index
    %c0_47 = arith.constant 0 : index
    %55 = vector.load %arg2[%c3_45, %c0_46, %c0_47] : memref<9x3x32xbf16, #tpu.memory_space<vmem>>, vector<1x3x32xbf16>
    %56 = vector.shape_cast %55 : vector<1x3x32xbf16> to vector<3x32xbf16>
    %cst_48 = arith.constant dense<0.000000e+00> : vector<98x32xf32>
    %57 = tpu.matmul %54, %56, %cst_48 {dimension_numbers = #tpu.dot_dimension_numbers<[1], [0], [0], [1], [0, 0, 1, 1], [], []>} : vector<98x3xbf16>, vector<3x32xbf16>, vector<98x32xf32> -> vector<98x32xf32>
    %58 = arith.addf %49, %57 : vector<98x32xf32>
    %c8_49 = arith.constant 8 : index
    %c0_50 = arith.constant 0 : index
    %59 = vector.load %arg13[%c8_49, %c0_50] : memref<114x3xf32, #tpu.memory_space<vmem>>, vector<98x3xf32>
    %60 = arith.truncf %59 : vector<98x3xf32> to vector<98x3xbf16>
    %c4 = arith.constant 4 : index
    %c0_51 = arith.constant 0 : index
    %c0_52 = arith.constant 0 : index
    %61 = vector.load %arg2[%c4, %c0_51, %c0_52] : memref<9x3x32xbf16, #tpu.memory_space<vmem>>, vector<1x3x32xbf16>
    %62 = vector.shape_cast %61 : vector<1x3x32xbf16> to vector<3x32xbf16>
    %cst_53 = arith.constant dense<0.000000e+00> : vector<98x32xf32>
    %63 = tpu.matmul %60, %62, %cst_53 {dimension_numbers = #tpu.dot_dimension_numbers<[1], [0], [0], [1], [0, 0, 1, 1], [], []>} : vector<98x3xbf16>, vector<3x32xbf16>, vector<98x32xf32> -> vector<98x32xf32>
    %64 = arith.addf %58, %63 : vector<98x32xf32>
    %c9 = arith.constant 9 : index
    %c0_54 = arith.constant 0 : index
    %65 = vector.load %arg13[%c9, %c0_54] : memref<114x3xf32, #tpu.memory_space<vmem>>, vector<98x3xf32>
    %c0_55 = arith.constant 0 : index
    %c5 = arith.constant 5 : index
    %66 = vector.load %arg1[%c0_55, %c5] : memref<98x9xf32, #tpu.memory_space<vmem>>, vector<98x1xf32>
    %67 = vector.broadcast %66 : vector<98x1xf32> to vector<98x3xf32>
    %68 = arith.mulf %65, %67 : vector<98x3xf32>
    %69 = arith.truncf %68 : vector<98x3xf32> to vector<98x3xbf16>
    %c5_56 = arith.constant 5 : index
    %c0_57 = arith.constant 0 : index
    %c0_58 = arith.constant 0 : index
    %70 = vector.load %arg2[%c5_56, %c0_57, %c0_58] : memref<9x3x32xbf16, #tpu.memory_space<vmem>>, vector<1x3x32xbf16>
    %71 = vector.shape_cast %70 : vector<1x3x32xbf16> to vector<3x32xbf16>
    %cst_59 = arith.constant dense<0.000000e+00> : vector<98x32xf32>
    %72 = tpu.matmul %69, %71, %cst_59 {dimension_numbers = #tpu.dot_dimension_numbers<[1], [0], [0], [1], [0, 0, 1, 1], [], []>} : vector<98x3xbf16>, vector<3x32xbf16>, vector<98x32xf32> -> vector<98x32xf32>
    %73 = arith.addf %64, %72 : vector<98x32xf32>
    %c14 = arith.constant 14 : index
    %c0_60 = arith.constant 0 : index
    %74 = vector.load %arg13[%c14, %c0_60] : memref<114x3xf32, #tpu.memory_space<vmem>>, vector<98x3xf32>
    %c0_61 = arith.constant 0 : index
    %c6 = arith.constant 6 : index
    %75 = vector.load %arg1[%c0_61, %c6] : memref<98x9xf32, #tpu.memory_space<vmem>>, vector<98x1xf32>
    %76 = vector.broadcast %75 : vector<98x1xf32> to vector<98x3xf32>
    %77 = arith.mulf %74, %76 : vector<98x3xf32>
    %78 = arith.truncf %77 : vector<98x3xf32> to vector<98x3xbf16>
    %c6_62 = arith.constant 6 : index
    %c0_63 = arith.constant 0 : index
    %c0_64 = arith.constant 0 : index
    %79 = vector.load %arg2[%c6_62, %c0_63, %c0_64] : memref<9x3x32xbf16, #tpu.memory_space<vmem>>, vector<1x3x32xbf16>
    %80 = vector.shape_cast %79 : vector<1x3x32xbf16> to vector<3x32xbf16>
    %cst_65 = arith.constant dense<0.000000e+00> : vector<98x32xf32>
    %81 = tpu.matmul %78, %80, %cst_65 {dimension_numbers = #tpu.dot_dimension_numbers<[1], [0], [0], [1], [0, 0, 1, 1], [], []>} : vector<98x3xbf16>, vector<3x32xbf16>, vector<98x32xf32> -> vector<98x32xf32>
    %82 = arith.addf %73, %81 : vector<98x32xf32>
    %c15 = arith.constant 15 : index
    %c0_66 = arith.constant 0 : index
    %83 = vector.load %arg13[%c15, %c0_66] : memref<114x3xf32, #tpu.memory_space<vmem>>, vector<98x3xf32>
    %c0_67 = arith.constant 0 : index
    %c7_68 = arith.constant 7 : index
    %84 = vector.load %arg1[%c0_67, %c7_68] : memref<98x9xf32, #tpu.memory_space<vmem>>, vector<98x1xf32>
    %85 = vector.broadcast %84 : vector<98x1xf32> to vector<98x3xf32>
    %86 = arith.mulf %83, %85 : vector<98x3xf32>
    %87 = arith.truncf %86 : vector<98x3xf32> to vector<98x3xbf16>
    %c7_69 = arith.constant 7 : index
    %c0_70 = arith.constant 0 : index
    %c0_71 = arith.constant 0 : index
    %88 = vector.load %arg2[%c7_69, %c0_70, %c0_71] : memref<9x3x32xbf16, #tpu.memory_space<vmem>>, vector<1x3x32xbf16>
    %89 = vector.shape_cast %88 : vector<1x3x32xbf16> to vector<3x32xbf16>
    %cst_72 = arith.constant dense<0.000000e+00> : vector<98x32xf32>
    %90 = tpu.matmul %87, %89, %cst_72 {dimension_numbers = #tpu.dot_dimension_numbers<[1], [0], [0], [1], [0, 0, 1, 1], [], []>} : vector<98x3xbf16>, vector<3x32xbf16>, vector<98x32xf32> -> vector<98x32xf32>
    %91 = arith.addf %82, %90 : vector<98x32xf32>
    %c16 = arith.constant 16 : index
    %c0_73 = arith.constant 0 : index
    %92 = vector.load %arg13[%c16, %c0_73] : memref<114x3xf32, #tpu.memory_space<vmem>>, vector<98x3xf32>
    %c0_74 = arith.constant 0 : index
    %c8_75 = arith.constant 8 : index
    %93 = vector.load %arg1[%c0_74, %c8_75] : memref<98x9xf32, #tpu.memory_space<vmem>>, vector<98x1xf32>
    %94 = vector.broadcast %93 : vector<98x1xf32> to vector<98x3xf32>
    %95 = arith.mulf %92, %94 : vector<98x3xf32>
    %96 = arith.truncf %95 : vector<98x3xf32> to vector<98x3xbf16>
    %c8_76 = arith.constant 8 : index
    %c0_77 = arith.constant 0 : index
    %c0_78 = arith.constant 0 : index
    %97 = vector.load %arg2[%c8_76, %c0_77, %c0_78] : memref<9x3x32xbf16, #tpu.memory_space<vmem>>, vector<1x3x32xbf16>
    %98 = vector.shape_cast %97 : vector<1x3x32xbf16> to vector<3x32xbf16>
    %cst_79 = arith.constant dense<0.000000e+00> : vector<98x32xf32>
    %99 = tpu.matmul %96, %98, %cst_79 {dimension_numbers = #tpu.dot_dimension_numbers<[1], [0], [0], [1], [0, 0, 1, 1], [], []>} : vector<98x3xbf16>, vector<3x32xbf16>, vector<98x32xf32> -> vector<98x32xf32>
    %100 = arith.addf %91, %99 : vector<98x32xf32>
    %101 = vector.broadcast %21 : vector<1x32xf32> to vector<98x32xf32>
    %102 = arith.addf %100, %101 : vector<98x32xf32>
    %cst_80 = arith.constant 0.000000e+00 : f32
    %103 = vector.broadcast %cst_80 : f32 to vector<98x32xf32>
    %104 = arith.maximumf %102, %103 : vector<98x32xf32>
    %cst_81 = arith.constant 0.000000e+00 : f32
    %105 = vector.broadcast %cst_81 : f32 to vector<8x32xf32>
    %c0_82 = arith.constant 0 : index
    %c0_83 = arith.constant 0 : index
    %106 = vector.load %arg14[%c0_82, %c0_83] : memref<114x32xf32, #tpu.memory_space<vmem>>, vector<8x32xf32>
    tpu.vector_store %arg14[%c0_82, %c0_83], %105 {strides = array<i32>} : memref<114x32xf32, #tpu.memory_space<vmem>>, vector<8x32xf32>,
    %c106_84 = arith.constant 106 : index
    %c0_85 = arith.constant 0 : index
    %107 = vector.load %arg14[%c106_84, %c0_85] : memref<114x32xf32, #tpu.memory_space<vmem>>, vector<8x32xf32>
    tpu.vector_store %arg14[%c106_84, %c0_85], %105 {strides = array<i32>} : memref<114x32xf32, #tpu.memory_space<vmem>>, vector<8x32xf32>,
    %c8_86 = arith.constant 8 : index
    %c0_87 = arith.constant 0 : index
    %108 = vector.load %arg14[%c8_86, %c0_87] : memref<114x32xf32, #tpu.memory_space<vmem>>, vector<98x32xf32>
    tpu.vector_store %arg14[%c8_86, %c0_87], %104 {strides = array<i32>} : memref<114x32xf32, #tpu.memory_space<vmem>>, vector<98x32xf32>,
    %c0_88 = arith.constant 0 : index
    %c0_89 = arith.constant 0 : index
    %109 = vector.load %arg5[%c0_88, %c0_89] : memref<1x128xf32, #tpu.memory_space<vmem>>, vector<1x128xf32>
    %cst_90 = arith.constant 0.000000e+00 : f32
    %110 = vector.broadcast %cst_90 : f32 to vector<98x128xf32>
    %c0_91 = arith.constant 0 : index
    %c0_92 = arith.constant 0 : index
    %111 = vector.load %arg14[%c0_91, %c0_92] : memref<114x32xf32, #tpu.memory_space<vmem>>, vector<98x32xf32>
    %c0_93 = arith.constant 0 : index
    %c0_94 = arith.constant 0 : index
    %112 = vector.load %arg1[%c0_93, %c0_94] : memref<98x9xf32, #tpu.memory_space<vmem>>, vector<98x1xf32>
    %113 = vector.broadcast %112 : vector<98x1xf32> to vector<98x32xf32>
    %114 = arith.mulf %111, %113 : vector<98x32xf32>
    %115 = arith.truncf %114 : vector<98x32xf32> to vector<98x32xbf16>
    %c0_95 = arith.constant 0 : index
    %c0_96 = arith.constant 0 : index
    %c0_97 = arith.constant 0 : index
    %116 = vector.load %arg4[%c0_95, %c0_96, %c0_97] : memref<9x32x128xbf16, #tpu.memory_space<vmem>>, vector<1x32x128xbf16>
    %117 = vector.shape_cast %116 : vector<1x32x128xbf16> to vector<32x128xbf16>
    %cst_98 = arith.constant dense<0.000000e+00> : vector<98x128xf32>
    %118 = tpu.matmul %115, %117, %cst_98 {dimension_numbers = #tpu.dot_dimension_numbers<[1], [0], [0], [1], [0, 0, 1, 1], [], []>} : vector<98x32xbf16>, vector<32x128xbf16>, vector<98x128xf32> -> vector<98x128xf32>
    %119 = arith.addf %110, %118 : vector<98x128xf32>
    %c1_99 = arith.constant 1 : index
    %c0_100 = arith.constant 0 : index
    %120 = vector.load %arg14[%c1_99, %c0_100] : memref<114x32xf32, #tpu.memory_space<vmem>>, vector<98x32xf32>
    %c0_101 = arith.constant 0 : index
    %c1_102 = arith.constant 1 : index
    %121 = vector.load %arg1[%c0_101, %c1_102] : memref<98x9xf32, #tpu.memory_space<vmem>>, vector<98x1xf32>
    %122 = vector.broadcast %121 : vector<98x1xf32> to vector<98x32xf32>
    %123 = arith.mulf %120, %122 : vector<98x32xf32>
    %124 = arith.truncf %123 : vector<98x32xf32> to vector<98x32xbf16>
    %c1_103 = arith.constant 1 : index
    %c0_104 = arith.constant 0 : index
    %c0_105 = arith.constant 0 : index
    %125 = vector.load %arg4[%c1_103, %c0_104, %c0_105] : memref<9x32x128xbf16, #tpu.memory_space<vmem>>, vector<1x32x128xbf16>
    %126 = vector.shape_cast %125 : vector<1x32x128xbf16> to vector<32x128xbf16>
    %cst_106 = arith.constant dense<0.000000e+00> : vector<98x128xf32>
    %127 = tpu.matmul %124, %126, %cst_106 {dimension_numbers = #tpu.dot_dimension_numbers<[1], [0], [0], [1], [0, 0, 1, 1], [], []>} : vector<98x32xbf16>, vector<32x128xbf16>, vector<98x128xf32> -> vector<98x128xf32>
    %128 = arith.addf %119, %127 : vector<98x128xf32>
    %c2_107 = arith.constant 2 : index
    %c0_108 = arith.constant 0 : index
    %129 = vector.load %arg14[%c2_107, %c0_108] : memref<114x32xf32, #tpu.memory_space<vmem>>, vector<98x32xf32>
    %c0_109 = arith.constant 0 : index
    %c2_110 = arith.constant 2 : index
    %130 = vector.load %arg1[%c0_109, %c2_110] : memref<98x9xf32, #tpu.memory_space<vmem>>, vector<98x1xf32>
    %131 = vector.broadcast %130 : vector<98x1xf32> to vector<98x32xf32>
    %132 = arith.mulf %129, %131 : vector<98x32xf32>
    %133 = arith.truncf %132 : vector<98x32xf32> to vector<98x32xbf16>
    %c2_111 = arith.constant 2 : index
    %c0_112 = arith.constant 0 : index
    %c0_113 = arith.constant 0 : index
    %134 = vector.load %arg4[%c2_111, %c0_112, %c0_113] : memref<9x32x128xbf16, #tpu.memory_space<vmem>>, vector<1x32x128xbf16>
    %135 = vector.shape_cast %134 : vector<1x32x128xbf16> to vector<32x128xbf16>
    %cst_114 = arith.constant dense<0.000000e+00> : vector<98x128xf32>
    %136 = tpu.matmul %133, %135, %cst_114 {dimension_numbers = #tpu.dot_dimension_numbers<[1], [0], [0], [1], [0, 0, 1, 1], [], []>} : vector<98x32xbf16>, vector<32x128xbf16>, vector<98x128xf32> -> vector<98x128xf32>
    %137 = arith.addf %128, %136 : vector<98x128xf32>
    %c7_115 = arith.constant 7 : index
    %c0_116 = arith.constant 0 : index
    %138 = vector.load %arg14[%c7_115, %c0_116] : memref<114x32xf32, #tpu.memory_space<vmem>>, vector<98x32xf32>
    %c0_117 = arith.constant 0 : index
    %c3_118 = arith.constant 3 : index
    %139 = vector.load %arg1[%c0_117, %c3_118] : memref<98x9xf32, #tpu.memory_space<vmem>>, vector<98x1xf32>
    %140 = vector.broadcast %139 : vector<98x1xf32> to vector<98x32xf32>
    %141 = arith.mulf %138, %140 : vector<98x32xf32>
    %142 = arith.truncf %141 : vector<98x32xf32> to vector<98x32xbf16>
    %c3_119 = arith.constant 3 : index
    %c0_120 = arith.constant 0 : index
    %c0_121 = arith.constant 0 : index
    %143 = vector.load %arg4[%c3_119, %c0_120, %c0_121] : memref<9x32x128xbf16, #tpu.memory_space<vmem>>, vector<1x32x128xbf16>
    %144 = vector.shape_cast %143 : vector<1x32x128xbf16> to vector<32x128xbf16>
    %cst_122 = arith.constant dense<0.000000e+00> : vector<98x128xf32>
    %145 = tpu.matmul %142, %144, %cst_122 {dimension_numbers = #tpu.dot_dimension_numbers<[1], [0], [0], [1], [0, 0, 1, 1], [], []>} : vector<98x32xbf16>, vector<32x128xbf16>, vector<98x128xf32> -> vector<98x128xf32>
    %146 = arith.addf %137, %145 : vector<98x128xf32>
    %c8_123 = arith.constant 8 : index
    %c0_124 = arith.constant 0 : index
    %147 = vector.load %arg14[%c8_123, %c0_124] : memref<114x32xf32, #tpu.memory_space<vmem>>, vector<98x32xf32>
    %148 = arith.truncf %147 : vector<98x32xf32> to vector<98x32xbf16>
    %c4_125 = arith.constant 4 : index
    %c0_126 = arith.constant 0 : index
    %c0_127 = arith.constant 0 : index
    %149 = vector.load %arg4[%c4_125, %c0_126, %c0_127] : memref<9x32x128xbf16, #tpu.memory_space<vmem>>, vector<1x32x128xbf16>
    %150 = vector.shape_cast %149 : vector<1x32x128xbf16> to vector<32x128xbf16>
    %cst_128 = arith.constant dense<0.000000e+00> : vector<98x128xf32>
    %151 = tpu.matmul %148, %150, %cst_128 {dimension_numbers = #tpu.dot_dimension_numbers<[1], [0], [0], [1], [0, 0, 1, 1], [], []>} : vector<98x32xbf16>, vector<32x128xbf16>, vector<98x128xf32> -> vector<98x128xf32>
    %152 = arith.addf %146, %151 : vector<98x128xf32>
    %c9_129 = arith.constant 9 : index
    %c0_130 = arith.constant 0 : index
    %153 = vector.load %arg14[%c9_129, %c0_130] : memref<114x32xf32, #tpu.memory_space<vmem>>, vector<98x32xf32>
    %c0_131 = arith.constant 0 : index
    %c5_132 = arith.constant 5 : index
    %154 = vector.load %arg1[%c0_131, %c5_132] : memref<98x9xf32, #tpu.memory_space<vmem>>, vector<98x1xf32>
    %155 = vector.broadcast %154 : vector<98x1xf32> to vector<98x32xf32>
    %156 = arith.mulf %153, %155 : vector<98x32xf32>
    %157 = arith.truncf %156 : vector<98x32xf32> to vector<98x32xbf16>
    %c5_133 = arith.constant 5 : index
    %c0_134 = arith.constant 0 : index
    %c0_135 = arith.constant 0 : index
    %158 = vector.load %arg4[%c5_133, %c0_134, %c0_135] : memref<9x32x128xbf16, #tpu.memory_space<vmem>>, vector<1x32x128xbf16>
    %159 = vector.shape_cast %158 : vector<1x32x128xbf16> to vector<32x128xbf16>
    %cst_136 = arith.constant dense<0.000000e+00> : vector<98x128xf32>
    %160 = tpu.matmul %157, %159, %cst_136 {dimension_numbers = #tpu.dot_dimension_numbers<[1], [0], [0], [1], [0, 0, 1, 1], [], []>} : vector<98x32xbf16>, vector<32x128xbf16>, vector<98x128xf32> -> vector<98x128xf32>
    %161 = arith.addf %152, %160 : vector<98x128xf32>
    %c14_137 = arith.constant 14 : index
    %c0_138 = arith.constant 0 : index
    %162 = vector.load %arg14[%c14_137, %c0_138] : memref<114x32xf32, #tpu.memory_space<vmem>>, vector<98x32xf32>
    %c0_139 = arith.constant 0 : index
    %c6_140 = arith.constant 6 : index
    %163 = vector.load %arg1[%c0_139, %c6_140] : memref<98x9xf32, #tpu.memory_space<vmem>>, vector<98x1xf32>
    %164 = vector.broadcast %163 : vector<98x1xf32> to vector<98x32xf32>
    %165 = arith.mulf %162, %164 : vector<98x32xf32>
    %166 = arith.truncf %165 : vector<98x32xf32> to vector<98x32xbf16>
    %c6_141 = arith.constant 6 : index
    %c0_142 = arith.constant 0 : index
    %c0_143 = arith.constant 0 : index
    %167 = vector.load %arg4[%c6_141, %c0_142, %c0_143] : memref<9x32x128xbf16, #tpu.memory_space<vmem>>, vector<1x32x128xbf16>
    %168 = vector.shape_cast %167 : vector<1x32x128xbf16> to vector<32x128xbf16>
    %cst_144 = arith.constant dense<0.000000e+00> : vector<98x128xf32>
    %169 = tpu.matmul %166, %168, %cst_144 {dimension_numbers = #tpu.dot_dimension_numbers<[1], [0], [0], [1], [0, 0, 1, 1], [], []>} : vector<98x32xbf16>, vector<32x128xbf16>, vector<98x128xf32> -> vector<98x128xf32>
    %170 = arith.addf %161, %169 : vector<98x128xf32>
    %c15_145 = arith.constant 15 : index
    %c0_146 = arith.constant 0 : index
    %171 = vector.load %arg14[%c15_145, %c0_146] : memref<114x32xf32, #tpu.memory_space<vmem>>, vector<98x32xf32>
    %c0_147 = arith.constant 0 : index
    %c7_148 = arith.constant 7 : index
    %172 = vector.load %arg1[%c0_147, %c7_148] : memref<98x9xf32, #tpu.memory_space<vmem>>, vector<98x1xf32>
    %173 = vector.broadcast %172 : vector<98x1xf32> to vector<98x32xf32>
    %174 = arith.mulf %171, %173 : vector<98x32xf32>
    %175 = arith.truncf %174 : vector<98x32xf32> to vector<98x32xbf16>
    %c7_149 = arith.constant 7 : index
    %c0_150 = arith.constant 0 : index
    %c0_151 = arith.constant 0 : index
    %176 = vector.load %arg4[%c7_149, %c0_150, %c0_151] : memref<9x32x128xbf16, #tpu.memory_space<vmem>>, vector<1x32x128xbf16>
    %177 = vector.shape_cast %176 : vector<1x32x128xbf16> to vector<32x128xbf16>
    %cst_152 = arith.constant dense<0.000000e+00> : vector<98x128xf32>
    %178 = tpu.matmul %175, %177, %cst_152 {dimension_numbers = #tpu.dot_dimension_numbers<[1], [0], [0], [1], [0, 0, 1, 1], [], []>} : vector<98x32xbf16>, vector<32x128xbf16>, vector<98x128xf32> -> vector<98x128xf32>
    %179 = arith.addf %170, %178 : vector<98x128xf32>
    %c16_153 = arith.constant 16 : index
    %c0_154 = arith.constant 0 : index
    %180 = vector.load %arg14[%c16_153, %c0_154] : memref<114x32xf32, #tpu.memory_space<vmem>>, vector<98x32xf32>
    %c0_155 = arith.constant 0 : index
    %c8_156 = arith.constant 8 : index
    %181 = vector.load %arg1[%c0_155, %c8_156] : memref<98x9xf32, #tpu.memory_space<vmem>>, vector<98x1xf32>
    %182 = vector.broadcast %181 : vector<98x1xf32> to vector<98x32xf32>
    %183 = arith.mulf %180, %182 : vector<98x32xf32>
    %184 = arith.truncf %183 : vector<98x32xf32> to vector<98x32xbf16>
    %c8_157 = arith.constant 8 : index
    %c0_158 = arith.constant 0 : index
    %c0_159 = arith.constant 0 : index
    %185 = vector.load %arg4[%c8_157, %c0_158, %c0_159] : memref<9x32x128xbf16, #tpu.memory_space<vmem>>, vector<1x32x128xbf16>
    %186 = vector.shape_cast %185 : vector<1x32x128xbf16> to vector<32x128xbf16>
    %cst_160 = arith.constant dense<0.000000e+00> : vector<98x128xf32>
    %187 = tpu.matmul %184, %186, %cst_160 {dimension_numbers = #tpu.dot_dimension_numbers<[1], [0], [0], [1], [0, 0, 1, 1], [], []>} : vector<98x32xbf16>, vector<32x128xbf16>, vector<98x128xf32> -> vector<98x128xf32>
    %188 = arith.addf %179, %187 : vector<98x128xf32>
    %189 = vector.broadcast %109 : vector<1x128xf32> to vector<98x128xf32>
    %190 = arith.addf %188, %189 : vector<98x128xf32>
    %cst_161 = arith.constant 0.000000e+00 : f32
    %191 = vector.broadcast %cst_161 : f32 to vector<98x128xf32>
    %192 = arith.maximumf %190, %191 : vector<98x128xf32>
    %193 = vector.shape_cast %192 : vector<98x128xf32> to vector<2x6272xf32>
    %194 = arith.truncf %193 : vector<2x6272xf32> to vector<2x6272xbf16>
    %cst_162 = arith.constant 0.000000e+00 : f32
    %195 = vector.broadcast %cst_162 : f32 to vector<2x128xf32>
    %c0_i32_163 = arith.constant 0 : i32
    %c0_i32_164 = arith.constant 0 : i32
    %c0_i32_165 = arith.constant 0 : i32
    %196 = tpu.memref_slice %arg6[%c0_i32_164, %c0_i32_165] : memref<6272x128xbf16, #tpu.memory_space<any>> -> memref<1664x128xbf16, #tpu.memory_space<any>>
    %c0_i32_166 = arith.constant 0 : i32
    %c0_i32_167 = arith.constant 0 : i32
    %197 = tpu.memref_slice %arg11[%c0_i32_166, %c0_i32_167] : memref<6272x128xbf16, #tpu.memory_space<vmem>> -> memref<1664x128xbf16, #tpu.memory_space<vmem>>
    %198 = tpu.memref_slice %arg12[%c0_i32_163] : memref<4x!tpu.dma_semaphore, #tpu.memory_space<semaphore_mem>> -> memref<1x!tpu.dma_semaphore, #tpu.memory_space<semaphore_mem>>
    %199 = tpu.memref_squeeze %198 : memref<1x!tpu.dma_semaphore, #tpu.memory_space<semaphore_mem>> -> memref<!tpu.dma_semaphore, #tpu.memory_space<semaphore_mem>>
    tpu.wait_dma2 semaphore(%199 : memref<!tpu.dma_semaphore, #tpu.memory_space<semaphore_mem>>) src(%196 : memref<1664x128xbf16, #tpu.memory_space<any>>) dst(%197 : memref<1664x128xbf16, #tpu.memory_space<vmem>>)
    %200 = vector.extract_strided_slice %194 {offsets = [0, 0], sizes = [2, 1664], strides = [1, 1]} : vector<2x6272xbf16> to vector<2x1664xbf16>
    %c0_168 = arith.constant 0 : index
    %c0_169 = arith.constant 0 : index
    %201 = vector.load %arg11[%c0_168, %c0_169] : memref<6272x128xbf16, #tpu.memory_space<vmem>>, vector<1664x128xbf16>
    %cst_170 = arith.constant dense<0.000000e+00> : vector<2x128xf32>
    %202 = tpu.matmul %200, %201, %cst_170 {dimension_numbers = #tpu.dot_dimension_numbers<[1], [0], [0], [1], [0, 0, 1, 1], [], []>} : vector<2x1664xbf16>, vector<1664x128xbf16>, vector<2x128xf32> -> vector<2x128xf32>
    %203 = arith.addf %195, %202 : vector<2x128xf32>
    %c1_i32_171 = arith.constant 1 : i32
    %c1664_i32_172 = arith.constant 1664 : i32
    %c0_i32_173 = arith.constant 0 : i32
    %204 = tpu.memref_slice %arg6[%c1664_i32_172, %c0_i32_173] : memref<6272x128xbf16, #tpu.memory_space<any>> -> memref<1536x128xbf16, #tpu.memory_space<any>>
    %c1664_i32_174 = arith.constant 1664 : i32
    %c0_i32_175 = arith.constant 0 : i32
    %205 = tpu.memref_slice %arg11[%c1664_i32_174, %c0_i32_175] : memref<6272x128xbf16, #tpu.memory_space<vmem>> -> memref<1536x128xbf16, #tpu.memory_space<vmem>>
    %206 = tpu.memref_slice %arg12[%c1_i32_171] : memref<4x!tpu.dma_semaphore, #tpu.memory_space<semaphore_mem>> -> memref<1x!tpu.dma_semaphore, #tpu.memory_space<semaphore_mem>>
    %207 = tpu.memref_squeeze %206 : memref<1x!tpu.dma_semaphore, #tpu.memory_space<semaphore_mem>> -> memref<!tpu.dma_semaphore, #tpu.memory_space<semaphore_mem>>
    tpu.wait_dma2 semaphore(%207 : memref<!tpu.dma_semaphore, #tpu.memory_space<semaphore_mem>>) src(%204 : memref<1536x128xbf16, #tpu.memory_space<any>>) dst(%205 : memref<1536x128xbf16, #tpu.memory_space<vmem>>)
    %208 = vector.extract_strided_slice %194 {offsets = [0, 1664], sizes = [2, 1536], strides = [1, 1]} : vector<2x6272xbf16> to vector<2x1536xbf16>
    %c1664 = arith.constant 1664 : index
    %c0_176 = arith.constant 0 : index
    %209 = vector.load %arg11[%c1664, %c0_176] : memref<6272x128xbf16, #tpu.memory_space<vmem>>, vector<1536x128xbf16>
    %cst_177 = arith.constant dense<0.000000e+00> : vector<2x128xf32>
    %210 = tpu.matmul %208, %209, %cst_177 {dimension_numbers = #tpu.dot_dimension_numbers<[1], [0], [0], [1], [0, 0, 1, 1], [], []>} : vector<2x1536xbf16>, vector<1536x128xbf16>, vector<2x128xf32> -> vector<2x128xf32>
    %211 = arith.addf %203, %210 : vector<2x128xf32>
    %c2_i32_178 = arith.constant 2 : i32
    %c3200_i32_179 = arith.constant 3200 : i32
    %c0_i32_180 = arith.constant 0 : i32
    %212 = tpu.memref_slice %arg6[%c3200_i32_179, %c0_i32_180] : memref<6272x128xbf16, #tpu.memory_space<any>> -> memref<1536x128xbf16, #tpu.memory_space<any>>
    %c3200_i32_181 = arith.constant 3200 : i32
    %c0_i32_182 = arith.constant 0 : i32
    %213 = tpu.memref_slice %arg11[%c3200_i32_181, %c0_i32_182] : memref<6272x128xbf16, #tpu.memory_space<vmem>> -> memref<1536x128xbf16, #tpu.memory_space<vmem>>
    %214 = tpu.memref_slice %arg12[%c2_i32_178] : memref<4x!tpu.dma_semaphore, #tpu.memory_space<semaphore_mem>> -> memref<1x!tpu.dma_semaphore, #tpu.memory_space<semaphore_mem>>
    %215 = tpu.memref_squeeze %214 : memref<1x!tpu.dma_semaphore, #tpu.memory_space<semaphore_mem>> -> memref<!tpu.dma_semaphore, #tpu.memory_space<semaphore_mem>>
    tpu.wait_dma2 semaphore(%215 : memref<!tpu.dma_semaphore, #tpu.memory_space<semaphore_mem>>) src(%212 : memref<1536x128xbf16, #tpu.memory_space<any>>) dst(%213 : memref<1536x128xbf16, #tpu.memory_space<vmem>>)
    %216 = vector.extract_strided_slice %194 {offsets = [0, 3200], sizes = [2, 1536], strides = [1, 1]} : vector<2x6272xbf16> to vector<2x1536xbf16>
    %c3200 = arith.constant 3200 : index
    %c0_183 = arith.constant 0 : index
    %217 = vector.load %arg11[%c3200, %c0_183] : memref<6272x128xbf16, #tpu.memory_space<vmem>>, vector<1536x128xbf16>
    %cst_184 = arith.constant dense<0.000000e+00> : vector<2x128xf32>
    %218 = tpu.matmul %216, %217, %cst_184 {dimension_numbers = #tpu.dot_dimension_numbers<[1], [0], [0], [1], [0, 0, 1, 1], [], []>} : vector<2x1536xbf16>, vector<1536x128xbf16>, vector<2x128xf32> -> vector<2x128xf32>
    %219 = arith.addf %211, %218 : vector<2x128xf32>
    %c3_i32_185 = arith.constant 3 : i32
    %c4736_i32_186 = arith.constant 4736 : i32
    %c0_i32_187 = arith.constant 0 : i32
    %220 = tpu.memref_slice %arg6[%c4736_i32_186, %c0_i32_187] : memref<6272x128xbf16, #tpu.memory_space<any>> -> memref<1536x128xbf16, #tpu.memory_space<any>>
    %c4736_i32_188 = arith.constant 4736 : i32
    %c0_i32_189 = arith.constant 0 : i32
    %221 = tpu.memref_slice %arg11[%c4736_i32_188, %c0_i32_189] : memref<6272x128xbf16, #tpu.memory_space<vmem>> -> memref<1536x128xbf16, #tpu.memory_space<vmem>>
    %222 = tpu.memref_slice %arg12[%c3_i32_185] : memref<4x!tpu.dma_semaphore, #tpu.memory_space<semaphore_mem>> -> memref<1x!tpu.dma_semaphore, #tpu.memory_space<semaphore_mem>>
    %223 = tpu.memref_squeeze %222 : memref<1x!tpu.dma_semaphore, #tpu.memory_space<semaphore_mem>> -> memref<!tpu.dma_semaphore, #tpu.memory_space<semaphore_mem>>
    tpu.wait_dma2 semaphore(%223 : memref<!tpu.dma_semaphore, #tpu.memory_space<semaphore_mem>>) src(%220 : memref<1536x128xbf16, #tpu.memory_space<any>>) dst(%221 : memref<1536x128xbf16, #tpu.memory_space<vmem>>)
    %224 = vector.extract_strided_slice %194 {offsets = [0, 4736], sizes = [2, 1536], strides = [1, 1]} : vector<2x6272xbf16> to vector<2x1536xbf16>
    %c4736 = arith.constant 4736 : index
    %c0_190 = arith.constant 0 : index
    %225 = vector.load %arg11[%c4736, %c0_190] : memref<6272x128xbf16, #tpu.memory_space<vmem>>, vector<1536x128xbf16>
    %cst_191 = arith.constant dense<0.000000e+00> : vector<2x128xf32>
    %226 = tpu.matmul %224, %225, %cst_191 {dimension_numbers = #tpu.dot_dimension_numbers<[1], [0], [0], [1], [0, 0, 1, 1], [], []>} : vector<2x1536xbf16>, vector<1536x128xbf16>, vector<2x128xf32> -> vector<2x128xf32>
    %227 = arith.addf %219, %226 : vector<2x128xf32>
    %c0_192 = arith.constant 0 : index
    %c0_193 = arith.constant 0 : index
    %228 = vector.load %arg7[%c0_192, %c0_193] : memref<1x128xf32, #tpu.memory_space<vmem>>, vector<1x128xf32>
    %229 = vector.broadcast %228 : vector<1x128xf32> to vector<2x128xf32>
    %230 = arith.addf %227, %229 : vector<2x128xf32>
    %cst_194 = arith.constant 0.000000e+00 : f32
    %231 = vector.broadcast %cst_194 : f32 to vector<2x128xf32>
    %232 = arith.maximumf %230, %231 : vector<2x128xf32>
    %233 = arith.truncf %232 : vector<2x128xf32> to vector<2x128xbf16>
    %c0_195 = arith.constant 0 : index
    %c0_196 = arith.constant 0 : index
    %234 = vector.load %arg8[%c0_195, %c0_196] : memref<128x128xbf16, #tpu.memory_space<vmem>>, vector<128x128xbf16>
    %cst_197 = arith.constant dense<0.000000e+00> : vector<2x128xf32>
    %235 = tpu.matmul %233, %234, %cst_197 {dimension_numbers = #tpu.dot_dimension_numbers<[1], [0], [0], [1], [0, 0, 1, 1], [], []>} : vector<2x128xbf16>, vector<128x128xbf16>, vector<2x128xf32> -> vector<2x128xf32>
    %c0_198 = arith.constant 0 : index
    %c0_199 = arith.constant 0 : index
    %236 = vector.load %arg9[%c0_198, %c0_199] : memref<1x128xf32, #tpu.memory_space<vmem>>, vector<1x128xf32>
    %237 = vector.broadcast %236 : vector<1x128xf32> to vector<2x128xf32>
    %238 = arith.addf %235, %237 : vector<2x128xf32>
    %c0_200 = arith.constant 0 : index
    %c0_201 = arith.constant 0 : index
    %239 = vector.load %arg10[%c0_200, %c0_201] : memref<2x256xf32, #tpu.memory_space<vmem>>, vector<2x128xf32>
    tpu.vector_store %arg10[%c0_200, %c0_201], %232 {strides = array<i32>} : memref<2x256xf32, #tpu.memory_space<vmem>>, vector<2x128xf32>,
    %c0_202 = arith.constant 0 : index
    %c128 = arith.constant 128 : index
    %240 = vector.load %arg10[%c0_202, %c128] : memref<2x256xf32, #tpu.memory_space<vmem>>, vector<2x128xf32>
    tpu.vector_store %arg10[%c0_202, %c128], %238 {strides = array<i32>} : memref<2x256xf32, #tpu.memory_space<vmem>>, vector<2x128xf32>,
    return
  }
}

</mosaic_0001>

<bundles_post_ra>
// kernel: minigrid_ppo_forward.1
= control target key start
LH: loop header
LB: loop body
LE: loop exit
PB: predicated region body
PF: predicated region fallthrough
CT: control target
= control target key end

     0   :  { %15 = vsyncpa [#allocation7], 0  ;;  %s11032_s0 = inlined_call_operand.vmem [shape: f32[98,3], index: 0, kind: input, shape index: {}]   ;;  %s11033_s1 = inlined_call_operand.vmem [shape: f32[98,9], index: 1, kind: input, shape index: {}]   ;;  %s11034_s2 = inlined_call_operand.hbm [shape: bf16[9,3,32], index: 2, kind: input, shape index: {}]   ;;  %s11035_s3 = inlined_call_operand.hbm [shape: f32[1,32], index: 3, kind: input, shape index: {}]   ;;  %s11036_s4 = inlined_call_operand.hbm [shape: bf16[9,32,128], index: 4, kind: input, shape index: {}]   ;;  %s11037_s5 = inlined_call_operand.hbm [shape: f32[1,128], index: 5, kind: input, shape index: {}]   ;;  %s11038_s6 = inlined_call_operand.hbm [shape: bf16[6272,128], index: 6, kind: input, shape index: {}]   ;;  %s11039_s7 = inlined_call_operand.hbm [shape: f32[1,128], index: 7, kind: input, shape index: {}]   ;;  %s11040_s8 = inlined_call_operand.hbm [shape: bf16[128,128], index: 8, kind: input, shape index: {}]   ;;  %s11041_s9 = inlined_call_operand.hbm [shape: f32[1,128], index: 9, kind: input, shape index: {}]   ;;  %s11042_s10 = inlined_call_operand.vmem [shape: f32[2,256], index: 10, kind: output, shape index: {}]  }
   0x1   :  { %16 = vsyncpa [#allocation9], 0 }
   0x2   :  { %17 = vsyncpa [#allocation12], 0 }
   0x3   :  { %18 = vsyncpa [#allocation15], 0  ;;  %s7783_s13 = smov [#allocation8]   ;;  %s7784_s15 = smov [#allocation11]  }
   0x4   :  { %s41_s14 = sshll.u32 %s7783_s13, 4  ;;  %s63_s16 = sshll.u32 %s7784_s15, 4  ;;  %s42_s14 = int_to_ptr.vmem [resolvable:$true] %s41_s14  ;;  %s64_s16 = int_to_ptr.vmem [resolvable:$true] %s63_s16 }
   0x5   :  { %s7516_s19 = scalar_lea.hbm %s11035_s3, 16 }
   0x6   :  { %p7517_p0 = scmp.ne.s32.totalorder %s11035_s3, %s7516_s19  ;;  %p7520_p1 = scmp.lt.u32.totalorder %s7516_s19, %s11035_s3 }
   0x8   :  { %p7522_p2 = pnand %p7520_p1, %p7517_p0 }
   0xa   :  { %7525 = shalt.err (!%p7522_p2)
}
   0xb   :  { %s7526_s24 = scalar_lea.vmem %s42_s14, 16  ;;  %s7530_s25 = scalar_lea.vmem %s42_s14, 32 }
   0xc   :  { %p7527_p3 = scmp.ne.s32.totalorder %s42_s14, %s7526_s24  ;;  %p7531_p4 = scmp.lt.s32.totalorder %s42_s14, %s42_s14 }
   0xd   :  { %p7532_p5 = scmp.lt.s32.totalorder %s7530_s25, %s7526_s24 }
   0xf   :  { %p7533_p6 = por %p7532_p5, %p7531_p4 }
  0x11   :  { %p7534_p7 = pnand %p7533_p6, %p7527_p3 }
  0x13   :  { %7537 = shalt.err (!%p7534_p7)
}
  0x14   :  { %44 = dma.hbm_to_vmem [thread:$0]  %s11035_s3, 16, %s42_s14, [#allocation9]  }
  0x15   :  { %s7538_s30 = scalar_lea.hbm %s11037_s5, 16 }
  0x16   :  { %p7539_p8 = scmp.ne.s32.totalorder %s11037_s5, %s7538_s30  ;;  %p7542_p9 = scmp.lt.u32.totalorder %s7538_s30, %s11037_s5 }
  0x18   :  { %p7544_p10 = pnand %p7542_p9, %p7539_p8 }
  0x1a   :  { %7547 = shalt.err (!%p7544_p10)
}
  0x1b   :  { %s7548_s17 = scalar_lea.vmem %s64_s16, 16  ;;  %s7552_s18 = scalar_lea.vmem %s64_s16, 32 }
  0x1c   :  { %p7549_p11 = scmp.ne.s32.totalorder %s64_s16, %s7548_s17  ;;  %p7553_p12 = scmp.lt.s32.totalorder %s64_s16, %s64_s16 }
  0x1d   :  { %p7554_p13 = scmp.lt.s32.totalorder %s7552_s18, %s7548_s17 }
  0x1f   :  { %p7555_p0 = por %p7554_p13, %p7553_p12 }
  0x21   :  { %p7556_p1 = pnand %p7555_p0, %p7549_p11 }
  0x23   :  { %7559 = shalt.err (!%p7556_p1)
}
  0x24   :  { %66 = dma.hbm_to_vmem [thread:$0]  %s11037_s5, 16, %s64_s16, [#allocation12]  }
  0x25   :  { %s7785_s19 = smov [#allocation14]   ;;  %s7786_s21 = smov [#allocation6]  }
  0x26   :  { %s82_s20 = sshll.u32 %s7785_s19, 4  ;;  %s28_s22 = sshll.u32 %s7786_s21, 4  ;;  %s83_s20 = int_to_ptr.vmem [resolvable:$true] %s82_s20  ;;  %s7888_s22 = int_to_ptr.vmem [resolvable:$true] %s28_s22 }
  0x27   :  { %s7560_s25 = scalar_lea.hbm %s11040_s8, 1024 }
  0x28   :  { %p7561_p2 = scmp.ne.s32.totalorder %s11040_s8, %s7560_s25  ;;  %p7564_p3 = scmp.lt.u32.totalorder %s7560_s25, %s11040_s8 }
  0x2a   :  { %p7566_p4 = pnand %p7564_p3, %p7561_p2 }
  0x2c   :  { %7569 = shalt.err (!%p7566_p4)
}
  0x2d   :  { %s7570_s5 = scalar_lea.vmem %s83_s20, 1024  ;;  %p7575_p6 = scmp.lt.s32.totalorder %s83_s20, %s83_s20 }
  0x2e   :  { %p7571_p5 = scmp.ne.s32.totalorder %s83_s20, %s7570_s5  ;;  %p7576_p7 = scmp.lt.s32.totalorder %s7570_s5, %s7570_s5 }
  0x30   :  { %p7577_p8 = por %p7576_p7, %p7575_p6 }
  0x32   :  { %p7578_p9 = pnand %p7577_p8, %p7571_p5 }
  0x34   :  { %7581 = shalt.err (!%p7578_p9)
}
  0x35   :  { %s7787_s16 = smov 64   ;;  %s7788_s30 = smov 4  }
  0x36   :  { %88 = dma.hbm_to_vmem [thread:$0]  %s11040_s8, 1024, %s83_s20, [#allocation15], %s7787_s16, %s7787_s16, %s7788_s30  }
  0x37   :  { %s7582_s17 = scalar_lea.hbm %s11034_s2, 288 }
  0x38   :  { %p7583_p10 = scmp.ne.s32.totalorder %s11034_s2, %s7582_s17  ;;  %p7586_p11 = scmp.lt.u32.totalorder %s7582_s17, %s11034_s2 }
  0x3a   :  { %p7588_p12 = pnand %p7586_p11, %p7583_p10 }
  0x3c   :  { %7591 = shalt.err (!%p7588_p12)
}
  0x3d   :  { %s7592_s21 = scalar_lea.vmem %s7888_s22, 288  ;;  %p7597_p0 = scmp.lt.s32.totalorder %s7888_s22, %s7888_s22 }
  0x3e   :  { %p7593_p13 = scmp.ne.s32.totalorder %s7888_s22, %s7592_s21  ;;  %p7598_p1 = scmp.lt.s32.totalorder %s7592_s21, %s7592_s21 }
  0x40   :  { %p7599_p2 = por %p7598_p1, %p7597_p0 }
  0x42   :  { %p7600_p3 = pnand %p7599_p2, %p7593_p13 }
  0x44   :  { %7603 = shalt.err (!%p7600_p3)
}
  0x45   :  { %s7789_s8 = smov 32   ;;  %s7790_s20 = smov 2  }
  0x46   :  { %34 = dma.hbm_to_vmem [thread:$0]  %s11034_s2, 288, %s7888_s22, [#allocation7], %s7789_s8, %s7789_s8, %s7790_s20  }
  0x47   :  { %s7791_s25 = smov [#allocation10]   ;;  %s7792_s27 = smov [#allocation13]  }
  0x48   :  { %s50_s26 = sshll.u32 %s7791_s25, 4  ;;  %s73_s28 = sshll.u32 %s7792_s27, 4  ;;  %s51_s26 = int_to_ptr.vmem [resolvable:$true] %s50_s26  ;;  %s74_s28 = int_to_ptr.vmem [resolvable:$true] %s73_s28 }
  0x49   :  { %s7604_s11 = scalar_lea.hbm %s11036_s4, 2304 }
  0x4a   :  { %p7605_p4 = scmp.ne.s32.totalorder %s11036_s4, %s7604_s11  ;;  %p7608_p5 = scmp.lt.u32.totalorder %s7604_s11, %s11036_s4 }
  0x4c   :  { %p7610_p6 = pnand %p7608_p5, %p7605_p4 }
  0x4e   :  { %7613 = shalt.err (!%p7610_p6)
}
  0x4f   :  { %s7614_s2 = scalar_lea.vmem %s51_s26, 2304  ;;  %p7619_p8 = scmp.lt.s32.totalorder %s51_s26, %s51_s26 }
  0x50   :  { %p7615_p7 = scmp.ne.s32.totalorder %s51_s26, %s7614_s2  ;;  %p7620_p9 = scmp.lt.s32.totalorder %s7614_s2, %s7614_s2 }
  0x52   :  { %p7621_p10 = por %p7620_p9, %p7619_p8 }
  0x54   :  { %p7622_p11 = pnand %p7621_p10, %p7615_p7 }
  0x56   :  { %7625 = shalt.err (!%p7622_p11)
}
  0x57   :  { %56 = dma.hbm_to_vmem [thread:$0]  %s11036_s4, 2304, %s51_s26, [#allocation9], %s7787_s16, %s7787_s16, %s7788_s30  }
  0x58   :  { %s7626_s19 = scalar_lea.hbm %s11039_s7, 16 }
  0x59   :  { %p7627_p12 = scmp.ne.s32.totalorder %s11039_s7, %s7626_s19  ;;  %p7630_p13 = scmp.lt.u32.totalorder %s7626_s19, %s11039_s7 }
  0x5b   :  { %p7632_p0 = pnand %p7630_p13, %p7627_p12 }
  0x5d   :  { %7635 = shalt.err (!%p7632_p0)
}
  0x5e   :  { %s7636_s24 = scalar_lea.vmem %s74_s28, 16  ;;  %s7640_s25 = scalar_lea.vmem %s74_s28, 32 }
  0x5f   :  { %p7637_p1 = scmp.ne.s32.totalorder %s74_s28, %s7636_s24  ;;  %p7641_p2 = scmp.lt.s32.totalorder %s74_s28, %s74_s28 }
  0x60   :  { %p7642_p3 = scmp.lt.s32.totalorder %s7640_s25, %s7636_s24 }
  0x62   :  { %p7643_p4 = por %p7642_p3, %p7641_p2 }
  0x64   :  { %p7644_p5 = pnand %p7643_p4, %p7637_p1 }
  0x66   :  { %7647 = shalt.err (!%p7644_p5)
}
  0x67   :  { %76 = dma.hbm_to_vmem [thread:$0]  %s11039_s7, 16, %s74_s28, [#allocation12]  }
  0x68   :  { %s7793_s30 = smov [#allocation16]   ;;  %s7648_s5 = scalar_lea.hbm %s11041_s9, 16 }
  0x69   :  { %s95_s26 = sshll.u32 %s7793_s30, 4  ;;  %p7649_p6 = scmp.ne.s32.totalorder %s11041_s9, %s7648_s5  ;;  %s96_s26 = int_to_ptr.vmem [resolvable:$true] %s95_s26 }
  0x6a   :  { %p7652_p7 = scmp.lt.u32.totalorder %s7648_s5, %s11041_s9 }
  0x6c   :  { %p7654_p8 = pnand %p7652_p7, %p7649_p6 }
  0x6e   :  { %7657 = shalt.err (!%p7654_p8)
}
  0x6f   :  { %s7658_s17 = scalar_lea.vmem %s96_s26, 16  ;;  %s7662_s7 = scalar_lea.vmem %s96_s26, 32 }
  0x70   :  { %p7659_p9 = scmp.ne.s32.totalorder %s96_s26, %s7658_s17  ;;  %p7663_p10 = scmp.lt.s32.totalorder %s96_s26, %s96_s26 }
  0x71   :  { %p7664_p11 = scmp.lt.s32.totalorder %s7662_s7, %s7658_s17 }
  0x73   :  { %p7665_p12 = por %p7664_p11, %p7663_p10 }
  0x75   :  { %p7666_p13 = pnand %p7665_p12, %p7659_p9 }
  0x77   :  { %7669 = shalt.err (!%p7666_p13)
}
  0x78   :  { %98 = dma.hbm_to_vmem [thread:$0]  %s11041_s9, 16, %s96_s26, [#allocation15]  }
  0x79   :  { %7767 = dma.done.wait [#allocation7], 288  }
  0x7a   :  { %7768 = vsyncadd [#allocation7], 4294967008 }
  0x7b   :  { %7769 = dma.done.wait [#allocation9], 2320  }
  0x7c   :  { %7770 = vsyncadd [#allocation9], 4294964976 }
  0x7d   :  { %7771 = dma.done.wait [#allocation12], 32  }
  0x7e   :  { %7772 = vsyncadd [#allocation12], 4294967264 }
  0x7f   :  { %7773 = dma.done.wait [#allocation15], 1040  }
  0x80   :  { %7774 = vsyncadd [#allocation15], 4294966256  ;;  %v7794_v0 = vmov 1   ;;  %vm174_vm0 = vcmask 23552   ;;  %v11054_v1 = vmov 0.0   ;;  %v7972_v2 = vld [vmem:[%s11033_s1 + $0x10] sm:$0xff] }
  0x81   :  { %7363 = vset.pattern.permute.xlu1 %v7794_v0  ;;  %7362 = vset.pattern.permute.xlu0 %v7794_v0  ;;  %175 = vst.msk [vmem:[#allocation4] sm:$0xff] %vm174_vm0, %v11054_v1  ;;  %176 = vst.msk [vmem:[#allocation4 + $0x6a] sm:$0xff] %vm174_vm0, %v11054_v1  ;;  %v7977_v3 = vld [vmem:[%s11033_s1] sm:$0xff]  ;;  %vm425_vm1 = vcmask 1040384   ;;  %v7984_v4 = vld [vmem:[%s11033_s1 + $0x18] sm:$0xff]  ;;  %vm426_vm2 = vcmask 1041408  }
  0x82   :  { %6738 = vmatprep.subr.bf16.mxu0 %v11054_v1  ;;  %6768 = vmatprep.subr.bf16.mxu1 %v11054_v1  ;;  %v7989_v5 = vld [vmem:[%s11033_s1 + $0x8] sm:$0xff]  ;;  %v7796_v6 = vmov 65535   ;;  %v8002_v10 = vld [vmem:[%s11033_s1 + $0x20] sm:$0xff]  ;;  %v179_v12 = vld [vmem:[%s11032_s0 + $0x10] sm:$0xff]  ;;  %vm7797_vm3 = vmmov 0   ;;  %v11050_v32 = vmov 0  }
  0x83   :  { %339 = vperm.xlu1 %7363, %v7972_v2   ;;  %331 = vperm.xlu0 %7362, %v7977_v3   ;;  %v427_v7 = vsel %vm425_vm1, 4294967295, %v7796_v6  ;;  %v7997_v9 = vld [vmem:[%s11033_s1 + $0x28] sm:$0xff]  ;;  %192 = vst.msk [vmem:[#allocation4 + $0x18] sm:$0xff] %vm174_vm0, %v179_v12  ;;  %v177_v13 = vld [vmem:[%s11032_s0] sm:$0xff]  ;;  %v180_v14 = vld [vmem:[%s11032_s0 + $0x18] sm:$0xff]  ;;  %v11043_v35 = vmov 2  }
  0x84   :  { %v7992_v8 = vsel %vm426_vm2, %v427_v7, 0  ;;  %v178_v11 = vld [vmem:[%s11032_s0 + $0x8] sm:$0xff]  ;;  %v403_v15 = vld [vmem:[#allocation6 + $0x2] sm:$0x3]  ;;  %190 = vst.msk [vmem:[#allocation4 + $0x8] sm:$0xff] %vm174_vm0, %v177_v13  ;;  %193 = vst.msk [vmem:[#allocation4 + $0x20] sm:$0xff] %vm174_vm0, %v180_v14  ;;  %6740 = vmatprep.mubr.msk.bf16.mxu0 %vm7797_vm3, %v11054_v1  ;;  %6770 = vmatprep.mubr.msk.bf16.mxu1 %vm7797_vm3, %v11054_v1 }
  0x85   :  { %191 = vst.msk [vmem:[#allocation4 + $0x10] sm:$0xff] %vm174_vm0, %v178_v11  ;;  %v430_v16 = vand.u32 %v7992_v8, %v403_v15  ;;  %v181_v17 = vld [vmem:[%s11032_s0 + $0x20] sm:$0xff]  ;;  %v182_v18 = vld [vmem:[%s11032_s0 + $0x28] sm:$0xff]  ;;  %v183_v19 = vld [vmem:[%s11032_s0 + $0x30] sm:$0xff]  ;;  %v11045_v36 = vmov 3   ;;  %v7801_v37 = vmov 5  }
  0x86   :  { %194 = vst.msk [vmem:[#allocation4 + $0x28] sm:$0xff] %vm174_vm0, %v181_v17  ;;  %195 = vst.msk [vmem:[#allocation4 + $0x30] sm:$0xff] %vm174_vm0, %v182_v18  ;;  %v184_v20 = vld [vmem:[%s11032_s0 + $0x38] sm:$0xff]  ;;  %v8046_v22 = vld [vmem:[%s11033_s1 + $0x30] sm:$0xff]  ;;  %v11052_v38 = vmov 6   ;;  %vm202_vm4 = vcmask 17408  }
  0x87   :  { %343 = vperm.xlu1 %7363, %v7984_v4   ;;  %335 = vperm.xlu0 %7362, %v7989_v5   ;;  %196 = vst.msk [vmem:[#allocation4 + $0x38] sm:$0xff] %vm174_vm0, %v183_v19  ;;  %v8041_v21 = vld [vmem:[%s11033_s1 + $0x38] sm:$0xff]  ;;  %197 = vst.msk [vmem:[#allocation4 + $0x40] sm:$0xff] %vm174_vm0, %v184_v20  ;;  %v185_v23 = vld [vmem:[%s11032_s0 + $0x40] sm:$0xff]  ;;  %v11048_v6 = vmov 7   ;;  %v11046_v15 = vmov 8  }
  0x88   :  { %6739 = vmatpush3.bf16.msra.mxu0 %v430_v16  ;;  %v186_v24 = vld [vmem:[%s11032_s0 + $0x48] sm:$0xff]  ;;  %198 = vst.msk [vmem:[#allocation4 + $0x48] sm:$0xff] %vm174_vm0, %v185_v23  ;;  %v187_v25 = vld [vmem:[%s11032_s0 + $0x50] sm:$0xff]  ;;  %v188_v26 = vld [vmem:[%s11032_s0 + $0x58] sm:$0xff]  ;;  %vm2083_vm5 = vcmask 261120   ;;  %vm2098_vm6 = vcmask 254976  }
  0x89   :  { %199 = vst.msk [vmem:[#allocation4 + $0x50] sm:$0xff] %vm174_vm0, %v186_v24  ;;  %6798 = vmatprep.subr.bf16.mxu0 %v11054_v1  ;;  %200 = vst.msk [vmem:[#allocation4 + $0x58] sm:$0xff] %vm174_vm0, %v187_v25  ;;  %v8077_v27 = vld [vmem:[%s11033_s1 + $0x48] sm:$0xff]  ;;  %v8082_v28 = vld [vmem:[%s11033_s1 + $0x40] sm:$0xff]  ;;  %s7806_s27 = smov [#allocation2 + $0x340]   ;;  %s9909_s12 = scalar_lea.hbm %s11038_s6, 13312 }
  0x8a   :  { %201 = vst.msk [vmem:[#allocation4 + $0x60] sm:$0xff] %vm174_vm0, %v188_v26  ;;  %v8087_v29 = vld [vmem:[%s11033_s1 + $0x58] sm:$0xff]  ;;  %v8092_v30 = vld [vmem:[%s11033_s1 + $0x50] sm:$0xff]  ;;  %v8099_v31 = vld [vmem:[%s11033_s1 + $0x60] sm:$0x3]  ;;  %s142_s29 = sshll.u32 %s7806_s27, 4  ;;  %p7671_p0 = scmp.ne.s32.totalorder %s11038_s6, %s9909_s12  ;;  %s143_s29 = int_to_ptr.vmem [resolvable:$true] %s142_s29 }
  0x8b   :  { %351 = vperm.xlu1 %7363, %v7997_v9   ;;  %347 = vperm.xlu0 %7362, %v8002_v10   ;;  %v316_v33 = vld [vmem:[#allocation6] sm:$0x3]  ;;  %v189_v39 = vld [vmem:[%s11032_s0 + $0x60] sm:$0x3]  ;;  %v718_v45 = vld [vmem:[#allocation6 + $0x4] sm:$0x3]  ;;  %p7674_p2 = scmp.lt.u32.totalorder %s9909_s12, %s11038_s6 }
  0x8c   :  { %v542_v34 = vand.u32 %v7992_v8, %v316_v33  ;;  %203 = vst.msk [vmem:[#allocation4 + $0x68] sm:$0x3] %vm202_vm4, %v189_v39  ;;  %v317_v42 = vld [vmem:[#allocation4 + $0x1] sm:$0xff]  ;;  %v8179_v43 = vld [vmem:[#allocation4 + $0x9] sm:$0xff]  ;;  %v741_v49 = vand.u32 %v718_v45, %v7992_v8  ;;  %v8187_v51 = vld [vmem:[#allocation4 + $0x19] sm:$0xff]  ;;  %s9918_s0 = scalar_lea.hbm %s11038_s6, 50176 }
  0x8d   :  { %v8193_v54 = vld [vmem:[#allocation4 + $0x11] sm:$0xff]  ;;  %v8202_v60 = vld [vmem:[#allocation4 + $0x29] sm:$0xff]  ;;  %v8204_v61 = vld [vmem:[#allocation4 + $0x21] sm:$0xff]  ;;  %2084 = vst.msk [vmem:[#allocation5] sm:$0xff] %vm2083_vm5, %v11054_v1  ;;  %p7673_p1 = scmp.lt.u32.totalorder %s9918_s0, %s9909_s12 }
  0x8e   :  { %6769 = vmatpush3.bf16.msra.mxu1 %v542_v34  ;;  %v8218_v16 = vld [vmem:[#allocation4 + $0x39] sm:$0xff]  ;;  %v8220_v17 = vld [vmem:[#allocation4 + $0x31] sm:$0xff]  ;;  %v8231_v25 = vld [vmem:[#allocation4 + $0x8] sm:$0xff]  ;;  %2085 = vst.msk [vmem:[#allocation5 + $0x6a] sm:$0xff] %vm2083_vm5, %v11054_v1 }
  0x8f   :  { %359 = vperm.xlu1 %7363, %v8041_v21   ;;  %355 = vperm.xlu0 %7362, %v8046_v22   ;;  %v205_v24 = vld [vmem:[#allocation4] sm:$0xff]  ;;  %v930_v26 = vld [vmem:[#allocation6 + $0x6] sm:$0x3]  ;;  %p7675_p3 = por %p7674_p2, %p7673_p1 }
  0x90   :  { %6828 = vmatprep.subr.bf16.mxu1 %v11054_v1  ;;  %v8242_v45 = vld [vmem:[#allocation4 + $0x41] sm:$0xff] }
  0x91   :  { %p7676_p4 = pnand %p7675_p3, %p7671_p0 }
  0x93   :  { %367 = vperm.xlu1 %7363, %v8077_v27   ;;  %363 = vperm.xlu0 %7362, %v8082_v28  }
  0x97   :  { %375 = vperm.xlu1 %7363, %v8087_v29   ;;  %371 = vperm.xlu0 %7362, %v8092_v30  }
  0x9b   :  { %7364 = vset.pattern.permute.xlu1 %v11050_v32  ;;  %379 = vperm.xlu0 %7362, %v8099_v31  }
  0x9c   :  { %233 = vperm.xlu1 %7364, %v7977_v3  }
  0x9f   :  { %7365 = vset.pattern.permute.xlu0 %v11050_v32 }
  0xa0   :  { %7366 = vset.pattern.permute.xlu1 %v11043_v35  ;;  %238 = vperm.xlu0 %7365, %v7989_v5  }
  0xa1   :  { %646 = vperm.xlu1 %7366, %v7977_v3  }
  0xa4   :  { %7368 = vset.pattern.permute.xlu0 %v11043_v35 }
  0xa5   :  { %650 = vperm.xlu1 %7366, %v7989_v5   ;;  %654 = vperm.xlu0 %7368, %v7972_v2  }
  0xa9   :  { %7367 = vset.pattern.permute.xlu1 %v11050_v32  ;;  %7369 = vset.pattern.permute.xlu0 %v11050_v32 }
  0xaa   :  { %248 = vperm.xlu1 %7367, %v7984_v4   ;;  %243 = vperm.xlu0 %7369, %v7972_v2  }
  0xae   :  { %7370 = vset.pattern.permute.xlu1 %v11043_v35  ;;  %258 = vperm.xlu0 %7369, %v7997_v9  }
  0xaf   :  { %658 = vperm.xlu1 %7370, %v7984_v4  }
  0xb2   :  { %263 = vperm.xlu0 %7369, %v8046_v22  }
  0xb3   :  { %7371 = vset.pattern.permute.xlu1 %v11050_v32 }
  0xb4   :  { %253 = vperm.xlu1 %7371, %v8002_v10  }
  0xb6   :  { %7374 = vset.pattern.permute.xlu0 %v11043_v35 }
  0xb7   :  { %670 = vperm.xlu0 %7374, %v8046_v22  }
  0xb8   :  { %7372 = vset.pattern.permute.xlu1 %v11043_v35 }
  0xb9   :  { %662 = vperm.xlu1 %7372, %v8002_v10  }
  0xbb   :  { %7377 = vset.pattern.permute.xlu0 %v11050_v32 }
  0xbc   :  { %278 = vperm.xlu0 %7377, %v8077_v27  }
  0xbd   :  { %666 = vperm.xlu1 %7372, %v7997_v9  }
  0xc0   :  { %283 = vperm.xlu0 %7377, %v8092_v30  }
  0xc1   :  { %7373 = vset.pattern.permute.xlu1 %v11050_v32 }
  0xc2   :  { %268 = vperm.xlu1 %7373, %v8041_v21  }
  0xc4   :  { %7380 = vset.pattern.permute.xlu0 %v11043_v35 }
  0xc5   :  { %686 = vperm.xlu0 %7380, %v8092_v30  }
  0xc6   :  { %7375 = vset.pattern.permute.xlu1 %v11043_v35 }
  0xc7   :  { %674 = vperm.xlu1 %7375, %v8041_v21  }
  0xc9   :  { %694 = vperm.xlu0 %7380, %v8099_v31  }
  0xcb   :  { %7376 = vset.pattern.permute.xlu1 %v11050_v32 }
  0xcc   :  { %273 = vperm.xlu1 %7376, %v8082_v28  }
  0xcd   :  { %7384 = vset.pattern.permute.xlu0 %v11045_v36 }
  0xce   :  { %862 = vperm.xlu0 %7384, %v7989_v5  }
  0xd0   :  { %7378 = vset.pattern.permute.xlu1 %v11043_v35 }
  0xd1   :  { %678 = vperm.xlu1 %7378, %v8082_v28  }
  0xd2   :  { %874 = vperm.xlu0 %7384, %v8002_v10  }
  0xd5   :  { %682 = vperm.xlu1 %7378, %v8077_v27  }
  0xd6   :  { %882 = vperm.xlu0 %7384, %v8046_v22  }
  0xd9   :  { %7379 = vset.pattern.permute.xlu1 %v11050_v32 }
  0xda   :  { %288 = vperm.xlu1 %7379, %v8087_v29   ;;  %890 = vperm.xlu0 %7384, %v8082_v28  }
  0xde   :  { %7381 = vset.pattern.permute.xlu1 %v11043_v35  ;;  %898 = vperm.xlu0 %7384, %v8092_v30  }
  0xdf   :  { %690 = vperm.xlu1 %7381, %v8087_v29  }
  0xe2   :  { %906 = vperm.xlu0 %7384, %v8099_v31  }
  0xe3   :  { %7382 = vset.pattern.permute.xlu1 %v11050_v32 }
  0xe4   :  { %293 = vperm.xlu1 %7382, %v8099_v31  }
  0xe6   :  { %7386 = vset.pattern.permute.xlu0 %v7801_v37 }
  0xe7   :  { %1221 = vperm.xlu0 %7386, %v7989_v5  }
  0xe8   :  { %7383 = vset.pattern.permute.xlu1 %v11045_v36 }
  0xe9   :  { %858 = vperm.xlu1 %7383, %v7977_v3  }
  0xeb   :  { %1225 = vperm.xlu0 %7386, %v7972_v2  }
  0xed   :  { %866 = vperm.xlu1 %7383, %v7972_v2  }
  0xef   :  { %7389 = vset.pattern.permute.xlu0 %v11052_v38 }
  0xf0   :  { %1437 = vperm.xlu0 %7389, %v7972_v2  }
  0xf1   :  { %870 = vperm.xlu1 %7383, %v7984_v4  }
  0xf4   :  { %1453 = vperm.xlu0 %7389, %v8046_v22  }
  0xf5   :  { %878 = vperm.xlu1 %7383, %v7997_v9  }
  0xf8   :  { %7394 = vset.pattern.permute.xlu0 %v7801_v37 }
  0xf9   :  { %886 = vperm.xlu1 %7383, %v8041_v21   ;;  %1237 = vperm.xlu0 %7394, %v7997_v9  }
  0xfd   :  { %894 = vperm.xlu1 %7383, %v8077_v27   ;;  %1241 = vperm.xlu0 %7394, %v8046_v22  }
 0x101   :  { %902 = vperm.xlu1 %7383, %v8087_v29   ;;  %1253 = vperm.xlu0 %7394, %v8077_v27  }
 0x102   :  { %v340_v40 = vpop.permute.xlu1 %339  ;;  %v332_v41 = vpop.permute.xlu0 %331 }
 0x103   :  { %v382_v44 = vmul.f32 %v332_v41, %v317_v42  ;;  %v384_v58 = vmul.f32 %v340_v40, %v8193_v54  ;;  %v953_v42 = vand.u32 %v930_v26, %v7992_v8 }
 0x105   :  { %7385 = vset.pattern.permute.xlu1 %v7801_v37  ;;  %1257 = vperm.xlu0 %7394, %v8092_v30  }
 0x106   :  { %v344_v46 = vpop.permute.xlu1 %343  ;;  %1217 = vperm.xlu1 %7385, %v7977_v3   ;;  %v336_v47 = vpop.permute.xlu0 %335 }
 0x107   :  { %v383_v48 = vmul.f32 %v336_v47, %v8179_v43  ;;  %v385_v55 = vmul.f32 %v344_v46, %v8187_v51 }
 0x109   :  { %v395_v50 = vpack.c.bf16 %v383_v48, %v382_v44  ;;  %7399 = vset.pattern.permute.xlu0 %v11052_v38  ;;  %v396_v59 = vpack.c.bf16 %v385_v55, %v384_v58  ;;  %v8240_v44 = vld [vmem:[#allocation4 + $0x49] sm:$0xff]  ;;  %v8267_v58 = vld [vmem:[#allocation4 + $0x51] sm:$0xff] }
 0x10a   :  { %v352_v52 = vpop.permute.xlu1 %351  ;;  %7387 = vset.pattern.permute.xlu1 %v11052_v38  ;;  %v348_v53 = vpop.permute.xlu0 %347  ;;  %1469 = vperm.xlu0 %7399, %v8092_v30  }
 0x10b   :  { %1429 = vperm.xlu1 %7387, %v7977_v3   ;;  %6741 = vmatmul.mubr.msk.bf16.vlgmr.msra.gmra.mrb[0].mxu0 %vm174_vm0, %v395_v50  ;;  %v387_v7 = vmul.f32 %v352_v52, %v8202_v60  ;;  %v386_v11 = vmul.f32 %v348_v53, %v8204_v61  ;;  %v8261_v50 = vld [vmem:[#allocation4 + $0x18] sm:$0xff]  ;;  %v8263_v52 = vld [vmem:[#allocation4 + $0x10] sm:$0xff] }
 0x10c   :  { %6744 = vmatprep.mubr.msk.bf16.mxu0 %vm7797_vm3, %v11054_v1  ;;  %6799 = vmatpush3.bf16.msra.mxu0 %v741_v49 }
 0x10d   :  { %6858 = vmatprep.subr.bf16.mxu0 %v11054_v1  ;;  %v397_v14 = vpack.c.bf16 %v387_v7, %v386_v11 }
 0x10e   :  { %v360_v56 = vpop.permute.xlu1 %359  ;;  %v356_v57 = vpop.permute.xlu0 %355  ;;  %1477 = vperm.xlu0 %7399, %v8099_v31  }
 0x10f   :  { %1433 = vperm.xlu1 %7387, %v7989_v5   ;;  %v389_v20 = vmul.f32 %v360_v56, %v8218_v16  ;;  %v388_v23 = vmul.f32 %v356_v57, %v8220_v17  ;;  %v8265_v57 = vld [vmem:[#allocation4 + $0x59] sm:$0xff] }
 0x111   :  { %v398_v41 = vpack.c.bf16 %v389_v20, %v388_v23  ;;  %v8281_v20 = vld [vmem:[#allocation4 + $0x28] sm:$0xff] }
 0x112   :  { %v368_v62 = vpop.permute.xlu1 %367  ;;  %v364_v63 = vpop.permute.xlu0 %363  ;;  %7403 = vset.pattern.permute.xlu0 %v11048_v6 }
 0x113   :  { %7388 = vset.pattern.permute.xlu1 %v7801_v37  ;;  %6745 = vmatmul.mubr.msk.bf16.gmra.mrb[4].mxu0 %vm174_vm0, %v396_v59  ;;  %v391_v48 = vmul.f32 %v368_v62, %v8240_v44  ;;  %v390_v49 = vmul.f32 %v364_v63, %v8242_v45 }
 0x114   :  { %1229 = vperm.xlu1 %7388, %v7984_v4   ;;  %6748 = vmatprep.mubr.msk.bf16.mxu0 %vm7797_vm3, %v11054_v1 }
 0x115   :  { %1645 = vperm.xlu0 %7403, %v7989_v5   ;;  %v399_v53 = vpack.c.bf16 %v391_v48, %v390_v49 }
 0x116   :  { %v376_v12 = vpop.permute.xlu1 %375  ;;  %v372_v13 = vpop.permute.xlu0 %371 }
 0x117   :  { %v393_v7 = vmul.f32 %v376_v12, %v8265_v57  ;;  %v392_v11 = vmul.f32 %v372_v13, %v8267_v58  ;;  %v8288_v12 = vld [vmem:[#allocation4 + $0x20] sm:$0xff] }
 0x118   :  { %7390 = vset.pattern.permute.xlu1 %v11052_v38  ;;  %v329_v13 = vld [vmem:[#allocation4 + $0x61] sm:$0x3] }
 0x119   :  { %1441 = vperm.xlu1 %7390, %v7984_v4   ;;  %7406 = vset.pattern.permute.xlu0 %v11046_v15  ;;  %v400_v23 = vpack.c.bf16 %v393_v7, %v392_v11 }
 0x11a   :  { %v8222_v18 = vpop.permute.xlu0 %379  ;;  %1861 = vperm.xlu0 %7406, %v7972_v2  }
 0x11b   :  { %v234_v19 = vpop.permute.xlu1 %233  ;;  %6749 = vmatmul.mubr.msk.bf16.gmra.mrb[8].mxu0 %vm174_vm0, %v397_v14 }
 0x11c   :  { %6752 = vmatprep.mubr.msk.bf16.mxu0 %vm7797_vm3, %v11054_v1  ;;  %v296_v34 = vmul.f32 %v234_v19, %v205_v24 }
 0x11d   :  { %7391 = vset.pattern.permute.xlu1 %v7801_v37 }
 0x11e   :  { %1233 = vperm.xlu1 %7391, %v8002_v10   ;;  %7407 = vset.pattern.permute.xlu0 %v11048_v6 }
 0x11f   :  { %v239_v33 = vpop.permute.xlu0 %238  ;;  %1649 = vperm.xlu0 %7407, %v7972_v2  }
 0x120   :  { %v297_v39 = vmul.f32 %v239_v33, %v8231_v25  ;;  %v8237_v40 = vpop.permute.xlu1 %646 }
 0x122   :  { %v309_v46 = vpack.c.bf16 %v297_v39, %v296_v34  ;;  %7392 = vset.pattern.permute.xlu1 %v11052_v38 }
 0x123   :  { %1445 = vperm.xlu1 %7392, %v8002_v10   ;;  %6753 = vmatmul.mubr.msk.bf16.gmra.mrb[12].mxu0 %vm174_vm0, %v398_v41 }
 0x124   :  { %v8247_v2 = vpop.permute.xlu1 %650  ;;  %6771 = vmatmul.mubr.msk.bf16.vlgmr.msra.gmra.mrb[0].mxu1 %vm174_vm0, %v309_v46  ;;  %v8250_v47 = vpop.permute.xlu0 %654  ;;  %6756 = vmatprep.mubr.msk.bf16.mxu0 %vm7797_vm3, %v11054_v1  ;;  %v632_v46 = vld [vmem:[#allocation4 + $0x2] sm:$0xff] }
 0x125   :  { %6774 = vmatprep.mubr.msk.bf16.mxu1 %vm7797_vm3, %v11054_v1  ;;  %6829 = vmatpush3.bf16.msra.mxu1 %v953_v42  ;;  %v633_v42 = vld [vmem:[#allocation4 + $0xa] sm:$0xff] }
 0x126   :  { %1661 = vperm.xlu0 %7407, %v7997_v9   ;;  %6888 = vmatprep.subr.bf16.mxu1 %v11054_v1  ;;  %v698_v49 = vmul.f32 %v8247_v2, %v633_v42  ;;  %v634_v2 = vld [vmem:[#allocation4 + $0x12] sm:$0xff]  ;;  %v637_v42 = vld [vmem:[#allocation4 + $0x2a] sm:$0xff] }
 0x127   :  { %1449 = vperm.xlu1 %7392, %v7997_v9  }
 0x129   :  { %v249_v55 = vpop.permute.xlu1 %248  ;;  %v244_v56 = vpop.permute.xlu0 %243 }
 0x12a   :  { %v299_v59 = vmul.f32 %v249_v55, %v8261_v50  ;;  %v298_v62 = vmul.f32 %v244_v56, %v8263_v52  ;;  %1665 = vperm.xlu0 %7407, %v8046_v22   ;;  %v1077_v55 = vld [vmem:[#allocation6 + $0x8] sm:$0x3]  ;;  %v697_v56 = vmul.f32 %v8237_v40, %v632_v46 }
 0x12b   :  { %7393 = vset.pattern.permute.xlu1 %v7801_v37  ;;  %6757 = vmatmul.mubr.msk.bf16.gmra.mrb[16].mxu0 %vm174_vm0, %v399_v53  ;;  %v8313_v53 = vld [vmem:[#allocation4 + $0x30] sm:$0xff] }
 0x12c   :  { %v310_v63 = vpack.c.bf16 %v299_v59, %v298_v62  ;;  %1245 = vperm.xlu1 %7393, %v8041_v21   ;;  %6760 = vmatprep.mubr.msk.bf16.mxu0 %vm7797_vm3, %v11054_v1  ;;  %v8318_v59 = vld [vmem:[#allocation4 + $0x38] sm:$0xff] }
 0x12d   :  { %v259_v19 = vpop.permute.xlu0 %258 }
 0x12e   :  { %v659_v14 = vpop.permute.xlu1 %658  ;;  %6775 = vmatmul.mubr.msk.bf16.gmra.mrb[4].mxu1 %vm174_vm0, %v310_v63  ;;  %7412 = vset.pattern.permute.xlu0 %v11046_v15  ;;  %v301_v24 = vmul.f32 %v259_v19, %v8281_v20  ;;  %v710_v63 = vpack.c.bf16 %v698_v49, %v697_v56  ;;  %v1100_v19 = vand.u32 %v1077_v55, %v7992_v8  ;;  %v636_v49 = vld [vmem:[#allocation4 + $0x22] sm:$0xff]  ;;  %v8361_v56 = vld [vmem:[%s11033_s1 + $0x30] sm:$0xff] }
 0x12f   :  { %6778 = vmatprep.mubr.msk.bf16.mxu1 %vm7797_vm3, %v11054_v1  ;;  %1877 = vperm.xlu0 %7412, %v8046_v22   ;;  %v394_v22 = vmul.f32 %v8222_v18, %v329_v13  ;;  %v8332_v13 = vld [vmem:[%s11033_s1 + $0x8] sm:$0xff] }
 0x130   :  { %7395 = vset.pattern.permute.xlu1 %v11052_v38 }
 0x131   :  { %1457 = vperm.xlu1 %7395, %v8041_v21   ;;  %v401_v41 = vpack.c.bf16 %v394_v22, %v394_v22  ;;  %v264_v18 = vpop.permute.xlu0 %263 }
 0x132   :  { %v302_v62 = vmul.f32 %v264_v18, %v8313_v53 }
 0x133   :  { %v254_v26 = vpop.permute.xlu1 %253  ;;  %6761 = vmatmul.mubr.msk.bf16.gmra.mrb[20].mxu0 %vm174_vm0, %v400_v23  ;;  %7415 = vset.pattern.permute.xlu0 %v11048_v6  ;;  %v635_v23 = vld [vmem:[#allocation4 + $0x1a] sm:$0xff] }
 0x134   :  { %v300_v33 = vmul.f32 %v254_v26, %v8288_v12  ;;  %6764 = vmatprep.mubr.msk.bf16.mxu0 %vm7797_vm3, %v11054_v1  ;;  %1677 = vperm.xlu0 %7415, %v8077_v27   ;;  %v700_v26 = vmul.f32 %v659_v14, %v635_v23  ;;  %v639_v23 = vld [vmem:[#allocation4 + $0x3a] sm:$0xff] }
 0x135   :  { %7396 = vset.pattern.permute.xlu1 %v7801_v37 }
 0x136   :  { %v311_v34 = vpack.c.bf16 %v301_v24, %v300_v33  ;;  %1249 = vperm.xlu1 %7396, %v8082_v28   ;;  %v671_v11 = vpop.permute.xlu0 %670  ;;  %v699_v24 = vmul.f32 %v8250_v47, %v634_v2  ;;  %v8347_v47 = vld [vmem:[%s11033_s1 + $0x20] sm:$0xff] }
 0x138   :  { %v8300_v39 = vpop.permute.xlu1 %662  ;;  %6779 = vmatmul.mubr.msk.bf16.gmra.mrb[8].mxu1 %vm174_vm0, %v311_v34  ;;  %1681 = vperm.xlu0 %7415, %v8092_v30   ;;  %v8338_v34 = vld [vmem:[#allocation4 + $0x48] sm:$0xff]  ;;  %v711_v14 = vpack.c.bf16 %v700_v26, %v699_v24 }
 0x139   :  { %6782 = vmatprep.mubr.msk.bf16.mxu1 %vm7797_vm3, %v11054_v1 }
 0x13a   :  { %7397 = vset.pattern.permute.xlu1 %v11052_v38 }
 0x13b   :  { %1461 = vperm.xlu1 %7397, %v8082_v28   ;;  %6765 = vmatmul.mubr.msk.bf16.gmra.mrb[24].mxu0 %vm174_vm0, %v401_v41  ;;  %v279_v22 = vpop.permute.xlu0 %278  ;;  %v8350_v41 = vld [vmem:[#allocation4 + $0x40] sm:$0xff] }
 0x13c   :  { %v667_v48 = vpop.permute.xlu1 %666  ;;  %6800 = vmatprep.mubr.msk.bf16.mxu0 %vm7797_vm3, %v11054_v1  ;;  %7418 = vset.pattern.permute.xlu0 %v11046_v15  ;;  %v305_v18 = vmul.f32 %v279_v22, %v8338_v34  ;;  %v8381_v22 = vld [vmem:[#allocation4 + $0x50] sm:$0xff] }
 0x13d   :  { %1893 = vperm.xlu0 %7418, %v8092_v30  }
 0x13f   :  { %1465 = vperm.xlu1 %7397, %v8077_v27   ;;  %v284_v26 = vpop.permute.xlu0 %283 }
 0x141   :  { %v269_v7 = vpop.permute.xlu1 %268  ;;  %1901 = vperm.xlu0 %7418, %v8099_v31  }
 0x142   :  { %v303_v30 = vmul.f32 %v269_v7, %v8318_v59  ;;  %v701_v7 = vmul.f32 %v8300_v39, %v636_v49 }
 0x143   :  { %7398 = vset.pattern.permute.xlu1 %v7801_v37  ;;  %6801 = vmatmul.mubr.msk.bf16.vlgmr.msra.gmra.mrb[28].mxu0 %vm174_vm0, %v710_v63 }
 0x144   :  { %v312_v40 = vpack.c.bf16 %v303_v30, %v302_v62  ;;  %1261 = vperm.xlu1 %7398, %v8087_v29   ;;  %6804 = vmatprep.mubr.msk.bf16.mxu0 %vm7797_vm3, %v11054_v1  ;;  %v702_v62 = vmul.f32 %v667_v48, %v637_v42  ;;  %v8373_v48 = vld [vmem:[%s11033_s1 + $0x40] sm:$0xff]  ;;  %v638_v30 = vld [vmem:[#allocation4 + $0x32] sm:$0xff] }
 0x145   :  { %6859 = vmatpush3.bf16.msra.mxu0 %v1100_v19  ;;  %7422 = vset.pattern.permute.xlu0 %v7794_v0  ;;  %v703_v24 = vmul.f32 %v671_v11, %v638_v30  ;;  %v8389_v42 = vld [vmem:[#allocation4 + $0x58] sm:$0xff] }
 0x146   :  { %v675_v33 = vpop.permute.xlu1 %674  ;;  %6783 = vmatmul.mubr.msk.bf16.gmra.mrb[12].mxu1 %vm174_vm0, %v312_v40  ;;  %6918 = vmatprep.subr.bf16.mxu0 %v11054_v1  ;;  %v712_v2 = vpack.c.bf16 %v702_v62, %v701_v7  ;;  %v687_v62 = vpop.permute.xlu0 %686 }
 0x147   :  { %6786 = vmatprep.mubr.msk.bf16.mxu1 %vm7797_vm3, %v11054_v1  ;;  %2234 = vperm.xlu0 %7422, %v8332_v13   ;;  %v704_v40 = vmul.f32 %v675_v33, %v639_v23 }
 0x148   :  { %7400 = vset.pattern.permute.xlu1 %v11052_v38 }
 0x149   :  { %1473 = vperm.xlu1 %7400, %v8087_v29   ;;  %v713_v33 = vpack.c.bf16 %v704_v40, %v703_v24  ;;  %v217_v40 = vld [vmem:[#allocation4 + $0x60] sm:$0x3] }
 0x14a   :  { %v643_v24 = vld [vmem:[#allocation4 + $0x5a] sm:$0xff] }
 0x14b   :  { %v274_v46 = vpop.permute.xlu1 %273  ;;  %6805 = vmatmul.mubr.msk.bf16.gmra.mrb[32].mxu0 %vm174_vm0, %v711_v14  ;;  %2246 = vperm.xlu0 %7422, %v8347_v47   ;;  %v8386_v14 = vld [vmem:[%s11033_s1 + $0x50] sm:$0xff] }
 0x14c   :  { %v304_v55 = vmul.f32 %v274_v46, %v8350_v41  ;;  %6808 = vmatprep.mubr.msk.bf16.mxu0 %vm7797_vm3, %v11054_v1  ;;  %v641_v46 = vld [vmem:[#allocation4 + $0x4a] sm:$0xff] }
 0x14d   :  { %7401 = vset.pattern.permute.xlu1 %v7801_v37 }
 0x14e   :  { %v313_v63 = vpack.c.bf16 %v305_v18, %v304_v55  ;;  %1265 = vperm.xlu1 %7401, %v8099_v31   ;;  %v306_v18 = vmul.f32 %v284_v26, %v8381_v22  ;;  %v8398_v55 = vld [vmem:[%s11033_s1 + $0x60] sm:$0x3] }
 0x14f   :  { %2254 = vperm.xlu0 %7422, %v8361_v56  }
 0x150   :  { %v679_v19 = vpop.permute.xlu1 %678  ;;  %6787 = vmatmul.mubr.msk.bf16.gmra.mrb[16].mxu1 %vm174_vm0, %v313_v63  ;;  %v640_v63 = vld [vmem:[#allocation4 + $0x42] sm:$0xff] }
 0x151   :  { %6790 = vmatprep.mubr.msk.bf16.mxu1 %vm7797_vm3, %v11054_v1  ;;  %v705_v23 = vmul.f32 %v679_v19, %v640_v63  ;;  %v8423_v63 = vld [vmem:[#allocation4 + $0xf] sm:$0xff] }
 0x152   :  { %7402 = vset.pattern.permute.xlu1 %v11048_v6 }
 0x153   :  { %1641 = vperm.xlu1 %7402, %v7977_v3   ;;  %6809 = vmatmul.mubr.msk.bf16.gmra.mrb[36].mxu0 %vm174_vm0, %v712_v2 }
 0x154   :  { %v683_v39 = vpop.permute.xlu1 %682  ;;  %6812 = vmatprep.mubr.msk.bf16.mxu0 %vm7797_vm3, %v11054_v1  ;;  %2262 = vperm.xlu0 %7422, %v8373_v48  }
 0x157   :  { %7404 = vset.pattern.permute.xlu1 %v11046_v15 }
 0x158   :  { %1853 = vperm.xlu1 %7404, %v7977_v3   ;;  %2270 = vperm.xlu0 %7422, %v8386_v14   ;;  %v706_v3 = vmul.f32 %v683_v39, %v641_v46  ;;  %v642_v39 = vld [vmem:[#allocation4 + $0x52] sm:$0xff] }
 0x159   :  { %v289_v11 = vpop.permute.xlu1 %288  ;;  %v8420_v46 = vld [vmem:[%s11033_s1 + $0x10] sm:$0xff] }
 0x15a   :  { %v307_v49 = vmul.f32 %v289_v11, %v8389_v42  ;;  %v714_v30 = vpack.c.bf16 %v706_v3, %v705_v23  ;;  %v644_v3 = vld [vmem:[#allocation4 + $0x62] sm:$0x3] }
 0x15b   :  { %6813 = vmatmul.mubr.msk.bf16.gmra.mrb[40].mxu0 %vm174_vm0, %v713_v33  ;;  %v707_v33 = vmul.f32 %v687_v62, %v642_v39 }
 0x15c   :  { %v314_v7 = vpack.c.bf16 %v307_v49, %v306_v18  ;;  %1857 = vperm.xlu1 %7404, %v7989_v5   ;;  %6816 = vmatprep.mubr.msk.bf16.mxu0 %vm7797_vm3, %v11054_v1  ;;  %v695_v5 = vpop.permute.xlu0 %694 }
 0x15d   :  { %2278 = vperm.xlu0 %7422, %v8398_v55  }
 0x15e   :  { %v691_v2 = vpop.permute.xlu1 %690  ;;  %6791 = vmatmul.mubr.msk.bf16.gmra.mrb[20].mxu1 %vm174_vm0, %v314_v7  ;;  %v844_v7 = vld [vmem:[#allocation4 + $0x7] sm:$0xff] }
 0x15f   :  { %6794 = vmatprep.mubr.msk.bf16.mxu1 %vm7797_vm3, %v11054_v1  ;;  %v708_v18 = vmul.f32 %v691_v2, %v643_v24 }
 0x160   :  { %7405 = vset.pattern.permute.xlu1 %v11048_v6  ;;  %v863_v49 = vpop.permute.xlu0 %862 }
 0x161   :  { %1653 = vperm.xlu1 %7405, %v7984_v4   ;;  %7424 = vset.pattern.permute.xlu0 %v11050_v32  ;;  %v715_v2 = vpack.c.bf16 %v708_v18, %v707_v33  ;;  %v8439_v18 = vld [vmem:[#allocation4 + $0x1f] sm:$0xff]  ;;  %v8443_v33 = vld [vmem:[#allocation4 + $0x17] sm:$0xff] }
 0x162   :  { %2134 = vperm.xlu0 %7424, %v8332_v13  }
 0x163   :  { %v294_v26 = vpop.permute.xlu1 %293  ;;  %6817 = vmatmul.mubr.msk.bf16.gmra.mrb[44].mxu0 %vm174_vm0, %v714_v30  ;;  %v1289_v30 = vld [vmem:[#allocation6 + $0xa] sm:$0x3] }
 0x164   :  { %v308_v19 = vmul.f32 %v294_v26, %v217_v40  ;;  %6820 = vmatprep.mubr.msk.bf16.mxu0 %vm7797_vm3, %v11054_v1  ;;  %v709_v40 = vmul.f32 %v695_v5, %v644_v3  ;;  %v1312_v39 = vand.u32 %v1289_v30, %v7992_v8  ;;  %v1501_v3 = vld [vmem:[#allocation6 + $0xc] sm:$0x3] }
 0x165   :  { %7408 = vset.pattern.permute.xlu1 %v11046_v15 }
 0x166   :  { %v315_v11 = vpack.c.bf16 %v308_v19, %v308_v19  ;;  %1865 = vperm.xlu1 %7408, %v7984_v4   ;;  %7427 = vset.pattern.permute.xlu0 %v11043_v35  ;;  %v910_v4 = vmul.f32 %v863_v49, %v8423_v63  ;;  %v716_v19 = vpack.c.bf16 %v709_v40, %v709_v40  ;;  %v875_v40 = vpop.permute.xlu0 %874 }
 0x167   :  { %2570 = vperm.xlu0 %7427, %v8420_v46  }
 0x168   :  { %v859_v62 = vpop.permute.xlu1 %858  ;;  %6795 = vmatmul.mubr.msk.bf16.gmra.mrb[24].mxu1 %vm174_vm0, %v315_v11  ;;  %v8450_v11 = vld [vmem:[%s11033_s1 + $0x28] sm:$0xff] }
 0x169   :  { %6830 = vmatprep.mubr.msk.bf16.mxu1 %vm7797_vm3, %v11054_v1  ;;  %v909_v23 = vmul.f32 %v859_v62, %v844_v7 }
 0x16a   :  { %7409 = vset.pattern.permute.xlu1 %v11048_v6 }
 0x16b   :  { %1657 = vperm.xlu1 %7409, %v8002_v10   ;;  %6821 = vmatmul.mubr.msk.bf16.gmra.mrb[48].mxu0 %vm174_vm0, %v715_v2  ;;  %v922_v26 = vpack.c.bf16 %v910_v4, %v909_v23  ;;  %v8461_v2 = vld [vmem:[#allocation4 + $0x27] sm:$0xff]  ;;  %v8463_v4 = vld [vmem:[#allocation4 + $0x2f] sm:$0xff]  ;;  %v1069_v23 = vpack.c.bf16 %v8263_v52, %v8231_v25 }
 0x16c   :  { %v867_v24 = vpop.permute.xlu1 %866  ;;  %6824 = vmatprep.mubr.msk.bf16.mxu0 %vm7797_vm3, %v11054_v1  ;;  %7428 = vset.pattern.permute.xlu0 %v11050_v32 }
 0x16d   :  { %2139 = vperm.xlu0 %7428, %v8420_v46  }
 0x16f   :  { %7410 = vset.pattern.permute.xlu1 %v11046_v15 }
 0x170   :  { %1869 = vperm.xlu1 %7410, %v8002_v10   ;;  %v871_v5 = vpop.permute.xlu1 %870  ;;  %6831 = vmatmul.mubr.msk.bf16.vlgmr.msra.gmra.mrb[28].mxu1 %vm174_vm0, %v922_v26  ;;  %v911_v10 = vmul.f32 %v867_v24, %v8443_v33  ;;  %v913_v24 = vmul.f32 %v875_v40, %v8461_v2  ;;  %v8509_v40 = vld [vmem:[#allocation4 + $0x47] sm:$0xff] }
 0x171   :  { %6834 = vmatprep.mubr.msk.bf16.mxu1 %vm7797_vm3, %v11054_v1  ;;  %6889 = vmatpush3.bf16.msra.mxu1 %v1312_v39  ;;  %v912_v49 = vmul.f32 %v871_v5, %v8439_v18  ;;  %v8485_v5 = vld [vmem:[#allocation4 + $0x3f] sm:$0xff] }
 0x172   :  { %6948 = vmatprep.subr.bf16.mxu1 %v11054_v1  ;;  %2154 = vperm.xlu0 %7428, %v8450_v11  }
 0x173   :  { %6825 = vmatmul.mubr.msk.bf16.gmra.mrb[52].mxu0 %vm174_vm0, %v716_v19  ;;  %v923_v62 = vpack.c.bf16 %v912_v49, %v911_v10  ;;  %v8483_v19 = vld [vmem:[#allocation4 + $0x37] sm:$0xff]  ;;  %v1070_v49 = vpack.c.bf16 %v8288_v12, %v8261_v50  ;;  %v8492_v10 = vld [vmem:[%s11033_s1 + $0x48] sm:$0xff] }
 0x174   :  { %1873 = vperm.xlu1 %7410, %v7997_v9   ;;  %v879_v7 = vpop.permute.xlu1 %878  ;;  %6860 = vmatprep.mubr.msk.bf16.mxu0 %vm7797_vm3, %v11054_v1  ;;  %v1524_v9 = vand.u32 %v1501_v3, %v7992_v8 }
 0x175   :  { %v914_v39 = vmul.f32 %v879_v7, %v8463_v4 }
 0x176   :  { %2159 = vperm.xlu0 %7428, %v8361_v56  }
 0x177   :  { %v924_v26 = vpack.c.bf16 %v914_v39, %v913_v24  ;;  %v8511_v24 = vld [vmem:[#allocation4 + $0x4f] sm:$0xff] }
 0x178   :  { %7411 = vset.pattern.permute.xlu1 %v11048_v6  ;;  %v887_v30 = vpop.permute.xlu1 %886  ;;  %6835 = vmatmul.mubr.msk.bf16.gmra.mrb[32].mxu1 %vm174_vm0, %v923_v62 }
 0x179   :  { %1669 = vperm.xlu1 %7411, %v8041_v21   ;;  %6838 = vmatprep.mubr.msk.bf16.mxu1 %vm7797_vm3, %v11054_v1  ;;  %v916_v62 = vmul.f32 %v887_v30, %v8485_v5  ;;  %v1071_v30 = vpack.c.bf16 %v8313_v53, %v8281_v20 }
 0x17a   :  { %7433 = vset.pattern.permute.xlu0 %v11043_v35 }
 0x17b   :  { %6861 = vmatmul.mubr.msk.bf16.vlgmr.msra.gmra.mrb[56].mxu0 %vm174_vm0, %v1069_v23  ;;  %2586 = vperm.xlu0 %7433, %v8361_v56  }
 0x17c   :  { %v895_v25 = vpop.permute.xlu1 %894  ;;  %6864 = vmatprep.mubr.msk.bf16.mxu0 %vm7797_vm3, %v11054_v1  ;;  %6919 = vmatpush3.bf16.msra.mxu0 %v1524_v9 }
 0x17d   :  { %7413 = vset.pattern.permute.xlu1 %v11046_v15  ;;  %6978 = vmatprep.subr.bf16.mxu0 %v11054_v1 }
 0x17e   :  { %1881 = vperm.xlu1 %7413, %v8041_v21   ;;  %v883_v21 = vpop.permute.xlu0 %882 }
 0x17f   :  { %7436 = vset.pattern.permute.xlu0 %v11050_v32  ;;  %v915_v3 = vmul.f32 %v883_v21, %v8483_v19  ;;  %v1416_v32 = vld [vmem:[#allocation4 + $0x16] sm:$0xff] }
 0x180   :  { %v903_v7 = vpop.permute.xlu1 %902  ;;  %6839 = vmatmul.mubr.msk.bf16.gmra.mrb[36].mxu1 %vm174_vm0, %v924_v26  ;;  %2174 = vperm.xlu0 %7436, %v8492_v10  }
 0x181   :  { %6842 = vmatprep.mubr.msk.bf16.mxu1 %vm7797_vm3, %v11054_v1  ;;  %v925_v9 = vpack.c.bf16 %v916_v62, %v915_v3 }
 0x182   :  { %7414 = vset.pattern.permute.xlu1 %v11048_v6  ;;  %v891_v39 = vpop.permute.xlu0 %890 }
 0x183   :  { %1673 = vperm.xlu1 %7414, %v8082_v28   ;;  %6865 = vmatmul.mubr.msk.bf16.gmra.mrb[60].mxu0 %vm174_vm0, %v1070_v49  ;;  %v917_v26 = vmul.f32 %v891_v39, %v8509_v40  ;;  %v918_v49 = vmul.f32 %v895_v25, %v8511_v24  ;;  %v1072_v25 = vpack.c.bf16 %v8350_v41, %v8318_v59 }
 0x184   :  { %6868 = vmatprep.mubr.msk.bf16.mxu0 %vm7797_vm3, %v11054_v1  ;;  %2179 = vperm.xlu0 %7436, %v8386_v14  }
 0x185   :  { %v8507_v23 = vpop.permute.xlu1 %1217 }
 0x186   :  { %v899_v62 = vpop.permute.xlu0 %898 }
 0x187   :  { %7416 = vset.pattern.permute.xlu1 %v11046_v15 }
 0x188   :  { %1885 = vperm.xlu1 %7416, %v8082_v28   ;;  %6843 = vmatmul.mubr.msk.bf16.gmra.mrb[40].mxu1 %vm174_vm0, %v925_v9  ;;  %v926_v28 = vpack.c.bf16 %v918_v49, %v917_v26  ;;  %v8533_v9 = vld [vmem:[#allocation4 + $0x5f] sm:$0xff] }
 0x189   :  { %6846 = vmatprep.mubr.msk.bf16.mxu1 %vm7797_vm3, %v11054_v1  ;;  %7439 = vset.pattern.permute.xlu0 %v11043_v35  ;;  %v856_v35 = vld [vmem:[#allocation4 + $0x67] sm:$0x3] }
 0x18a   :  { %v8523_v21 = vpop.permute.xlu1 %1429  ;;  %2602 = vperm.xlu0 %7439, %v8386_v14   ;;  %v907_v49 = vpop.permute.xlu0 %906 }
 0x18b   :  { %6869 = vmatmul.mubr.msk.bf16.gmra.mrb[64].mxu0 %vm174_vm0, %v1071_v30  ;;  %v8539_v30 = vld [vmem:[#allocation4 + $0x57] sm:$0xff] }
 0x18c   :  { %1889 = vperm.xlu1 %7416, %v8077_v27   ;;  %6872 = vmatprep.mubr.msk.bf16.mxu0 %vm7797_vm3, %v11054_v1  ;;  %v920_v27 = vmul.f32 %v903_v7, %v8533_v9  ;;  %v919_v26 = vmul.f32 %v899_v62, %v8539_v30  ;;  %v1073_v7 = vpack.c.bf16 %v8381_v22, %v8338_v34 }
 0x18e   :  { %v8530_v3 = vpop.permute.xlu1 %1433  ;;  %2610 = vperm.xlu0 %7439, %v8398_v55   ;;  %v1222_v62 = vpop.permute.xlu0 %1221 }
 0x190   :  { %7417 = vset.pattern.permute.xlu1 %v11048_v6  ;;  %6847 = vmatmul.mubr.msk.bf16.gmra.mrb[44].mxu1 %vm174_vm0, %v926_v28  ;;  %v927_v28 = vpack.c.bf16 %v920_v27, %v919_v26 }
 0x191   :  { %1685 = vperm.xlu1 %7417, %v8087_v29   ;;  %6850 = vmatprep.mubr.msk.bf16.mxu1 %vm7797_vm3, %v11054_v1 }
 0x192   :  { %7443 = vset.pattern.permute.xlu0 %v11045_v36  ;;  %v921_v36 = vmul.f32 %v907_v49, %v856_v35  ;;  %v1226_v27 = vpop.permute.xlu0 %1225  ;;  %v1268_v49 = vmul.f32 %v8507_v23, %v8179_v43 }
 0x193   :  { %v1230_v39 = vpop.permute.xlu1 %1229  ;;  %6873 = vmatmul.mubr.msk.bf16.gmra.mrb[68].mxu0 %vm174_vm0, %v1072_v25  ;;  %2790 = vperm.xlu0 %7443, %v8332_v13   ;;  %v1270_v38 = vmul.f32 %v1226_v27, %v8187_v51  ;;  %v8616_v51 = vld [vmem:[%s11033_s1 + $0x38] sm:$0xff] }
 0x194   :  { %6876 = vmatprep.mubr.msk.bf16.mxu0 %vm7797_vm3, %v11054_v1  ;;  %v928_v35 = vpack.c.bf16 %v921_v36, %v921_v36 }
 0x195   :  { %7419 = vset.pattern.permute.xlu1 %v11046_v15 }
 0x196   :  { %1897 = vperm.xlu1 %7419, %v8087_v29   ;;  %v8566_v29 = vld [vmem:[#allocation4 + $0x60] sm:$0xff]  ;;  %v1438_v15 = vpop.permute.xlu0 %1437 }
 0x197   :  { %2802 = vperm.xlu0 %7443, %v8347_v47  }
 0x198   :  { %v8556_v25 = vpop.permute.xlu1 %1441  ;;  %6851 = vmatmul.mubr.msk.bf16.gmra.mrb[48].mxu1 %vm174_vm0, %v927_v28  ;;  %v8572_v28 = vld [vmem:[%s11033_s1] sm:$0xff] }
 0x199   :  { %6854 = vmatprep.mubr.msk.bf16.mxu1 %vm7797_vm3, %v11054_v1 }
 0x19a   :  { %7420 = vset.pattern.permute.xlu1 %v11048_v6  ;;  %v8594_v6 = vld [vmem:[%s11033_s1 + $0x18] sm:$0xff] }
 0x19b   :  { %1689 = vperm.xlu1 %7420, %v8099_v31   ;;  %6877 = vmatmul.mubr.msk.bf16.gmra.mrb[72].mxu0 %vm174_vm0, %v1073_v7  ;;  %v1074_v31 = vpack.c.bf16 %v8566_v29, %v8389_v42  ;;  %v1269_v7 = vmul.f32 %v1222_v62, %v8193_v54 }
 0x19c   :  { %6880 = vmatprep.mubr.msk.bf16.mxu0 %vm7797_vm3, %v11054_v1  ;;  %2810 = vperm.xlu0 %7443, %v8361_v56  }
 0x19d   :  { %v1234_v26 = vpop.permute.xlu1 %1233  ;;  %v1281_v54 = vpack.c.bf16 %v1269_v7, %v1268_v49  ;;  %v1415_v7 = vld [vmem:[#allocation4 + $0xe] sm:$0xff] }
 0x19e   :  { %v1480_v27 = vmul.f32 %v8523_v21, %v1415_v7 }
 0x19f   :  { %7421 = vset.pattern.permute.xlu1 %v7794_v0  ;;  %v1713_v0 = vld [vmem:[#allocation6 + $0xe] sm:$0x3] }
 0x1a0   :  { %2230 = vperm.xlu1 %7421, %v8572_v28   ;;  %6855 = vmatmul.mubr.msk.bf16.gmra.mrb[52].mxu1 %vm174_vm0, %v928_v35  ;;  %v1068_v35 = vld [vmem:[#allocation4 + $0x68] sm:$0x3]  ;;  %v1736_v43 = vand.u32 %v1713_v0, %v7992_v8  ;;  %v1271_v0 = vmul.f32 %v1230_v39, %v8204_v61  ;;  %v1925_v39 = vld [vmem:[#allocation6 + $0x10] sm:$0x3] }
 0x1a1   :  { %6890 = vmatprep.mubr.msk.bf16.mxu1 %vm7797_vm3, %v11054_v1  ;;  %2818 = vperm.xlu0 %7443, %v8373_v48   ;;  %v1075_v62 = vpack.c.bf16 %v1068_v35, %v1068_v35  ;;  %v1481_v35 = vmul.f32 %v8530_v3, %v1416_v32  ;;  %v1948_v3 = vand.u32 %v1925_v39, %v7992_v8  ;;  %v8637_v8 = vld [vmem:[%s11033_s1 + $0x58] sm:$0xff] }
 0x1a2   :  { %v8585_v36 = vpop.permute.xlu1 %1445  ;;  %v1282_v61 = vpack.c.bf16 %v1271_v0, %v1270_v38  ;;  %v1417_v38 = vld [vmem:[#allocation4 + $0x1e] sm:$0xff]  ;;  %v1272_v0 = vmul.f32 %v1234_v26, %v8202_v60  ;;  %v11131_v26 = vmov 6  }
 0x1a3   :  { %6881 = vmatmul.mubr.msk.bf16.gmra.mrb[76].mxu0 %vm174_vm0, %v1074_v31  ;;  %v8600_v31 = vpop.permute.xlu0 %1453  ;;  %v1493_v32 = vpack.c.bf16 %v1481_v35, %v1480_v27  ;;  %v1482_v7 = vmul.f32 %v1438_v15, %v1417_v38 }
 0x1a4   :  { %2238 = vperm.xlu1 %7421, %v8420_v46   ;;  %6884 = vmatprep.mubr.msk.bf16.mxu0 %vm7797_vm3, %v11054_v1 }
 0x1a5   :  { %2826 = vperm.xlu0 %7443, %v8386_v14  }
 0x1a6   :  { %v1450_v23 = vpop.permute.xlu1 %1449 }
 0x1a8   :  { %2242 = vperm.xlu1 %7421, %v8594_v6   ;;  %6891 = vmatmul.mubr.msk.bf16.vlgmr.msra.gmra.mrb[56].mxu1 %vm174_vm0, %v1281_v54 }
 0x1a9   :  { %6894 = vmatprep.mubr.msk.bf16.mxu1 %vm7797_vm3, %v11054_v1  ;;  %6949 = vmatpush3.bf16.msra.mxu1 %v1736_v43  ;;  %v1238_v43 = vpop.permute.xlu0 %1237 }
 0x1aa   :  { %2834 = vperm.xlu0 %7443, %v8398_v55   ;;  %7008 = vmatprep.subr.bf16.mxu1 %v11054_v1  ;;  %v1273_v21 = vmul.f32 %v1238_v43, %v8220_v17 }
 0x1ab   :  { %v1246_v49 = vpop.permute.xlu1 %1245  ;;  %6885 = vmatmul.mubr.msk.bf16.gmra.mrb[80].mxu0 %vm174_vm0, %v1075_v62  ;;  %v1418_v62 = vld [vmem:[#allocation4 + $0x26] sm:$0xff] }
 0x1ac   :  { %2250 = vperm.xlu1 %7421, %v8450_v11   ;;  %6920 = vmatprep.mubr.msk.bf16.mxu0 %vm7797_vm3, %v11054_v1  ;;  %v1483_v35 = vmul.f32 %v8556_v25, %v1418_v62  ;;  %v1283_v60 = vpack.c.bf16 %v1273_v21, %v1272_v0  ;;  %v1420_v25 = vld [vmem:[#allocation4 + $0x36] sm:$0xff]  ;;  %v1275_v39 = vmul.f32 %v1246_v49, %v8242_v45  ;;  %v11133_v21 = vmov 2  }
 0x1ad   :  { %v1242_v17 = vpop.permute.xlu0 %1241  ;;  %v1485_v38 = vmul.f32 %v1450_v23, %v1420_v25 }
 0x1ae   :  { %7445 = vset.pattern.permute.xlu0 %v7801_v37  ;;  %v1494_v15 = vpack.c.bf16 %v1483_v35, %v1482_v7  ;;  %v1274_v27 = vmul.f32 %v1242_v17, %v8218_v16  ;;  %v1421_v7 = vld [vmem:[#allocation4 + $0x3e] sm:$0xff]  ;;  %v1422_v35 = vld [vmem:[#allocation4 + $0x46] sm:$0xff] }
 0x1af   :  { %3173 = vperm.xlu0 %7445, %v8332_v13   ;;  %v1486_v17 = vmul.f32 %v8600_v31, %v1421_v7  ;;  %v1215_v7 = vld [vmem:[#allocation4 + $0x69] sm:$0x3] }
 0x1b0   :  { %2258 = vperm.xlu1 %7421, %v8616_v51   ;;  %v1458_v54 = vpop.permute.xlu1 %1457  ;;  %6895 = vmatmul.mubr.msk.bf16.gmra.mrb[60].mxu1 %vm174_vm0, %v1282_v61  ;;  %v1284_v62 = vpack.c.bf16 %v1275_v39, %v1274_v27  ;;  %v1424_v27 = vld [vmem:[#allocation4 + $0x56] sm:$0xff] }
 0x1b1   :  { %6898 = vmatprep.mubr.msk.bf16.mxu1 %vm7797_vm3, %v11054_v1  ;;  %v1254_v49 = vpop.permute.xlu0 %1253 }
 0x1b3   :  { %6921 = vmatmul.mubr.msk.bf16.vlgmr.msra.gmra.mrb[84].mxu0 %vm174_vm0, %v1493_v32  ;;  %3177 = vperm.xlu0 %7445, %v8420_v46   ;;  %v1419_v32 = vld [vmem:[#allocation4 + $0x2e] sm:$0xff] }
 0x1b4   :  { %2266 = vperm.xlu1 %7421, %v8492_v10   ;;  %6924 = vmatprep.mubr.msk.bf16.mxu0 %vm7797_vm3, %v11054_v1  ;;  %v1484_v45 = vmul.f32 %v8585_v36, %v1419_v32 }
 0x1b5   :  { %v1250_v61 = vpop.permute.xlu1 %1249  ;;  %6979 = vmatpush3.bf16.msra.mxu0 %v1948_v3  ;;  %v11132_v3 = vmov 0   ;;  %v1258_v25 = vpop.permute.xlu0 %1257 }
 0x1b6   :  { %7040 = vmatprep.subr.bf16.mxu0 %v11054_v1  ;;  %v1495_v16 = vpack.c.bf16 %v1485_v38, %v1484_v45  ;;  %v1276_v23 = vmul.f32 %v1250_v61, %v8240_v44  ;;  %v1214_v44 = vld [vmem:[#allocation4 + $0x61] sm:$0xff]  ;;  %v1278_v38 = vmul.f32 %v1258_v25, %v8265_v57 }
 0x1b7   :  { %7448 = vset.pattern.permute.xlu0 %v11131_v26 }
 0x1b8   :  { %2274 = vperm.xlu1 %7421, %v8637_v8   ;;  %6899 = vmatmul.mubr.msk.bf16.gmra.mrb[64].mxu1 %vm174_vm0, %v1283_v60  ;;  %v1277_v60 = vmul.f32 %v1254_v49, %v8267_v58 }
 0x1b9   :  { %6902 = vmatprep.mubr.msk.bf16.mxu1 %vm7797_vm3, %v11054_v1  ;;  %3401 = vperm.xlu0 %7448, %v8420_v46   ;;  %v1470_v31 = vpop.permute.xlu0 %1469 }
 0x1ba   :  { %v1462_v43 = vpop.permute.xlu1 %1461  ;;  %v1285_v39 = vpack.c.bf16 %v1277_v60, %v1276_v23  ;;  %v1426_v23 = vld [vmem:[#allocation4 + $0x66] sm:$0xff]  ;;  %v1425_v60 = vld [vmem:[#allocation4 + $0x5e] sm:$0xff] }
 0x1bb   :  { %6925 = vmatmul.mubr.msk.bf16.gmra.mrb[88].mxu0 %vm174_vm0, %v1494_v15  ;;  %v1487_v15 = vmul.f32 %v1458_v54, %v1422_v35  ;;  %v1423_v54 = vld [vmem:[#allocation4 + $0x4e] sm:$0xff] }
 0x1bc   :  { %7423 = vset.pattern.permute.xlu1 %v11132_v3  ;;  %6928 = vmatprep.mubr.msk.bf16.mxu0 %vm7797_vm3, %v11054_v1 }
 0x1bd   :  { %2129 = vperm.xlu1 %7423, %v8572_v28   ;;  %3417 = vperm.xlu0 %7448, %v8361_v56   ;;  %v1496_v61 = vpack.c.bf16 %v1487_v15, %v1486_v17  ;;  %v1478_v35 = vpop.permute.xlu0 %1477  ;;  %v1490_v17 = vmul.f32 %v1470_v31, %v1425_v60 }
 0x1be   :  { %v1466_v0 = vpop.permute.xlu1 %1465 }
 0x1c0   :  { %6903 = vmatmul.mubr.msk.bf16.gmra.mrb[68].mxu1 %vm174_vm0, %v1284_v62  ;;  %v1489_v62 = vmul.f32 %v1466_v0, %v1424_v27 }
 0x1c1   :  { %7425 = vset.pattern.permute.xlu1 %v11133_v21  ;;  %6906 = vmatprep.mubr.msk.bf16.mxu1 %vm7797_vm3, %v11054_v1  ;;  %v1646_v15 = vpop.permute.xlu0 %1645 }
 0x1c2   :  { %2562 = vperm.xlu1 %7425, %v8572_v28   ;;  %7453 = vset.pattern.permute.xlu0 %v7801_v37 }
 0x1c3   :  { %v1262_v36 = vpop.permute.xlu1 %1261  ;;  %6929 = vmatmul.mubr.msk.bf16.gmra.mrb[92].mxu0 %vm174_vm0, %v1495_v16  ;;  %3189 = vperm.xlu0 %7453, %v8450_v11   ;;  %v1488_v16 = vmul.f32 %v1462_v43, %v1423_v54 }
 0x1c4   :  { %6932 = vmatprep.mubr.msk.bf16.mxu0 %vm7797_vm3, %v11054_v1  ;;  %v1279_v32 = vmul.f32 %v1262_v36, %v1214_v44  ;;  %v1427_v44 = vld [vmem:[#allocation4 + $0x6e] sm:$0x3] }
 0x1c5   :  { %v1497_v57 = vpack.c.bf16 %v1489_v62, %v1488_v16 }
 0x1c6   :  { %2566 = vperm.xlu1 %7425, %v8332_v13   ;;  %v1286_v49 = vpack.c.bf16 %v1279_v32, %v1278_v38  ;;  %v1693_v32 = vmul.f32 %v1646_v15, %v8443_v33  ;;  %v1492_v38 = vmul.f32 %v1478_v35, %v1427_v44 }
 0x1c7   :  { %3193 = vperm.xlu0 %7453, %v8361_v56  }
 0x1c8   :  { %v1474_v58 = vpop.permute.xlu1 %1473  ;;  %6907 = vmatmul.mubr.msk.bf16.gmra.mrb[72].mxu1 %vm174_vm0, %v1285_v39 }
 0x1c9   :  { %6910 = vmatprep.mubr.msk.bf16.mxu1 %vm7797_vm3, %v11054_v1  ;;  %v1491_v43 = vmul.f32 %v1474_v58, %v1426_v23 }
 0x1ca   :  { %7426 = vset.pattern.permute.xlu1 %v11132_v3 }
 0x1cb   :  { %2144 = vperm.xlu1 %7426, %v8594_v6   ;;  %6933 = vmatmul.mubr.msk.bf16.gmra.mrb[96].mxu0 %vm174_vm0, %v1496_v61  ;;  %v1498_v58 = vpack.c.bf16 %v1491_v43, %v1490_v17  ;;  %v1862_v61 = vpop.permute.xlu0 %1861 }
 0x1cc   :  { %6936 = vmatprep.mubr.msk.bf16.mxu0 %vm7797_vm3, %v11054_v1  ;;  %3205 = vperm.xlu0 %7453, %v8492_v10  }
 0x1cd   :  { %v1266_v45 = vpop.permute.xlu1 %1265 }
 0x1ce   :  { %v1280_v0 = vmul.f32 %v1266_v45, %v1215_v7  ;;  %v11134_v45 = vmov 7  }
 0x1cf   :  { %7429 = vset.pattern.permute.xlu1 %v11133_v21 }
 0x1d0   :  { %2574 = vperm.xlu1 %7429, %v8594_v6   ;;  %6911 = vmatmul.mubr.msk.bf16.gmra.mrb[76].mxu1 %vm174_vm0, %v1286_v49  ;;  %v1287_v25 = vpack.c.bf16 %v1280_v0, %v1280_v0  ;;  %v1650_v49 = vpop.permute.xlu0 %1649 }
 0x1d1   :  { %6914 = vmatprep.mubr.msk.bf16.mxu1 %vm7797_vm3, %v11054_v1  ;;  %3209 = vperm.xlu0 %7453, %v8386_v14  }
 0x1d2   :  { %v1642_v36 = vpop.permute.xlu1 %1641 }
 0x1d3   :  { %6937 = vmatmul.mubr.msk.bf16.gmra.mrb[100].mxu0 %vm174_vm0, %v1497_v57  ;;  %v1692_v27 = vmul.f32 %v1642_v36, %v8423_v63  ;;  %v1499_v63 = vpack.c.bf16 %v1492_v38, %v1492_v38  ;;  %v1694_v57 = vmul.f32 %v1650_v49, %v8439_v18 }
 0x1d4   :  { %7430 = vset.pattern.permute.xlu1 %v11132_v3  ;;  %6940 = vmatprep.mubr.msk.bf16.mxu0 %vm7797_vm3, %v11054_v1  ;;  %v1662_v18 = vpop.permute.xlu0 %1661 }
 0x1d5   :  { %2149 = vperm.xlu1 %7430, %v8347_v47   ;;  %7458 = vset.pattern.permute.xlu0 %v11131_v26  ;;  %v1705_v54 = vpack.c.bf16 %v1693_v32, %v1692_v27 }
 0x1d6   :  { %3433 = vperm.xlu0 %7458, %v8386_v14  }
 0x1d7   :  { %v1854_v39 = vpop.permute.xlu1 %1853 }
 0x1d8   :  { %6915 = vmatmul.mubr.msk.bf16.gmra.mrb[80].mxu1 %vm174_vm0, %v1287_v25  ;;  %v1904_v36 = vmul.f32 %v1854_v39, %v8263_v52  ;;  %v1697_v25 = vmul.f32 %v1662_v18, %v8483_v19  ;;  %v1906_v39 = vmul.f32 %v1862_v61, %v8288_v12 }
 0x1d9   :  { %7431 = vset.pattern.permute.xlu1 %v11133_v21  ;;  %6950 = vmatprep.mubr.msk.bf16.mxu1 %vm7797_vm3, %v11054_v1 }
 0x1da   :  { %2578 = vperm.xlu1 %7431, %v8347_v47   ;;  %3441 = vperm.xlu0 %7458, %v8398_v55  }
 0x1db   :  { %v1858_v31 = vpop.permute.xlu1 %1857  ;;  %6941 = vmatmul.mubr.msk.bf16.gmra.mrb[104].mxu0 %vm174_vm0, %v1498_v58 }
 0x1dc   :  { %6944 = vmatprep.mubr.msk.bf16.mxu0 %vm7797_vm3, %v11054_v1  ;;  %v1905_v23 = vmul.f32 %v1858_v31, %v8261_v50 }
 0x1de   :  { %2582 = vperm.xlu1 %7431, %v8450_v11   ;;  %v8709_v62 = vpop.f32.mrb[0].mxu0  ;;  %7462 = vset.pattern.permute.xlu0 %v11134_v45  ;;  %v1917_v15 = vpack.c.bf16 %v1905_v23, %v1904_v36 }
 0x1df   :  { %v6742_v33 = vpop.f32.mrb[1].mxu0  ;;  %3621 = vperm.xlu0 %7462, %v8332_v13   ;;  %v11135_v13 = vmov 8  }
 0x1e0   :  { %v1654_v47 = vpop.permute.xlu1 %1653  ;;  %v8713_v16 = vpop.f32.mrb[2].mxu0  ;;  %6951 = vmatmul.mubr.msk.bf16.vlgmr.msra.gmra.mrb[84].mxu1 %vm174_vm0, %v1705_v54 }
 0x1e1   :  { %v6743_v7 = vpop.f32.mrb[3].mxu0  ;;  %6954 = vmatprep.mubr.msk.bf16.mxu1 %vm7797_vm3, %v11054_v1  ;;  %v1695_v35 = vmul.f32 %v1654_v47, %v8461_v2 }
 0x1e2   :  { %7432 = vset.pattern.permute.xlu1 %v11132_v3 }
 0x1e3   :  { %2164 = vperm.xlu1 %7432, %v8616_v51   ;;  %6945 = vmatmul.mubr.msk.bf16.gmra.mrb[108].mxu0 %vm174_vm0, %v1499_v63  ;;  %v1706_v0 = vpack.c.bf16 %v1695_v35, %v1694_v57 }
 0x1e4   :  { %6980 = vmatprep.mubr.msk.bf16.mxu0 %vm7797_vm3, %v11054_v1  ;;  %7465 = vset.pattern.permute.xlu0 %v11135_v13 }
 0x1e5   :  { %v1866_v60 = vpop.permute.xlu1 %1865  ;;  %3849 = vperm.xlu0 %7465, %v8420_v46  }
 0x1e6   :  { %v8728_v2 = vpop.f32.mrb[4].mxu0  ;;  %v1907_v19 = vmul.f32 %v1866_v60, %v8281_v20  ;;  %v1666_v20 = vpop.permute.xlu0 %1665 }
 0x1e7   :  { %7434 = vset.pattern.permute.xlu1 %v11133_v21  ;;  %v6746_v43 = vpop.f32.mrb[5].mxu0  ;;  %v1698_v23 = vmul.f32 %v1666_v20, %v8485_v5 }
 0x1e8   :  { %2590 = vperm.xlu1 %7434, %v8616_v51   ;;  %v8733_v17 = vpop.f32.mrb[6].mxu0  ;;  %6955 = vmatmul.mubr.msk.bf16.gmra.mrb[88].mxu1 %vm174_vm0, %v1706_v0  ;;  %v1918_v31 = vpack.c.bf16 %v1907_v19, %v1906_v39 }
 0x1e9   :  { %v6747_v50 = vpop.f32.mrb[7].mxu0  ;;  %6958 = vmatprep.mubr.msk.bf16.mxu1 %vm7797_vm3, %v11054_v1  ;;  %7466 = vset.pattern.permute.xlu0 %v11134_v45 }
 0x1ea   :  { %v1658_v44 = vpop.permute.xlu1 %1657  ;;  %3625 = vperm.xlu0 %7466, %v8420_v46   ;;  %v1878_v33 = vpop.permute.xlu0 %1877 }
 0x1eb   :  { %v1696_v52 = vmul.f32 %v1658_v44, %v8463_v4  ;;  %6981 = vmatmul.mubr.msk.bf16.vlgmr.msra.gmra.mrb[112].mxu0 %vm174_vm0, %v1917_v15 }
 0x1ec   :  { %7435 = vset.pattern.permute.xlu1 %v11132_v3  ;;  %6984 = vmatprep.mubr.msk.bf16.mxu0 %vm7797_vm3, %v11054_v1 }
 0x1ed   :  { %v1707_v58 = vpack.c.bf16 %v1697_v25, %v1696_v52  ;;  %2169 = vperm.xlu1 %7435, %v8373_v48  }
 0x1ee   :  { %v8749_v27 = vpop.f32.mrb[8].mxu0  ;;  %3637 = vperm.xlu0 %7466, %v8450_v11   ;;  %v1678_v15 = vpop.permute.xlu0 %1677 }
 0x1ef   :  { %v1870_v32 = vpop.permute.xlu1 %1869  ;;  %v6750_v4 = vpop.f32.mrb[9].mxu0  ;;  %v1701_v39 = vmul.f32 %v1678_v15, %v8539_v30 }
 0x1f0   :  { %v8752_v38 = vpop.f32.mrb[10].mxu0  ;;  %6959 = vmatmul.mubr.msk.bf16.gmra.mrb[92].mxu1 %vm174_vm0, %v1707_v58 }
 0x1f1   :  { %7437 = vset.pattern.permute.xlu1 %v11133_v21  ;;  %v6751_v54 = vpop.f32.mrb[11].mxu0  ;;  %6962 = vmatprep.mubr.msk.bf16.mxu1 %vm7797_vm3, %v11054_v1 }
 0x1f2   :  { %2594 = vperm.xlu1 %7437, %v8373_v48   ;;  %3641 = vperm.xlu0 %7466, %v8361_v56   ;;  %v1908_v48 = vmul.f32 %v1870_v32, %v8313_v53 }
 0x1f3   :  { %v1874_v12 = vpop.permute.xlu1 %1873  ;;  %6985 = vmatmul.mubr.msk.bf16.gmra.mrb[116].mxu0 %vm174_vm0, %v1918_v31 }
 0x1f4   :  { %6988 = vmatprep.mubr.msk.bf16.mxu0 %vm7797_vm3, %v11054_v1  ;;  %v1909_v61 = vmul.f32 %v1874_v12, %v8318_v59 }
 0x1f6   :  { %2598 = vperm.xlu1 %7437, %v8492_v10   ;;  %v8765_v63 = vpop.f32.mrb[12].mxu0  ;;  %7471 = vset.pattern.permute.xlu0 %v11135_v13  ;;  %v1919_v59 = vpack.c.bf16 %v1909_v61, %v1908_v48 }
 0x1f7   :  { %v6754_v49 = vpop.f32.mrb[13].mxu0  ;;  %v578_v47 = vpop.f32.mrb[0].mxu1  ;;  %3865 = vperm.xlu0 %7471, %v8361_v56  }
 0x1f8   :  { %v8771_v7 = vadd.f32 %v578_v47, %v8709_v62  ;;  %v1670_v35 = vpop.permute.xlu1 %1669  ;;  %v8773_v57 = vpop.f32.mrb[14].mxu0  ;;  %v1910_v62 = vmul.f32 %v1878_v33, %v8350_v41 }
 0x1f9   :  { %v1699_v60 = vmul.f32 %v1670_v35, %v8509_v40  ;;  %v6772_v0 = vpop.f32.mrb[1].mxu1  ;;  %v6755_v18 = vpop.f32.mrb[15].mxu0 }
 0x1fa   :  { %v581_v36 = vpop.f32.mrb[2].mxu1  ;;  %7438 = vset.pattern.permute.xlu1 %v11132_v3  ;;  %v1682_v47 = vpop.permute.xlu0 %1681  ;;  %v1638_v0 = vld [vmem:[#allocation4 + $0x67] sm:$0xff] }
 0x1fb   :  { %v1708_v53 = vpack.c.bf16 %v1699_v60, %v1698_v23  ;;  %v8779_v43 = vadd.f32 %v581_v36, %v8713_v16  ;;  %v6773_v56 = vpop.f32.mrb[3].mxu1  ;;  %2184 = vperm.xlu1 %7438, %v8637_v8   ;;  %6989 = vmatmul.mubr.msk.bf16.gmra.mrb[120].mxu0 %vm174_vm0, %v1919_v59 }
 0x1fc   :  { %6992 = vmatprep.mubr.msk.bf16.mxu0 %vm7797_vm3, %v11054_v1  ;;  %7474 = vset.pattern.permute.xlu0 %v11134_v45  ;;  %v1850_v56 = vld [vmem:[#allocation4 + $0x68] sm:$0xff] }
 0x1fd   :  { %v1882_v5 = vpop.permute.xlu1 %1881  ;;  %6963 = vmatmul.mubr.msk.bf16.gmra.mrb[96].mxu1 %vm174_vm0, %v1708_v53  ;;  %3653 = vperm.xlu0 %7474, %v8492_v10  }
 0x1fe   :  { %v1911_v40 = vmul.f32 %v1882_v5, %v8338_v34  ;;  %v8790_v16 = vpop.f32.mrb[16].mxu0  ;;  %6966 = vmatprep.mubr.msk.bf16.mxu1 %vm7797_vm3, %v11054_v1 }
 0x1ff   :  { %7440 = vset.pattern.permute.xlu1 %v11133_v21  ;;  %v6758_v41 = vpop.f32.mrb[17].mxu0 }
 0x200   :  { %v1920_v50 = vpack.c.bf16 %v1911_v40, %v1910_v62  ;;  %2606 = vperm.xlu1 %7440, %v8637_v8   ;;  %v8796_v25 = vpop.f32.mrb[18].mxu0 }
 0x201   :  { %v6759_v44 = vpop.f32.mrb[19].mxu0  ;;  %v586_v52 = vpop.f32.mrb[4].mxu1  ;;  %3657 = vperm.xlu0 %7474, %v8386_v14  }
 0x202   :  { %v8801_v34 = vadd.f32 %v586_v52, %v8728_v2  ;;  %v1674_v19 = vpop.permute.xlu1 %1673  ;;  %v6776_v58 = vpop.f32.mrb[5].mxu1 }
 0x203   :  { %v1700_v32 = vmul.f32 %v1674_v19, %v8511_v24  ;;  %v589_v21 = vpop.f32.mrb[6].mxu1  ;;  %6993 = vmatmul.mubr.msk.bf16.gmra.mrb[124].mxu0 %vm174_vm0, %v1920_v50  ;;  %v1851_v19 = vld [vmem:[#allocation4 + $0x70] sm:$0x3] }
 0x204   :  { %v8806_v4 = vadd.f32 %v589_v21, %v8733_v17  ;;  %7441 = vset.pattern.permute.xlu1 %v11132_v3  ;;  %v6777_v31 = vpop.f32.mrb[7].mxu1  ;;  %6996 = vmatprep.mubr.msk.bf16.mxu0 %vm7797_vm3, %v11054_v1  ;;  %v11136_v3 = vmov 3  }
 0x205   :  { %v1709_v30 = vpack.c.bf16 %v1701_v39, %v1700_v32  ;;  %2189 = vperm.xlu1 %7441, %v8398_v55   ;;  %7477 = vset.pattern.permute.xlu0 %v11135_v13  ;;  %v1639_v39 = vld [vmem:[#allocation4 + $0x6f] sm:$0x3] }
 0x206   :  { %v8813_v2 = vpop.f32.mrb[20].mxu0  ;;  %3881 = vperm.xlu0 %7477, %v8386_v14  }
 0x207   :  { %v1886_v24 = vpop.permute.xlu1 %1885  ;;  %v6762_v54 = vpop.f32.mrb[21].mxu0  ;;  %6967 = vmatmul.mubr.msk.bf16.gmra.mrb[100].mxu1 %vm174_vm0, %v1709_v30 }
 0x208   :  { %v8817_v17 = vpop.f32.mrb[22].mxu0  ;;  %6970 = vmatprep.mubr.msk.bf16.mxu1 %vm7797_vm3, %v11054_v1  ;;  %v1912_v14 = vmul.f32 %v1886_v24, %v8381_v22 }
 0x209   :  { %7442 = vset.pattern.permute.xlu1 %v11136_v3  ;;  %v6763_v20 = vpop.f32.mrb[23].mxu0 }
 0x20a   :  { %2786 = vperm.xlu1 %7442, %v8572_v28   ;;  %3889 = vperm.xlu0 %7477, %v8398_v55  }
 0x20b   :  { %v1890_v12 = vpop.permute.xlu1 %1889  ;;  %v594_v61 = vpop.f32.mrb[8].mxu1 }
 0x20c   :  { %v1913_v33 = vmul.f32 %v1890_v12, %v8389_v42  ;;  %v8827_v48 = vadd.f32 %v594_v61, %v8749_v27  ;;  %v6780_v49 = vpop.f32.mrb[9].mxu1  ;;  %v1702_v42 = vmul.f32 %v1682_v47, %v8533_v9 }
 0x20d   :  { %v597_v35 = vpop.f32.mrb[10].mxu1 }
 0x20e   :  { %v1921_v59 = vpack.c.bf16 %v1913_v33, %v1912_v14  ;;  %v8830_v23 = vadd.f32 %v597_v35, %v8752_v38  ;;  %2794 = vperm.xlu1 %7442, %v8420_v46   ;;  %v8833_v60 = vpop.f32.mrb[24].mxu0  ;;  %v6781_v55 = vpop.f32.mrb[11].mxu1  ;;  %v7480_v35 = vld [vmem:[#allocation10 + $0x10] sm:$0xff]  }
 0x20f   :  { %v6766_v18 = vpop.f32.mrb[25].mxu0  ;;  %v1894_v38 = vpop.permute.xlu0 %1893  ;;  %7009 = vmatpush3.bf16.msra.mxu1 %v7480_v35 }
 0x210   :  { %v1686_v22 = vpop.permute.xlu1 %1685  ;;  %v517_v36 = vpop.f32.mrb[26].mxu0  ;;  %6997 = vmatmul.mubr.msk.bf16.gmra.mrb[128].mxu0 %vm174_vm0, %v1921_v59  ;;  %v1914_v62 = vmul.f32 %v1894_v38, %v8566_v29  ;;  %7010 = vmatprep.subr.bf16.mxu1 %v11054_v1 }
 0x211   :  { %v1703_v27 = vmul.f32 %v1686_v22, %v1638_v0  ;;  %v6767_v53 = vpop.f32.mrb[27].mxu0  ;;  %7000 = vmatprep.mubr.msk.bf16.mxu0 %vm7797_vm3, %v11054_v1 }
 0x212   :  { %2798 = vperm.xlu1 %7442, %v8594_v6  }
 0x213   :  { %v1710_v46 = vpack.c.bf16 %v1703_v27, %v1702_v42  ;;  %v1902_v44 = vpop.permute.xlu0 %1901 }
 0x214   :  { %v1916_v24 = vmul.f32 %v1902_v44, %v1851_v19 }
 0x215   :  { %v1898_v5 = vpop.permute.xlu1 %1897  ;;  %6971 = vmatmul.mubr.msk.bf16.gmra.mrb[104].mxu1 %vm174_vm0, %v1710_v46 }
 0x216   :  { %v1915_v40 = vmul.f32 %v1898_v5, %v1850_v56  ;;  %2806 = vperm.xlu1 %7442, %v8450_v11   ;;  %v777_v15 = vpop.f32.mrb[28].mxu0  ;;  %6974 = vmatprep.mubr.msk.bf16.mxu1 %vm7797_vm3, %v11054_v1  ;;  %v1923_v33 = vpack.c.bf16 %v1916_v24, %v1916_v24 }
 0x217   :  { %v8846_v9 = vadd.f32 %v777_v15, %v8771_v7  ;;  %v6802_v41 = vpop.f32.mrb[29].mxu0  ;;  %v8857_v3 = vpop.permute.xlu0 %2234 }
 0x218   :  { %v1922_v50 = vpack.c.bf16 %v1915_v40, %v1914_v62  ;;  %v780_v52 = vpop.f32.mrb[30].mxu0 }
 0x219   :  { %v8849_v29 = vadd.f32 %v780_v52, %v8779_v43  ;;  %v602_v58 = vpop.f32.mrb[12].mxu1  ;;  %v6803_v32 = vpop.f32.mrb[31].mxu0 }
 0x21a   :  { %v603_v11 = vadd.f32 %v602_v58, %v8765_v63  ;;  %2814 = vperm.xlu1 %7442, %v8616_v51   ;;  %v1690_v21 = vpop.permute.xlu1 %1689  ;;  %v6784_v31 = vpop.f32.mrb[13].mxu1  ;;  %7001 = vmatmul.mubr.msk.bf16.gmra.mrb[132].mxu0 %vm174_vm0, %v1922_v50 }
 0x21b   :  { %v1704_v7 = vmul.f32 %v1690_v21, %v1639_v39  ;;  %v605_v30 = vpop.f32.mrb[14].mxu1  ;;  %7004 = vmatprep.mubr.msk.bf16.mxu0 %vm7797_vm3, %v11054_v1 }
 0x21c   :  { %v606_v54 = vadd.f32 %v605_v30, %v8773_v57  ;;  %v6785_v43 = vpop.f32.mrb[15].mxu1 }
 0x21d   :  { %v1711_v20 = vpack.c.bf16 %v1704_v7, %v1704_v7 }
 0x21e   :  { %2822 = vperm.xlu1 %7442, %v8492_v10   ;;  %v785_v63 = vpop.f32.mrb[32].mxu0  ;;  %v8873_v10 = vpop.permute.xlu0 %2246 }
 0x21f   :  { %v8861_v12 = vadd.f32 %v785_v63, %v8801_v34  ;;  %v6806_v61 = vpop.f32.mrb[33].mxu0  ;;  %6975 = vmatmul.mubr.msk.bf16.gmra.mrb[108].mxu1 %vm174_vm0, %v1711_v20  ;;  %v8864_v14 = vpop.permute.xlu1 %2230 }
 0x220   :  { %v788_v49 = vpop.f32.mrb[34].mxu0  ;;  %7012 = vmatprep.mubr.msk.bf16.mxu1 %vm7797_vm3, %v11054_v1 }
 0x221   :  { %v8869_v57 = vadd.f32 %v788_v49, %v8806_v4  ;;  %v6807_v47 = vpop.f32.mrb[35].mxu0 }
 0x222   :  { %2830 = vperm.xlu1 %7442, %v8637_v8   ;;  %7005 = vmatmul.mubr.msk.bf16.gmra.mrb[136].mxu0 %vm174_vm0, %v1923_v33 }
 0x223   :  { %v610_v34 = vpop.f32.mrb[16].mxu1  ;;  %v8875_v59 = vpop.permute.xlu1 %2238  ;;  %7044 = vmatprep.mubr.msk.bf16.mxu0 %vm7797_vm3, %v11054_v1 }
 0x224   :  { %v611_v55 = vadd.f32 %v610_v34, %v8790_v16  ;;  %v6788_v0 = vpop.f32.mrb[17].mxu1  ;;  %v8889_v16 = vpop.permute.xlu0 %2254 }
 0x225   :  { %v613_v4 = vpop.f32.mrb[18].mxu1 }
 0x226   :  { %v614_v18 = vadd.f32 %v613_v4, %v8796_v25  ;;  %7444 = vset.pattern.permute.xlu1 %v7801_v37  ;;  %v6789_v22 = vpop.f32.mrb[19].mxu1  ;;  %v793_v36 = vpop.f32.mrb[36].mxu0 }
 0x227   :  { %v8884_v42 = vadd.f32 %v793_v36, %v8827_v48  ;;  %3169 = vperm.xlu1 %7444, %v8572_v28   ;;  %v6810_v27 = vpop.f32.mrb[37].mxu0  ;;  %v8887_v53 = vpop.permute.xlu1 %2242 }
 0x228   :  { %v796_v38 = vpop.f32.mrb[38].mxu0  ;;  %v8898_v62 = vpop.permute.xlu0 %2262 }
 0x229   :  { %v8892_v46 = vadd.f32 %v796_v38, %v8830_v23  ;;  %v6811_v56 = vpop.f32.mrb[39].mxu0  ;;  %v8907_v23 = vld [vmem:[%s11033_s1 + $0x8] sm:$0xff] }
 0x22b   :  { %7446 = vset.pattern.permute.xlu1 %v11131_v26  ;;  %v8895_v25 = vpop.permute.xlu1 %2250 }
 0x22c   :  { %3393 = vperm.xlu1 %7446, %v8572_v28   ;;  %v8917_v21 = vpop.permute.xlu0 %2270 }
 0x22d   :  { %11137 = vst [vmem:[#allocation35_spill] sm:$0xff] %v8917_v21 }
 0x22e   :  { %v801_v48 = vpop.f32.mrb[40].mxu0 }
 0x22f   :  { %v8900_v5 = vadd.f32 %v801_v48, %v603_v11  ;;  %v6814_v40 = vpop.f32.mrb[41].mxu0  ;;  %v8902_v15 = vpop.permute.xlu1 %2258 }
 0x230   :  { %3397 = vperm.xlu1 %7446, %v8907_v23   ;;  %v804_v41 = vpop.f32.mrb[42].mxu0  ;;  %v7481_v40 = vld [vmem:[#allocation10 + $0x18] sm:$0xff]  }
 0x231   :  { %v8910_v50 = vadd.f32 %v804_v41, %v606_v54  ;;  %v618_v44 = vpop.f32.mrb[20].mxu1  ;;  %v6815_v28 = vpop.f32.mrb[43].mxu0  ;;  %7011 = vmatpush3.bf16.msra.mxu1 %v7481_v40 }
 0x232   :  { %v619_v52 = vadd.f32 %v618_v44, %v8813_v2  ;;  %v6792_v39 = vpop.f32.mrb[21].mxu1  ;;  %7072 = vmatprep.subr.bf16.mxu1 %v11054_v1 }
 0x233   :  { %v621_v19 = vpop.f32.mrb[22].mxu1  ;;  %v8913_v58 = vpop.permute.xlu1 %2266 }
 0x234   :  { %v622_v32 = vadd.f32 %v621_v19, %v8817_v17  ;;  %7447 = vset.pattern.permute.xlu1 %v7801_v37  ;;  %v6793_v11 = vpop.f32.mrb[23].mxu1  ;;  %v8928_v17 = vpop.permute.xlu0 %2278 }
 0x235   :  { %3181 = vperm.xlu1 %7447, %v8594_v6   ;;  %11139 = vst [vmem:[#allocation37_spill] sm:$0xff] %v8928_v17 }
 0x236   :  { %v809_v31 = vpop.f32.mrb[44].mxu0 }
 0x237   :  { %v8920_v7 = vadd.f32 %v809_v31, %v611_v55  ;;  %v6818_v30 = vpop.f32.mrb[45].mxu0  ;;  %v8922_v24 = vpop.permute.xlu1 %2274  ;;  %v8939_v55 = vld [vmem:[%s11033_s1 + $0x20] sm:$0xff] }
 0x238   :  { %11138 = vst [vmem:[#allocation36_spill] sm:$0xff] %v8922_v24  ;;  %v812_v2 = vpop.f32.mrb[46].mxu0 }
 0x239   :  { %v8924_v54 = vadd.f32 %v812_v2, %v614_v18  ;;  %7449 = vset.pattern.permute.xlu1 %v11131_v26  ;;  %v6819_v43 = vpop.f32.mrb[47].mxu0 }
 0x23a   :  { %3405 = vperm.xlu1 %7449, %v8594_v6  }
 0x23b   :  { %v626_v20 = vpop.f32.mrb[24].mxu1 }
 0x23c   :  { %v627_v63 = vadd.f32 %v626_v20, %v8833_v60  ;;  %v6796_v61 = vpop.f32.mrb[25].mxu1  ;;  %v8931_v33 = vpop.permute.xlu1 %2129 }
 0x23d   :  { %v629_v49 = vpop.f32.mrb[26].mxu1  ;;  %v8942_v60 = vpop.permute.xlu0 %2134  ;;  %v7483_v61 = vld [vmem:[#allocation10 + $0x8] sm:$0xff]  }
 0x23e   :  { %7450 = vset.pattern.permute.xlu1 %v7801_v37  ;;  %v6797_v47 = vpop.f32.mrb[27].mxu1  ;;  %v817_v35 = vpop.f32.mrb[48].mxu0 }
 0x23f   :  { %v8934_v34 = vadd.f32 %v817_v35, %v619_v52  ;;  %3185 = vperm.xlu1 %7450, %v8939_v55   ;;  %v6822_v6 = vpop.f32.mrb[49].mxu0 }
 0x240   :  { %v820_v0 = vpop.f32.mrb[50].mxu0 }
 0x241   :  { %v8944_v4 = vadd.f32 %v820_v0, %v622_v32  ;;  %v6823_v18 = vpop.f32.mrb[51].mxu0  ;;  %v8946_v22 = vpop.permute.xlu1 %2562 }
 0x242   :  { %11140 = vst [vmem:[#allocation38_spill] sm:$0xff] %v8946_v22  ;;  %v8956_v19 = vpop.permute.xlu0 %2570 }
 0x243   :  { %7451 = vset.pattern.permute.xlu1 %v11131_v26  ;;  %v989_v36 = vpop.f32.mrb[28].mxu1  ;;  %11142 = vst [vmem:[#allocation40_spill] sm:$0xff] %v8956_v19 }
 0x244   :  { %v1043_v27 = vadd.f32 %v989_v36, %v8846_v9  ;;  %3409 = vperm.xlu1 %7451, %v8939_v55   ;;  %v6832_v38 = vpop.f32.mrb[29].mxu1  ;;  %v8961_v9 = vld [vmem:[%s11033_s1 + $0x28] sm:$0xff] }
 0x245   :  { %v992_v56 = vpop.f32.mrb[30].mxu1  ;;  %v8951_v48 = vpop.permute.xlu1 %2566 }
 0x246   :  { %11141 = vst [vmem:[#allocation39_spill] sm:$0xff] %v8951_v48  ;;  %v1044_v41 = vadd.f32 %v992_v56, %v8849_v29  ;;  %v825_v44 = vpop.f32.mrb[52].mxu0  ;;  %v6833_v28 = vpop.f32.mrb[31].mxu1  ;;  %v7482_v29 = vld [vmem:[#allocation10] sm:$0xff]  }
 0x247   :  { %v8954_v52 = vadd.f32 %v825_v44, %v627_v63  ;;  %v6826_v39 = vpop.f32.mrb[53].mxu0  ;;  %7041 = vmatpush3.bf16.msra.mxu0 %v7482_v29  ;;  %v8971_v63 = vpop.permute.xlu0 %2139 }
 0x248   :  { %3413 = vperm.xlu1 %7451, %v8961_v9   ;;  %v828_v32 = vpop.f32.mrb[54].mxu0  ;;  %7042 = vmatprep.subr.bf16.mxu0 %v11054_v1 }
 0x249   :  { %v6827_v11 = vpop.f32.mrb[55].mxu0 }
 0x24a   :  { %v8965_v31 = vpop.permute.xlu1 %2144 }
 0x24b   :  { %v997_v30 = vpop.f32.mrb[32].mxu1  ;;  %7043 = vmatpush3.bf16.msra.mxu0 %v7483_v61  ;;  %v8986_v28 = vpop.permute.xlu0 %2154 }
 0x24c   :  { %v1045_v2 = vadd.f32 %v997_v30, %v8861_v12  ;;  %7452 = vset.pattern.permute.xlu1 %v7801_v37  ;;  %v6836_v43 = vpop.f32.mrb[33].mxu1  ;;  %7104 = vmatprep.subr.bf16.mxu0 %v11054_v1 }
 0x24d   :  { %3197 = vperm.xlu1 %7452, %v8616_v51   ;;  %v1000_v20 = vpop.f32.mrb[34].mxu1 }
 0x24e   :  { %v1046_v49 = vadd.f32 %v1000_v20, %v8869_v57  ;;  %v6837_v47 = vpop.f32.mrb[35].mxu1  ;;  %v1136_v35 = vpop.f32.mrb[56].mxu0 }
 0x24f   :  { %v8974_v6 = vadd.f32 %v1136_v35, %v1043_v27  ;;  %v6862_v0 = vpop.f32.mrb[57].mxu0  ;;  %v8976_v18 = vpop.permute.xlu1 %2574 }
 0x250   :  { %11143 = vst [vmem:[#allocation41_spill] sm:$0xff] %v8976_v18  ;;  %v1139_v12 = vpop.f32.mrb[58].mxu0  ;;  %v9005_v47 = vpop.permute.xlu0 %2159 }
 0x251   :  { %v8979_v36 = vadd.f32 %v1139_v12, %v1044_v41  ;;  %7454 = vset.pattern.permute.xlu1 %v11131_v26  ;;  %v6863_v38 = vpop.f32.mrb[59].mxu0 }
 0x252   :  { %3421 = vperm.xlu1 %7454, %v8616_v51   ;;  %v8995_v51 = vld [vmem:[%s11033_s1 + $0x40] sm:$0xff] }
 0x253   :  { %v1005_v56 = vpop.f32.mrb[36].mxu1 }
 0x254   :  { %v1047_v57 = vadd.f32 %v1005_v56, %v8884_v42  ;;  %v6840_v40 = vpop.f32.mrb[37].mxu1  ;;  %v8984_v27 = vpop.permute.xlu1 %2149 }
 0x255   :  { %v1008_v44 = vpop.f32.mrb[38].mxu1 }
 0x256   :  { %v1048_v39 = vadd.f32 %v1008_v44, %v8892_v46  ;;  %7455 = vset.pattern.permute.xlu1 %v7801_v37  ;;  %v6841_v41 = vpop.f32.mrb[39].mxu1  ;;  %v1144_v32 = vpop.f32.mrb[60].mxu0  ;;  %v9015_v44 = vld [vmem:[%s11033_s1 + $0x48] sm:$0xff] }
 0x257   :  { %v8990_v11 = vadd.f32 %v1144_v32, %v1045_v2  ;;  %3201 = vperm.xlu1 %7455, %v8995_v51   ;;  %v6866_v42 = vpop.f32.mrb[61].mxu0 }
 0x258   :  { %v1147_v29 = vpop.f32.mrb[62].mxu0 }
 0x259   :  { %v8998_v30 = vadd.f32 %v1147_v29, %v1046_v49  ;;  %v6867_v43 = vpop.f32.mrb[63].mxu0  ;;  %v9000_v20 = vpop.permute.xlu1 %2578 }
 0x25a   :  { %11144 = vst [vmem:[#allocation42_spill] sm:$0xff] %v9000_v20  ;;  %v9024_v43 = vpop.permute.xlu0 %2586 }
 0x25b   :  { %7456 = vset.pattern.permute.xlu1 %v11131_v26  ;;  %v1013_v46 = vpop.f32.mrb[40].mxu1  ;;  %11146 = vst [vmem:[#allocation44_spill] sm:$0xff] %v9024_v43 }
 0x25c   :  { %v1049_v2 = vadd.f32 %v1013_v46, %v8900_v5  ;;  %3425 = vperm.xlu1 %7456, %v8995_v51   ;;  %v6844_v61 = vpop.f32.mrb[41].mxu1 }
 0x25d   :  { %v1016_v35 = vpop.f32.mrb[42].mxu1  ;;  %v9007_v0 = vpop.permute.xlu1 %2582 }
 0x25e   :  { %11145 = vst [vmem:[#allocation43_spill] sm:$0xff] %v9007_v0  ;;  %v1050_v12 = vadd.f32 %v1016_v35, %v8910_v50  ;;  %v6845_v49 = vpop.f32.mrb[43].mxu1  ;;  %v1152_v38 = vpop.f32.mrb[64].mxu0 }
 0x25f   :  { %v9010_v56 = vadd.f32 %v1152_v38, %v1047_v57  ;;  %v6870_v40 = vpop.f32.mrb[65].mxu0 }
 0x260   :  { %3429 = vperm.xlu1 %7456, %v9015_v44   ;;  %v1155_v5 = vpop.f32.mrb[66].mxu0 }
 0x261   :  { %v9018_v41 = vadd.f32 %v1155_v5, %v1048_v39  ;;  %v6871_v32 = vpop.f32.mrb[67].mxu0 }
 0x262   :  { %v9020_v42 = vpop.permute.xlu1 %2164 }
 0x263   :  { %v1021_v29 = vpop.f32.mrb[44].mxu1 }
 0x264   :  { %v1051_v50 = vadd.f32 %v1021_v29, %v8920_v7  ;;  %7457 = vset.pattern.permute.xlu1 %v7801_v37  ;;  %v6848_v57 = vpop.f32.mrb[45].mxu1  ;;  %v9036_v29 = vpop.permute.xlu0 %2174 }
 0x265   :  { %3213 = vperm.xlu1 %7457, %v8637_v8   ;;  %v1024_v46 = vpop.f32.mrb[46].mxu1 }
 0x266   :  { %v1052_v61 = vadd.f32 %v1024_v46, %v8924_v54  ;;  %v6849_v35 = vpop.f32.mrb[47].mxu1  ;;  %v1160_v49 = vpop.f32.mrb[68].mxu0 }
 0x267   :  { %v9028_v39 = vadd.f32 %v1160_v49, %v1049_v2  ;;  %v6874_v38 = vpop.f32.mrb[69].mxu0  ;;  %v9030_v40 = vpop.permute.xlu1 %2590 }
 0x268   :  { %11147 = vst [vmem:[#allocation45_spill] sm:$0xff] %v9030_v40  ;;  %v1163_v5 = vpop.f32.mrb[70].mxu0 }
 0x269   :  { %v9032_v32 = vadd.f32 %v1163_v5, %v1050_v12  ;;  %7459 = vset.pattern.permute.xlu1 %v11131_v26  ;;  %v6875_v7 = vpop.f32.mrb[71].mxu0 }
 0x26a   :  { %3437 = vperm.xlu1 %7459, %v8637_v8   ;;  %v9048_v8 = vld [vmem:[%s11033_s1 + $0x60] sm:$0x3]  ;;  %v9051_v7 = vpop.permute.xlu0 %2179 }
 0x26b   :  { %v1029_v57 = vpop.f32.mrb[48].mxu1 }
 0x26c   :  { %v1053_v54 = vadd.f32 %v1029_v57, %v8934_v34  ;;  %v6852_v46 = vpop.f32.mrb[49].mxu1  ;;  %v9039_v35 = vpop.permute.xlu1 %2169 }
 0x26d   :  { %v1032_v2 = vpop.f32.mrb[50].mxu1 }
 0x26e   :  { %v1054_v49 = vadd.f32 %v1032_v2, %v8944_v4  ;;  %7460 = vset.pattern.permute.xlu1 %v7801_v37  ;;  %v6853_v12 = vpop.f32.mrb[51].mxu1  ;;  %v1168_v38 = vpop.f32.mrb[72].mxu0  ;;  %v7504_v2 = vld [vmem:[%s11033_s1] sm:$0xff] }
 0x26f   :  { %v9043_v5 = vadd.f32 %v1168_v38, %v1051_v50  ;;  %3217 = vperm.xlu1 %7460, %v9048_v8   ;;  %v6878_v26 = vpop.f32.mrb[73].mxu0 }
 0x270   :  { %v1171_v34 = vpop.f32.mrb[74].mxu0 }
 0x271   :  { %v9053_v57 = vadd.f32 %v1171_v34, %v1052_v61  ;;  %v6879_v4 = vpop.f32.mrb[75].mxu0  ;;  %v9055_v46 = vpop.permute.xlu1 %2594 }
 0x272   :  { %11148 = vst [vmem:[#allocation46_spill] sm:$0xff] %v9055_v46  ;;  %v9066_v46 = vpop.permute.xlu0 %2602 }
 0x273   :  { %7461 = vset.pattern.permute.xlu1 %v11134_v45  ;;  %v1037_v37 = vpop.f32.mrb[52].mxu1  ;;  %11150 = vst [vmem:[#allocation48_spill] sm:$0xff] %v9066_v46 }
 0x274   :  { %v1055_v50 = vadd.f32 %v1037_v37, %v8954_v52  ;;  %3617 = vperm.xlu1 %7461, %v7504_v2   ;;  %v6856_v12 = vpop.f32.mrb[53].mxu1 }
 0x275   :  { %v1040_v38 = vpop.f32.mrb[54].mxu1  ;;  %v9062_v26 = vpop.permute.xlu1 %2598 }
 0x276   :  { %11149 = vst [vmem:[#allocation47_spill] sm:$0xff] %v9062_v26  ;;  %v6857_v1 = vpop.f32.mrb[55].mxu1  ;;  %v1176_v61 = vpop.f32.mrb[76].mxu0 }
 0x277   :  { %v9064_v34 = vadd.f32 %v1176_v61, %v1053_v54  ;;  %v6882_v4 = vpop.f32.mrb[77].mxu0  ;;  %v9075_v54 = vpop.permute.xlu0 %2610 }
 0x278   :  { %7463 = vset.pattern.permute.xlu1 %v11135_v13  ;;  %v1179_v43 = vpop.f32.mrb[78].mxu0  ;;  %11151 = vst [vmem:[#allocation49_spill] sm:$0xff] %v9075_v54 }
 0x279   :  { %v9069_v52 = vadd.f32 %v1179_v43, %v1054_v49  ;;  %3841 = vperm.xlu1 %7463, %v7504_v2   ;;  %v6883_v37 = vpop.f32.mrb[79].mxu0 }
 0x27a   :  { %v9071_v40 = vpop.permute.xlu1 %2184 }
 0x27b   :  { %v1348_v12 = vpop.f32.mrb[56].mxu1 }
 0x27c   :  { %v1402_v38 = vadd.f32 %v1348_v12, %v8974_v6  ;;  %v6892_v26 = vpop.f32.mrb[57].mxu1 }
 0x27d   :  { %3845 = vperm.xlu1 %7463, %v8907_v23   ;;  %v1351_v1 = vpop.f32.mrb[58].mxu1  ;;  %v7505_v23 = vld [vmem:[%s11033_s1 + $0x18] sm:$0xff] }
 0x27e   :  { %v1403_v61 = vadd.f32 %v1351_v1, %v8979_v36  ;;  %v1184_v4 = vpop.f32.mrb[80].mxu0  ;;  %v6893_v46 = vpop.f32.mrb[59].mxu1 }
 0x27f   :  { %v9078_v20 = vadd.f32 %v1184_v4, %v1055_v50  ;;  %v6886_v43 = vpop.f32.mrb[81].mxu0  ;;  %v9080_v49 = vpop.permute.xlu1 %2606 }
 0x280   :  { %11152 = vst [vmem:[#allocation50_spill] sm:$0xff] %v9080_v49  ;;  %v1187_v2 = vpop.f32.mrb[82].mxu0  ;;  %v9089_v50 = vpop.permute.xlu0 %2790 }
 0x281   :  { %7464 = vset.pattern.permute.xlu1 %v11134_v45  ;;  %v6887_v37 = vpop.f32.mrb[83].mxu0  ;;  %11154 = vst [vmem:[#allocation52_spill] sm:$0xff] %v9089_v50  ;;  %v7484_v50 = vld [vmem:[#allocation10 + $0x20] sm:$0xff]  }
 0x282   :  { %3629 = vperm.xlu1 %7464, %v7505_v23  }
 0x283   :  { %v1356_v6 = vpop.f32.mrb[60].mxu1 }
 0x284   :  { %v1404_v26 = vadd.f32 %v1356_v6, %v8990_v11  ;;  %v6896_v36 = vpop.f32.mrb[61].mxu1  ;;  %v9087_v12 = vpop.permute.xlu1 %2189 }
 0x285   :  { %11153 = vst [vmem:[#allocation51_spill] sm:$0xff] %v9087_v12  ;;  %v1359_v46 = vpop.f32.mrb[62].mxu1 }
 0x286   :  { %v1405_v1 = vadd.f32 %v1359_v46, %v8998_v30  ;;  %7467 = vset.pattern.permute.xlu1 %v11135_v13  ;;  %v6897_v4 = vpop.f32.mrb[63].mxu1  ;;  %v1560_v43 = vpop.f32.mrb[84].mxu0 }
 0x287   :  { %v9093_v2 = vadd.f32 %v1560_v43, %v1402_v38  ;;  %3853 = vperm.xlu1 %7467, %v7505_v23   ;;  %v6922_v37 = vpop.f32.mrb[85].mxu0  ;;  %v9102_v46 = vpop.permute.xlu0 %2802 }
 0x288   :  { %v1563_v54 = vpop.f32.mrb[86].mxu0  ;;  %11156 = vst [vmem:[#allocation54_spill] sm:$0xff] %v9102_v46 }
 0x289   :  { %v9095_v49 = vadd.f32 %v1563_v54, %v1403_v61  ;;  %v6923_v11 = vpop.f32.mrb[87].mxu0  ;;  %v9097_v6 = vpop.permute.xlu1 %2786 }
 0x28a   :  { %11155 = vst [vmem:[#allocation53_spill] sm:$0xff] %v9097_v6 }
 0x28b   :  { %7468 = vset.pattern.permute.xlu1 %v11134_v45  ;;  %v1364_v36 = vpop.f32.mrb[64].mxu1 }
 0x28c   :  { %v1406_v0 = vadd.f32 %v1364_v36, %v9010_v56  ;;  %3633 = vperm.xlu1 %7468, %v8939_v55   ;;  %v6900_v30 = vpop.f32.mrb[65].mxu1 }
 0x28d   :  { %v1367_v38 = vpop.f32.mrb[66].mxu1  ;;  %v9104_v4 = vpop.permute.xlu1 %2794 }
 0x28e   :  { %11157 = vst [vmem:[#allocation55_spill] sm:$0xff] %v9104_v4  ;;  %v1407_v23 = vadd.f32 %v1367_v38, %v9018_v41  ;;  %v6901_v54 = vpop.f32.mrb[67].mxu1  ;;  %v1568_v61 = vpop.f32.mrb[88].mxu0 }
 0x28f   :  { %v9107_v43 = vadd.f32 %v1568_v61, %v1404_v26  ;;  %v6926_v37 = vpop.f32.mrb[89].mxu0  ;;  %v9115_v30 = vpop.permute.xlu0 %2810 }
 0x290   :  { %7469 = vset.pattern.permute.xlu1 %v11135_v13  ;;  %v1571_v11 = vpop.f32.mrb[90].mxu0  ;;  %11159 = vst [vmem:[#allocation57_spill] sm:$0xff] %v9115_v30 }
 0x291   :  { %v9110_v19 = vadd.f32 %v1571_v11, %v1405_v1  ;;  %3857 = vperm.xlu1 %7469, %v8939_v55   ;;  %v6927_v56 = vpop.f32.mrb[91].mxu0  ;;  %v9113_v36 = vpop.permute.xlu1 %2798 }
 0x292   :  { %11158 = vst [vmem:[#allocation56_spill] sm:$0xff] %v9113_v36 }
 0x293   :  { %v1372_v46 = vpop.f32.mrb[68].mxu1  ;;  %v9124_v18 = vpop.permute.xlu0 %2818 }
 0x294   :  { %v1408_v41 = vadd.f32 %v1372_v46, %v9028_v39  ;;  %v6904_v38 = vpop.f32.mrb[69].mxu1  ;;  %11161 = vst [vmem:[#allocation59_spill] sm:$0xff] %v9124_v18 }
 0x295   :  { %3861 = vperm.xlu1 %7469, %v8961_v9   ;;  %v1375_v26 = vpop.f32.mrb[70].mxu1  ;;  %v9119_v54 = vpop.permute.xlu1 %2806  ;;  %v7506_v9 = vld [vmem:[%s11033_s1 + $0x38] sm:$0xff] }
 0x296   :  { %11160 = vst [vmem:[#allocation58_spill] sm:$0xff] %v9119_v54  ;;  %v1409_v61 = vadd.f32 %v1375_v26, %v9032_v32  ;;  %v6905_v1 = vpop.f32.mrb[71].mxu1  ;;  %v1576_v37 = vpop.f32.mrb[92].mxu0 }
 0x297   :  { %v9122_v11 = vadd.f32 %v1576_v37, %v1406_v0  ;;  %v6930_v55 = vpop.f32.mrb[93].mxu0 }
 0x298   :  { %v1579_v56 = vpop.f32.mrb[94].mxu0 }
 0x299   :  { %v9126_v30 = vadd.f32 %v1579_v56, %v1407_v23  ;;  %7470 = vset.pattern.permute.xlu1 %v11134_v45  ;;  %v6931_v39 = vpop.f32.mrb[95].mxu0  ;;  %v9129_v46 = vpop.permute.xlu1 %2814 }
 0x29a   :  { %11162 = vst [vmem:[#allocation60_spill] sm:$0xff] %v9129_v46  ;;  %3645 = vperm.xlu1 %7470, %v7506_v9   ;;  %v9139_v56 = vpop.permute.xlu0 %2826 }
 0x29b   :  { %v1380_v32 = vpop.f32.mrb[72].mxu1  ;;  %11164 = vst [vmem:[#allocation62_spill] sm:$0xff] %v9139_v56 }
 0x29c   :  { %v1410_v0 = vadd.f32 %v1380_v32, %v9043_v5  ;;  %v6908_v38 = vpop.f32.mrb[73].mxu1 }
 0x29d   :  { %v1383_v26 = vpop.f32.mrb[74].mxu1  ;;  %v9135_v1 = vpop.permute.xlu1 %2822 }
 0x29e   :  { %11163 = vst [vmem:[#allocation61_spill] sm:$0xff] %v9135_v1  ;;  %v1411_v23 = vadd.f32 %v1383_v26, %v9053_v57  ;;  %7472 = vset.pattern.permute.xlu1 %v11135_v13  ;;  %v6909_v37 = vpop.f32.mrb[75].mxu1  ;;  %v1584_v55 = vpop.f32.mrb[96].mxu0 }
 0x29f   :  { %v9141_v39 = vadd.f32 %v1584_v55, %v1408_v41  ;;  %3869 = vperm.xlu1 %7472, %v7506_v9   ;;  %v6934_v18 = vpop.f32.mrb[97].mxu0  ;;  %v9150_v37 = vpop.permute.xlu0 %2834 }
 0x2a0   :  { %v1587_v46 = vpop.f32.mrb[98].mxu0  ;;  %11166 = vst [vmem:[#allocation64_spill] sm:$0xff] %v9150_v37 }
 0x2a1   :  { %v9143_v54 = vadd.f32 %v1587_v46, %v1409_v61  ;;  %v6935_v5 = vpop.f32.mrb[99].mxu0  ;;  %v9145_v32 = vpop.permute.xlu1 %2830 }
 0x2a2   :  { %11165 = vst [vmem:[#allocation63_spill] sm:$0xff] %v9145_v32 }
 0x2a3   :  { %7473 = vset.pattern.permute.xlu1 %v11134_v45  ;;  %v1388_v38 = vpop.f32.mrb[76].mxu1 }
 0x2a4   :  { %v1412_v57 = vadd.f32 %v1388_v38, %v9064_v34  ;;  %3649 = vperm.xlu1 %7473, %v8995_v51   ;;  %v6912_v26 = vpop.f32.mrb[77].mxu1 }
 0x2a5   :  { %v1391_v41 = vpop.f32.mrb[78].mxu1 }
 0x2a6   :  { %v1413_v9 = vadd.f32 %v1391_v41, %v9069_v52  ;;  %v6913_v18 = vpop.f32.mrb[79].mxu1  ;;  %v1592_v55 = vpop.f32.mrb[100].mxu0 }
 0x2a7   :  { %v9153_v61 = vadd.f32 %v1592_v55, %v1410_v0  ;;  %v6938_v46 = vpop.f32.mrb[101].mxu0  ;;  %v9155_v5 = vpop.permute.xlu1 %3169 }
 0x2a8   :  { %7475 = vset.pattern.permute.xlu1 %v11135_v13  ;;  %v1595_v56 = vpop.f32.mrb[102].mxu0  ;;  %v9164_v18 = vpop.permute.xlu0 %3173 }
 0x2a9   :  { %v9158_v32 = vadd.f32 %v1595_v56, %v1411_v23  ;;  %3873 = vperm.xlu1 %7475, %v8995_v51   ;;  %v6939_v34 = vpop.f32.mrb[103].mxu0 }
 0x2ab   :  { %v1396_v38 = vpop.f32.mrb[80].mxu1  ;;  %v9161_v26 = vpop.permute.xlu1 %3393 }
 0x2ac   :  { %v1414_v52 = vadd.f32 %v1396_v38, %v9078_v20  ;;  %v6916_v41 = vpop.f32.mrb[81].mxu1  ;;  %v7507_v20 = vld [vmem:[%s11033_s1 + $0x58] sm:$0xff]  ;;  %s7805_s1 = smov [#allocation2]  }
 0x2ad   :  { %3877 = vperm.xlu1 %7475, %v9015_v44   ;;  %v1399_v0 = vpop.f32.mrb[82].mxu1  ;;  %s128_s26 = sshll.u32 %s7805_s1, 4  ;;  %s9904_s26 = int_to_ptr.vmem [resolvable:$true] %s128_s26 }
 0x2ae   :  { %v6917_v55 = vpop.f32.mrb[83].mxu1  ;;  %v1600_v46 = vpop.f32.mrb[104].mxu0 }
 0x2af   :  { %v9167_v37 = vadd.f32 %v1600_v46, %v1412_v57  ;;  %v6942_v23 = vpop.f32.mrb[105].mxu0  ;;  %v9169_v56 = vpop.permute.xlu1 %3397 }
 0x2b0   :  { %v1603_v51 = vpop.f32.mrb[106].mxu0  ;;  %v9180_v0 = vpop.permute.xlu0 %3177 }
 0x2b1   :  { %v9171_v34 = vadd.f32 %v1603_v51, %v1413_v9  ;;  %7476 = vset.pattern.permute.xlu1 %v11134_v45  ;;  %v6943_v1 = vpop.f32.mrb[107].mxu0 }
 0x2b2   :  { %3661 = vperm.xlu1 %7476, %v7507_v20  }
 0x2b3   :  { %v1772_v44 = vpop.f32.mrb[84].mxu1 }
 0x2b4   :  { %v1826_v38 = vadd.f32 %v1772_v44, %v9093_v2  ;;  %v6952_v41 = vpop.f32.mrb[85].mxu1  ;;  %v9178_v57 = vpop.permute.xlu1 %3181 }
 0x2b5   :  { %v1775_v55 = vpop.f32.mrb[86].mxu1  ;;  %v9189_v44 = vpop.permute.xlu0 %3401 }
 0x2b6   :  { %v1827_v9 = vadd.f32 %v1775_v55, %v9095_v49  ;;  %7478 = vset.pattern.permute.xlu1 %v11135_v13  ;;  %v1608_v46 = vpop.f32.mrb[108].mxu0  ;;  %v6953_v1 = vpop.f32.mrb[87].mxu1  ;;  %11168 = vst [vmem:[#allocation66_spill] sm:$0xff] %v9189_v44 }
 0x2b7   :  { %v9184_v23 = vadd.f32 %v1608_v46, %v1414_v52  ;;  %3885 = vperm.xlu1 %7478, %v7507_v20   ;;  %v6946_v51 = vpop.f32.mrb[109].mxu0  ;;  %v9194_v20 = vld [vmem:[#allocation8] ss:$0 sm:$0xff] }
 0x2b8   :  { %v1611_v4 = vpop.f32.mrb[110].mxu0 }
 0x2b9   :  { %v6947_v36 = vpop.f32.mrb[111].mxu0  ;;  %v9186_v22 = vpop.permute.xlu1 %3405 }
 0x2ba   :  { %11167 = vst [vmem:[#allocation65_spill] sm:$0xff] %v9186_v22 }
 0x2bb   :  { %v1780_v2 = vpop.f32.mrb[88].mxu1  ;;  %7479 = vset.pattern.permute.xlu1 %v11134_v45 }
 0x2bc   :  { %v1828_v41 = vadd.f32 %v1780_v2, %v9107_v43  ;;  %v6956_v49 = vpop.f32.mrb[89].mxu1  ;;  %3665 = vperm.xlu1 %7479, %v9048_v8   ;;  %v9199_v43 = vpop.permute.xlu0 %3417 }
 0x2bd   :  { %v1783_v13 = vpop.f32.mrb[90].mxu1  ;;  %11169 = vst [vmem:[#allocation67_spill] sm:$0xff] %v9199_v43 }
 0x2be   :  { %v1829_v52 = vadd.f32 %v1783_v13, %v9110_v19  ;;  %v6957_v55 = vpop.f32.mrb[91].mxu1  ;;  %v1984_v4 = vpop.f32.mrb[112].mxu0 }
 0x2bf   :  { %v2038_v36 = vadd.f32 %v1984_v4, %v1826_v38  ;;  %v6982_v46 = vpop.f32.mrb[113].mxu0  ;;  %v9196_v1 = vpop.permute.xlu1 %3185 }
 0x2c0   :  { %v1987_v51 = vpop.f32.mrb[114].mxu0  ;;  %v9210_v48 = vpop.permute.xlu0 %3189 }
 0x2c1   :  { %v2057_v45 = vadd.f32 %v9194_v20, %v2038_v36  ;;  %v2039_v44 = vadd.f32 %v1987_v51, %v1827_v9  ;;  %v6983_v22 = vpop.f32.mrb[115].mxu0 }
 0x2c3   :  { %v2070_v2 = vmax.f32 %v2057_v45, 0.0  ;;  %v2058_v8 = vadd.f32 %v9194_v20, %v2039_v44  ;;  %v1788_v49 = vpop.f32.mrb[92].mxu1  ;;  %v9202_v19 = vpop.permute.xlu1 %3409  ;;  %v2101_v44 = vld [vmem:[#allocation5] sm:$0xff] }
 0x2c4   :  { %v1830_v13 = vadd.f32 %v1788_v49, %v9122_v11  ;;  %v6960_v55 = vpop.f32.mrb[93].mxu1 }
 0x2c5   :  { %2086 = vst.msk [vmem:[#allocation5 + $0x8] sm:$0xff] %vm2083_vm5, %v2070_v2  ;;  %v2071_v38 = vmax.f32 %v2058_v8, 0.0  ;;  %v1791_v4 = vpop.f32.mrb[94].mxu1  ;;  %v2192_v8 = vmul.f32 %v8931_v33, %v2101_v44  ;;  %v9224_v33 = vpop.permute.xlu0 %3193 }
 0x2c6   :  { %v1831_v46 = vadd.f32 %v1791_v4, %v9126_v30  ;;  %v6961_v36 = vpop.f32.mrb[95].mxu1  ;;  %v1992_v9 = vpop.f32.mrb[116].mxu0 }
 0x2c7   :  { %2087 = vst.msk [vmem:[#allocation5 + $0x10] sm:$0xff] %vm2083_vm5, %v2071_v38  ;;  %v2040_v22 = vadd.f32 %v1992_v9, %v1828_v41  ;;  %v6986_v51 = vpop.f32.mrb[117].mxu0  ;;  %v9208_v45 = vpop.permute.xlu1 %3413 }
 0x2c8   :  { %v1995_v43 = vpop.f32.mrb[118].mxu0 }
 0x2c9   :  { %v2059_v11 = vadd.f32 %v9194_v20, %v2040_v22  ;;  %v2041_v49 = vadd.f32 %v1995_v43, %v1829_v52  ;;  %v6987_v2 = vpop.f32.mrb[119].mxu0  ;;  %v7486_v43 = vld [vmem:[#allocation10 + $0x30] sm:$0xff]  }
 0x2cb   :  { %v2072_v55 = vmax.f32 %v2059_v11, 0.0  ;;  %v2060_v30 = vadd.f32 %v9194_v20, %v2041_v49 }
 0x2cc   :  { %v9215_v4 = vld [vmem:[#allocation5 + $0x8] sm:$0xff]  ;;  %v9217_v38 = vpop.permute.xlu1 %3197 }
 0x2cd   :  { %v2216_v41 = vld [vmem:[#allocation5 + $0x1] sm:$0xff]  ;;  %2088 = vst.msk [vmem:[#allocation5 + $0x18] sm:$0xff] %vm2083_vm5, %v2072_v55  ;;  %v2073_v36 = vmax.f32 %v2060_v30, 0.0  ;;  %v2193_v9 = vmul.f32 %v8942_v60, %v9215_v4 }
 0x2ce   :  { %v2000_v51 = vpop.f32.mrb[120].mxu0  ;;  %v2217_v22 = vld [vmem:[#allocation5 + $0x9] sm:$0xff]  ;;  %v2281_v2 = vmul.f32 %v8864_v14, %v2216_v41 }
 0x2cf   :  { %v9222_v52 = vld [vmem:[#allocation5 + $0x10] sm:$0xff]  ;;  %2089 = vst.msk [vmem:[#allocation5 + $0x20] sm:$0xff] %vm2083_vm5, %v2073_v36  ;;  %v2042_v44 = vadd.f32 %v2000_v51, %v1830_v13  ;;  %v6990_v11 = vpop.f32.mrb[121].mxu0  ;;  %v2205_v49 = vpack.c.bf16 %v2193_v9, %v2192_v8  ;;  %v2282_v55 = vmul.f32 %v8857_v3, %v2217_v22  ;;  %v11170_v3 = vmov 0.0   ;;  %v7487_v41 = vld [vmem:[#allocation10 + $0x38] sm:$0xff]  }
 0x2d0   :  { %v1796_v30 = vpop.f32.mrb[96].mxu1  ;;  %v2003_v6 = vpop.f32.mrb[122].mxu0  ;;  %v11182_v60 = vld [vmem:[#allocation39_spill] sm:$0xff] }
 0x2d1   :  { %v2061_v17 = vadd.f32 %v9194_v20, %v2042_v44  ;;  %v1832_v12 = vadd.f32 %v1796_v30, %v9141_v39  ;;  %v2043_v24 = vadd.f32 %v2003_v6, %v1831_v46  ;;  %v6964_v21 = vpop.f32.mrb[97].mxu1  ;;  %v6991_v36 = vpop.f32.mrb[123].mxu0  ;;  %7045 = vmatmul.mubr.msk.bf16.vlgmr.msra.gmra.mrb[140].mxu0 %vm2083_vm5, %v2205_v49  ;;  %v2294_v13 = vpack.c.bf16 %v2282_v55, %v2281_v2  ;;  %v7485_v46 = vld [vmem:[#allocation10 + $0x28] sm:$0xff]  }
 0x2d2   :  { %v1799_v8 = vpop.f32.mrb[98].mxu1  ;;  %v9234_v14 = vpop.permute.xlu1 %3421  ;;  %7048 = vmatprep.mubr.msk.bf16.mxu0 %vm7797_vm3, %v11170_v3  ;;  %7105 = vmatpush3.bf16.msra.mxu0 %v7486_v43 }
 0x2d3   :  { %v2074_v9 = vmax.f32 %v2061_v17, 0.0  ;;  %v2062_v51 = vadd.f32 %v9194_v20, %v2043_v24  ;;  %v1833_v44 = vadd.f32 %v1799_v8, %v9143_v54  ;;  %v6965_v39 = vpop.f32.mrb[99].mxu1  ;;  %7013 = vmatmul.mubr.msk.bf16.vlgmr.msra.gmra.mrb[112].mxu1 %vm2083_vm5, %v2294_v13  ;;  %7106 = vmatprep.subr.bf16.mxu0 %v11170_v3  ;;  %v2194_v24 = vmul.f32 %v8971_v63, %v9222_v52  ;;  %v9257_v55 = vpop.permute.xlu0 %3205  ;;  %v3379_v13 = vld [vmem:[#allocation5 + $0xe] sm:$0xff] }
 0x2d4   :  { %v9242_v21 = vld [vmem:[#allocation5 + $0x18] sm:$0xff]  ;;  %7016 = vmatprep.mubr.msk.bf16.mxu1 %vm7797_vm3, %v11170_v3  ;;  %7073 = vmatpush3.bf16.msra.mxu1 %v7484_v50 }
 0x2d5   :  { %v2218_v6 = vld [vmem:[#allocation5 + $0x11] sm:$0xff]  ;;  %2090 = vst.msk [vmem:[#allocation5 + $0x28] sm:$0xff] %vm2083_vm5, %v2074_v9  ;;  %v2075_v17 = vmax.f32 %v2062_v51, 0.0  ;;  %v2195_v54 = vmul.f32 %v8965_v31, %v9242_v21  ;;  %7074 = vmatprep.subr.bf16.mxu1 %v11170_v3  ;;  %v9262_v31 = vmul.f32 %v9155_v5, %v2217_v22 }
 0x2d6   :  { %v3380_v43 = vld [vmem:[#allocation5 + $0x16] sm:$0xff]  ;;  %v2008_v11 = vpop.f32.mrb[124].mxu0  ;;  %v9252_v49 = vpop.permute.xlu1 %3201  ;;  %7107 = vmatpush3.bf16.msra.mxu0 %v7487_v41  ;;  %v9255_v50 = vmul.f32 %v9164_v18, %v2218_v6  ;;  %v9264_v8 = vld [vmem:[#allocation5 + $0x20] sm:$0xff]  ;;  %v2283_v41 = vmul.f32 %v8875_v59, %v2218_v6  ;;  %v9279_v59 = vmul.f32 %v9161_v26, %v3379_v13 }
 0x2d7   :  { %v2219_v2 = vld [vmem:[#allocation5 + $0x19] sm:$0xff]  ;;  %2091 = vst.msk [vmem:[#allocation5 + $0x30] sm:$0xff] %vm2083_vm5, %v2075_v17  ;;  %v2044_v30 = vadd.f32 %v2008_v11, %v1832_v12  ;;  %v6994_v63 = vpop.f32.mrb[125].mxu0  ;;  %v2206_v36 = vpack.c.bf16 %v2195_v54, %v2194_v24  ;;  %7168 = vmatprep.subr.bf16.mxu0 %v11170_v3  ;;  %v9269_v51 = vmul.f32 %v9169_v56, %v3380_v43 }
 0x2d8   :  { %v2011_v9 = vpop.f32.mrb[126].mxu0  ;;  %v2284_v18 = vmul.f32 %v8887_v53, %v2219_v2  ;;  %7075 = vmatpush3.bf16.msra.mxu1 %v7485_v46  ;;  %v9292_v63 = vpop.permute.xlu0 %3209  ;;  %v11181_v54 = vld [vmem:[#allocation53_spill] sm:$0xff] }
 0x2d9   :  { %v2063_v12 = vadd.f32 %v9194_v20, %v2044_v30  ;;  %v2045_v39 = vadd.f32 %v2011_v9, %v1833_v44  ;;  %v6995_v17 = vpop.f32.mrb[127].mxu0  ;;  %7049 = vmatmul.mubr.msk.bf16.gmra.mrb[144].mxu0 %vm2083_vm5, %v2206_v36  ;;  %7136 = vmatprep.subr.bf16.mxu1 %v11170_v3  ;;  %v2196_v9 = vmul.f32 %v9264_v8, %v8984_v27 }
 0x2da   :  { %v1804_v22 = vpop.f32.mrb[100].mxu1  ;;  %v2295_v24 = vpack.c.bf16 %v2284_v18, %v2283_v41  ;;  %7052 = vmatprep.mubr.msk.bf16.mxu0 %vm7797_vm3, %v11170_v3 }
 0x2db   :  { %v2076_v53 = vmax.f32 %v2063_v12, 0.0  ;;  %v2064_v56 = vadd.f32 %v9194_v20, %v2045_v39  ;;  %v1834_v44 = vadd.f32 %v1804_v22, %v9153_v61  ;;  %v6968_v6 = vpop.f32.mrb[101].mxu1  ;;  %v9283_v46 = vpop.permute.xlu1 %3425  ;;  %v9305_v39 = vmul.f32 %v9180_v0, %v2219_v2 }
 0x2dc   :  { %7017 = vmatmul.mubr.msk.bf16.gmra.mrb[116].mxu1 %vm2083_vm5, %v2295_v24  ;;  %v1807_v43 = vpop.f32.mrb[102].mxu1  ;;  %v9288_v11 = vld [vmem:[#allocation5 + $0x28] sm:$0xff] }
 0x2dd   :  { %v2220_v30 = vld [vmem:[#allocation5 + $0x21] sm:$0xff]  ;;  %2092 = vst.msk [vmem:[#allocation5 + $0x38] sm:$0xff] %vm2083_vm5, %v2076_v53  ;;  %v2077_v61 = vmax.f32 %v2064_v56, 0.0  ;;  %v1835_v36 = vadd.f32 %v1807_v43, %v9158_v32  ;;  %v6969_v13 = vpop.f32.mrb[103].mxu1  ;;  %v2197_v41 = vmul.f32 %v8986_v28, %v9288_v11  ;;  %7020 = vmatprep.mubr.msk.bf16.mxu1 %vm7797_vm3, %v11170_v3 }
 0x2de   :  { %v2221_v18 = vld [vmem:[#allocation5 + $0x29] sm:$0xff]  ;;  %v9308_v17 = vmul.f32 %v9178_v57, %v2220_v30  ;;  %v2285_v27 = vmul.f32 %v8873_v10, %v2220_v30  ;;  %v9322_v57 = vpop.permute.xlu0 %3433 }
 0x2df   :  { %v9302_v12 = vld [vmem:[#allocation5 + $0x30] sm:$0xff]  ;;  %2093 = vst.msk [vmem:[#allocation5 + $0x40] sm:$0xff] %vm2083_vm5, %v2077_v61  ;;  %v2207_v32 = vpack.c.bf16 %v2197_v41, %v2196_v9  ;;  %v9311_v22 = vpop.permute.xlu1 %3429  ;;  %v2286_v28 = vmul.f32 %v8895_v25, %v2221_v18 }
 0x2e0   :  { %v2198_v61 = vmul.f32 %v9005_v47, %v9302_v12 }
 0x2e1   :  { %7053 = vmatmul.mubr.msk.bf16.gmra.mrb[148].mxu0 %vm2083_vm5, %v2207_v32  ;;  %v2296_v0 = vpack.c.bf16 %v2286_v28, %v2285_v27 }
 0x2e2   :  { %7056 = vmatprep.mubr.msk.bf16.mxu0 %vm7797_vm3, %v11170_v3 }
 0x2e3   :  { %v2016_v2 = vpop.f32.mrb[128].mxu0 }
 0x2e4   :  { %v2046_v56 = vadd.f32 %v2016_v2, %v1834_v44  ;;  %7021 = vmatmul.mubr.msk.bf16.gmra.mrb[120].mxu1 %vm2083_vm5, %v2296_v0  ;;  %v6998_v10 = vpop.f32.mrb[129].mxu0  ;;  %v9325_v25 = vpop.permute.xlu1 %3213  ;;  %v9327_v6 = vld [vmem:[#allocation5 + $0x38] sm:$0xff] }
 0x2e5   :  { %v2222_v43 = vld [vmem:[#allocation5 + $0x31] sm:$0xff]  ;;  %v2019_v30 = vpop.f32.mrb[130].mxu0  ;;  %v2199_v13 = vmul.f32 %v9020_v42, %v9327_v6  ;;  %7024 = vmatprep.mubr.msk.bf16.mxu1 %vm7797_vm3, %v11170_v3  ;;  %v9344_v42 = vmul.f32 %v9196_v1, %v2221_v18 }
 0x2e6   :  { %v2065_v44 = vadd.f32 %v9194_v20, %v2046_v56  ;;  %v2047_v9 = vadd.f32 %v2019_v30, %v1835_v36  ;;  %v6999_v41 = vpop.f32.mrb[131].mxu0  ;;  %v2223_v32 = vld [vmem:[#allocation5 + $0x39] sm:$0xff]  ;;  %v9337_v27 = vmul.f32 %v9210_v48, %v2222_v43  ;;  %v2287_v2 = vmul.f32 %v8889_v16, %v2222_v43  ;;  %v3383_v36 = vld [vmem:[#allocation5 + $0x2e] sm:$0xff] }
 0x2e7   :  { %v9339_v28 = vld [vmem:[#allocation5 + $0x40] sm:$0xff]  ;;  %v2208_v0 = vpack.c.bf16 %v2199_v13, %v2198_v61  ;;  %v2288_v47 = vmul.f32 %v8902_v15, %v2223_v32  ;;  %v3384_v30 = vld [vmem:[#allocation5 + $0x36] sm:$0xff]  ;;  %v9353_v15 = vpop.permute.xlu0 %3441 }
 0x2e8   :  { %v2078_v10 = vmax.f32 %v2065_v44, 0.0  ;;  %v2066_v26 = vadd.f32 %v9194_v20, %v2047_v9  ;;  %v1812_v56 = vpop.f32.mrb[104].mxu1  ;;  %11171 = vst [vmem:[#allocation68_spill] sm:$0xff] %v9353_v15  ;;  %v9362_v44 = vmul.f32 %v9202_v19, %v3383_v36  ;;  %v9365_v9 = vmul.f32 %v9208_v45, %v3384_v30 }
 0x2e9   :  { %v1836_v41 = vadd.f32 %v1812_v56, %v9167_v37  ;;  %v6972_v48 = vpop.f32.mrb[105].mxu1  ;;  %7057 = vmatmul.mubr.msk.bf16.gmra.mrb[152].mxu0 %vm2083_vm5, %v2208_v0  ;;  %v9349_v53 = vpop.permute.xlu1 %3437  ;;  %v2297_v61 = vpack.c.bf16 %v2288_v47, %v2287_v2  ;;  %v9373_v2 = vld [vmem:[#allocation5 + $0x17] sm:$0xff] }
 0x2ea   :  { %2094 = vst.msk [vmem:[#allocation5 + $0x48] sm:$0xff] %vm2083_vm5, %v2078_v10  ;;  %v2079_v1 = vmax.f32 %v2066_v26, 0.0  ;;  %v1815_v18 = vpop.f32.mrb[106].mxu1  ;;  %7060 = vmatprep.mubr.msk.bf16.mxu0 %vm7797_vm3, %v11170_v3 }
 0x2eb   :  { %v1837_v43 = vadd.f32 %v1815_v18, %v9171_v34  ;;  %v6973_v13 = vpop.f32.mrb[107].mxu1  ;;  %v3622_v45 = vpop.permute.xlu0 %3621 }
 0x2ec   :  { %2095 = vst.msk [vmem:[#allocation5 + $0x50] sm:$0xff] %vm2083_vm5, %v2079_v1  ;;  %7025 = vmatmul.mubr.msk.bf16.gmra.mrb[124].mxu1 %vm2083_vm5, %v2297_v61  ;;  %v9379_v48 = vmul.f32 %v3622_v45, %v9373_v2 }
 0x2ed   :  { %v2024_v26 = vpop.f32.mrb[132].mxu0  ;;  %7028 = vmatprep.mubr.msk.bf16.mxu1 %vm7797_vm3, %v11170_v3 }
 0x2ee   :  { %v2048_v34 = vadd.f32 %v2024_v26, %v1836_v41  ;;  %v7002_v47 = vpop.f32.mrb[133].mxu0  ;;  %v9375_v19 = vpop.permute.xlu1 %3217  ;;  %v2200_v41 = vmul.f32 %v9339_v28, %v9039_v35 }
 0x2ef   :  { %v2027_v10 = vpop.f32.mrb[134].mxu0  ;;  %v9389_v47 = vld [vmem:[#allocation5 + $0xf] sm:$0xff] }
 0x2f0   :  { %v2067_v56 = vadd.f32 %v9194_v20, %v2048_v34  ;;  %v2049_v36 = vadd.f32 %v2027_v10, %v1837_v43  ;;  %v7003_v30 = vpop.f32.mrb[135].mxu0 }
 0x2f1   :  { %v9381_v61 = vld [vmem:[#allocation5 + $0x48] sm:$0xff]  ;;  %v9393_v30 = vmul.f32 %v9224_v33, %v2223_v32 }
 0x2f2   :  { %v2224_v1 = vld [vmem:[#allocation5 + $0x41] sm:$0xff]  ;;  %v2080_v18 = vmax.f32 %v2067_v56, 0.0  ;;  %v2068_v13 = vadd.f32 %v9194_v20, %v2049_v36  ;;  %v1820_v0 = vpop.f32.mrb[108].mxu1  ;;  %v2201_v26 = vmul.f32 %v9036_v29, %v9381_v61  ;;  %v3607_v33 = vld [vmem:[#allocation5 + $0x2f] sm:$0xff] }
 0x2f3   :  { %v1838_v34 = vadd.f32 %v1820_v0, %v9184_v23  ;;  %v3618_v43 = vpop.permute.xlu1 %3617  ;;  %v2225_v10 = vld [vmem:[#allocation5 + $0x49] sm:$0xff]  ;;  %v2289_v45 = vmul.f32 %v8898_v62, %v2224_v1  ;;  %v9396_v56 = vmul.f32 %v9217_v38, %v2224_v1  ;;  %v6976_v36 = vpop.f32.mrb[109].mxu1  ;;  %v3605_v38 = vld [vmem:[#allocation5 + $0x1f] sm:$0xff] }
 0x2f4   :  { %2096 = vst.msk [vmem:[#allocation5 + $0x58] sm:$0xff] %vm2083_vm5, %v2080_v18  ;;  %v2081_v35 = vmax.f32 %v2068_v13, 0.0  ;;  %v9400_v29 = vmul.f32 %v3618_v43, %v9389_v47  ;;  %v2209_v23 = vpack.c.bf16 %v2201_v26, %v2200_v41  ;;  %v2290_v0 = vmul.f32 %v8913_v58, %v2225_v10  ;;  %v9403_v37 = vld [vmem:[#allocation5 + $0x50] sm:$0xff]  ;;  %v1823_v16 = vpop.f32.mrb[110].mxu1  ;;  %v3850_v36 = vpop.permute.xlu0 %3849 }
 0x2f5   :  { %v2032_v62 = vpop.f32.mrb[136].mxu0  ;;  %v6977_v32 = vpop.f32.mrb[111].mxu1 }
 0x2f6   :  { %2097 = vst.msk [vmem:[#allocation5 + $0x60] sm:$0xff] %vm2083_vm5, %v2081_v35  ;;  %v2050_v1 = vadd.f32 %v2032_v62, %v1838_v34  ;;  %v7006_v18 = vpop.f32.mrb[137].mxu0  ;;  %7061 = vmatmul.mubr.msk.bf16.gmra.mrb[156].mxu0 %vm2083_vm5, %v2209_v23  ;;  %v2298_v13 = vpack.c.bf16 %v2290_v0, %v2289_v45 }
 0x2f7   :  { %v2035_v41 = vpop.f32.mrb[138].mxu0  ;;  %7064 = vmatprep.mubr.msk.bf16.mxu0 %vm7797_vm3, %v11170_v3 }
 0x2f8   :  { %v2069_v16 = vadd.f32 %v9194_v20, %v2050_v1  ;;  %v3842_v26 = vpop.permute.xlu1 %3841  ;;  %v7007_v43 = vpop.f32.mrb[139].mxu0  ;;  %7029 = vmatmul.mubr.msk.bf16.gmra.mrb[128].mxu1 %vm2083_vm5, %v2298_v13  ;;  %v2202_v20 = vmul.f32 %v9051_v7, %v9403_v37  ;;  %v11174_v41 = vld [vmem:[#allocation35_spill] sm:$0xff] }
 0x2f9   :  { %v9418_v34 = vmul.f32 %v3842_v26, %v9222_v52  ;;  %7032 = vmatprep.mubr.msk.bf16.mxu1 %vm7797_vm3, %v11170_v3  ;;  %v11175_v26 = vld [vmem:[#allocation36_spill] sm:$0xff]  ;;  %v3626_v7 = vpop.permute.xlu0 %3625 }
 0x2fa   :  { %v2082_v45 = vmax.f32 %v2069_v16, 0.0 }
 0x2fb   :  { %11172 = vst [vmem:[#allocation69_spill] sm:$0xff] %v9418_v34  ;;  %v9422_v35 = vld [vmem:[#allocation5 + $0x58] sm:$0xff]  ;;  %v7488_v34 = vld [vmem:[#allocation10 + $0x40] sm:$0xff]  }
 0x2fc   :  { %v2226_v23 = vld [vmem:[#allocation5 + $0x51] sm:$0xff]  ;;  %2099 = vst.msk [vmem:[#allocation5 + $0x68] sm:$0x3] %vm2098_vm6, %v2082_v45  ;;  %v3846_v0 = vpop.permute.xlu1 %3845  ;;  %v2203_v62 = vmul.f32 %v9071_v40, %v9422_v35  ;;  %v9440_v45 = vmul.f32 %v9252_v49, %v2225_v10  ;;  %v9451_v10 = vmul.f32 %v3626_v7, %v3605_v38  ;;  %v9464_v7 = vmul.f32 %v3850_v36, %v9264_v8 }
 0x2fd   :  { %v9429_v32 = vmul.f32 %v3846_v0, %v9242_v21  ;;  %v9431_v1 = vld [vmem:[#allocation5 + $0x59] sm:$0xff]  ;;  %v9434_v18 = vmul.f32 %v9257_v55, %v2226_v23  ;;  %v2291_v16 = vmul.f32 %v11174_v41, %v2226_v23  ;;  %v9447_v23 = vld [vmem:[#allocation5 + $0x27] sm:$0xff]  ;;  %v2228_v49 = vld [vmem:[#allocation5 + $0x61] sm:$0x3] }
 0x2fe   :  { %v2210_v13 = vpack.c.bf16 %v2203_v62, %v2202_v20  ;;  %v2292_v43 = vmul.f32 %v11175_v26, %v9431_v1  ;;  %v2113_v0 = vld [vmem:[#allocation5 + $0x60] sm:$0x3]  ;;  %v11176_v41 = vld [vmem:[#allocation51_spill] sm:$0xff]  ;;  %v11177_v26 = vld [vmem:[#allocation37_spill] sm:$0xff]  ;;  %11178 = vst [vmem:[#allocation35_spill] sm:$0xff] %v9464_v7 }
 0x2ff   :  { %11173 = vst [vmem:[#allocation70_spill] sm:$0xff] %v9429_v32  ;;  %v11180_v36 = vld [vmem:[#allocation52_spill] sm:$0xff]  ;;  %v11183_v7 = vld [vmem:[#allocation38_spill] sm:$0xff] }
 0x300   :  { %7065 = vmatmul.mubr.msk.bf16.gmra.mrb[160].mxu0 %vm2083_vm5, %v2210_v13  ;;  %v2299_v58 = vpack.c.bf16 %v2292_v43, %v2291_v16  ;;  %v2204_v13 = vmul.f32 %v11176_v41, %v2113_v0  ;;  %v2293_v43 = vmul.f32 %v11177_v26, %v2228_v49  ;;  %v9470_v0 = vld [vmem:[#allocation5 + $0x37] sm:$0xff]  ;;  %v2772_v49 = vld [vmem:[#allocation5 + $0x7] sm:$0xff] }
 0x301   :  { %v3630_v20 = vpop.permute.xlu1 %3629  ;;  %7068 = vmatprep.mubr.msk.bf16.mxu0 %vm7797_vm3, %v11170_v3  ;;  %v2549_v26 = vld [vmem:[#allocation5 + $0xa] sm:$0xff]  ;;  %v2837_v24 = vmul.f32 %v11181_v54, %v2772_v49 }
 0x302   :  { %v9454_v62 = vmul.f32 %v3630_v20, %v9447_v23  ;;  %7033 = vmatmul.mubr.msk.bf16.gmra.mrb[132].mxu1 %vm2083_vm5, %v2299_v58  ;;  %v2211_v55 = vpack.c.bf16 %v2204_v13, %v2204_v13  ;;  %v2300_v58 = vpack.c.bf16 %v2293_v43, %v2293_v43  ;;  %v2838_v13 = vmul.f32 %v9389_v47, %v11180_v36  ;;  %v7491_v54 = vld [vmem:[#allocation10 + $0x58] sm:$0xff]   ;;  %v11193_v47 = vld [vmem:[#allocation42_spill] sm:$0xff] }
 0x303   :  { %7036 = vmatprep.mubr.msk.bf16.mxu1 %vm7797_vm3, %v11170_v3  ;;  %v2614_v5 = vmul.f32 %v11182_v60, %v2549_v26  ;;  %v11184_v60 = vld [vmem:[#allocation56_spill] sm:$0xff] }
 0x304   :  { %v2850_v36 = vpack.c.bf16 %v2838_v13, %v2837_v24  ;;  %v2840_v49 = vmul.f32 %v3605_v38, %v11184_v60  ;;  %v2550_v24 = vld [vmem:[#allocation5 + $0x12] sm:$0xff]  ;;  %v3609_v60 = vld [vmem:[#allocation5 + $0x3f] sm:$0xff] }
 0x305   :  { %v11186_v13 = vld [vmem:[#allocation41_spill] sm:$0xff] }
 0x306   :  { %v3854_v40 = vpop.permute.xlu1 %3853 }
 0x307   :  { %v9467_v20 = vmul.f32 %v3854_v40, %v9288_v11  ;;  %v3638_v40 = vpop.permute.xlu0 %3637 }
 0x308   :  { %7069 = vmatmul.mubr.msk.bf16.gmra.mrb[164].mxu0 %vm2083_vm5, %v2211_v55  ;;  %v2548_v55 = vld [vmem:[#allocation5 + $0x2] sm:$0xff]  ;;  %v9482_v43 = vmul.f32 %v3638_v40, %v9470_v0 }
 0x309   :  { %11179 = vst [vmem:[#allocation36_spill] sm:$0xff] %v9467_v20  ;;  %7108 = vmatprep.mubr.msk.bf16.mxu0 %vm7797_vm3, %v11170_v3  ;;  %v2613_v20 = vmul.f32 %v11183_v7, %v2548_v55  ;;  %v7489_v7 = vld [vmem:[#allocation10 + $0x48] sm:$0xff]  }
 0x30a   :  { %7037 = vmatmul.mubr.msk.bf16.gmra.mrb[136].mxu1 %vm2083_vm5, %v2300_v58  ;;  %v7490_v58 = vld [vmem:[#allocation10 + $0x50] sm:$0xff]  }
 0x30b   :  { %v3634_v16 = vpop.permute.xlu1 %3633  ;;  %7076 = vmatprep.mubr.msk.bf16.mxu1 %vm7797_vm3, %v11170_v3  ;;  %v2626_v15 = vpack.c.bf16 %v2614_v5, %v2613_v20  ;;  %v11185_v5 = vld [vmem:[#allocation55_spill] sm:$0xff] }
 0x30c   :  { %v9484_v41 = vmul.f32 %v3634_v16, %v3607_v33  ;;  %v2551_v16 = vld [vmem:[#allocation5 + $0x1a] sm:$0xff]  ;;  %v2839_v20 = vmul.f32 %v9373_v2, %v11185_v5 }
 0x30d   :  { %v2616_v40 = vmul.f32 %v11186_v13, %v2551_v16  ;;  %v11190_v5 = vld [vmem:[#allocation58_spill] sm:$0xff] }
 0x30e   :  { %v2851_v55 = vpack.c.bf16 %v2840_v49, %v2839_v20  ;;  %v2842_v20 = vmul.f32 %v3607_v33, %v11190_v5 }
 0x310   :  { %v3858_v32 = vpop.permute.xlu1 %3857  ;;  %7109 = vmatmul.mubr.msk.bf16.vlgmr.msra.gmra.mrb[168].mxu0 %vm2083_vm5, %v2850_v36 }
 0x311   :  { %7112 = vmatprep.mubr.msk.bf16.mxu0 %vm7797_vm3, %v11170_v3  ;;  %7169 = vmatpush3.bf16.msra.mxu0 %v7490_v58  ;;  %v11189_v58 = vld [vmem:[#allocation40_spill] sm:$0xff] }
 0x312   :  { %7077 = vmatmul.mubr.msk.bf16.vlgmr.msra.gmra.mrb[140].mxu1 %vm2083_vm5, %v2626_v15  ;;  %7170 = vmatprep.subr.bf16.mxu0 %v11170_v3  ;;  %v9504_v15 = vmul.f32 %v3858_v32, %v9302_v12  ;;  %v2615_v36 = vmul.f32 %v11189_v58, %v2550_v24 }
 0x313   :  { %7137 = vmatpush3.bf16.msra.mxu1 %v7488_v34  ;;  %7080 = vmatprep.mubr.msk.bf16.mxu1 %vm7797_vm3, %v11170_v3  ;;  %v3642_v34 = vpop.permute.xlu0 %3641 }
 0x314   :  { %v3862_v26 = vpop.permute.xlu1 %3861  ;;  %7138 = vmatprep.subr.bf16.mxu1 %v11170_v3  ;;  %11187 = vst [vmem:[#allocation51_spill] sm:$0xff] %v9504_v15  ;;  %v2627_v16 = vpack.c.bf16 %v2616_v40, %v2615_v36  ;;  %v9517_v49 = vmul.f32 %v3642_v34, %v3609_v60  ;;  %v11192_v36 = vld [vmem:[#allocation43_spill] sm:$0xff] }
 0x315   :  { %v9507_v38 = vmul.f32 %v3862_v26, %v9327_v6  ;;  %7171 = vmatpush3.bf16.msra.mxu0 %v7491_v54  ;;  %v3610_v26 = vld [vmem:[#allocation5 + $0x47] sm:$0xff] }
 0x316   :  { %7232 = vmatprep.subr.bf16.mxu0 %v11170_v3  ;;  %v2553_v54 = vld [vmem:[#allocation5 + $0x2a] sm:$0xff] }
 0x317   :  { %11188 = vst [vmem:[#allocation37_spill] sm:$0xff] %v9507_v38  ;;  %7139 = vmatpush3.bf16.msra.mxu1 %v7489_v7  ;;  %v2552_v7 = vld [vmem:[#allocation5 + $0x22] sm:$0xff]  ;;  %v3866_v13 = vpop.permute.xlu0 %3865  ;;  %v2618_v34 = vmul.f32 %v11192_v36, %v2553_v54  ;;  %v3612_v38 = vld [vmem:[#allocation5 + $0x57] sm:$0xff] }
 0x318   :  { %7113 = vmatmul.mubr.msk.bf16.gmra.mrb[172].mxu0 %vm2083_vm5, %v2851_v55  ;;  %7200 = vmatprep.subr.bf16.mxu1 %v11170_v3  ;;  %v11191_v55 = vld [vmem:[#allocation54_spill] sm:$0xff]  ;;  %v2617_v15 = vmul.f32 %v11193_v47, %v2552_v7  ;;  %v11196_v47 = vld [vmem:[#allocation60_spill] sm:$0xff] }
 0x319   :  { %v3646_v32 = vpop.permute.xlu1 %3645  ;;  %7116 = vmatprep.mubr.msk.bf16.mxu0 %vm7797_vm3, %v11170_v3  ;;  %v2841_v58 = vmul.f32 %v9447_v23, %v11191_v55  ;;  %v2555_v23 = vld [vmem:[#allocation5 + $0x3a] sm:$0xff]  ;;  %v2844_v54 = vmul.f32 %v3609_v60, %v11196_v47  ;;  %v11199_v47 = vld [vmem:[#allocation44_spill] sm:$0xff] }
 0x31a   :  { %v9519_v24 = vmul.f32 %v3646_v32, %v3610_v26  ;;  %7081 = vmatmul.mubr.msk.bf16.gmra.mrb[144].mxu1 %vm2083_vm5, %v2627_v16  ;;  %v9532_v16 = vmul.f32 %v3866_v13, %v9339_v28  ;;  %v2628_v5 = vpack.c.bf16 %v2618_v34, %v2617_v15  ;;  %v3611_v13 = vld [vmem:[#allocation5 + $0x4f] sm:$0xff] }
 0x31b   :  { %7084 = vmatprep.mubr.msk.bf16.mxu1 %vm7797_vm3, %v11170_v3  ;;  %v2852_v32 = vpack.c.bf16 %v2842_v20, %v2841_v58  ;;  %v3654_v20 = vpop.permute.xlu0 %3653  ;;  %v11197_v58 = vld [vmem:[#allocation57_spill] sm:$0xff] }
 0x31c   :  { %11194 = vst [vmem:[#allocation52_spill] sm:$0xff] %v9532_v16  ;;  %v9546_v15 = vmul.f32 %v3654_v20, %v3612_v38  ;;  %v2843_v36 = vmul.f32 %v9470_v0, %v11197_v58  ;;  %v11198_v34 = vld [vmem:[#allocation45_spill] sm:$0xff]  ;;  %v2557_v20 = vld [vmem:[#allocation5 + $0x4a] sm:$0xff] }
 0x31e   :  { %v3870_v2 = vpop.permute.xlu1 %3869  ;;  %v2853_v60 = vpack.c.bf16 %v2844_v54, %v2843_v36  ;;  %v11201_v54 = vld [vmem:[#allocation59_spill] sm:$0xff] }
 0x31f   :  { %v9535_v33 = vmul.f32 %v3870_v2, %v9381_v61  ;;  %v2554_v2 = vld [vmem:[#allocation5 + $0x32] sm:$0xff]  ;;  %v2845_v36 = vmul.f32 %v3610_v26, %v11201_v54  ;;  %v2559_v26 = vld [vmem:[#allocation5 + $0x5a] sm:$0xff] }
 0x320   :  { %7117 = vmatmul.mubr.msk.bf16.gmra.mrb[176].mxu0 %vm2083_vm5, %v2852_v32  ;;  %v2620_v32 = vmul.f32 %v11198_v34, %v2555_v23  ;;  %v2619_v40 = vmul.f32 %v11199_v47, %v2554_v2  ;;  %v2556_v23 = vld [vmem:[#allocation5 + $0x42] sm:$0xff]  ;;  %v11203_v47 = vld [vmem:[#allocation46_spill] sm:$0xff] }
 0x321   :  { %11195 = vst [vmem:[#allocation53_spill] sm:$0xff] %v9535_v33  ;;  %7120 = vmatprep.mubr.msk.bf16.mxu0 %vm7797_vm3, %v11170_v3  ;;  %v11202_v2 = vld [vmem:[#allocation47_spill] sm:$0xff]  ;;  %v11206_v54 = vld [vmem:[#allocation50_spill] sm:$0xff] }
 0x322   :  { %7085 = vmatmul.mubr.msk.bf16.gmra.mrb[148].mxu1 %vm2083_vm5, %v2628_v5  ;;  %v2629_v33 = vpack.c.bf16 %v2620_v32, %v2619_v40  ;;  %v2622_v34 = vmul.f32 %v11202_v2, %v2557_v20  ;;  %v9572_v5 = vld [vmem:[#allocation5 + $0x5f] sm:$0xff] }
 0x323   :  { %v3650_v7 = vpop.permute.xlu1 %3649  ;;  %7088 = vmatprep.mubr.msk.bf16.mxu1 %vm7797_vm3, %v11170_v3 }
 0x324   :  { %v9548_v55 = vmul.f32 %v3650_v7, %v3611_v13  ;;  %v11200_v7 = vld [vmem:[#allocation61_spill] sm:$0xff] }
 0x325   :  { %v2846_v0 = vmul.f32 %v3611_v13, %v11200_v7 }
 0x327   :  { %v2854_v32 = vpack.c.bf16 %v2846_v0, %v2845_v36  ;;  %v2558_v0 = vld [vmem:[#allocation5 + $0x52] sm:$0xff]  ;;  %v2624_v36 = vmul.f32 %v11206_v54, %v2559_v26  ;;  %v11210_v54 = vpack.c.bf16 %v9255_v50, %v9262_v31  ;;  %v11212_v50 = vpack.c.bf16 %v9308_v17, %v9305_v39 }
 0x328   :  { %v3874_v16 = vpop.permute.xlu1 %3873  ;;  %7121 = vmatmul.mubr.msk.bf16.gmra.mrb[180].mxu0 %vm2083_vm5, %v2853_v60  ;;  %v11215_v31 = vpack.c.bf16 %v9302_v12, %v9288_v11  ;;  %v3166_v11 = vld [vmem:[#allocation5 + $0x61] sm:$0xff]  ;;  %v11218_v12 = vpack.c.bf16 %v9434_v18, %v9440_v45  ;;  %v11219_v39 = vpack.c.bf16 %v9403_v37, %v9381_v61  ;;  %v7497_v45 = vld [vmem:[#allocation10 + $0x88] sm:$0xff]  }
 0x329   :  { %7124 = vmatprep.mubr.msk.bf16.mxu0 %vm7797_vm3, %v11170_v3  ;;  %v9566_v60 = vmul.f32 %v3874_v16, %v9403_v37  ;;  %v11204_v16 = vld [vmem:[#allocation63_spill] sm:$0xff]  ;;  %v3231_v17 = vmul.f32 %v9325_v25, %v3166_v11 }
 0x32a   :  { %7089 = vmatmul.mubr.msk.bf16.gmra.mrb[152].mxu1 %vm2083_vm5, %v2629_v33  ;;  %v2621_v33 = vmul.f32 %v11203_v47, %v2556_v23  ;;  %v2848_v20 = vmul.f32 %v9572_v5, %v11204_v16  ;;  %v11205_v23 = vld [vmem:[#allocation62_spill] sm:$0xff]  ;;  %v2784_v47 = vld [vmem:[#allocation5 + $0x67] sm:$0x3]  ;;  %v11208_v16 = vld [vmem:[#allocation64_spill] sm:$0xff] }
 0x32b   :  { %7092 = vmatprep.mubr.msk.bf16.mxu1 %vm7797_vm3, %v11170_v3  ;;  %v2849_v13 = vmul.f32 %v11208_v16, %v2784_v47  ;;  %v3381_v18 = vld [vmem:[#allocation5 + $0x1e] sm:$0xff]  ;;  %v11224_v47 = vpack.c.bf16 %v9454_v62, %v9451_v10  ;;  %v3386_v10 = vld [vmem:[#allocation5 + $0x46] sm:$0xff]  ;;  %v11226_v62 = vpack.c.bf16 %v9365_v9, %v9362_v44  ;;  %v3388_v44 = vld [vmem:[#allocation5 + $0x56] sm:$0xff] }
 0x32c   :  { %v3878_v58 = vpop.permute.xlu1 %3877  ;;  %v2630_v7 = vpack.c.bf16 %v2622_v34, %v2621_v33  ;;  %v11227_v16 = vld [vmem:[#allocation67_spill] sm:$0xff] }
 0x32d   :  { %v9569_v40 = vmul.f32 %v3878_v58, %v9422_v35  ;;  %v2847_v58 = vmul.f32 %v3612_v38, %v11205_v23  ;;  %v11209_v38 = vld [vmem:[#allocation49_spill] sm:$0xff]  ;;  %v7494_v23 = vld [vmem:[#allocation10 + $0x70] sm:$0xff]  }
 0x32f   :  { %v2855_v2 = vpack.c.bf16 %v2848_v20, %v2847_v58  ;;  %v2856_v20 = vpack.c.bf16 %v2849_v13, %v2849_v13  ;;  %v7492_v58 = vld [vmem:[#allocation10 + $0x60] sm:$0xff]   ;;  %v7495_v13 = vld [vmem:[#allocation10 + $0x78] sm:$0xff]  }
 0x330   :  { %7125 = vmatmul.mubr.msk.bf16.gmra.mrb[184].mxu0 %vm2083_vm5, %v2854_v32  ;;  %v11207_v32 = vld [vmem:[#allocation48_spill] sm:$0xff] }
 0x331   :  { %7128 = vmatprep.mubr.msk.bf16.mxu0 %vm7797_vm3, %v11170_v3  ;;  %v2623_v34 = vmul.f32 %v11207_v32, %v2558_v0  ;;  %v11222_v32 = vld [vmem:[#allocation65_spill] sm:$0xff]  ;;  %v3662_v9 = vpop.permute.xlu1 %3661 }
 0x332   :  { %7093 = vmatmul.mubr.msk.bf16.gmra.mrb[156].mxu1 %vm2083_vm5, %v2630_v7  ;;  %v2560_v7 = vld [vmem:[#allocation5 + $0x62] sm:$0x3] }
 0x333   :  { %7096 = vmatprep.mubr.msk.bf16.mxu1 %vm7797_vm3, %v11170_v3  ;;  %v2631_v33 = vpack.c.bf16 %v2624_v36, %v2623_v34  ;;  %v2625_v26 = vmul.f32 %v11209_v38, %v2560_v7  ;;  %v11211_v36 = vpack.c.bf16 %v9222_v52, %v9215_v4  ;;  %v11213_v4 = vpack.c.bf16 %v9264_v8, %v9242_v21 }
 0x334   :  { %v11214_v52 = vpack.c.bf16 %v9337_v27, %v9344_v42  ;;  %v11216_v21 = vpack.c.bf16 %v9396_v56, %v9393_v30  ;;  %v11217_v8 = vpack.c.bf16 %v9339_v28, %v9327_v6  ;;  %v3230_v6 = vmul.f32 %v9292_v63, %v9431_v1  ;;  %v9667_v27 = vld [vmem:[#allocation5 + $0x60] sm:$0xff]  ;;  %v3167_v42 = vld [vmem:[#allocation5 + $0x69] sm:$0x3]  ;;  %v7496_v56 = vld [vmem:[#allocation10 + $0x80] sm:$0xff]  }
 0x335   :  { %v2632_v0 = vpack.c.bf16 %v2625_v26, %v2625_v26  ;;  %v3014_v30 = vpack.c.bf16 %v9667_v27, %v9422_v35  ;;  %v3232_v25 = vmul.f32 %v9375_v19, %v3167_v42  ;;  %v3008_v63 = vld [vmem:[#allocation5 + $0x68] sm:$0x3]  ;;  %v11220_v19 = vpack.c.bf16 %v9379_v48, %v9400_v29  ;;  %v11223_v48 = vld [vmem:[#allocation66_spill] sm:$0xff]  ;;  %v3387_v26 = vld [vmem:[#allocation5 + $0x4e] sm:$0xff] }
 0x336   :  { %v3238_v28 = vpack.c.bf16 %v3231_v17, %v3230_v6  ;;  %v3015_v61 = vpack.c.bf16 %v3008_v63, %v3008_v63  ;;  %v3382_v35 = vld [vmem:[#allocation5 + $0x26] sm:$0xff]  ;;  %v11221_v1 = vpack.c.bf16 %v9269_v51, %v9279_v59  ;;  %v3446_v29 = vmul.f32 %v11223_v48, %v3381_v18  ;;  %v3391_v6 = vld [vmem:[#allocation5 + $0x6e] sm:$0x3] }
 0x337   :  { %v3239_v37 = vpack.c.bf16 %v3232_v25, %v3232_v25  ;;  %v3447_v34 = vmul.f32 %v11222_v32, %v3382_v35  ;;  %v11225_v59 = vpack.c.bf16 %v9482_v43, %v9484_v41  ;;  %v3451_v7 = vmul.f32 %v9234_v14, %v3386_v10 }
 0x338   :  { %7129 = vmatmul.mubr.msk.bf16.gmra.mrb[188].mxu0 %vm2083_vm5, %v2855_v2  ;;  %v7493_v2 = vld [vmem:[#allocation10 + $0x68] sm:$0xff]   ;;  %v11228_v41 = vpack.c.bf16 %v9519_v24, %v9517_v49  ;;  %v3453_v14 = vmul.f32 %v9311_v22, %v3388_v44  ;;  %v11229_v49 = vpack.c.bf16 %v9546_v15, %v9548_v55 }
 0x339   :  { %7132 = vmatprep.mubr.msk.bf16.mxu0 %vm7797_vm3, %v11170_v3  ;;  %v3458_v51 = vpack.c.bf16 %v3447_v34, %v3446_v29 }
 0x33a   :  { %7097 = vmatmul.mubr.msk.bf16.gmra.mrb[160].mxu1 %vm2083_vm5, %v2631_v33  ;;  %v3385_v33 = vld [vmem:[#allocation5 + $0x3e] sm:$0xff] }
 0x33b   :  { %7100 = vmatprep.mubr.msk.bf16.mxu1 %vm7797_vm3, %v11170_v3  ;;  %v3450_v38 = vmul.f32 %v11227_v16, %v3385_v33  ;;  %v11231_v16 = vld [vmem:[#allocation70_spill] sm:$0xff] }
 0x33d   :  { %v3460_v43 = vpack.c.bf16 %v3451_v7, %v3450_v38  ;;  %v11232_v38 = vld [vmem:[#allocation69_spill] sm:$0xff] }
 0x340   :  { %7133 = vmatmul.mubr.msk.bf16.gmra.mrb[192].mxu0 %vm2083_vm5, %v2856_v20  ;;  %v3452_v20 = vmul.f32 %v9283_v46, %v3387_v26  ;;  %v3389_v46 = vld [vmem:[#allocation5 + $0x5e] sm:$0xff] }
 0x341   :  { %7172 = vmatprep.mubr.msk.bf16.mxu0 %vm7797_vm3, %v11170_v3 }
 0x342   :  { %7101 = vmatmul.mubr.msk.bf16.gmra.mrb[164].mxu1 %vm2083_vm5, %v2632_v0  ;;  %v3461_v24 = vpack.c.bf16 %v3453_v14, %v3452_v20  ;;  %v3614_v0 = vld [vmem:[#allocation5 + $0x67] sm:$0xff] }
 0x343   :  { %7140 = vmatprep.mubr.msk.bf16.mxu1 %vm7797_vm3, %v11170_v3 }
 0x348   :  { %7173 = vmatmul.mubr.msk.bf16.vlgmr.msra.gmra.mrb[196].mxu0 %vm2083_vm5, %v11210_v54  ;;  %v3679_v54 = vmul.f32 %v3662_v9, %v3614_v0 }
 0x349   :  { %7176 = vmatprep.mubr.msk.bf16.mxu0 %vm7797_vm3, %v11170_v3  ;;  %7233 = vmatpush3.bf16.msra.mxu0 %v7494_v23  ;;  %v9737_v23 = vpop.permute.xlu1 %3885 }
 0x34a   :  { %7141 = vmatmul.mubr.msk.bf16.vlgmr.msra.gmra.mrb[168].mxu1 %vm2083_vm5, %v11211_v36  ;;  %7234 = vmatprep.subr.bf16.mxu0 %v11170_v3 }
 0x34b   :  { %7201 = vmatpush3.bf16.msra.mxu1 %v7492_v58  ;;  %7144 = vmatprep.mubr.msk.bf16.mxu1 %vm7797_vm3, %v11170_v3  ;;  %v3390_v58 = vld [vmem:[#allocation5 + $0x66] sm:$0xff] }
 0x34c   :  { %7202 = vmatprep.subr.bf16.mxu1 %v11170_v3  ;;  %v3455_v55 = vmul.f32 %v9349_v53, %v3390_v58 }
 0x34d   :  { %7235 = vmatpush3.bf16.msra.mxu0 %v7495_v13  ;;  %v3658_v13 = vpop.permute.xlu0 %3657 }
 0x34e   :  { %v3678_v22 = vmul.f32 %v3658_v13, %v9572_v5  ;;  %v11235_v13 = vld [vmem:[#allocation35_spill] sm:$0xff] }
 0x34f   :  { %7203 = vmatpush3.bf16.msra.mxu1 %v7493_v2  ;;  %v3615_v2 = vld [vmem:[#allocation5 + $0x6f] sm:$0x3] }
 0x350   :  { %7177 = vmatmul.mubr.msk.bf16.gmra.mrb[200].mxu0 %vm2083_vm5, %v11212_v50  ;;  %7264 = vmatprep.subr.bf16.mxu1 %v11170_v3  ;;  %v3666_v50 = vpop.permute.xlu1 %3665 }
 0x351   :  { %7180 = vmatprep.mubr.msk.bf16.mxu0 %vm7797_vm3, %v11170_v3  ;;  %v3680_v5 = vmul.f32 %v3666_v50, %v3615_v2 }
 0x352   :  { %7145 = vmatmul.mubr.msk.bf16.gmra.mrb[172].mxu1 %vm2083_vm5, %v11213_v4  ;;  %v3686_v4 = vpack.c.bf16 %v3679_v54, %v3678_v22  ;;  %v11234_v54 = vld [vmem:[#allocation36_spill] sm:$0xff] }
 0x353   :  { %7148 = vmatprep.mubr.msk.bf16.mxu1 %vm7797_vm3, %v11170_v3  ;;  %v3687_v25 = vpack.c.bf16 %v3680_v5, %v3680_v5  ;;  %v11241_v5 = vld [vmem:[#allocation52_spill] sm:$0xff] }
 0x358   :  { %7181 = vmatmul.mubr.msk.bf16.gmra.mrb[204].mxu0 %vm2083_vm5, %v11214_v52 }
 0x359   :  { %7184 = vmatprep.mubr.msk.bf16.mxu0 %vm7797_vm3, %v11170_v3 }
 0x35a   :  { %7149 = vmatmul.mubr.msk.bf16.gmra.mrb[176].mxu1 %vm2083_vm5, %v11215_v31 }
 0x35b   :  { %7152 = vmatprep.mubr.msk.bf16.mxu1 %vm7797_vm3, %v11170_v3 }
 0x360   :  { %7185 = vmatmul.mubr.msk.bf16.gmra.mrb[208].mxu0 %vm2083_vm5, %v11216_v21  ;;  %v3454_v21 = vmul.f32 %v9322_v57, %v3389_v46  ;;  %v11230_v57 = vld [vmem:[#allocation68_spill] sm:$0xff]  ;;  %v11236_v46 = vpack.c.bf16 %v11234_v54, %v11235_v13 }
 0x361   :  { %7188 = vmatprep.mubr.msk.bf16.mxu0 %vm7797_vm3, %v11170_v3  ;;  %v3456_v42 = vmul.f32 %v11230_v57, %v3391_v6 }
 0x362   :  { %7153 = vmatmul.mubr.msk.bf16.gmra.mrb[180].mxu1 %vm2083_vm5, %v11217_v8  ;;  %v3462_v17 = vpack.c.bf16 %v3455_v55, %v3454_v21  ;;  %v11237_v55 = vld [vmem:[#allocation37_spill] sm:$0xff] }
 0x363   :  { %7156 = vmatprep.mubr.msk.bf16.mxu1 %vm7797_vm3, %v11170_v3 }
 0x368   :  { %7189 = vmatmul.mubr.msk.bf16.gmra.mrb[212].mxu0 %vm2083_vm5, %v11218_v12 }
 0x369   :  { %7192 = vmatprep.mubr.msk.bf16.mxu0 %vm7797_vm3, %v11170_v3 }
 0x36a   :  { %7157 = vmatmul.mubr.msk.bf16.gmra.mrb[184].mxu1 %vm2083_vm5, %v11219_v39 }
 0x36b   :  { %7160 = vmatprep.mubr.msk.bf16.mxu1 %vm7797_vm3, %v11170_v3 }
 0x370   :  { %7193 = vmatmul.mubr.msk.bf16.gmra.mrb[216].mxu0 %vm2083_vm5, %v3238_v28 }
 0x371   :  { %7196 = vmatprep.mubr.msk.bf16.mxu0 %vm7797_vm3, %v11170_v3 }
 0x372   :  { %7161 = vmatmul.mubr.msk.bf16.gmra.mrb[188].mxu1 %vm2083_vm5, %v3014_v30 }
 0x373   :  { %7164 = vmatprep.mubr.msk.bf16.mxu1 %vm7797_vm3, %v11170_v3 }
 0x378   :  { %7197 = vmatmul.mubr.msk.bf16.gmra.mrb[220].mxu0 %vm2083_vm5, %v3239_v37 }
 0x379   :  { %7236 = vmatprep.mubr.msk.bf16.mxu0 %vm7797_vm3, %v11170_v3 }
 0x37a   :  { %7165 = vmatmul.mubr.msk.bf16.gmra.mrb[192].mxu1 %vm2083_vm5, %v3015_v61 }
 0x37b   :  { %7204 = vmatprep.mubr.msk.bf16.mxu1 %vm7797_vm3, %v11170_v3 }
 0x380   :  { %7237 = vmatmul.mubr.msk.bf16.vlgmr.msra.gmra.mrb[224].mxu0 %vm2083_vm5, %v11220_v19  ;;  %v3463_v19 = vpack.c.bf16 %v3456_v42, %v3456_v42 }
 0x381   :  { %7240 = vmatprep.mubr.msk.bf16.mxu0 %vm7797_vm3, %v11170_v3 }
 0x382   :  { %7205 = vmatmul.mubr.msk.bf16.vlgmr.msra.gmra.mrb[196].mxu1 %vm2083_vm5, %v11221_v1 }
 0x383   :  { %7265 = vmatpush3.bf16.msra.mxu1 %v7496_v56  ;;  %7208 = vmatprep.mubr.msk.bf16.mxu1 %vm7797_vm3, %v11170_v3 }
 0x384   :  { %7266 = vmatprep.subr.bf16.mxu1 %v11170_v3 }
 0x387   :  { %7267 = vmatpush3.bf16.msra.mxu1 %v7497_v45 }
 0x388   :  { %7241 = vmatmul.mubr.msk.bf16.gmra.mrb[228].mxu0 %vm2083_vm5, %v11224_v47 }
 0x389   :  { %7244 = vmatprep.mubr.msk.bf16.mxu0 %vm7797_vm3, %v11170_v3 }
 0x38a   :  { %7209 = vmatmul.mubr.msk.bf16.gmra.mrb[200].mxu1 %vm2083_vm5, %v3458_v51 }
 0x38b   :  { %7212 = vmatprep.mubr.msk.bf16.mxu1 %vm7797_vm3, %v11170_v3 }
 0x390   :  { %7245 = vmatmul.mubr.msk.bf16.gmra.mrb[232].mxu0 %vm2083_vm5, %v11225_v59 }
 0x391   :  { %7248 = vmatprep.mubr.msk.bf16.mxu0 %vm7797_vm3, %v11170_v3 }
 0x392   :  { %7213 = vmatmul.mubr.msk.bf16.gmra.mrb[204].mxu1 %vm2083_vm5, %v11226_v62 }
 0x393   :  { %7216 = vmatprep.mubr.msk.bf16.mxu1 %vm7797_vm3, %v11170_v3 }
 0x398   :  { %7249 = vmatmul.mubr.msk.bf16.gmra.mrb[236].mxu0 %vm2083_vm5, %v11228_v41  ;;  %v11233_v41 = vpack.c.bf16 %v11231_v16, %v11232_v38 }
 0x399   :  { %7252 = vmatprep.mubr.msk.bf16.mxu0 %vm7797_vm3, %v11170_v3 }
 0x39a   :  { %7217 = vmatmul.mubr.msk.bf16.gmra.mrb[208].mxu1 %vm2083_vm5, %v3460_v43 }
 0x39b   :  { %7220 = vmatprep.mubr.msk.bf16.mxu1 %vm7797_vm3, %v11170_v3 }
 0x3a0   :  { %7253 = vmatmul.mubr.msk.bf16.gmra.mrb[240].mxu0 %vm2083_vm5, %v11229_v49 }
 0x3a1   :  { %7256 = vmatprep.mubr.msk.bf16.mxu0 %vm7797_vm3, %v11170_v3 }
 0x3a2   :  { %7221 = vmatmul.mubr.msk.bf16.gmra.mrb[212].mxu1 %vm2083_vm5, %v3461_v24 }
 0x3a3   :  { %7224 = vmatprep.mubr.msk.bf16.mxu1 %vm7797_vm3, %v11170_v3 }
 0x3a4   :  { %v2494_v15 = vpop.f32.mrb[140].mxu0 }
 0x3a5   :  { %v7046_v36 = vpop.f32.mrb[141].mxu0 }
 0x3a6   :  { %v2373_v52 = vpop.f32.mrb[112].mxu1  ;;  %v2497_v31 = vpop.f32.mrb[142].mxu0  ;;  %v11238_v36 = vld [vmem:[#allocation51_spill] sm:$0xff] }
 0x3a7   :  { %v9747_v8 = vadd.f32 %v2494_v15, %v2373_v52  ;;  %v7014_v11 = vpop.f32.mrb[113].mxu1  ;;  %v7047_v12 = vpop.f32.mrb[143].mxu0  ;;  %v11239_v2 = vpack.c.bf16 %v11237_v55, %v11238_v36 }
 0x3a8   :  { %v2376_v39 = vpop.f32.mrb[114].mxu1  ;;  %7257 = vmatmul.mubr.msk.bf16.gmra.mrb[244].mxu0 %vm2083_vm5, %v3686_v4 }
 0x3a9   :  { %v9750_v28 = vadd.f32 %v2497_v31, %v2376_v39  ;;  %v7015_v53 = vpop.f32.mrb[115].mxu1  ;;  %7260 = vmatprep.mubr.msk.bf16.mxu0 %vm7797_vm3, %v11170_v3 }
 0x3aa   :  { %7225 = vmatmul.mubr.msk.bf16.gmra.mrb[216].mxu1 %vm2083_vm5, %v3462_v17  ;;  %v11240_v17 = vld [vmem:[#allocation53_spill] sm:$0xff] }
 0x3ab   :  { %7228 = vmatprep.mubr.msk.bf16.mxu1 %vm7797_vm3, %v11170_v3  ;;  %v11242_v6 = vpack.c.bf16 %v11240_v17, %v11241_v5 }
 0x3ac   :  { %v2502_v30 = vpop.f32.mrb[144].mxu0 }
 0x3ad   :  { %v7050_v63 = vpop.f32.mrb[145].mxu0 }
 0x3ae   :  { %v2505_v37 = vpop.f32.mrb[146].mxu0 }
 0x3af   :  { %v2381_v61 = vpop.f32.mrb[116].mxu1  ;;  %v7051_v56 = vpop.f32.mrb[147].mxu0 }
 0x3b0   :  { %v9758_v35 = vadd.f32 %v2502_v30, %v2381_v61  ;;  %v7018_v1 = vpop.f32.mrb[117].mxu1  ;;  %7261 = vmatmul.mubr.msk.bf16.gmra.mrb[248].mxu0 %vm2083_vm5, %v3687_v25 }
 0x3b1   :  { %v2384_v18 = vpop.f32.mrb[118].mxu1  ;;  %v11243_v1 = vpack.c.bf16 %v9569_v40, %v9566_v60 }
 0x3b2   :  { %v9761_v45 = vadd.f32 %v2505_v37, %v2384_v18  ;;  %v7019_v32 = vpop.f32.mrb[119].mxu1  ;;  %7229 = vmatmul.mubr.msk.bf16.gmra.mrb[220].mxu1 %vm2083_vm5, %v3463_v19  ;;  %v3882_v18 = vpop.permute.xlu0 %3881 }
 0x3b3   :  { %7268 = vmatprep.mubr.msk.bf16.mxu1 %vm7797_vm3, %v11170_v3  ;;  %v3838_v32 = vld [vmem:[#allocation5 + $0x68] sm:$0xff] }
 0x3b4   :  { %v2510_v34 = vpop.f32.mrb[148].mxu0 }
 0x3b5   :  { %v7054_v48 = vpop.f32.mrb[149].mxu0 }
 0x3b6   :  { %v2513_v29 = vpop.f32.mrb[150].mxu0  ;;  %v3903_v48 = vmul.f32 %v9737_v23, %v3838_v32 }
 0x3b7   :  { %v2389_v47 = vpop.f32.mrb[120].mxu1  ;;  %v7055_v51 = vpop.f32.mrb[151].mxu0 }
 0x3b8   :  { %v9766_v59 = vadd.f32 %v2510_v34, %v2389_v47  ;;  %v7022_v10 = vpop.f32.mrb[121].mxu1 }
 0x3b9   :  { %v2392_v62 = vpop.f32.mrb[122].mxu1  ;;  %v3902_v10 = vmul.f32 %v3882_v18, %v9667_v27 }
 0x3ba   :  { %v9768_v33 = vadd.f32 %v2513_v29, %v2392_v62  ;;  %v7023_v7 = vpop.f32.mrb[123].mxu1  ;;  %7269 = vmatmul.mubr.msk.bf16.vlgmr.msra.gmra.mrb[224].mxu1 %vm2083_vm5, %v11233_v41  ;;  %v3839_v41 = vld [vmem:[#allocation5 + $0x70] sm:$0x3] }
 0x3bb   :  { %7272 = vmatprep.mubr.msk.bf16.mxu1 %vm7797_vm3, %v11170_v3  ;;  %v3910_v40 = vpack.c.bf16 %v3903_v48, %v3902_v10 }
 0x3bc   :  { %v2518_v43 = vpop.f32.mrb[152].mxu0 }
 0x3bd   :  { %v7058_v44 = vpop.f32.mrb[153].mxu0 }
 0x3be   :  { %v2521_v9 = vpop.f32.mrb[154].mxu0 }
 0x3bf   :  { %v2397_v26 = vpop.f32.mrb[124].mxu1  ;;  %v7059_v14 = vpop.f32.mrb[155].mxu0 }
 0x3c0   :  { %v9776_v20 = vadd.f32 %v2518_v43, %v2397_v26  ;;  %v7026_v49 = vpop.f32.mrb[125].mxu1  ;;  %v3890_v43 = vpop.permute.xlu0 %3889 }
 0x3c1   :  { %v2400_v24 = vpop.f32.mrb[126].mxu1  ;;  %v3904_v23 = vmul.f32 %v3890_v43, %v3839_v41 }
 0x3c2   :  { %v9778_v0 = vadd.f32 %v2521_v9, %v2400_v24  ;;  %v7027_v58 = vpop.f32.mrb[127].mxu1  ;;  %7273 = vmatmul.mubr.msk.bf16.gmra.mrb[228].mxu1 %vm2083_vm5, %v11236_v46 }
 0x3c3   :  { %7276 = vmatprep.mubr.msk.bf16.mxu1 %vm7797_vm3, %v11170_v3  ;;  %v3911_v54 = vpack.c.bf16 %v3904_v23, %v3904_v23 }
 0x3c9   :  { %v2526_v22 = vpop.f32.mrb[156].mxu0 }
 0x3ca   :  { %v7062_v15 = vpop.f32.mrb[157].mxu0  ;;  %7277 = vmatmul.mubr.msk.bf16.gmra.mrb[232].mxu1 %vm2083_vm5, %v11239_v2 }
 0x3cb   :  { %v2405_v50 = vpop.f32.mrb[128].mxu1  ;;  %v2529_v4 = vpop.f32.mrb[158].mxu0  ;;  %7280 = vmatprep.mubr.msk.bf16.mxu1 %vm7797_vm3, %v11170_v3 }
 0x3cc   :  { %v9792_v52 = vadd.f32 %v2526_v22, %v2405_v50  ;;  %v7030_v31 = vpop.f32.mrb[129].mxu1  ;;  %v7063_v21 = vpop.f32.mrb[159].mxu0 }
 0x3cd   :  { %v2408_v11 = vpop.f32.mrb[130].mxu1 }
 0x3ce   :  { %v9794_v12 = vadd.f32 %v2529_v4, %v2408_v11  ;;  %v7031_v39 = vpop.f32.mrb[131].mxu1 }
 0x3d2   :  { %7281 = vmatmul.mubr.msk.bf16.gmra.mrb[236].mxu1 %vm2083_vm5, %v11242_v6 }
 0x3d3   :  { %v2534_v53 = vpop.f32.mrb[160].mxu0  ;;  %7284 = vmatprep.mubr.msk.bf16.mxu1 %vm7797_vm3, %v11170_v3 }
 0x3d4   :  { %v7066_v57 = vpop.f32.mrb[161].mxu0 }
 0x3d5   :  { %v2413_v42 = vpop.f32.mrb[132].mxu1  ;;  %v2537_v30 = vpop.f32.mrb[162].mxu0 }
 0x3d6   :  { %v9802_v25 = vadd.f32 %v2534_v53, %v2413_v42  ;;  %v7034_v63 = vpop.f32.mrb[133].mxu1  ;;  %v7067_v37 = vpop.f32.mrb[163].mxu0 }
 0x3d7   :  { %v2416_v61 = vpop.f32.mrb[134].mxu1 }
 0x3d8   :  { %v9804_v56 = vadd.f32 %v2537_v30, %v2416_v61  ;;  %v7035_v19 = vpop.f32.mrb[135].mxu1 }
 0x3da   :  { %7285 = vmatmul.mubr.msk.bf16.gmra.mrb[240].mxu1 %vm2083_vm5, %v11243_v1 }
 0x3db   :  { %v2542_v34 = vpop.f32.mrb[164].mxu0  ;;  %7288 = vmatprep.mubr.msk.bf16.mxu1 %vm7797_vm3, %v11170_v3 }
 0x3dc   :  { %v7070_v29 = vpop.f32.mrb[165].mxu0 }
 0x3dd   :  { %v2421_v47 = vpop.f32.mrb[136].mxu1  ;;  %v2545_v51 = vpop.f32.mrb[166].mxu0 }
 0x3de   :  { %v9814_v62 = vadd.f32 %v2542_v34, %v2421_v47  ;;  %v7038_v7 = vpop.f32.mrb[137].mxu1  ;;  %v7071_v16 = vpop.f32.mrb[167].mxu0 }
 0x3df   :  { %v2424_v60 = vpop.f32.mrb[138].mxu1 }
 0x3e0   :  { %v7039_v38 = vpop.f32.mrb[139].mxu1 }
 0x3e2   :  { %7289 = vmatmul.mubr.msk.bf16.gmra.mrb[244].mxu1 %vm2083_vm5, %v3910_v40 }
 0x3e3   :  { %v2929_v44 = vpop.f32.mrb[168].mxu0  ;;  %7292 = vmatprep.mubr.msk.bf16.mxu1 %vm7797_vm3, %v11170_v3 }
 0x3e4   :  { %v7110_v9 = vpop.f32.mrb[169].mxu0 }
 0x3e5   :  { %v2705_v26 = vpop.f32.mrb[140].mxu1  ;;  %v2932_v14 = vpop.f32.mrb[170].mxu0 }
 0x3e6   :  { %v2759_v27 = vadd.f32 %v2705_v26, %v9747_v8  ;;  %v7078_v49 = vpop.f32.mrb[141].mxu1  ;;  %v7111_v24 = vpop.f32.mrb[171].mxu0 }
 0x3e7   :  { %v2708_v58 = vpop.f32.mrb[142].mxu1 }
 0x3e8   :  { %v2760_v13 = vadd.f32 %v2708_v58, %v9750_v28  ;;  %v7079_v46 = vpop.f32.mrb[143].mxu1  ;;  %v9821_v22 = vadd.f32 %v2929_v44, %v2759_v27 }
 0x3ea   :  { %7293 = vmatmul.mubr.msk.bf16.gmra.mrb[248].mxu1 %vm2083_vm5, %v3911_v54  ;;  %v9824_v15 = vadd.f32 %v2932_v14, %v2760_v13 }
 0x3eb   :  { %v2937_v55 = vpop.f32.mrb[172].mxu0 }
 0x3ec   :  { %v7114_v36 = vpop.f32.mrb[173].mxu0 }
 0x3ed   :  { %v2713_v2 = vpop.f32.mrb[144].mxu1  ;;  %v2940_v50 = vpop.f32.mrb[174].mxu0 }
 0x3ee   :  { %v2761_v4 = vadd.f32 %v2713_v2, %v9758_v35  ;;  %v7082_v8 = vpop.f32.mrb[145].mxu1  ;;  %v7115_v31 = vpop.f32.mrb[175].mxu0 }
 0x3ef   :  { %v2716_v21 = vpop.f32.mrb[146].mxu1 }
 0x3f0   :  { %v2762_v11 = vadd.f32 %v2716_v21, %v9761_v45  ;;  %v7083_v39 = vpop.f32.mrb[147].mxu1  ;;  %v9828_v28 = vadd.f32 %v2937_v55, %v2761_v4 }
 0x3f2   :  { %v9830_v17 = vadd.f32 %v2940_v50, %v2762_v11 }
 0x3f3   :  { %v2945_v5 = vpop.f32.mrb[176].mxu0 }
 0x3f4   :  { %v7118_v6 = vpop.f32.mrb[177].mxu0 }
 0x3f5   :  { %v2721_v53 = vpop.f32.mrb[148].mxu1  ;;  %v2948_v57 = vpop.f32.mrb[178].mxu0 }
 0x3f6   :  { %v2763_v42 = vadd.f32 %v2721_v53, %v9766_v59  ;;  %v7086_v30 = vpop.f32.mrb[149].mxu1  ;;  %v7119_v63 = vpop.f32.mrb[179].mxu0 }
 0x3f7   :  { %v2724_v37 = vpop.f32.mrb[150].mxu1 }
 0x3f8   :  { %v2764_v35 = vadd.f32 %v2724_v37, %v9768_v33  ;;  %v7087_v61 = vpop.f32.mrb[151].mxu1  ;;  %v9834_v19 = vadd.f32 %v2945_v5, %v2763_v42 }
 0x3fa   :  { %v9836_v45 = vadd.f32 %v2948_v57, %v2764_v35 }
 0x3fb   :  { %v2953_v1 = vpop.f32.mrb[180].mxu0 }
 0x3fc   :  { %v7122_v18 = vpop.f32.mrb[181].mxu0 }
 0x3fd   :  { %v2729_v32 = vpop.f32.mrb[152].mxu1  ;;  %v2956_v34 = vpop.f32.mrb[182].mxu0 }
 0x3fe   :  { %v2765_v48 = vadd.f32 %v2729_v32, %v9776_v20  ;;  %v7090_v29 = vpop.f32.mrb[153].mxu1  ;;  %v7123_v47 = vpop.f32.mrb[183].mxu0 }
 0x3ff   :  { %v2732_v51 = vpop.f32.mrb[154].mxu1 }
 0x400   :  { %v2766_v59 = vadd.f32 %v2732_v51, %v9778_v0  ;;  %v7091_v10 = vpop.f32.mrb[155].mxu1  ;;  %v9840_v7 = vadd.f32 %v2953_v1, %v2765_v48 }
 0x402   :  { %v9842_v33 = vadd.f32 %v2956_v34, %v2766_v59 }
 0x403   :  { %v2961_v16 = vpop.f32.mrb[184].mxu0 }
 0x404   :  { %v7126_v60 = vpop.f32.mrb[185].mxu0 }
 0x405   :  { %v2737_v40 = vpop.f32.mrb[156].mxu1  ;;  %v2964_v38 = vpop.f32.mrb[186].mxu0 }
 0x406   :  { %v2767_v41 = vadd.f32 %v2737_v40, %v9792_v52  ;;  %v7094_v43 = vpop.f32.mrb[157].mxu1  ;;  %v7127_v44 = vpop.f32.mrb[187].mxu0 }
 0x407   :  { %v2740_v23 = vpop.f32.mrb[158].mxu1 }
 0x408   :  { %v2768_v20 = vadd.f32 %v2740_v23, %v9794_v12  ;;  %v7095_v9 = vpop.f32.mrb[159].mxu1  ;;  %v9846_v26 = vadd.f32 %v2961_v16, %v2767_v41 }
 0x40a   :  { %v9848_v0 = vadd.f32 %v2964_v38, %v2768_v20 }
 0x40b   :  { %v2969_v14 = vpop.f32.mrb[188].mxu0 }
 0x40c   :  { %v7130_v27 = vpop.f32.mrb[189].mxu0 }
 0x40d   :  { %v2745_v49 = vpop.f32.mrb[160].mxu1  ;;  %v2972_v24 = vpop.f32.mrb[190].mxu0 }
 0x40e   :  { %v2769_v58 = vadd.f32 %v2745_v49, %v9802_v25  ;;  %v7098_v54 = vpop.f32.mrb[161].mxu1  ;;  %v7131_v13 = vpop.f32.mrb[191].mxu0 }
 0x40f   :  { %v2748_v46 = vpop.f32.mrb[162].mxu1 }
 0x410   :  { %v2770_v52 = vadd.f32 %v2748_v46, %v9804_v56  ;;  %v7099_v55 = vpop.f32.mrb[163].mxu1  ;;  %v9852_v36 = vadd.f32 %v2969_v14, %v2769_v58 }
 0x412   :  { %v9854_v12 = vadd.f32 %v2972_v24, %v2770_v52 }
 0x413   :  { %v2977_v2 = vpop.f32.mrb[192].mxu0 }
 0x414   :  { %v7134_v50 = vpop.f32.mrb[193].mxu0 }
 0x415   :  { %v2753_v4 = vpop.f32.mrb[164].mxu1  ;;  %v2980_v8 = vpop.f32.mrb[194].mxu0 }
 0x416   :  { %v2771_v31 = vadd.f32 %v2753_v4, %v9814_v62  ;;  %v7102_v21 = vpop.f32.mrb[165].mxu1  ;;  %v7135_v11 = vpop.f32.mrb[195].mxu0 }
 0x417   :  { %v2756_v39 = vpop.f32.mrb[166].mxu1 }
 0x418   :  { %v7103_v25 = vpop.f32.mrb[167].mxu1  ;;  %v9857_v5 = vadd.f32 %v2977_v2, %v2771_v31 }
 0x41b   :  { %v3312_v6 = vpop.f32.mrb[196].mxu0 }
 0x41c   :  { %v7174_v53 = vpop.f32.mrb[197].mxu0 }
 0x41d   :  { %v3088_v56 = vpop.f32.mrb[168].mxu1  ;;  %v3315_v57 = vpop.f32.mrb[198].mxu0 }
 0x41e   :  { %v3142_v42 = vadd.f32 %v3088_v56, %v9821_v22  ;;  %v7142_v30 = vpop.f32.mrb[169].mxu1  ;;  %v7175_v63 = vpop.f32.mrb[199].mxu0 }
 0x41f   :  { %v3091_v37 = vpop.f32.mrb[170].mxu1 }
 0x420   :  { %v3143_v35 = vadd.f32 %v3091_v37, %v9824_v15  ;;  %v7143_v61 = vpop.f32.mrb[171].mxu1  ;;  %v9861_v1 = vadd.f32 %v3312_v6, %v3142_v42 }
 0x422   :  { %v9863_v62 = vadd.f32 %v3315_v57, %v3143_v35 }
 0x423   :  { %v3320_v18 = vpop.f32.mrb[200].mxu0 }
 0x424   :  { %v7178_v32 = vpop.f32.mrb[201].mxu0 }
 0x425   :  { %v3096_v34 = vpop.f32.mrb[172].mxu1  ;;  %v3323_v48 = vpop.f32.mrb[202].mxu0 }
 0x426   :  { %v3144_v29 = vadd.f32 %v3096_v34, %v9828_v28  ;;  %v7146_v47 = vpop.f32.mrb[173].mxu1  ;;  %v7179_v51 = vpop.f32.mrb[203].mxu0 }
 0x427   :  { %v3099_v59 = vpop.f32.mrb[174].mxu1 }
 0x428   :  { %v3145_v22 = vadd.f32 %v3099_v59, %v9830_v17  ;;  %v7147_v10 = vpop.f32.mrb[175].mxu1  ;;  %v9867_v16 = vadd.f32 %v3320_v18, %v3144_v29 }
 0x42a   :  { %v9869_v15 = vadd.f32 %v3323_v48, %v3145_v22 }
 0x42b   :  { %v3328_v60 = vpop.f32.mrb[204].mxu0 }
 0x42c   :  { %v7182_v40 = vpop.f32.mrb[205].mxu0 }
 0x42d   :  { %v3104_v38 = vpop.f32.mrb[176].mxu1  ;;  %v3331_v41 = vpop.f32.mrb[206].mxu0 }
 0x42e   :  { %v3146_v43 = vadd.f32 %v3104_v38, %v9834_v19  ;;  %v7150_v44 = vpop.f32.mrb[177].mxu1  ;;  %v7183_v23 = vpop.f32.mrb[207].mxu0 }
 0x42f   :  { %v3107_v20 = vpop.f32.mrb[178].mxu1 }
 0x430   :  { %v3147_v28 = vadd.f32 %v3107_v20, %v9836_v45  ;;  %v7151_v9 = vpop.f32.mrb[179].mxu1  ;;  %v9873_v14 = vadd.f32 %v3328_v60, %v3146_v43 }
 0x432   :  { %v9875_v17 = vadd.f32 %v3331_v41, %v3147_v28 }
 0x433   :  { %v3336_v27 = vpop.f32.mrb[208].mxu0 }
 0x434   :  { %v7186_v49 = vpop.f32.mrb[209].mxu0 }
 0x435   :  { %v3112_v24 = vpop.f32.mrb[180].mxu1  ;;  %v3339_v58 = vpop.f32.mrb[210].mxu0 }
 0x436   :  { %v3148_v54 = vadd.f32 %v3112_v24, %v9840_v7  ;;  %v7154_v13 = vpop.f32.mrb[181].mxu1  ;;  %v7187_v46 = vpop.f32.mrb[211].mxu0 }
 0x437   :  { %v3115_v52 = vpop.f32.mrb[182].mxu1 }
 0x438   :  { %v3149_v19 = vadd.f32 %v3115_v52, %v9842_v33  ;;  %v7155_v55 = vpop.f32.mrb[183].mxu1  ;;  %v9879_v2 = vadd.f32 %v3336_v27, %v3148_v54 }
 0x43a   :  { %v9881_v45 = vadd.f32 %v3339_v58, %v3149_v19 }
 0x43b   :  { %v3344_v50 = vpop.f32.mrb[212].mxu0 }
 0x43c   :  { %v7190_v4 = vpop.f32.mrb[213].mxu0 }
 0x43d   :  { %v3120_v8 = vpop.f32.mrb[184].mxu1  ;;  %v3347_v31 = vpop.f32.mrb[214].mxu0 }
 0x43e   :  { %v3150_v21 = vadd.f32 %v3120_v8, %v9846_v26  ;;  %v7158_v11 = vpop.f32.mrb[185].mxu1  ;;  %v7191_v39 = vpop.f32.mrb[215].mxu0 }
 0x43f   :  { %v3123_v25 = vpop.f32.mrb[186].mxu1 }
 0x440   :  { %v3151_v7 = vadd.f32 %v3123_v25, %v9848_v0  ;;  %v7159_v6 = vpop.f32.mrb[187].mxu1  ;;  %v9885_v53 = vadd.f32 %v3344_v50, %v3150_v21 }
 0x442   :  { %v9887_v33 = vadd.f32 %v3347_v31, %v3151_v7 }
 0x443   :  { %v3352_v56 = vpop.f32.mrb[216].mxu0 }
 0x444   :  { %v7194_v57 = vpop.f32.mrb[217].mxu0 }
 0x445   :  { %v3128_v42 = vpop.f32.mrb[188].mxu1  ;;  %v3355_v30 = vpop.f32.mrb[218].mxu0 }
 0x446   :  { %v3152_v63 = vadd.f32 %v3128_v42, %v9852_v36  ;;  %v7162_v37 = vpop.f32.mrb[189].mxu1  ;;  %v7195_v35 = vpop.f32.mrb[219].mxu0 }
 0x447   :  { %v3131_v61 = vpop.f32.mrb[190].mxu1 }
 0x448   :  { %v3153_v26 = vadd.f32 %v3131_v61, %v9854_v12  ;;  %v7163_v18 = vpop.f32.mrb[191].mxu1  ;;  %v9891_v32 = vadd.f32 %v3352_v56, %v3152_v63 }
 0x44a   :  { %v9893_v0 = vadd.f32 %v3355_v30, %v3153_v26 }
 0x44b   :  { %v3360_v34 = vpop.f32.mrb[220].mxu0 }
 0x44c   :  { %v7198_v48 = vpop.f32.mrb[221].mxu0 }
 0x44d   :  { %v3136_v29 = vpop.f32.mrb[192].mxu1  ;;  %v3363_v47 = vpop.f32.mrb[222].mxu0 }
 0x44e   :  { %v3154_v51 = vadd.f32 %v3136_v29, %v9857_v5  ;;  %v7166_v59 = vpop.f32.mrb[193].mxu1  ;;  %v7199_v22 = vpop.f32.mrb[223].mxu0 }
 0x44f   :  { %v3139_v10 = vpop.f32.mrb[194].mxu1 }
 0x450   :  { %v7167_v36 = vpop.f32.mrb[195].mxu1  ;;  %v9896_v60 = vadd.f32 %v3360_v34, %v3154_v51 }
 0x453   :  { %v3760_v40 = vpop.f32.mrb[224].mxu0 }
 0x454   :  { %v7238_v38 = vpop.f32.mrb[225].mxu0 }
 0x455   :  { %v3536_v12 = vpop.f32.mrb[196].mxu1  ;;  %v3763_v41 = vpop.f32.mrb[226].mxu0 }
 0x456   :  { %v3590_v43 = vadd.f32 %v3536_v12, %v9861_v1  ;;  %v7206_v44 = vpop.f32.mrb[197].mxu1  ;;  %v7239_v23 = vpop.f32.mrb[227].mxu0 }
 0x457   :  { %v3539_v20 = vpop.f32.mrb[198].mxu1 }
 0x458   :  { %v3591_v28 = vadd.f32 %v3539_v20, %v9863_v62  ;;  %v7207_v9 = vpop.f32.mrb[199].mxu1  ;;  %v9900_v27 = vadd.f32 %v3760_v40, %v3590_v43 }
 0x45a   :  { %v9902_v5 = vadd.f32 %v3763_v41, %v3591_v28 }
 0x45b   :  { %v3768_v49 = vpop.f32.mrb[228].mxu0 }
 0x45c   :  { %v7242_v24 = vpop.f32.mrb[229].mxu0 }
 0x45d   :  { %v3544_v58 = vpop.f32.mrb[200].mxu1  ;;  %v3771_v1 = vpop.f32.mrb[230].mxu0 }
 0x45e   :  { %7679 = shalt.err (!%p7676_p4)  }
 0x45f   :  { %s7680_s18 = scalar_lea.vmem %s9904_s26, 13312  ;;  %s9934_s3 = scalar_lea.vmem %s9904_s26, 50176 }
 0x460   :  { %p7681_p5 = scmp.ne.s32.totalorder %s9904_s26, %s7680_s18  ;;  %p7685_p6 = scmp.lt.s32.totalorder %s9904_s26, %s9904_s26 }
 0x461   :  { %p7686_p7 = scmp.lt.s32.totalorder %s9934_s3, %s7680_s18 }
 0x463   :  { %p7687_p8 = por %p7686_p7, %p7685_p6 }
 0x465   :  { %p7688_p9 = pnand %p7687_p8, %p7681_p5 }
 0x467   :  { %7691 = shalt.err (!%p7688_p9)  }
 0x468   :  { %131 = dma.hbm_to_vmem [thread:$0]  %s11038_s6, 13312, %s9904_s26, [#allocation3]  ;;  %v3592_v62 = vadd.f32 %v3544_v58, %v9867_v16  ;;  %v7210_v54 = vpop.f32.mrb[201].mxu1  ;;  %v7243_v13 = vpop.f32.mrb[231].mxu0 }
 0x469   :  { %v3547_v46 = vpop.f32.mrb[202].mxu1  ;;  %s9947_s20 = scalar_lea.hbm %s11038_s6, 25600 }
 0x46a   :  { %p7693_p10 = scmp.ne.s32.totalorder %s9909_s12, %s9947_s20  ;;  %p7696_p11 = scmp.lt.u32.totalorder %s9918_s0, %s9947_s20 }
 0x46b   :  { %p7698_p13 = scmp.lt.u32.totalorder %s9947_s20, %s9909_s12 }
 0x46c   :  { %p7697_p12 = por %p7696_p11, %p7674_p2 }
 0x46e   :  { %p7699_p0 = por %p7698_p13, %p7697_p12 }
 0x470   :  { %p7700_p1 = pnand %p7699_p0, %p7693_p10 }
 0x472   :  { %7703 = shalt.err (!%p7700_p1)  }
 0x473   :  { %s7704_s25 = scalar_lea.vmem %s143_s29, 12288  ;;  %p7709_p4 = scmp.lt.s32.totalorder %s143_s29, %s9904_s26 }
 0x474   :  { %p7705_p3 = scmp.ne.s32.totalorder %s143_s29, %s7704_s25  ;;  %p7710_p5 = scmp.lt.s32.totalorder %s9934_s3, %s7704_s25 }
 0x476   :  { %p7711_p6 = por %p7710_p5, %p7709_p4 }
 0x478   :  { %p7712_p7 = pnand %p7711_p6, %p7705_p3 }
 0x47a   :  { %7715 = shalt.err (!%p7712_p7)  }
 0x47b   :  { %145 = dma.hbm_to_vmem [thread:$0]  %s9909_s12, 12288, %s143_s29, [#allocation3 + $0x1]  ;;  %v3593_v16 = vadd.f32 %v3547_v46, %v9869_v15  ;;  %v7211_v52 = vpop.f32.mrb[203].mxu1  ;;  %v9964_v19 = vadd.f32 %v3768_v49, %v3592_v62  ;;  %v3776_v50 = vpop.f32.mrb[232].mxu0 }
 0x47c   :  { %s7807_s4 = smov [#allocation2 + $0x640]   ;;  %s9969_s27 = scalar_lea.hbm %s11038_s6, 37888 }
 0x47d   :  { %s156_s16 = sshll.u32 %s7807_s4, 4  ;;  %v9971_v55 = vadd.f32 %v3771_v1, %v3593_v16  ;;  %p7718_p2 = scmp.ne.s32.totalorder %s9947_s20, %s9969_s27  ;;  %s157_s16 = int_to_ptr.vmem [resolvable:$true] %s156_s16 }
 0x47e   :  { %p7720_p8 = scmp.lt.u32.totalorder %s9947_s20, %s11038_s6  ;;  %p7721_p9 = scmp.lt.u32.totalorder %s9918_s0, %s9969_s27 }
 0x47f   :  { %p7723_p11 = scmp.lt.u32.totalorder %s9969_s27, %s9947_s20 }
 0x480   :  { %p7722_p10 = por %p7721_p9, %p7720_p8 }
 0x482   :  { %p7724_p12 = por %p7723_p11, %p7722_p10 }
 0x484   :  { %p7725_p13 = pnand %p7724_p12, %p7718_p2 }
 0x486   :  { %7728 = shalt.err (!%p7725_p13)  }
 0x487   :  { %s7729_s11 = scalar_lea.vmem %s157_s16, 12288  ;;  %p7734_p1 = scmp.lt.s32.totalorder %s157_s16, %s9904_s26 }
 0x488   :  { %p7730_p0 = scmp.ne.s32.totalorder %s157_s16, %s7729_s11  ;;  %p7735_p3 = scmp.lt.s32.totalorder %s9934_s3, %s7729_s11 }
 0x48a   :  { %p7736_p4 = por %p7735_p3, %p7734_p1 }
 0x48c   :  { %p7737_p5 = pnand %p7736_p4, %p7730_p0 }
 0x48e   :  { %7740 = shalt.err (!%p7737_p5)  }
 0x48f   :  { %159 = dma.hbm_to_vmem [thread:$0]  %s9947_s20, 12288, %s157_s16, [#allocation3 + $0x2]  ;;  %v7246_v15 = vpop.f32.mrb[233].mxu0  ;;  %v3552_v4 = vpop.f32.mrb[204].mxu1 }
 0x490   :  { %s7808_s12 = smov [#allocation2 + $0x940]   ;;  %v3779_v8 = vpop.f32.mrb[234].mxu0  ;;  %v3594_v31 = vadd.f32 %v3552_v4, %v9873_v14  ;;  %v7214_v21 = vpop.f32.mrb[205].mxu1  ;;  %p7743_p6 = scmp.ne.s32.totalorder %s9969_s27, %s9918_s0 }
 0x491   :  { %s170_s13 = sshll.u32 %s7808_s12, 4  ;;  %v7247_v11 = vpop.f32.mrb[235].mxu0  ;;  %p7745_p7 = scmp.lt.u32.totalorder %s9969_s27, %s11038_s6  ;;  %s171_s13 = int_to_ptr.vmem [resolvable:$true] %s170_s13 }
 0x492   :  { %p7746_p2 = scmp.lt.u32.totalorder %s9918_s0, %s9918_s0 }
 0x494   :  { %p7747_p8 = por %p7746_p2, %p7745_p7 }
 0x496   :  { %p7749_p10 = por %p7747_p8, %p7721_p9 }
 0x498   :  { %p7750_p11 = pnand %p7749_p10, %p7743_p6 }
 0x49a   :  { %7753 = shalt.err (!%p7750_p11)  }
 0x49b   :  { %s7754_s7 = scalar_lea.vmem %s171_s13, 12288  ;;  %p7759_p13 = scmp.lt.s32.totalorder %s171_s13, %s9904_s26 }
 0x49c   :  { %p7755_p12 = scmp.ne.s32.totalorder %s171_s13, %s7754_s7  ;;  %p7760_p0 = scmp.lt.s32.totalorder %s9934_s3, %s7754_s7 }
 0x49e   :  { %p7761_p1 = por %p7760_p0, %p7759_p13 }
 0x4a0   :  { %p7762_p3 = pnand %p7761_p1, %p7755_p12 }
 0x4a2   :  { %7765 = shalt.err (!%p7762_p3)  }
 0x4a3   :  { %173 = dma.hbm_to_vmem [thread:$0]  %s9969_s27, 12288, %s171_s13, [#allocation3 + $0x3]  ;;  %v3555_v14 = vpop.f32.mrb[206].mxu1  ;;  %v10005_v7 = vadd.f32 %v3776_v50, %v3594_v31  ;;  %v3784_v56 = vpop.f32.mrb[236].mxu0  ;;  %v10030_v15 = vld [vmem:[#allocation11] ss:$0 sm:$0xff] }
 0x4a4   :  { %v3595_v39 = vadd.f32 %v3555_v14, %v9875_v17  ;;  %v7215_v25 = vpop.f32.mrb[207].mxu1  ;;  %v7250_v57 = vpop.f32.mrb[237].mxu0  ;;  %vm4084_vm7 = vcmask 1041409  }
 0x4a5   :  { %v3560_v42 = vpop.f32.mrb[208].mxu1  ;;  %v3787_v30 = vpop.f32.mrb[238].mxu0 }
 0x4a6   :  { %v10007_v6 = vadd.f32 %v3779_v8, %v3595_v39  ;;  %v3596_v63 = vadd.f32 %v3560_v42, %v9879_v2  ;;  %v7218_v37 = vpop.f32.mrb[209].mxu1  ;;  %v7251_v35 = vpop.f32.mrb[239].mxu0 }
 0x4a7   :  { %v3563_v61 = vpop.f32.mrb[210].mxu1  ;;  %v3792_v48 = vpop.f32.mrb[240].mxu0 }
 0x4a8   :  { %v3597_v26 = vadd.f32 %v3563_v61, %v9881_v45  ;;  %v7219_v18 = vpop.f32.mrb[211].mxu1  ;;  %v10011_v34 = vadd.f32 %v3784_v56, %v3596_v63  ;;  %v7254_v29 = vpop.f32.mrb[241].mxu0 }
 0x4a9   :  { %v3568_v47 = vpop.f32.mrb[212].mxu1  ;;  %v3795_v51 = vpop.f32.mrb[242].mxu0 }
 0x4aa   :  { %v10013_v17 = vadd.f32 %v3787_v30, %v3597_v26  ;;  %v3598_v59 = vadd.f32 %v3568_v47, %v9885_v53  ;;  %v7222_v22 = vpop.f32.mrb[213].mxu1  ;;  %v7255_v10 = vpop.f32.mrb[243].mxu0 }
 0x4ab   :  { %v3571_v36 = vpop.f32.mrb[214].mxu1  ;;  %v3800_v12 = vpop.f32.mrb[244].mxu0 }
 0x4ac   :  { %v3599_v2 = vadd.f32 %v3571_v36, %v9887_v33  ;;  %v7223_v40 = vpop.f32.mrb[215].mxu1  ;;  %v10017_v38 = vadd.f32 %v3792_v48, %v3598_v59  ;;  %v7258_v41 = vpop.f32.mrb[245].mxu0 }
 0x4ad   :  { %v3576_v43 = vpop.f32.mrb[216].mxu1  ;;  %v3803_v44 = vpop.f32.mrb[246].mxu0 }
 0x4ae   :  { %v10019_v45 = vadd.f32 %v3795_v51, %v3599_v2  ;;  %v3600_v23 = vadd.f32 %v3576_v43, %v9891_v32  ;;  %v7226_v20 = vpop.f32.mrb[217].mxu1  ;;  %v7259_v28 = vpop.f32.mrb[247].mxu0 }
 0x4af   :  { %v3579_v9 = vpop.f32.mrb[218].mxu1  ;;  %v3808_v58 = vpop.f32.mrb[248].mxu0 }
 0x4b0   :  { %v3601_v53 = vadd.f32 %v3579_v9, %v9893_v0  ;;  %v7227_v49 = vpop.f32.mrb[219].mxu1  ;;  %v10023_v24 = vadd.f32 %v3800_v12, %v3600_v23  ;;  %v7262_v1 = vpop.f32.mrb[249].mxu0 }
 0x4b1   :  { %v3584_v62 = vpop.f32.mrb[220].mxu1  ;;  %v3811_v54 = vpop.f32.mrb[250].mxu0 }
 0x4b2   :  { %v10025_v33 = vadd.f32 %v3803_v44, %v3601_v53  ;;  %v3602_v13 = vadd.f32 %v3584_v62, %v9896_v60  ;;  %v7230_v46 = vpop.f32.mrb[221].mxu1  ;;  %v7263_v16 = vpop.f32.mrb[251].mxu0 }
 0x4b3   :  { %v3587_v52 = vpop.f32.mrb[222].mxu1 }
 0x4b4   :  { %v10028_v32 = vadd.f32 %v3808_v58, %v3602_v13  ;;  %v7231_v50 = vpop.f32.mrb[223].mxu1 }
 0x4b5   :  { %v3984_v0 = vpop.f32.mrb[224].mxu1 }
 0x4b6   :  { %v4038_v4 = vadd.f32 %v3984_v0, %v9900_v27  ;;  %v7270_v8 = vpop.f32.mrb[225].mxu1 }
 0x4b7   :  { %v3987_v31 = vpop.f32.mrb[226].mxu1 }
 0x4b8   :  { %v4057_v21 = vadd.f32 %v10030_v15, %v4038_v4  ;;  %v4039_v11 = vadd.f32 %v3987_v31, %v9902_v5  ;;  %v7271_v14 = vpop.f32.mrb[227].mxu1 }
 0x4b9   :  { %v3992_v25 = vpop.f32.mrb[228].mxu1 }
 0x4ba   :  { %v4070_v39 = vmax.f32 %v4057_v21, 0.0  ;;  %v4058_v60 = vadd.f32 %v10030_v15, %v4039_v11  ;;  %v7274_v56 = vpop.f32.mrb[229].mxu1  ;;  %v4040_v61 = vadd.f32 %v3992_v25, %v9964_v19 }
 0x4bb   :  { %v3995_v57 = vpop.f32.mrb[230].mxu1 }
 0x4bc   :  { %v4086_v42 = vrot.slane %v4070_v39, 1  ;;  %v4090_v30 = vrot.slane %v4070_v39, 2  ;;  %v7275_v63 = vpop.f32.mrb[231].mxu1  ;;  %v4094_v37 = vrot.slane %v4070_v39, 3  ;;  %v4071_v35 = vmax.f32 %v4058_v60, 0.0 }
 0x4bd   :  { %v10037_v27 = vsel %vm425_vm1, %v4070_v39, 0.0  ;;  %v4098_v26 = vrot.slane %v4070_v39, 4  ;;  %v4102_v18 = vrot.slane %v4070_v39, 5  ;;  %v4106_v5 = vrot.slane %v4070_v39, 6  ;;  %v4000_v2 = vpop.f32.mrb[232].mxu1 }
 0x4be   :  { %v4110_v48 = vrot.slane %v4070_v39, 7  ;;  %v10041_v29 = vsel %vm425_vm1, %v4086_v42, 0.0  ;;  %v10044_v47 = vsel %vm425_vm1, %v4090_v30, 0.0  ;;  %v4059_v51 = vadd.f32 %v10030_v15, %v4040_v61  ;;  %v7278_v44 = vpop.f32.mrb[233].mxu1 }
 0x4bf   :  { %v4041_v59 = vadd.f32 %v3995_v57, %v9971_v55  ;;  %v10049_v22 = vsel %vm425_vm1, %v4094_v37, 0.0  ;;  %v4116_v10 = vrot.slane %v4071_v35, 1  ;;  %v4120_v36 = vrot.slane %v4071_v35, 2  ;;  %v4003_v9 = vpop.f32.mrb[234].mxu1 }
 0x4c0   :  { %v4124_v19 = vrot.slane %v4071_v35, 3  ;;  %v4128_v40 = vrot.slane %v4071_v35, 4  ;;  %v4072_v12 = vmax.f32 %v4059_v51, 0.0  ;;  %v4042_v43 = vadd.f32 %v4000_v2, %v10005_v7  ;;  %v7279_v1 = vpop.f32.mrb[235].mxu1 }
 0x4c1   :  { %v4060_v41 = vadd.f32 %v10030_v15, %v4041_v59  ;;  %v10054_v23 = vsel %vm425_vm1, %v4098_v26, 0.0  ;;  %v10057_v20 = vsel %vm425_vm1, %v4102_v18, 0.0  ;;  %v4132_v55 = vrot.slane %v4071_v35, 5  ;;  %v4008_v30 = vpop.f32.mrb[236].mxu1 }
 0x4c2   :  { %v4136_v28 = vrot.slane %v4071_v35, 6  ;;  %v10060_v53 = vsel %vm425_vm1, %v4106_v5, 0.0  ;;  %v10063_v49 = vsel %vm425_vm1, %v4110_v48, 0.0  ;;  %v10066_v58 = vsel %vm425_vm1, %v4071_v35, 0.0  ;;  %v7282_v26 = vpop.f32.mrb[237].mxu1 }
 0x4c3   :  { %v4140_v7 = vrot.slane %v4071_v35, 7  ;;  %v10069_v62 = vsel %vm425_vm1, %v4116_v10, 0.0  ;;  %v4146_v54 = vrot.slane %v4072_v12, 1  ;;  %v4150_v13 = vrot.slane %v4072_v12, 2  ;;  %v4011_v59 = vpop.f32.mrb[238].mxu1 }
 0x4c4   :  { %v4154_v46 = vrot.slane %v4072_v12, 3  ;;  %v10072_v16 = vsel %vm425_vm1, %v4120_v36, 0.0  ;;  %v10075_v52 = vsel %vm425_vm1, %v4124_v19, 0.0  ;;  %v10078_v50 = vsel %vm425_vm1, %v4128_v40, 0.0  ;;  %v7283_v40 = vpop.f32.mrb[239].mxu1 }
 0x4c5   :  { %v4073_v0 = vmax.f32 %v4060_v41, 0.0  ;;  %v10081_v4 = vsel %vm425_vm1, %v4132_v55, 0.0  ;;  %v10084_v8 = vsel %vm425_vm1, %v4136_v28, 0.0  ;;  %v4158_v31 = vrot.slane %v4072_v12, 4 }
 0x4c6   :  { %v4162_v21 = vrot.slane %v4072_v12, 5  ;;  %v10087_v11 = vsel %vm425_vm1, %v4140_v7, 0.0  ;;  %v10090_v14 = vsel %vm425_vm1, %v4072_v12, 0.0  ;;  %v4166_v39 = vrot.slane %v4072_v12, 6 }
 0x4c7   :  { %v4170_v60 = vrot.slane %v4072_v12, 7  ;;  %v10093_v25 = vsel %vm425_vm1, %v4146_v54, 0.0  ;;  %v10096_v56 = vsel %vm425_vm1, %v4150_v13, 0.0  ;;  %v10099_v57 = vsel %vm425_vm1, %v4154_v46, 0.0 }
 0x4c8   :  { %v4176_v42 = vrot.slane %v4073_v0, 1  ;;  %v4180_v63 = vrot.slane %v4073_v0, 2  ;;  %v4184_v37 = vrot.slane %v4073_v0, 3  ;;  %v4188_v35 = vrot.slane %v4073_v0, 4 }
 0x4c9   :  { %v4061_v61 = vadd.f32 %v10030_v15, %v4042_v43  ;;  %v10103_v18 = vsel %vm425_vm1, %v4158_v31, 0.0  ;;  %v10106_v5 = vsel %vm425_vm1, %v4162_v21, 0.0  ;;  %v4192_v48 = vrot.slane %v4073_v0, 5 }
 0x4ca   :  { %v4196_v51 = vrot.slane %v4073_v0, 6  ;;  %v4043_v36 = vadd.f32 %v4003_v9, %v10007_v6  ;;  %v4044_v19 = vadd.f32 %v4008_v30, %v10011_v34  ;;  %v4045_v2 = vadd.f32 %v4011_v59, %v10013_v17 }
 0x4cb   :  { %v4074_v10 = vmax.f32 %v4061_v61, 0.0  ;;  %v10112_v12 = vsel %vm425_vm1, %v4166_v39, 0.0  ;;  %v10115_v41 = vsel %vm425_vm1, %v4170_v60, 0.0  ;;  %v10118_v43 = vsel %vm425_vm1, %v4073_v0, 0.0 }
 0x4cc   :  { %v4200_v44 = vrot.slane %v4073_v0, 7  ;;  %v10121_v55 = vsel %vm425_vm1, %v4176_v42, 0.0  ;;  %v10124_v6 = vsel %vm425_vm1, %v4180_v63, 0.0  ;;  %v10127_v34 = vsel %vm425_vm1, %v4184_v37, 0.0  ;;  %v4016_v42 = vpop.f32.mrb[240].mxu1 }
 0x4cd   :  { %v10130_v17 = vsel %vm425_vm1, %v4188_v35, 0.0  ;;  %v4206_v28 = vrot.slane %v4074_v10, 1  ;;  %v4210_v9 = vrot.slane %v4074_v10, 2  ;;  %v4214_v7 = vrot.slane %v4074_v10, 3  ;;  %v7286_v61 = vpop.f32.mrb[241].mxu1 }
 0x4ce   :  { %v4218_v1 = vrot.slane %v4074_v10, 4  ;;  %v10133_v54 = vsel %vm425_vm1, %v4192_v48, 0.0  ;;  %v10136_v13 = vsel %vm425_vm1, %v4196_v51, 0.0  ;;  %v4222_v46 = vrot.slane %v4074_v10, 5 }
 0x4cf   :  { %v4062_v0 = vadd.f32 %v10030_v15, %v4043_v36  ;;  %v10140_v31 = vsel %vm425_vm1, %v4200_v44, 0.0  ;;  %v10143_v21 = vsel %vm425_vm1, %v4074_v10, 0.0  ;;  %v4226_v39 = vrot.slane %v4074_v10, 6 }
 0x4d0   :  { %v4230_v60 = vrot.slane %v4074_v10, 7  ;;  %v4063_v63 = vadd.f32 %v10030_v15, %v4044_v19  ;;  %v4064_v37 = vadd.f32 %v10030_v15, %v4045_v2  ;;  %v10150_v35 = vadd.f32 %v4016_v42, %v10017_v38  ;;  %v10164_v10 = vpop.f32.mrb[242].mxu1 }
 0x4d1   :  { %v10145_v30 = vmax.f32 %v4062_v0, 0.0  ;;  %v10153_v26 = vsel %vm425_vm1, %v4206_v28, 0.0  ;;  %v10156_v48 = vsel %vm425_vm1, %v4210_v9, 0.0  ;;  %v10159_v51 = vsel %vm425_vm1, %v4214_v7, 0.0  ;;  %v7287_v40 = vpop.f32.mrb[243].mxu1 }
 0x4d2   :  { %v10162_v59 = vsel %vm425_vm1, %v4218_v1, 0.0  ;;  %v10167_v36 = vsel %vm425_vm1, %v4222_v46, 0.0  ;;  %v10173_v44 = vsel %vm425_vm1, %v4226_v39, 0.0  ;;  %v10176_v28 = vsel %vm425_vm1, %v4230_v60, 0.0 }
 0x4d3   :  { %11244 = vst [vmem:[#allocation39_spill] sm:$0xff] %v10167_v36  ;;  %v4236_v38 = vrot.slane %v10145_v30, 1  ;;  %v4240_v19 = vrot.slane %v10145_v30, 2  ;;  %v4244_v2 = vrot.slane %v10145_v30, 3  ;;  %11245 = vst [vmem:[#allocation38_spill] sm:$0xff] %v10173_v44  ;;  %v10180_v9 = vsel %vm425_vm1, %v10145_v30, 0.0 }
 0x4d4   :  { %11246 = vst [vmem:[#allocation56_spill] sm:$0xff] %v10176_v28  ;;  %11247 = vst [vmem:[#allocation55_spill] sm:$0xff] %v10180_v9  ;;  %v10182_v7 = vmax.f32 %v4063_v63, 0.0  ;;  %v4248_v1 = vrot.slane %v10145_v30, 4  ;;  %v4252_v46 = vrot.slane %v10145_v30, 5  ;;  %v4256_v0 = vrot.slane %v10145_v30, 6 }
 0x4d5   :  { %v4077_v42 = vmax.f32 %v4064_v37, 0.0  ;;  %v10188_v61 = vsel %vm425_vm1, %v4236_v38, 0.0  ;;  %v10191_v39 = vsel %vm425_vm1, %v4240_v19, 0.0  ;;  %v10194_v60 = vsel %vm425_vm1, %v4244_v2, 0.0 }
 0x4d6   :  { %11248 = vst [vmem:[#allocation41_spill] sm:$0xff] %v10188_v61  ;;  %11249 = vst [vmem:[#allocation40_spill] sm:$0xff] %v10191_v39  ;;  %v10199_v63 = vsel %vm4084_vm7, %v10182_v7, %v10037_v27  ;;  %v4088_v40 = vrot.slane %v10182_v7, 1  ;;  %v4092_v3 = vrot.slane %v10182_v7, 2  ;;  %v4096_v37 = vrot.slane %v10182_v7, 3  ;;  %v4024_v39 = vpop.f32.mrb[244].mxu1 }
 0x4d7   :  { %11250 = vst [vmem:[#allocation58_spill] sm:$0xff] %v10194_v60  ;;  %v4100_v38 = vrot.slane %v10182_v7, 4  ;;  %v4104_v61 = vrot.slane %v10182_v7, 5  ;;  %v4108_v19 = vrot.slane %v10182_v7, 6  ;;  %v4112_v60 = vrot.slane %v4077_v42, 7  ;;  %v7290_v36 = vpop.f32.mrb[245].mxu1 }
 0x4d8   :  { %v10211_v27 = vsel %vm4084_vm7, %v4088_v40, %v10041_v29  ;;  %v10215_v28 = vsel %vm4084_vm7, %v4092_v3, %v10044_v47  ;;  %v10219_v9 = vsel %vm4084_vm7, %v4096_v37, %v10049_v22  ;;  %v4027_v22 = vpop.f32.mrb[246].mxu1  ;;  %v10251_v37 = vsel %vm4084_vm7, %v4077_v42, %v10066_v58 }
 0x4d9   :  { %v10223_v44 = vsel %vm4084_vm7, %v4100_v38, %v10054_v23  ;;  %v10227_v2 = vsel %vm4084_vm7, %v4104_v61, %v10057_v20  ;;  %v10231_v29 = vsel %vm4084_vm7, %v4108_v19, %v10060_v53  ;;  %v7291_v61 = vpop.f32.mrb[247].mxu1  ;;  %v10247_v40 = vsel %vm4084_vm7, %v4112_v60, %v10063_v49  ;;  %11255 = vst [vmem:[#allocation57_spill] sm:$0xff] %v10251_v37 }
 0x4da   :  { %11251 = vst [vmem:[#allocation54_spill] sm:$0xff] %v10223_v44  ;;  %11252 = vst [vmem:[#allocation43_spill] sm:$0xff] %v10227_v2  ;;  %v4118_v38 = vrot.slane %v4077_v42, 1  ;;  %v4122_v19 = vrot.slane %v4077_v42, 2  ;;  %v4126_v47 = vrot.slane %v4077_v42, 3  ;;  %v4130_v23 = vrot.slane %v4077_v42, 4 }
 0x4db   :  { %11253 = vst [vmem:[#allocation42_spill] sm:$0xff] %v10231_v29  ;;  %11254 = vst [vmem:[#allocation60_spill] sm:$0xff] %v10247_v40  ;;  %v4134_v36 = vrot.slane %v4077_v42, 5  ;;  %v4138_v3 = vrot.slane %v4077_v42, 6  ;;  %v4048_v58 = vadd.f32 %v4024_v39, %v10023_v24  ;;  %v10304_v53 = vsel %vm425_vm1, %v4252_v46, 0.0 }
 0x4dc   :  { %v10255_v20 = vsel %vm4084_vm7, %v4118_v38, %v10069_v62  ;;  %v10259_v61 = vsel %vm4084_vm7, %v4122_v19, %v10072_v16  ;;  %v10267_v60 = vsel %vm4084_vm7, %v4126_v47, %v10075_v52  ;;  %v10271_v42 = vsel %vm4084_vm7, %v4130_v23, %v10078_v50  ;;  %v4032_v47 = vpop.f32.mrb[248].mxu1 }
 0x4dd   :  { %11256 = vst [vmem:[#allocation45_spill] sm:$0xff] %v10255_v20  ;;  %11257 = vst [vmem:[#allocation44_spill] sm:$0xff] %v10259_v61  ;;  %v10275_v62 = vsel %vm4084_vm7, %v4134_v36, %v10081_v4  ;;  %v10279_v16 = vsel %vm4084_vm7, %v4138_v3, %v10084_v8  ;;  %v4065_v3 = vadd.f32 %v10030_v15, %v10150_v35  ;;  %v7294_v36 = vpop.f32.mrb[249].mxu1  ;;  %v10298_v19 = vsel %vm425_vm1, %v4248_v1, 0.0  ;;  %v11282_v4 = vld [vmem:[#allocation40_spill] sm:$0xff] }
 0x4de   :  { %11258 = vst [vmem:[#allocation61_spill] sm:$0xff] %v10267_v60  ;;  %11259 = vst [vmem:[#allocation59_spill] sm:$0xff] %v10271_v42  ;;  %v4047_v23 = vadd.f32 %v10164_v10, %v10019_v45  ;;  %v4049_v50 = vadd.f32 %v4027_v22, %v10025_v33  ;;  %v4050_v52 = vadd.f32 %v4032_v47, %v10028_v32  ;;  %v4035_v38 = vpop.f32.mrb[250].mxu1  ;;  %v10307_v49 = vsel %vm425_vm1, %v4256_v0, 0.0  ;;  %v11284_v8 = vld [vmem:[#allocation58_spill] sm:$0xff] }
 0x4df   :  { %v4078_v35 = vmax.f32 %v4065_v3, 0.0  ;;  %v7295_v10 = vpop.f32.mrb[251].mxu1  ;;  %v4067_v36 = vadd.f32 %v10030_v15, %v4048_v58 }
 0x4e0   :  { %v4066_v1 = vadd.f32 %v10030_v15, %v4047_v23  ;;  %v4068_v24 = vadd.f32 %v10030_v15, %v4049_v50  ;;  %v10314_v33 = vadd.f32 %v10030_v15, %v4050_v52 }
 0x4e1   :  { %v4142_v32 = vrot.slane %v4078_v35, 7  ;;  %v10318_v46 = vsel %vm4084_vm7, %v4078_v35, %v10090_v14  ;;  %v4148_v0 = vrot.slane %v4078_v35, 1  ;;  %v4152_v39 = vrot.slane %v4078_v35, 2 }
 0x4e2   :  { %v4156_v22 = vrot.slane %v4078_v35, 3  ;;  %v4160_v38 = vrot.slane %v4078_v35, 4  ;;  %v4164_v47 = vrot.slane %v4078_v35, 5  ;;  %v4168_v3 = vrot.slane %v4078_v35, 6 }
 0x4e3   :  { %v10322_v23 = vsel %vm4084_vm7, %v4142_v32, %v10087_v11  ;;  %v10326_v58 = vsel %vm4084_vm7, %v4148_v0, %v10093_v25  ;;  %v10330_v15 = vsel %vm4084_vm7, %v4152_v39, %v10096_v56  ;;  %v4079_v32 = vmax.f32 %v4066_v1, 0.0 }
 0x4e4   :  { %v10336_v52 = vsel %vm4084_vm7, %v4156_v22, %v10099_v57  ;;  %v10340_v50 = vsel %vm4084_vm7, %v4160_v38, %v10103_v18  ;;  %v10344_v11 = vsel %vm4084_vm7, %v4164_v47, %v10106_v5  ;;  %v10348_v25 = vsel %vm4084_vm7, %v4168_v3, %v10112_v12 }
 0x4e5   :  { %v4080_v0 = vmax.f32 %v4067_v36, 0.0  ;;  %v10364_v39 = vmax.f32 %v4068_v24, 0.0  ;;  %v4082_v22 = vmax.f32 %v10314_v33, 0.0  ;;  %v10369_v38 = vsel %vm425_vm1, %v10182_v7, 0.0 }
 0x4e6   :  { %v4172_v47 = vrot.slane %v4079_v32, 7  ;;  %v10373_v3 = vsel %vm4084_vm7, %v4079_v32, %v10118_v43  ;;  %v4178_v18 = vrot.slane %v4079_v32, 1  ;;  %v4182_v10 = vrot.slane %v4079_v32, 2  ;;  %v11280_v43 = vld [vmem:[#allocation41_spill] sm:$0xff] }
 0x4e7   :  { %v4186_v35 = vrot.slane %v4079_v32, 3  ;;  %v4190_v5 = vrot.slane %v4079_v32, 4  ;;  %v4194_v12 = vrot.slane %v4079_v32, 5  ;;  %v4198_v1 = vrot.slane %v4079_v32, 6 }
 0x4e8   :  { %v10377_v36 = vsel %vm4084_vm7, %v4172_v47, %v10115_v41  ;;  %v10381_v24 = vsel %vm4084_vm7, %v4178_v18, %v10121_v55  ;;  %v10385_v7 = vsel %vm4084_vm7, %v4182_v10, %v10124_v6  ;;  %v10421_v10 = vsel %vm4084_vm7, %v4080_v0, %v10143_v21  ;;  %v11278_v6 = vld [vmem:[#allocation56_spill] sm:$0xff] }
 0x4e9   :  { %11260 = vst [vmem:[#allocation47_spill] sm:$0xff] %v10381_v24  ;;  %11261 = vst [vmem:[#allocation46_spill] sm:$0xff] %v10385_v7  ;;  %v10391_v57 = vsel %vm4084_vm7, %v4186_v35, %v10127_v34  ;;  %v10395_v32 = vsel %vm4084_vm7, %v4190_v5, %v10130_v17  ;;  %v10399_v41 = vsel %vm4084_vm7, %v4194_v12, %v10133_v54  ;;  %v4202_v5 = vrot.slane %v4080_v0, 7 }
 0x4ea   :  { %11262 = vst [vmem:[#allocation63_spill] sm:$0xff] %v10391_v57  ;;  %11263 = vst [vmem:[#allocation62_spill] sm:$0xff] %v10395_v32  ;;  %v10403_v55 = vsel %vm4084_vm7, %v4198_v1, %v10136_v13  ;;  %v4208_v12 = vrot.slane %v4080_v0, 1  ;;  %v4212_v47 = vrot.slane %v4080_v0, 2  ;;  %v4216_v1 = vrot.slane %v4080_v0, 3 }
 0x4eb   :  { %11264 = vst [vmem:[#allocation50_spill] sm:$0xff] %v10399_v41  ;;  %11265 = vst [vmem:[#allocation48_spill] sm:$0xff] %v10403_v55  ;;  %v10425_v17 = vsel %vm4084_vm7, %v4202_v5, %v10140_v31  ;;  %v4220_v18 = vrot.slane %v4080_v0, 4  ;;  %v4224_v54 = vrot.slane %v4080_v0, 5  ;;  %v4228_v34 = vrot.slane %v4080_v0, 6  ;;  %v11272_v0 = vld [vmem:[#allocation39_spill] sm:$0xff] }
 0x4ec   :  { %11266 = vst [vmem:[#allocation64_spill] sm:$0xff] %v10421_v10  ;;  %11267 = vst [vmem:[#allocation49_spill] sm:$0xff] %v10425_v17  ;;  %v10429_v35 = vsel %vm4084_vm7, %v4208_v12, %v10153_v26  ;;  %v10433_v13 = vsel %vm4084_vm7, %v4212_v47, %v10156_v48  ;;  %v10437_v21 = vsel %vm4084_vm7, %v4216_v1, %v10159_v51  ;;  %v11274_v26 = vld [vmem:[#allocation38_spill] sm:$0xff]  ;;  %v4232_v1 = vrot.slane %v10364_v39, 7 }
 0x4ed   :  { %11268 = vst [vmem:[#allocation65_spill] sm:$0xff] %v10429_v35  ;;  %11269 = vst [vmem:[#allocation66_spill] sm:$0xff] %v10433_v13  ;;  %v10443_v31 = vsel %vm4084_vm7, %v4220_v18, %v10162_v59  ;;  %v10447_v5 = vsel %vm4084_vm7, %v4224_v54, %v11272_v0  ;;  %v10451_v12 = vsel %vm4084_vm7, %v4228_v34, %v11274_v26  ;;  %v11276_v0 = vld [vmem:[#allocation55_spill] sm:$0xff]  ;;  %v4238_v51 = vrot.slane %v10364_v39, 1 }
 0x4ee   :  { %11270 = vst [vmem:[#allocation67_spill] sm:$0xff] %v10437_v21  ;;  %11271 = vst [vmem:[#allocation68_spill] sm:$0xff] %v10443_v31  ;;  %v10471_v26 = vsel %vm4084_vm7, %v10364_v39, %v11276_v0  ;;  %v4242_v59 = vrot.slane %v10364_v39, 2  ;;  %v4246_v47 = vrot.slane %v10364_v39, 3  ;;  %v4250_v18 = vrot.slane %v10364_v39, 4 }
 0x4ef   :  { %11273 = vst [vmem:[#allocation70_spill] sm:$0xff] %v10447_v5  ;;  %11275 = vst [vmem:[#allocation69_spill] sm:$0xff] %v10451_v12  ;;  %v10479_v54 = vsel %vm4084_vm7, %v4232_v1, %v11278_v6  ;;  %v4254_v34 = vrot.slane %v10364_v39, 5  ;;  %v4258_v48 = vrot.slane %v10364_v39, 6  ;;  %v10487_v56 = vsel %vm4084_vm7, %v4238_v51, %v11280_v43 }
 0x4f0   :  { %11277 = vst [vmem:[#allocation36_spill] sm:$0xff] %v10471_v26  ;;  %11279 = vst [vmem:[#allocation35_spill] sm:$0xff] %v10479_v54  ;;  %v10491_v14 = vsel %vm4084_vm7, %v4242_v59, %v11282_v4  ;;  %v10495_v45 = vsel %vm4084_vm7, %v4246_v47, %v11284_v8  ;;  %v10499_v6 = vsel %vm4084_vm7, %v4250_v18, %v10298_v19  ;;  %v11290_v18 = vrot.slane %v10145_v30, 7 }
 0x4f1   :  { %11281 = vst [vmem:[#allocation37_spill] sm:$0xff] %v10487_v56  ;;  %11283 = vst [vmem:[#allocation51_spill] sm:$0xff] %v10491_v14  ;;  %v10503_v39 = vsel %vm4084_vm7, %v4254_v34, %v10304_v53  ;;  %v10507_v43 = vsel %vm4084_vm7, %v4258_v48, %v10307_v49  ;;  %v4262_v48 = vrot.slane %v4082_v22, 7  ;;  %v10529_v59 = vsel %vm4084_vm7, %v4082_v22, %v10369_v38 }
 0x4f2   :  { %11285 = vst [vmem:[#allocation53_spill] sm:$0xff] %v10495_v45  ;;  %11286 = vst [vmem:[#allocation52_spill] sm:$0xff] %v10499_v6  ;;  %v4261_v34 = vsel %vm425_vm1, %v11290_v18, 0.0 }
 0x4f3   :  { %11287 = vst [vmem:[#allocation39_spill] sm:$0xff] %v10503_v39  ;;  %11288 = vst [vmem:[#allocation38_spill] sm:$0xff] %v10507_v43  ;;  %v10537_v47 = vsel %vm4084_vm7, %v4262_v48, %v4261_v34 }
 0x4f4   :  { %11289 = vst [vmem:[#allocation55_spill] sm:$0xff] %v10529_v59  ;;  %11291 = vst [vmem:[#allocation56_spill] sm:$0xff] %v10537_v47 }
 0x4f5   :  { %7775 = dma.done.wait [#allocation3], 13312 }
 0x4f6   :  { %7776 = vsyncadd [#allocation3], 4294953984  ;;  %v10541_v19 = vld [vmem:[#allocation2] sm:$0xff]  ;;  %v10543_v33 = vld [vmem:[#allocation2 + $0x8] sm:$0xff] }
 0x4f7   :  { %v10545_v22 = vld [vmem:[#allocation2 + $0x10] sm:$0xff]  ;;  %v10547_v30 = vld [vmem:[#allocation2 + $0x18] sm:$0xff]  ;;  %v10549_v38 = vld [vmem:[#allocation2 + $0x20] sm:$0xff] }
 0x4f8   :  { %v10551_v18 = vld [vmem:[#allocation2 + $0x28] sm:$0xff]  ;;  %v10553_v1 = vld [vmem:[#allocation2 + $0x30] sm:$0xff]  ;;  %v10555_v48 = vld [vmem:[#allocation2 + $0x38] sm:$0xff] }
 0x4f9   :  { %v10557_v34 = vld [vmem:[#allocation2 + $0x40] sm:$0xff]  ;;  %v10559_v49 = vld [vmem:[#allocation2 + $0x48] sm:$0xff]  ;;  %v10561_v51 = vld [vmem:[#allocation2 + $0x50] sm:$0xff] }
 0x4fa   :  { %v10563_v53 = vld [vmem:[#allocation2 + $0x58] sm:$0xff]  ;;  %v10565_v8 = vld [vmem:[#allocation2 + $0x60] sm:$0xff]  ;;  %v10567_v4 = vld [vmem:[#allocation2 + $0x68] sm:$0xff] }
 0x4fb   :  { %v10569_v0 = vld [vmem:[#allocation2 + $0x70] sm:$0xff]  ;;  %v10571_v47 = vld [vmem:[#allocation2 + $0x78] sm:$0xff]  ;;  %v10573_v39 = vld [vmem:[#allocation2 + $0x80] sm:$0xff] }
 0x4fc   :  { %v10575_v59 = vld [vmem:[#allocation2 + $0x88] sm:$0xff]  ;;  %v10577_v43 = vld [vmem:[#allocation2 + $0x90] sm:$0xff]  ;;  %v10579_v45 = vld [vmem:[#allocation2 + $0x98] sm:$0xff] }
 0x4fd   :  { %v10581_v56 = vld [vmem:[#allocation2 + $0xa0] sm:$0xff]  ;;  %v10583_v6 = vld [vmem:[#allocation2 + $0xa8] sm:$0xff]  ;;  %v10585_v14 = vld [vmem:[#allocation2 + $0xb0] sm:$0xff] }
 0x4fe   :  { %v10587_v54 = vld [vmem:[#allocation2 + $0xb8] sm:$0xff]  ;;  %v10589_v5 = vld [vmem:[#allocation2 + $0xc0] sm:$0xff]  ;;  %v10591_v26 = vld [vmem:[#allocation2 + $0xc8] sm:$0xff] }
 0x4ff   :  { %v10593_v12 = vld [vmem:[#allocation2 + $0xd0] sm:$0xff]  ;;  %v10595_v21 = vld [vmem:[#allocation2 + $0xd8] sm:$0xff]  ;;  %v10597_v35 = vld [vmem:[#allocation2 + $0xe0] sm:$0xff] }
 0x500   :  { %v10599_v31 = vld [vmem:[#allocation2 + $0xe8] sm:$0xff]  ;;  %v10601_v13 = vld [vmem:[#allocation2 + $0xf0] sm:$0xff]  ;;  %v10603_v17 = vld [vmem:[#allocation2 + $0xf8] sm:$0xff] }
 0x501   :  { %v10605_v41 = vld [vmem:[#allocation2 + $0x100] sm:$0xff]  ;;  %v10607_v10 = vld [vmem:[#allocation2 + $0x108] sm:$0xff]  ;;  %v10609_v55 = vld [vmem:[#allocation2 + $0x110] sm:$0xff] }
 0x502   :  { %11292 = vst [vmem:[#allocation41_spill] sm:$0xff] %v10607_v10  ;;  %11293 = vst [vmem:[#allocation40_spill] sm:$0xff] %v10609_v55  ;;  %v10611_v57 = vld [vmem:[#allocation2 + $0x118] sm:$0xff]  ;;  %v10613_v24 = vld [vmem:[#allocation2 + $0x120] sm:$0xff] }
 0x503   :  { %11294 = vst [vmem:[#allocation58_spill] sm:$0xff] %v10611_v57  ;;  %11295 = vst [vmem:[#allocation71_spill] sm:$0xff] %v10613_v24  ;;  %v10615_v32 = vld [vmem:[#allocation2 + $0x128] sm:$0xff]  ;;  %v10617_v7 = vld [vmem:[#allocation2 + $0x130] sm:$0xff] }
 0x504   :  { %11296 = vst [vmem:[#allocation72_spill] sm:$0xff] %v10615_v32  ;;  %11297 = vst [vmem:[#allocation73_spill] sm:$0xff] %v10617_v7  ;;  %v10619_v42 = vld [vmem:[#allocation2 + $0x138] sm:$0xff]  ;;  %v10621_v61 = vld [vmem:[#allocation2 + $0x140] sm:$0xff] }
 0x505   :  { %11298 = vst [vmem:[#allocation74_spill] sm:$0xff] %v10619_v42  ;;  %v10623_v37 = vld [vmem:[#allocation2 + $0x148] sm:$0xff]  ;;  %v10625_v60 = vld [vmem:[#allocation2 + $0x150] sm:$0xff]  ;;  %v10627_v20 = vld [vmem:[#allocation2 + $0x158] sm:$0xff] }
 0x506   :  { %11299 = vst [vmem:[#allocation75_spill] sm:$0xff] %v10625_v60  ;;  %11300 = vst [vmem:[#allocation76_spill] sm:$0xff] %v10627_v20  ;;  %v10629_v29 = vld [vmem:[#allocation2 + $0x160] sm:$0xff]  ;;  %v10631_v44 = vld [vmem:[#allocation2 + $0x168] sm:$0xff] }
 0x507   :  { %11301 = vst [vmem:[#allocation77_spill] sm:$0xff] %v10629_v29  ;;  %11302 = vst [vmem:[#allocation78_spill] sm:$0xff] %v10631_v44  ;;  %v10633_v57 = vld [vmem:[#allocation2 + $0x170] sm:$0xff]  ;;  %v10635_v24 = vld [vmem:[#allocation2 + $0x178] sm:$0xff] }
 0x508   :  { %11303 = vst [vmem:[#allocation79_spill] sm:$0xff] %v10633_v57  ;;  %11304 = vst [vmem:[#allocation80_spill] sm:$0xff] %v10635_v24  ;;  %v10637_v32 = vld [vmem:[#allocation2 + $0x180] sm:$0xff]  ;;  %v10639_v7 = vld [vmem:[#allocation2 + $0x188] sm:$0xff] }
 0x509   :  { %11305 = vst [vmem:[#allocation81_spill] sm:$0xff] %v10639_v7  ;;  %v10641_v42 = vld [vmem:[#allocation2 + $0x190] sm:$0xff]  ;;  %v10643_v55 = vld [vmem:[#allocation2 + $0x198] sm:$0xff]  ;;  %v10645_v10 = vld [vmem:[#allocation2 + $0x1a0] sm:$0xff] }
 0x50a   :  { %11306 = vst [vmem:[#allocation82_spill] sm:$0xff] %v10641_v42  ;;  %11307 = vst [vmem:[#allocation83_spill] sm:$0xff] %v10643_v55  ;;  %v10647_v60 = vld [vmem:[#allocation2 + $0x1a8] sm:$0xff]  ;;  %v10649_v20 = vld [vmem:[#allocation2 + $0x1b0] sm:$0xff] }
 0x50b   :  { %11308 = vst [vmem:[#allocation84_spill] sm:$0xff] %v10645_v10  ;;  %11309 = vst [vmem:[#allocation85_spill] sm:$0xff] %v10647_v60  ;;  %v10651_v29 = vld [vmem:[#allocation2 + $0x1b8] sm:$0xff]  ;;  %v10653_v44 = vld [vmem:[#allocation2 + $0x1c0] sm:$0xff] }
 0x50c   :  { %11310 = vst [vmem:[#allocation86_spill] sm:$0xff] %v10649_v20  ;;  %11311 = vst [vmem:[#allocation87_spill] sm:$0xff] %v10651_v29  ;;  %v10655_v57 = vld [vmem:[#allocation2 + $0x1c8] sm:$0xff]  ;;  %v10657_v24 = vld [vmem:[#allocation2 + $0x1d0] sm:$0xff] }
 0x50d   :  { %11312 = vst [vmem:[#allocation88_spill] sm:$0xff] %v10655_v57  ;;  %11313 = vst [vmem:[#allocation89_spill] sm:$0xff] %v10657_v24  ;;  %v10659_v40 = vld [vmem:[#allocation2 + $0x1d8] sm:$0xff]  ;;  %v10661_v7 = vld [vmem:[#allocation2 + $0x1e0] sm:$0xff] }
 0x50e   :  { %11314 = vst [vmem:[#allocation90_spill] sm:$0xff] %v10659_v40  ;;  %11315 = vst [vmem:[#allocation91_spill] sm:$0xff] %v10661_v7  ;;  %v10663_v42 = vld [vmem:[#allocation2 + $0x1e8] sm:$0xff]  ;;  %v10665_v55 = vld [vmem:[#allocation2 + $0x1f0] sm:$0xff] }
 0x50f   :  { %11316 = vst [vmem:[#allocation92_spill] sm:$0xff] %v10663_v42  ;;  %11317 = vst [vmem:[#allocation93_spill] sm:$0xff] %v10665_v55  ;;  %v10667_v10 = vld [vmem:[#allocation2 + $0x1f8] sm:$0xff]  ;;  %v10669_v60 = vld [vmem:[#allocation2 + $0x200] sm:$0xff] }
 0x510   :  { %11318 = vst [vmem:[#allocation94_spill] sm:$0xff] %v10667_v10  ;;  %11319 = vst [vmem:[#allocation95_spill] sm:$0xff] %v10669_v60  ;;  %v10671_v20 = vld [vmem:[#allocation2 + $0x208] sm:$0xff]  ;;  %v10673_v29 = vld [vmem:[#allocation2 + $0x210] sm:$0xff] }
 0x511   :  { %11320 = vst [vmem:[#allocation96_spill] sm:$0xff] %v10671_v20  ;;  %11321 = vst [vmem:[#allocation97_spill] sm:$0xff] %v10673_v29  ;;  %v10675_v2 = vld [vmem:[#allocation2 + $0x218] sm:$0xff]  ;;  %v10677_v57 = vld [vmem:[#allocation2 + $0x220] sm:$0xff] }
 0x512   :  { %11322 = vst [vmem:[#allocation98_spill] sm:$0xff] %v10675_v2  ;;  %11323 = vst [vmem:[#allocation99_spill] sm:$0xff] %v10677_v57  ;;  %v10679_v24 = vld [vmem:[#allocation2 + $0x228] sm:$0xff]  ;;  %v10681_v40 = vld [vmem:[#allocation2 + $0x230] sm:$0xff] }
 0x513   :  { %11324 = vst [vmem:[#allocation100_spill] sm:$0xff] %v10679_v24  ;;  %11325 = vst [vmem:[#allocation101_spill] sm:$0xff] %v10681_v40  ;;  %v10683_v7 = vld [vmem:[#allocation2 + $0x238] sm:$0xff]  ;;  %v10685_v42 = vld [vmem:[#allocation2 + $0x240] sm:$0xff] }
 0x514   :  { %11326 = vst [vmem:[#allocation102_spill] sm:$0xff] %v10683_v7  ;;  %11327 = vst [vmem:[#allocation103_spill] sm:$0xff] %v10685_v42  ;;  %v10687_v55 = vld [vmem:[#allocation2 + $0x248] sm:$0xff]  ;;  %v10689_v10 = vld [vmem:[#allocation2 + $0x250] sm:$0xff] }
 0x515   :  { %11328 = vst [vmem:[#allocation104_spill] sm:$0xff] %v10687_v55  ;;  %11329 = vst [vmem:[#allocation105_spill] sm:$0xff] %v10689_v10  ;;  %v10691_v60 = vld [vmem:[#allocation2 + $0x258] sm:$0xff]  ;;  %v10693_v20 = vld [vmem:[#allocation2 + $0x260] sm:$0xff] }
 0x516   :  { %11330 = vst [vmem:[#allocation106_spill] sm:$0xff] %v10691_v60  ;;  %11331 = vst [vmem:[#allocation107_spill] sm:$0xff] %v10693_v20  ;;  %v10695_v29 = vld [vmem:[#allocation2 + $0x268] sm:$0xff]  ;;  %v10697_v2 = vld [vmem:[#allocation2 + $0x270] sm:$0xff] }
 0x517   :  { %11332 = vst [vmem:[#allocation108_spill] sm:$0xff] %v10695_v29  ;;  %11333 = vst [vmem:[#allocation109_spill] sm:$0xff] %v10697_v2  ;;  %v10699_v57 = vld [vmem:[#allocation2 + $0x278] sm:$0xff]  ;;  %v10701_v24 = vld [vmem:[#allocation2 + $0x280] sm:$0xff] }
 0x518   :  { %11334 = vst [vmem:[#allocation110_spill] sm:$0xff] %v10699_v57  ;;  %11335 = vst [vmem:[#allocation111_spill] sm:$0xff] %v10701_v24  ;;  %v10703_v40 = vld [vmem:[#allocation2 + $0x288] sm:$0xff]  ;;  %v10705_v7 = vld [vmem:[#allocation2 + $0x290] sm:$0xff] }
 0x519   :  { %11336 = vst [vmem:[#allocation112_spill] sm:$0xff] %v10703_v40  ;;  %11337 = vst [vmem:[#allocation113_spill] sm:$0xff] %v10705_v7  ;;  %v10707_v42 = vld [vmem:[#allocation2 + $0x298] sm:$0xff]  ;;  %v10709_v55 = vld [vmem:[#allocation2 + $0x2a0] sm:$0xff] }
 0x51a   :  { %11338 = vst [vmem:[#allocation114_spill] sm:$0xff] %v10707_v42  ;;  %11339 = vst [vmem:[#allocation115_spill] sm:$0xff] %v10709_v55  ;;  %v10711_v10 = vld [vmem:[#allocation2 + $0x2a8] sm:$0xff]  ;;  %v10713_v60 = vld [vmem:[#allocation2 + $0x2b0] sm:$0xff] }
 0x51b   :  { %11340 = vst [vmem:[#allocation116_spill] sm:$0xff] %v10711_v10  ;;  %11341 = vst [vmem:[#allocation117_spill] sm:$0xff] %v10713_v60  ;;  %v10715_v20 = vld [vmem:[#allocation2 + $0x2b8] sm:$0xff]  ;;  %v10717_v29 = vld [vmem:[#allocation2 + $0x2c0] sm:$0xff] }
 0x51c   :  { %11342 = vst [vmem:[#allocation118_spill] sm:$0xff] %v10715_v20  ;;  %11343 = vst [vmem:[#allocation119_spill] sm:$0xff] %v10717_v29  ;;  %v10719_v2 = vld [vmem:[#allocation2 + $0x2c8] sm:$0xff]  ;;  %v10721_v57 = vld [vmem:[#allocation2 + $0x2d0] sm:$0xff] }
 0x51d   :  { %11344 = vst [vmem:[#allocation120_spill] sm:$0xff] %v10719_v2  ;;  %11345 = vst [vmem:[#allocation121_spill] sm:$0xff] %v10721_v57  ;;  %v10723_v24 = vld [vmem:[#allocation2 + $0x2d8] sm:$0xff]  ;;  %v10725_v40 = vld [vmem:[#allocation2 + $0x2e0] sm:$0xff] }
 0x51e   :  { %11346 = vst [vmem:[#allocation122_spill] sm:$0xff] %v10723_v24  ;;  %11347 = vst [vmem:[#allocation123_spill] sm:$0xff] %v10725_v40  ;;  %v10727_v7 = vld [vmem:[#allocation2 + $0x2e8] sm:$0xff]  ;;  %v10729_v42 = vld [vmem:[#allocation2 + $0x2f0] sm:$0xff] }
 0x51f   :  { %11348 = vst [vmem:[#allocation124_spill] sm:$0xff] %v10727_v7  ;;  %11349 = vst [vmem:[#allocation125_spill] sm:$0xff] %v10729_v42  ;;  %v10731_v55 = vld [vmem:[#allocation2 + $0x2f8] sm:$0xff]  ;;  %v10733_v10 = vld [vmem:[#allocation2 + $0x300] sm:$0xff] }
 0x520   :  { %11350 = vst [vmem:[#allocation126_spill] sm:$0xff] %v10731_v55  ;;  %11351 = vst [vmem:[#allocation127_spill] sm:$0xff] %v10733_v10  ;;  %v10735_v60 = vld [vmem:[#allocation2 + $0x308] sm:$0xff]  ;;  %v10737_v20 = vld [vmem:[#allocation2 + $0x310] sm:$0xff] }
 0x521   :  { %11352 = vst [vmem:[#allocation128_spill] sm:$0xff] %v10735_v60  ;;  %11353 = vst [vmem:[#allocation129_spill] sm:$0xff] %v10737_v20  ;;  %v10739_v29 = vld [vmem:[#allocation2 + $0x318] sm:$0xff]  ;;  %v10741_v2 = vld [vmem:[#allocation2 + $0x320] sm:$0xff] }
 0x522   :  { %11354 = vst [vmem:[#allocation130_spill] sm:$0xff] %v10739_v29  ;;  %11355 = vst [vmem:[#allocation131_spill] sm:$0xff] %v10741_v2  ;;  %v10743_v57 = vld [vmem:[#allocation2 + $0x328] sm:$0xff]  ;;  %v10745_v24 = vld [vmem:[#allocation2 + $0x330] sm:$0xff] }
 0x523   :  { %11356 = vst [vmem:[#allocation132_spill] sm:$0xff] %v10743_v57  ;;  %11357 = vst [vmem:[#allocation133_spill] sm:$0xff] %v10745_v24  ;;  %v10747_v40 = vld [vmem:[#allocation2 + $0x338] sm:$0xff] }
 0x524   :  { %11358 = vst [vmem:[#allocation134_spill] sm:$0xff] %v10747_v40 }
 0x525   :  { %7777 = dma.done.wait [#allocation3 + $0x1], 12288 }
 0x526   :  { %7778 = vsyncadd [#allocation3 + $0x1], 4294955008  ;;  %v11359_v55 = vpack.c.bf16 %v10279_v16, %v10279_v16  ;;  %v11360_v60 = vpack.c.bf16 %v10318_v46, %v10318_v46  ;;  %v4435_v20 = vld [vmem:[#allocation2 + $0x380] sm:$0xff]  ;;  %v4436_v2 = vld [vmem:[#allocation2 + $0x388] sm:$0xff] }
 0x527   :  { %v4451_v29 = vld [vmem:[#allocation2 + $0x400] sm:$0xff]  ;;  %6192 = vmatprep.subr.bf16.mxu0 %v4435_v20  ;;  %v4452_v24 = vld [vmem:[#allocation2 + $0x408] sm:$0xff]  ;;  %v4437_v16 = vld [vmem:[#allocation2 + $0x390] sm:$0xff] }
 0x528   :  { %4555 = vmatprep.mubr.bf16.mxu0 %v11359_v55  ;;  %4595 = vmatprep.mubr.bf16.mxu1 %v11360_v60  ;;  %v4427_v10 = vld [vmem:[#allocation2 + $0x340] sm:$0xff]  ;;  %v4428_v40 = vld [vmem:[#allocation2 + $0x348] sm:$0xff]  ;;  %v4453_v55 = vld [vmem:[#allocation2 + $0x410] sm:$0xff] }
 0x529   :  { %6214 = vmatprep.subr.bf16.mxu1 %v4451_v29  ;;  %v4443_v57 = vld [vmem:[#allocation2 + $0x3c0] sm:$0xff]  ;;  %6193 = vmatpush3.bf16.msra.mxu0 %v4427_v10  ;;  %v4444_v42 = vld [vmem:[#allocation2 + $0x3c8] sm:$0xff]  ;;  %v4429_v60 = vld [vmem:[#allocation2 + $0x350] sm:$0xff] }
 0x52a   :  { %6215 = vmatpush3.bf16.msra.mxu1 %v4443_v57  ;;  %6194 = vmatprep.subr.bf16.mxu0 %v4436_v2  ;;  %v4445_v46 = vld [vmem:[#allocation2 + $0x3d0] sm:$0xff]  ;;  %v4438_v7 = vld [vmem:[#allocation2 + $0x398] sm:$0xff]  ;;  %v4439_v2 = vld [vmem:[#allocation2 + $0x3a0] sm:$0xff] }
 0x52b   :  { %6216 = vmatprep.subr.bf16.mxu1 %v4452_v24  ;;  %v4454_v20 = vld [vmem:[#allocation2 + $0x418] sm:$0xff]  ;;  %v4455_v24 = vld [vmem:[#allocation2 + $0x420] sm:$0xff]  ;;  %v4440_v10 = vld [vmem:[#allocation2 + $0x3a8] sm:$0xff] }
 0x52c   :  { %v4430_v29 = vld [vmem:[#allocation2 + $0x358] sm:$0xff] }
 0x52d   :  { %6195 = vmatpush3.bf16.msra.mxu0 %v4428_v40  ;;  %v4446_v57 = vld [vmem:[#allocation2 + $0x3d8] sm:$0xff]  ;;  %v4431_v40 = vld [vmem:[#allocation2 + $0x360] sm:$0xff] }
 0x52e   :  { %6217 = vmatpush3.bf16.msra.mxu1 %v4444_v42  ;;  %6196 = vmatprep.subr.bf16.mxu0 %v4437_v16  ;;  %v4447_v42 = vld [vmem:[#allocation2 + $0x3e0] sm:$0xff]  ;;  %v4456_v16 = vld [vmem:[#allocation2 + $0x428] sm:$0xff] }
 0x52f   :  { %6218 = vmatprep.subr.bf16.mxu1 %v4453_v55  ;;  %v4432_v55 = vld [vmem:[#allocation2 + $0x368] sm:$0xff] }
 0x531   :  { %6197 = vmatpush3.bf16.msra.mxu0 %v4429_v60  ;;  %v4448_v60 = vld [vmem:[#allocation2 + $0x3e8] sm:$0xff] }
 0x532   :  { %6219 = vmatpush3.bf16.msra.mxu1 %v4445_v46  ;;  %6198 = vmatprep.subr.bf16.mxu0 %v4438_v7  ;;  %v4441_v7 = vld [vmem:[#allocation2 + $0x3b0] sm:$0xff] }
 0x533   :  { %6220 = vmatprep.subr.bf16.mxu1 %v4454_v20  ;;  %v4457_v46 = vld [vmem:[#allocation2 + $0x430] sm:$0xff] }
 0x534   :  { %v4433_v20 = vld [vmem:[#allocation2 + $0x370] sm:$0xff] }
 0x535   :  { %6199 = vmatpush3.bf16.msra.mxu0 %v4430_v29  ;;  %v4449_v29 = vld [vmem:[#allocation2 + $0x3f0] sm:$0xff] }
 0x536   :  { %6221 = vmatpush3.bf16.msra.mxu1 %v4446_v57  ;;  %6200 = vmatprep.subr.bf16.mxu0 %v4439_v2  ;;  %v4442_v57 = vld [vmem:[#allocation2 + $0x3b8] sm:$0xff] }
 0x537   :  { %6222 = vmatprep.subr.bf16.mxu1 %v4455_v24  ;;  %v4458_v2 = vld [vmem:[#allocation2 + $0x438] sm:$0xff] }
 0x538   :  { %v4434_v24 = vld [vmem:[#allocation2 + $0x378] sm:$0xff] }
 0x539   :  { %6201 = vmatpush3.bf16.msra.mxu0 %v4431_v40  ;;  %v4450_v40 = vld [vmem:[#allocation2 + $0x3f8] sm:$0xff] }
 0x53a   :  { %6223 = vmatpush3.bf16.msra.mxu1 %v4447_v42  ;;  %6202 = vmatprep.subr.bf16.mxu0 %v4440_v10  ;;  %v4467_v42 = vld [vmem:[#allocation2 + $0x480] sm:$0xff] }
 0x53b   :  { %6224 = vmatprep.subr.bf16.mxu1 %v4456_v16  ;;  %v4483_v10 = vld [vmem:[#allocation2 + $0x500] sm:$0xff] }
 0x53c   :  { %v4459_v16 = vld [vmem:[#allocation2 + $0x440] sm:$0xff] }
 0x53d   :  { %6203 = vmatpush3.bf16.msra.mxu0 %v4432_v55  ;;  %v4475_v55 = vld [vmem:[#allocation2 + $0x4c0] sm:$0xff] }
 0x53e   :  { %6225 = vmatpush3.bf16.msra.mxu1 %v4448_v60  ;;  %6204 = vmatprep.subr.bf16.mxu0 %v4441_v7  ;;  %v4468_v60 = vld [vmem:[#allocation2 + $0x488] sm:$0xff] }
 0x53f   :  { %6226 = vmatprep.subr.bf16.mxu1 %v4457_v46  ;;  %v4484_v7 = vld [vmem:[#allocation2 + $0x508] sm:$0xff]  ;;  %v11361_v46 = vpack.c.bf16 %v10275_v62, %v10275_v62  ;;  %v11364_v62 = vpack.c.bf16 %v10340_v50, %v10340_v50  ;;  %v4463_v50 = vld [vmem:[#allocation2 + $0x460] sm:$0xff] }
 0x541   :  { %6205 = vmatpush3.bf16.msra.mxu0 %v4433_v20  ;;  %v11362_v20 = vpack.c.bf16 %v10322_v23, %v10322_v23  ;;  %v4461_v23 = vld [vmem:[#allocation2 + $0x450] sm:$0xff] }
 0x542   :  { %6227 = vmatpush3.bf16.msra.mxu1 %v4449_v29  ;;  %6206 = vmatprep.subr.bf16.mxu0 %v4442_v57  ;;  %v4460_v29 = vld [vmem:[#allocation2 + $0x448] sm:$0xff] }
 0x543   :  { %6228 = vmatprep.subr.bf16.mxu1 %v4458_v2  ;;  %v4476_v57 = vld [vmem:[#allocation2 + $0x4c8] sm:$0xff]  ;;  %v4469_v2 = vld [vmem:[#allocation2 + $0x490] sm:$0xff] }
 0x545   :  { %6207 = vmatpush3.bf16.msra.mxu0 %v4434_v24  ;;  %v4485_v24 = vld [vmem:[#allocation2 + $0x510] sm:$0xff] }
 0x546   :  { %6229 = vmatpush3.bf16.msra.mxu1 %v4450_v40  ;;  %6236 = vmatprep.subr.bf16.mxu0 %v4467_v42  ;;  %v11363_v40 = vpack.c.bf16 %v10330_v15, %v10330_v15  ;;  %v4477_v42 = vld [vmem:[#allocation2 + $0x4d0] sm:$0xff]  ;;  %v4471_v15 = vld [vmem:[#allocation2 + $0x4a0] sm:$0xff] }
 0x547   :  { %6258 = vmatprep.subr.bf16.mxu1 %v4483_v10  ;;  %v4470_v10 = vld [vmem:[#allocation2 + $0x498] sm:$0xff] }
 0x548   :  { %4556 = vmatmul.mubr.bf16.vlgmr.msra.gmra.mrb[252].mxu0 %v11361_v46  ;;  %v4479_v46 = vld [vmem:[#allocation2 + $0x4e0] sm:$0xff] }
 0x549   :  { %4596 = vmatmul.mubr.bf16.vlgmr.msra.gmra.mrb[252].mxu1 %v11362_v20  ;;  %6237 = vmatpush3.bf16.msra.mxu0 %v4459_v16  ;;  %v4486_v16 = vld [vmem:[#allocation2 + $0x518] sm:$0xff]  ;;  %v4472_v20 = vld [vmem:[#allocation2 + $0x4a8] sm:$0xff] }
 0x54a   :  { %6259 = vmatpush3.bf16.msra.mxu1 %v4475_v55  ;;  %6238 = vmatprep.subr.bf16.mxu0 %v4468_v60  ;;  %v4462_v55 = vld [vmem:[#allocation2 + $0x458] sm:$0xff] }
 0x54b   :  { %6260 = vmatprep.subr.bf16.mxu1 %v4484_v7  ;;  %4635 = vmatprep.mubr.bf16.mxu0 %v11363_v40  ;;  %v4478_v60 = vld [vmem:[#allocation2 + $0x4d8] sm:$0xff]  ;;  %v4487_v7 = vld [vmem:[#allocation2 + $0x520] sm:$0xff]  ;;  %v4489_v40 = vld [vmem:[#allocation2 + $0x530] sm:$0xff] }
 0x54c   :  { %4675 = vmatprep.mubr.bf16.mxu1 %v11364_v62  ;;  %v4465_v62 = vld [vmem:[#allocation2 + $0x470] sm:$0xff] }
 0x54d   :  { %6239 = vmatpush3.bf16.msra.mxu0 %v4460_v29  ;;  %v4488_v29 = vld [vmem:[#allocation2 + $0x528] sm:$0xff] }
 0x54e   :  { %6261 = vmatpush3.bf16.msra.mxu1 %v4476_v57  ;;  %6240 = vmatprep.subr.bf16.mxu0 %v4469_v2  ;;  %v4464_v57 = vld [vmem:[#allocation2 + $0x468] sm:$0xff] }
 0x54f   :  { %6262 = vmatprep.subr.bf16.mxu1 %v4485_v24  ;;  %v4480_v2 = vld [vmem:[#allocation2 + $0x4e8] sm:$0xff]  ;;  %v4473_v24 = vld [vmem:[#allocation2 + $0x4b0] sm:$0xff] }
 0x551   :  { %6241 = vmatpush3.bf16.msra.mxu0 %v4461_v23  ;;  %v4481_v23 = vld [vmem:[#allocation2 + $0x4f0] sm:$0xff] }
 0x552   :  { %6263 = vmatpush3.bf16.msra.mxu1 %v4477_v42  ;;  %6242 = vmatprep.subr.bf16.mxu0 %v4470_v10  ;;  %v4474_v42 = vld [vmem:[#allocation2 + $0x4b8] sm:$0xff] }
 0x553   :  { %6264 = vmatprep.subr.bf16.mxu1 %v4486_v16  ;;  %v4490_v10 = vld [vmem:[#allocation2 + $0x538] sm:$0xff] }
 0x554   :  { %v4466_v16 = vld [vmem:[#allocation2 + $0x478] sm:$0xff] }
 0x555   :  { %6243 = vmatpush3.bf16.msra.mxu0 %v4462_v55  ;;  %v4482_v55 = vld [vmem:[#allocation2 + $0x4f8] sm:$0xff] }
 0x556   :  { %6265 = vmatpush3.bf16.msra.mxu1 %v4478_v60  ;;  %6244 = vmatprep.subr.bf16.mxu0 %v4471_v15  ;;  %v4499_v60 = vld [vmem:[#allocation2 + $0x580] sm:$0xff] }
 0x557   :  { %6266 = vmatprep.subr.bf16.mxu1 %v4487_v7  ;;  %v4515_v15 = vld [vmem:[#allocation2 + $0x600] sm:$0xff] }
 0x558   :  { %v4491_v7 = vld [vmem:[#allocation2 + $0x540] sm:$0xff] }
 0x559   :  { %6245 = vmatpush3.bf16.msra.mxu0 %v4463_v50  ;;  %v4507_v50 = vld [vmem:[#allocation2 + $0x5c0] sm:$0xff] }
 0x55a   :  { %6267 = vmatpush3.bf16.msra.mxu1 %v4479_v46  ;;  %6246 = vmatprep.subr.bf16.mxu0 %v4472_v20  ;;  %v4500_v46 = vld [vmem:[#allocation2 + $0x588] sm:$0xff] }
 0x55b   :  { %6268 = vmatprep.subr.bf16.mxu1 %v4488_v29  ;;  %v4516_v20 = vld [vmem:[#allocation2 + $0x608] sm:$0xff]  ;;  %v11365_v29 = vpack.c.bf16 %v10326_v58, %v10326_v58  ;;  %v11368_v58 = vpack.c.bf16 %v10373_v3, %v10373_v3  ;;  %v4495_v3 = vld [vmem:[#allocation2 + $0x560] sm:$0xff] }
 0x55d   :  { %6247 = vmatpush3.bf16.msra.mxu0 %v4464_v57  ;;  %v11366_v57 = vpack.c.bf16 %v10336_v52, %v10336_v52  ;;  %v4493_v52 = vld [vmem:[#allocation2 + $0x550] sm:$0xff] }
 0x55e   :  { %6269 = vmatpush3.bf16.msra.mxu1 %v4480_v2  ;;  %6248 = vmatprep.subr.bf16.mxu0 %v4473_v24  ;;  %v4492_v2 = vld [vmem:[#allocation2 + $0x548] sm:$0xff] }
 0x55f   :  { %6270 = vmatprep.subr.bf16.mxu1 %v4489_v40  ;;  %v4508_v24 = vld [vmem:[#allocation2 + $0x5c8] sm:$0xff]  ;;  %v4501_v40 = vld [vmem:[#allocation2 + $0x590] sm:$0xff] }
 0x561   :  { %6249 = vmatpush3.bf16.msra.mxu0 %v4465_v62  ;;  %v4517_v62 = vld [vmem:[#allocation2 + $0x610] sm:$0xff] }
 0x562   :  { %6271 = vmatpush3.bf16.msra.mxu1 %v4481_v23  ;;  %6250 = vmatprep.subr.bf16.mxu0 %v4474_v42  ;;  %v11367_v23 = vpack.c.bf16 %v10348_v25, %v10348_v25  ;;  %v4509_v42 = vld [vmem:[#allocation2 + $0x5d0] sm:$0xff]  ;;  %v4503_v25 = vld [vmem:[#allocation2 + $0x5a0] sm:$0xff] }
 0x563   :  { %6272 = vmatprep.subr.bf16.mxu1 %v4490_v10  ;;  %v4502_v10 = vld [vmem:[#allocation2 + $0x598] sm:$0xff] }
 0x565   :  { %6251 = vmatpush3.bf16.msra.mxu0 %v4466_v16  ;;  %v4518_v16 = vld [vmem:[#allocation2 + $0x618] sm:$0xff] }
 0x566   :  { %6273 = vmatpush3.bf16.msra.mxu1 %v4482_v55  ;;  %6280 = vmatprep.subr.bf16.mxu0 %v4499_v60  ;;  %v4494_v55 = vld [vmem:[#allocation2 + $0x558] sm:$0xff] }
 0x567   :  { %6302 = vmatprep.subr.bf16.mxu1 %v4515_v15  ;;  %v4510_v60 = vld [vmem:[#allocation2 + $0x5d8] sm:$0xff]  ;;  %v4519_v15 = vld [vmem:[#allocation2 + $0x620] sm:$0xff] }
 0x568   :  { %4636 = vmatmul.mubr.bf16.vlgmr.msra.gmra.mrb[0].mxu0 %v11365_v29  ;;  %v4512_v29 = vld [vmem:[#allocation2 + $0x5e8] sm:$0xff] }
 0x569   :  { %4676 = vmatmul.mubr.bf16.vlgmr.msra.gmra.mrb[0].mxu1 %v11366_v57  ;;  %6281 = vmatpush3.bf16.msra.mxu0 %v4491_v7  ;;  %v4511_v7 = vld [vmem:[#allocation2 + $0x5e0] sm:$0xff]  ;;  %v4505_v57 = vld [vmem:[#allocation2 + $0x5b0] sm:$0xff] }
 0x56a   :  { %6303 = vmatpush3.bf16.msra.mxu1 %v4507_v50  ;;  %6282 = vmatprep.subr.bf16.mxu0 %v4500_v46  ;;  %v4504_v50 = vld [vmem:[#allocation2 + $0x5a8] sm:$0xff] }
 0x56b   :  { %6304 = vmatprep.subr.bf16.mxu1 %v4516_v20  ;;  %4715 = vmatprep.mubr.bf16.mxu0 %v11367_v23  ;;  %v4520_v46 = vld [vmem:[#allocation2 + $0x628] sm:$0xff]  ;;  %v4522_v23 = vld [vmem:[#allocation2 + $0x638] sm:$0xff] }
 0x56c   :  { %4755 = vmatprep.mubr.bf16.mxu1 %v11368_v58  ;;  %v4496_v20 = vld [vmem:[#allocation2 + $0x568] sm:$0xff]  ;;  %v4498_v58 = vld [vmem:[#allocation2 + $0x578] sm:$0xff] }
 0x56d   :  { %6283 = vmatpush3.bf16.msra.mxu0 %v4492_v2  ;;  %v4521_v2 = vld [vmem:[#allocation2 + $0x630] sm:$0xff] }
 0x56e   :  { %6305 = vmatpush3.bf16.msra.mxu1 %v4508_v24  ;;  %6284 = vmatprep.subr.bf16.mxu0 %v4501_v40  ;;  %v4497_v24 = vld [vmem:[#allocation2 + $0x570] sm:$0xff] }
 0x56f   :  { %6306 = vmatprep.subr.bf16.mxu1 %v4517_v62  ;;  %v4513_v40 = vld [vmem:[#allocation2 + $0x5f0] sm:$0xff]  ;;  %v4506_v62 = vld [vmem:[#allocation2 + $0x5b8] sm:$0xff] }
 0x571   :  { %6285 = vmatpush3.bf16.msra.mxu0 %v4493_v52  ;;  %v4514_v52 = vld [vmem:[#allocation2 + $0x5f8] sm:$0xff] }
 0x572   :  { %6307 = vmatpush3.bf16.msra.mxu1 %v4509_v42  ;;  %6286 = vmatprep.subr.bf16.mxu0 %v4502_v10  ;;  %v11369_v42 = vpack.c.bf16 %v10344_v11, %v10344_v11  ;;  %v11370_v10 = vpack.c.bf16 %v10377_v36, %v10377_v36  ;;  %v11372_v11 = vpack.c.bf16 %v10219_v9, %v10219_v9  ;;  %v11382_v36 = vld [vmem:[#allocation75_spill] sm:$0xff] }
 0x573   :  { %6308 = vmatprep.subr.bf16.mxu1 %v4518_v16  ;;  %v11373_v9 = vpack.c.bf16 %v10199_v63, %v10199_v63  ;;  %v11414_v16 = vld [vmem:[#allocation104_spill] sm:$0xff] }
 0x575   :  { %6287 = vmatpush3.bf16.msra.mxu0 %v4494_v55  ;;  %v11415_v55 = vld [vmem:[#allocation120_spill] sm:$0xff] }
 0x576   :  { %6309 = vmatpush3.bf16.msra.mxu1 %v4510_v60  ;;  %6288 = vmatprep.subr.bf16.mxu0 %v4503_v25  ;;  %v11416_v60 = vld [vmem:[#allocation45_spill] sm:$0xff] }
 0x577   :  { %6310 = vmatprep.subr.bf16.mxu1 %v4519_v15  ;;  %v11417_v25 = vpack.c.bf16 %v11416_v60, %v11416_v60  ;;  %v11418_v15 = vld [vmem:[#allocation61_spill] sm:$0xff] }
 0x579   :  { %6289 = vmatpush3.bf16.msra.mxu0 %v4495_v3  ;;  %v11419_v3 = vpack.c.bf16 %v11418_v15, %v11418_v15 }
 0x57a   :  { %6311 = vmatpush3.bf16.msra.mxu1 %v4511_v7  ;;  %6290 = vmatprep.subr.bf16.mxu0 %v4504_v50  ;;  %v11420_v7 = vld [vmem:[#allocation96_spill] sm:$0xff] }
 0x57b   :  { %6312 = vmatprep.subr.bf16.mxu1 %v4520_v46  ;;  %v11421_v50 = vld [vmem:[#allocation112_spill] sm:$0xff]  ;;  %v11422_v46 = vld [vmem:[#allocation105_spill] sm:$0xff] }
 0x57d   :  { %6291 = vmatpush3.bf16.msra.mxu0 %v4496_v20  ;;  %v11423_v20 = vld [vmem:[#allocation121_spill] sm:$0xff] }
 0x57e   :  { %6313 = vmatpush3.bf16.msra.mxu1 %v4512_v29  ;;  %6292 = vmatprep.subr.bf16.mxu0 %v4505_v57  ;;  %v11424_v29 = vld [vmem:[#allocation97_spill] sm:$0xff] }
 0x57f   :  { %6314 = vmatprep.subr.bf16.mxu1 %v4521_v2  ;;  %v11425_v57 = vld [vmem:[#allocation113_spill] sm:$0xff]  ;;  %v11426_v2 = vld [vmem:[#allocation106_spill] sm:$0xff] }
 0x581   :  { %6293 = vmatpush3.bf16.msra.mxu0 %v4497_v24  ;;  %v11427_v24 = vld [vmem:[#allocation122_spill] sm:$0xff] }
 0x582   :  { %6315 = vmatpush3.bf16.msra.mxu1 %v4513_v40  ;;  %6294 = vmatprep.subr.bf16.mxu0 %v4506_v62  ;;  %v11428_v40 = vld [vmem:[#allocation98_spill] sm:$0xff] }
 0x583   :  { %6316 = vmatprep.subr.bf16.mxu1 %v4522_v23  ;;  %v11429_v62 = vld [vmem:[#allocation114_spill] sm:$0xff]  ;;  %v11430_v23 = vld [vmem:[#allocation107_spill] sm:$0xff] }
 0x585   :  { %6295 = vmatpush3.bf16.msra.mxu0 %v4498_v58  ;;  %v11431_v58 = vld [vmem:[#allocation123_spill] sm:$0xff] }
 0x586   :  { %6317 = vmatpush3.bf16.msra.mxu1 %v4514_v52  ;;  %6324 = vmatprep.subr.bf16.mxu0 %v10557_v34  ;;  %v11371_v34 = vpack.c.bf16 %v10211_v27, %v10211_v27  ;;  %v11374_v27 = vpack.c.bf16 %v10215_v28, %v10215_v28  ;;  %v11381_v28 = vld [vmem:[#allocation81_spill] sm:$0xff]  ;;  %v11432_v52 = vld [vmem:[#allocation99_spill] sm:$0xff] }
 0x587   :  { %6346 = vmatprep.subr.bf16.mxu1 %v10589_v5  ;;  %v11391_v5 = vld [vmem:[#allocation91_spill] sm:$0xff] }
 0x588   :  { %4716 = vmatmul.mubr.bf16.vlgmr.msra.gmra.mrb[4].mxu0 %v11369_v42  ;;  %v11433_v42 = vld [vmem:[#allocation115_spill] sm:$0xff] }
 0x589   :  { %4756 = vmatmul.mubr.bf16.vlgmr.msra.gmra.mrb[4].mxu1 %v11370_v10  ;;  %6325 = vmatpush3.bf16.msra.mxu0 %v10541_v19  ;;  %v11402_v19 = vld [vmem:[#allocation80_spill] sm:$0xff] }
 0x58a   :  { %6347 = vmatpush3.bf16.msra.mxu1 %v10573_v39  ;;  %6326 = vmatprep.subr.bf16.mxu0 %v10559_v49  ;;  %v11397_v39 = vld [vmem:[#allocation85_spill] sm:$0xff]  ;;  %v11405_v49 = vld [vmem:[#allocation87_spill] sm:$0xff]  ;;  %v11434_v10 = vld [vmem:[#allocation108_spill] sm:$0xff] }
 0x58b   :  { %6348 = vmatprep.subr.bf16.mxu1 %v10591_v26  ;;  %4795 = vmatprep.mubr.bf16.mxu0 %v11371_v34  ;;  %v11394_v26 = vld [vmem:[#allocation78_spill] sm:$0xff]  ;;  %v11435_v34 = vld [vmem:[#allocation124_spill] sm:$0xff] }
 0x58c   :  { %4835 = vmatprep.mubr.bf16.mxu1 %v11372_v11  ;;  %v11436_v11 = vld [vmem:[#allocation100_spill] sm:$0xff] }
 0x58d   :  { %6327 = vmatpush3.bf16.msra.mxu0 %v10543_v33  ;;  %v11408_v33 = vld [vmem:[#allocation54_spill] sm:$0xff] }
 0x58e   :  { %6349 = vmatpush3.bf16.msra.mxu1 %v10575_v59  ;;  %6328 = vmatprep.subr.bf16.mxu0 %v10561_v51  ;;  %v11400_v51 = vld [vmem:[#allocation73_spill] sm:$0xff]  ;;  %v11406_v59 = vld [vmem:[#allocation103_spill] sm:$0xff] }
 0x58f   :  { %6350 = vmatprep.subr.bf16.mxu1 %v10593_v12  ;;  %v11392_v12 = vld [vmem:[#allocation71_spill] sm:$0xff] }
 0x591   :  { %6329 = vmatpush3.bf16.msra.mxu0 %v10545_v22  ;;  %v11409_v22 = vpack.c.bf16 %v11408_v33, %v11408_v33 }
 0x592   :  { %6351 = vmatpush3.bf16.msra.mxu1 %v10577_v43  ;;  %6330 = vmatprep.subr.bf16.mxu0 %v10563_v53  ;;  %v11398_v43 = vld [vmem:[#allocation79_spill] sm:$0xff]  ;;  %v11403_v53 = vld [vmem:[#allocation94_spill] sm:$0xff] }
 0x593   :  { %6352 = vmatprep.subr.bf16.mxu1 %v10595_v21  ;;  %v11389_v21 = vld [vmem:[#allocation83_spill] sm:$0xff] }
 0x595   :  { %6331 = vmatpush3.bf16.msra.mxu0 %v10547_v30  ;;  %v11410_v30 = vld [vmem:[#allocation42_spill] sm:$0xff] }
 0x596   :  { %6353 = vmatpush3.bf16.msra.mxu1 %v10579_v45  ;;  %6332 = vmatprep.subr.bf16.mxu0 %v10565_v8  ;;  %v11375_v45 = vld [vmem:[#allocation88_spill] sm:$0xff]  ;;  %v11401_v8 = vld [vmem:[#allocation86_spill] sm:$0xff] }
 0x597   :  { %6354 = vmatprep.subr.bf16.mxu1 %v10597_v35  ;;  %v11387_v35 = vld [vmem:[#allocation90_spill] sm:$0xff] }
 0x599   :  { %6333 = vmatpush3.bf16.msra.mxu0 %v10549_v38  ;;  %v11411_v38 = vpack.c.bf16 %v11410_v30, %v11410_v30 }
 0x59a   :  { %6355 = vmatpush3.bf16.msra.mxu1 %v10581_v56  ;;  %6334 = vmatprep.subr.bf16.mxu0 %v10567_v4  ;;  %v11380_v56 = vld [vmem:[#allocation41_spill] sm:$0xff] }
 0x59b   :  { %6356 = vmatprep.subr.bf16.mxu1 %v10599_v31  ;;  %v11390_v31 = vld [vmem:[#allocation77_spill] sm:$0xff] }
 0x59c   :  { %v11399_v4 = vld [vmem:[#allocation93_spill] sm:$0xff] }
 0x59d   :  { %6335 = vmatpush3.bf16.msra.mxu0 %v10551_v18  ;;  %v11412_v18 = vld [vmem:[#allocation95_spill] sm:$0xff] }
 0x59e   :  { %6357 = vmatpush3.bf16.msra.mxu1 %v10583_v6  ;;  %6336 = vmatprep.subr.bf16.mxu0 %v10569_v0  ;;  %v11395_v0 = vld [vmem:[#allocation92_spill] sm:$0xff] }
 0x59f   :  { %6358 = vmatprep.subr.bf16.mxu1 %v10601_v13  ;;  %v11388_v13 = vld [vmem:[#allocation58_spill] sm:$0xff]  ;;  %v11396_v6 = vld [vmem:[#allocation72_spill] sm:$0xff] }
 0x5a1   :  { %6337 = vmatpush3.bf16.msra.mxu0 %v10553_v1  ;;  %v11407_v1 = vld [vmem:[#allocation119_spill] sm:$0xff] }
 0x5a2   :  { %6359 = vmatpush3.bf16.msra.mxu1 %v10585_v14  ;;  %6338 = vmatprep.subr.bf16.mxu0 %v10571_v47  ;;  %v11376_v14 = vld [vmem:[#allocation43_spill] sm:$0xff]  ;;  %v11404_v47 = vld [vmem:[#allocation74_spill] sm:$0xff] }
 0x5a3   :  { %6360 = vmatprep.subr.bf16.mxu1 %v10603_v17  ;;  %v11386_v17 = vld [vmem:[#allocation76_spill] sm:$0xff] }
 0x5a5   :  { %6339 = vmatpush3.bf16.msra.mxu0 %v10555_v48  ;;  %v11413_v48 = vld [vmem:[#allocation111_spill] sm:$0xff] }
 0x5a6   :  { %6361 = vmatpush3.bf16.msra.mxu1 %v10587_v54  ;;  %6368 = vmatprep.subr.bf16.mxu0 %v10621_v61  ;;  %v11377_v61 = vpack.c.bf16 %v11376_v14, %v11376_v14  ;;  %v11393_v54 = vld [vmem:[#allocation84_spill] sm:$0xff]  ;;  %v11440_v14 = vld [vmem:[#allocation101_spill] sm:$0xff] }
 0x5a7   :  { %6390 = vmatprep.subr.bf16.mxu1 %v10653_v44  ;;  %v11378_v44 = vld [vmem:[#allocation60_spill] sm:$0xff] }
 0x5a8   :  { %4796 = vmatmul.mubr.bf16.vlgmr.msra.gmra.mrb[8].mxu0 %v11373_v9  ;;  %v11379_v63 = vpack.c.bf16 %v11378_v44, %v11378_v44  ;;  %v11437_v9 = vld [vmem:[#allocation116_spill] sm:$0xff]  ;;  %v11442_v44 = vld [vmem:[#allocation110_spill] sm:$0xff] }
 0x5a9   :  { %4836 = vmatmul.mubr.bf16.vlgmr.msra.gmra.mrb[8].mxu1 %v11374_v27  ;;  %6369 = vmatpush3.bf16.msra.mxu0 %v10605_v41  ;;  %v11383_v41 = vld [vmem:[#allocation89_spill] sm:$0xff] }
 0x5aa   :  { %6391 = vmatpush3.bf16.msra.mxu1 %v10637_v32  ;;  %6370 = vmatprep.subr.bf16.mxu0 %v10623_v37  ;;  %v11384_v32 = vld [vmem:[#allocation40_spill] sm:$0xff]  ;;  %v11385_v37 = vld [vmem:[#allocation82_spill] sm:$0xff]  ;;  %v11438_v27 = vld [vmem:[#allocation109_spill] sm:$0xff] }
 0x5ab   :  { %6392 = vmatprep.subr.bf16.mxu1 %v11375_v45  ;;  %4875 = vmatprep.mubr.bf16.mxu0 %v11377_v61  ;;  %v11439_v45 = vld [vmem:[#allocation125_spill] sm:$0xff] }
 0x5ac   :  { %4915 = vmatprep.mubr.bf16.mxu1 %v11379_v63  ;;  %v11441_v61 = vld [vmem:[#allocation117_spill] sm:$0xff]  ;;  %v11443_v63 = vld [vmem:[#allocation126_spill] sm:$0xff] }
 0x5ad   :  { %6371 = vmatpush3.bf16.msra.mxu0 %v11380_v56  ;;  %v11444_v56 = vld [vmem:[#allocation102_spill] sm:$0xff] }
 0x5ae   :  { %6393 = vmatpush3.bf16.msra.mxu1 %v11381_v28  ;;  %6372 = vmatprep.subr.bf16.mxu0 %v11382_v36  ;;  %v11445_v28 = vld [vmem:[#allocation118_spill] sm:$0xff]  ;;  %v11446_v36 = vmov 0.0  }
 0x5af   :  { %6394 = vmatprep.subr.bf16.mxu1 %v11383_v41  ;;  %v11447_v41 = vld [vmem:[#allocation57_spill] sm:$0xff] }
 0x5b1   :  { %6373 = vmatpush3.bf16.msra.mxu0 %v11384_v32  ;;  %v11448_v32 = vpack.c.bf16 %v11447_v41, %v11447_v41 }
 0x5b2   :  { %6395 = vmatpush3.bf16.msra.mxu1 %v11385_v37  ;;  %6374 = vmatprep.subr.bf16.mxu0 %v11386_v17  ;;  %v11449_v37 = vld [vmem:[#allocation44_spill] sm:$0xff] }
 0x5b3   :  { %6396 = vmatprep.subr.bf16.mxu1 %v11387_v35  ;;  %v11450_v17 = vpack.c.bf16 %v11449_v37, %v11449_v37  ;;  %v11451_v35 = vld [vmem:[#allocation127_spill] sm:$0xff] }
 0x5b5   :  { %6375 = vmatpush3.bf16.msra.mxu0 %v11388_v13  ;;  %v11452_v13 = vld [vmem:[#allocation128_spill] sm:$0xff] }
 0x5b6   :  { %6397 = vmatpush3.bf16.msra.mxu1 %v11389_v21  ;;  %6376 = vmatprep.subr.bf16.mxu0 %v11390_v31  ;;  %v11453_v21 = vld [vmem:[#allocation129_spill] sm:$0xff]  ;;  %v11454_v31 = vld [vmem:[#allocation130_spill] sm:$0xff] }
 0x5b7   :  { %6398 = vmatprep.subr.bf16.mxu1 %v11391_v5  ;;  %v11455_v5 = vld [vmem:[#allocation131_spill] sm:$0xff] }
 0x5b9   :  { %6377 = vmatpush3.bf16.msra.mxu0 %v11392_v12  ;;  %v11456_v12 = vld [vmem:[#allocation132_spill] sm:$0xff] }
 0x5ba   :  { %6399 = vmatpush3.bf16.msra.mxu1 %v11393_v54  ;;  %6378 = vmatprep.subr.bf16.mxu0 %v11394_v26  ;;  %v11457_v54 = vld [vmem:[#allocation133_spill] sm:$0xff]  ;;  %v11458_v26 = vld [vmem:[#allocation134_spill] sm:$0xff] }
 0x5bb   :  { %6400 = vmatprep.subr.bf16.mxu1 %v11395_v0  ;;  %v11459_v0 = vld [vmem:[#allocation59_spill] sm:$0xff] }
 0x5bd   :  { %6379 = vmatpush3.bf16.msra.mxu0 %v11396_v6  ;;  %v11460_v6 = vpack.c.bf16 %v11459_v0, %v11459_v0 }
 0x5be   :  { %6401 = vmatpush3.bf16.msra.mxu1 %v11397_v39  ;;  %6380 = vmatprep.subr.bf16.mxu0 %v11398_v43 }
 0x5bf   :  { %6402 = vmatprep.subr.bf16.mxu1 %v11399_v4 }
 0x5c1   :  { %6381 = vmatpush3.bf16.msra.mxu0 %v11400_v51 }
 0x5c2   :  { %6403 = vmatpush3.bf16.msra.mxu1 %v11401_v8  ;;  %6382 = vmatprep.subr.bf16.mxu0 %v11402_v19 }
 0x5c3   :  { %6404 = vmatprep.subr.bf16.mxu1 %v11403_v53 }
 0x5c5   :  { %6383 = vmatpush3.bf16.msra.mxu0 %v11404_v47 }
 0x5c6   :  { %6405 = vmatpush3.bf16.msra.mxu1 %v11405_v49  ;;  %6412 = vmatprep.subr.bf16.mxu0 %v11406_v59 }
 0x5c7   :  { %6434 = vmatprep.subr.bf16.mxu1 %v11407_v1 }
 0x5c8   :  { %4876 = vmatmul.mubr.bf16.vlgmr.msra.gmra.mrb[12].mxu0 %v11409_v22 }
 0x5c9   :  { %4916 = vmatmul.mubr.bf16.vlgmr.msra.gmra.mrb[12].mxu1 %v11411_v38  ;;  %6413 = vmatpush3.bf16.msra.mxu0 %v11412_v18 }
 0x5ca   :  { %6435 = vmatpush3.bf16.msra.mxu1 %v11413_v48  ;;  %6414 = vmatprep.subr.bf16.mxu0 %v11414_v16 }
 0x5cb   :  { %6436 = vmatprep.subr.bf16.mxu1 %v11415_v55  ;;  %4955 = vmatprep.mubr.bf16.mxu0 %v11417_v25 }
 0x5cc   :  { %4995 = vmatprep.mubr.bf16.mxu1 %v11419_v3 }
 0x5cd   :  { %6415 = vmatpush3.bf16.msra.mxu0 %v11420_v7 }
 0x5ce   :  { %6437 = vmatpush3.bf16.msra.mxu1 %v11421_v50  ;;  %6416 = vmatprep.subr.bf16.mxu0 %v11422_v46 }
 0x5cf   :  { %6438 = vmatprep.subr.bf16.mxu1 %v11423_v20 }
 0x5d1   :  { %6417 = vmatpush3.bf16.msra.mxu0 %v11424_v29 }
 0x5d2   :  { %6439 = vmatpush3.bf16.msra.mxu1 %v11425_v57  ;;  %6418 = vmatprep.subr.bf16.mxu0 %v11426_v2 }
 0x5d3   :  { %6440 = vmatprep.subr.bf16.mxu1 %v11427_v24 }
 0x5d5   :  { %6419 = vmatpush3.bf16.msra.mxu0 %v11428_v40 }
 0x5d6   :  { %6441 = vmatpush3.bf16.msra.mxu1 %v11429_v62  ;;  %6420 = vmatprep.subr.bf16.mxu0 %v11430_v23 }
 0x5d7   :  { %6442 = vmatprep.subr.bf16.mxu1 %v11431_v58 }
 0x5d9   :  { %6421 = vmatpush3.bf16.msra.mxu0 %v11432_v52 }
 0x5da   :  { %6443 = vmatpush3.bf16.msra.mxu1 %v11433_v42  ;;  %6422 = vmatprep.subr.bf16.mxu0 %v11434_v10 }
 0x5db   :  { %6444 = vmatprep.subr.bf16.mxu1 %v11435_v34 }
 0x5dd   :  { %6423 = vmatpush3.bf16.msra.mxu0 %v11436_v11 }
 0x5de   :  { %6445 = vmatpush3.bf16.msra.mxu1 %v11437_v9  ;;  %6424 = vmatprep.subr.bf16.mxu0 %v11438_v27 }
 0x5df   :  { %6446 = vmatprep.subr.bf16.mxu1 %v11439_v45 }
 0x5e1   :  { %6425 = vmatpush3.bf16.msra.mxu0 %v11440_v14 }
 0x5e2   :  { %6447 = vmatpush3.bf16.msra.mxu1 %v11441_v61  ;;  %6426 = vmatprep.subr.bf16.mxu0 %v11442_v44 }
 0x5e3   :  { %6448 = vmatprep.subr.bf16.mxu1 %v11443_v63 }
 0x5e5   :  { %6427 = vmatpush3.bf16.msra.mxu0 %v11444_v56 }
 0x5e6   :  { %6449 = vmatpush3.bf16.msra.mxu1 %v11445_v28  ;;  %7296 = vmatprep.subr.bf16.mxu0 %v11446_v36 }
 0x5e8   :  { %4956 = vmatmul.mubr.bf16.vlgmr.msra.gmra.mrb[16].mxu0 %v11448_v32 }
 0x5e9   :  { %4996 = vmatmul.mubr.bf16.vlgmr.msra.gmra.mrb[16].mxu1 %v11450_v17  ;;  %7297 = vmatpush3.bf16.msra.mxu0 %v11451_v35 }
 0x5ea   :  { %7312 = vmatprep.mubr.msk.bf16.mxu0 %vm7797_vm3, %v11446_v36  ;;  %7298 = vmatprep.subr.bf16.mxu0 %v11446_v36 }
 0x5ed   :  { %7299 = vmatpush3.bf16.msra.mxu0 %v11452_v13 }
 0x5ee   :  { %7300 = vmatprep.subr.bf16.mxu0 %v11446_v36 }
 0x5f1   :  { %7301 = vmatpush3.bf16.msra.mxu0 %v11453_v21 }
 0x5f2   :  { %7302 = vmatprep.subr.bf16.mxu0 %v11446_v36 }
 0x5f5   :  { %7303 = vmatpush3.bf16.msra.mxu0 %v11454_v31 }
 0x5f6   :  { %7304 = vmatprep.subr.bf16.mxu0 %v11446_v36 }
 0x5f9   :  { %7305 = vmatpush3.bf16.msra.mxu0 %v11455_v5 }
 0x5fa   :  { %7306 = vmatprep.subr.bf16.mxu0 %v11446_v36 }
 0x5fd   :  { %7307 = vmatpush3.bf16.msra.mxu0 %v11456_v12 }
 0x5fe   :  { %7308 = vmatprep.subr.bf16.mxu0 %v11446_v36 }
 0x601   :  { %7309 = vmatpush3.bf16.msra.mxu0 %v11457_v54 }
 0x602   :  { %7310 = vmatprep.subr.bf16.mxu0 %v11446_v36 }
 0x605   :  { %7311 = vmatpush3.bf16.msra.mxu0 %v11458_v26 }
 0x608   :  { %7313 = vmatmul.mubr.bf16.vlgmr.msra.gmra.mrb[20].mxu0 %v11460_v6 }
 0x61b   :  { %v6208_v39 = vpop.f32.mrb[252].mxu0 }
 0x61c   :  { %v6230_v43 = vpop.f32.mrb[252].mxu1  ;;  %v6209_v4 = vpop.f32.mrb[253].mxu0 }
 0x61d   :  { %v6231_v51 = vpop.f32.mrb[253].mxu1  ;;  %v6210_v8 = vadd.f32 %v6209_v4, %v6208_v39  ;;  %v6211_v53 = vpop.f32.mrb[254].mxu0 }
 0x61e   :  { %v6232_v19 = vadd.f32 %v6231_v51, %v6230_v43  ;;  %v6233_v47 = vpop.f32.mrb[254].mxu1  ;;  %v6212_v49 = vpop.f32.mrb[255].mxu0 }
 0x61f   :  { %v6234_v59 = vpop.f32.mrb[255].mxu1 }
 0x620   :  { %v4598_v1 = vadd.f32 %v6232_v19, %v6210_v8 }
 0x63b   :  { %v6252_v33 = vpop.f32.mrb[0].mxu0 }
 0x63c   :  { %v6274_v22 = vpop.f32.mrb[0].mxu1  ;;  %v6253_v30 = vpop.f32.mrb[1].mxu0 }
 0x63d   :  { %v6275_v38 = vpop.f32.mrb[1].mxu1  ;;  %v6254_v18 = vadd.f32 %v6253_v30, %v6252_v33  ;;  %v6255_v48 = vpop.f32.mrb[2].mxu0 }
 0x63e   :  { %v6276_v16 = vadd.f32 %v6275_v38, %v6274_v22  ;;  %v6277_v55 = vpop.f32.mrb[2].mxu1  ;;  %v6256_v60 = vpop.f32.mrb[3].mxu0 }
 0x63f   :  { %v6278_v25 = vpop.f32.mrb[3].mxu1  ;;  %v4638_v15 = vadd.f32 %v6254_v18, %v4598_v1 }
 0x641   :  { %v4678_v3 = vadd.f32 %v6276_v16, %v4638_v15 }
 0x65b   :  { %v6296_v7 = vpop.f32.mrb[4].mxu0 }
 0x65c   :  { %v6318_v50 = vpop.f32.mrb[4].mxu1  ;;  %v6297_v46 = vpop.f32.mrb[5].mxu0 }
 0x65d   :  { %v6319_v20 = vpop.f32.mrb[5].mxu1  ;;  %v6298_v29 = vadd.f32 %v6297_v46, %v6296_v7  ;;  %v6299_v57 = vpop.f32.mrb[6].mxu0 }
 0x65e   :  { %v6320_v2 = vadd.f32 %v6319_v20, %v6318_v50  ;;  %v6321_v24 = vpop.f32.mrb[6].mxu1  ;;  %v6300_v40 = vpop.f32.mrb[7].mxu0 }
 0x65f   :  { %v6322_v62 = vpop.f32.mrb[7].mxu1  ;;  %v4718_v23 = vadd.f32 %v6298_v29, %v4678_v3 }
 0x661   :  { %v4758_v58 = vadd.f32 %v6320_v2, %v4718_v23 }
 0x67b   :  { %v6340_v52 = vpop.f32.mrb[8].mxu0 }
 0x67c   :  { %v6362_v42 = vpop.f32.mrb[8].mxu1  ;;  %v6341_v10 = vpop.f32.mrb[9].mxu0 }
 0x67d   :  { %v6363_v34 = vpop.f32.mrb[9].mxu1  ;;  %v6342_v11 = vadd.f32 %v6341_v10, %v6340_v52  ;;  %v6343_v9 = vpop.f32.mrb[10].mxu0 }
 0x67e   :  { %v6364_v27 = vadd.f32 %v6363_v34, %v6362_v42  ;;  %v6365_v45 = vpop.f32.mrb[10].mxu1  ;;  %v6344_v14 = vpop.f32.mrb[11].mxu0 }
 0x67f   :  { %v6366_v61 = vpop.f32.mrb[11].mxu1  ;;  %v4798_v44 = vadd.f32 %v6342_v11, %v4758_v58 }
 0x681   :  { %v4838_v63 = vadd.f32 %v6364_v27, %v4798_v44 }
 0x69b   :  { %v6384_v56 = vpop.f32.mrb[12].mxu0 }
 0x69c   :  { %v6406_v28 = vpop.f32.mrb[12].mxu1  ;;  %v6385_v41 = vpop.f32.mrb[13].mxu0 }
 0x69d   :  { %v6407_v32 = vpop.f32.mrb[13].mxu1  ;;  %v6386_v37 = vadd.f32 %v6385_v41, %v6384_v56  ;;  %v6387_v17 = vpop.f32.mrb[14].mxu0 }
 0x69e   :  { %v6408_v35 = vadd.f32 %v6407_v32, %v6406_v28  ;;  %v6409_v13 = vpop.f32.mrb[14].mxu1  ;;  %v6388_v21 = vpop.f32.mrb[15].mxu0 }
 0x69f   :  { %v6410_v31 = vpop.f32.mrb[15].mxu1  ;;  %v4878_v5 = vadd.f32 %v6386_v37, %v4838_v63 }
 0x6a1   :  { %v4918_v12 = vadd.f32 %v6408_v35, %v4878_v5 }
 0x6bb   :  { %v6428_v54 = vpop.f32.mrb[16].mxu0 }
 0x6bc   :  { %v6450_v26 = vpop.f32.mrb[16].mxu1  ;;  %v6429_v0 = vpop.f32.mrb[17].mxu0 }
 0x6bd   :  { %v6451_v6 = vpop.f32.mrb[17].mxu1  ;;  %v6430_v39 = vadd.f32 %v6429_v0, %v6428_v54  ;;  %v6431_v43 = vpop.f32.mrb[18].mxu0 }
 0x6be   :  { %v6452_v4 = vadd.f32 %v6451_v6, %v6450_v26  ;;  %v6453_v51 = vpop.f32.mrb[18].mxu1  ;;  %v6432_v8 = vpop.f32.mrb[19].mxu0 }
 0x6bf   :  { %v6454_v19 = vpop.f32.mrb[19].mxu1  ;;  %v4958_v53 = vadd.f32 %v6430_v39, %v4918_v12 }
 0x6c1   :  { %v4998_v47 = vadd.f32 %v6452_v4, %v4958_v53 }
 0x6db   :  { %v5037_v49 = vpop.f32.mrb[20].mxu0 }
 0x6dc   :  { %v10938_v59 = vadd.f32 %v5037_v49, %v4998_v47  ;;  %v7314_v1 = vpop.f32.mrb[21].mxu0 }
 0x6dd   :  { %v5040_v33 = vpop.f32.mrb[22].mxu0 }
 0x6de   :  { %v7315_v22 = vpop.f32.mrb[23].mxu0 }
 0x6df   :  { %7779 = dma.done.wait [#allocation3 + $0x2], 12288 }
 0x6e0   :  { %7780 = vsyncadd [#allocation3 + $0x2], 4294955008  ;;  %v11461_v30 = vld [vmem:[#allocation46_spill] sm:$0xff]  ;;  %v5053_v16 = vld [vmem:[#allocation2 + $0x680] sm:$0xff] }
 0x6e1   :  { %v11462_v38 = vpack.c.bf16 %v11461_v30, %v11461_v30  ;;  %v11463_v18 = vld [vmem:[#allocation62_spill] sm:$0xff]  ;;  %v5069_v55 = vld [vmem:[#allocation2 + $0x700] sm:$0xff]  ;;  %6465 = vmatprep.subr.bf16.mxu1 %v5053_v16  ;;  %v5054_v15 = vld [vmem:[#allocation2 + $0x688] sm:$0xff] }
 0x6e2   :  { %v11464_v48 = vpack.c.bf16 %v11463_v18, %v11463_v18  ;;  %v5045_v60 = vld [vmem:[#allocation2 + $0x640] sm:$0xff]  ;;  %6487 = vmatprep.subr.bf16.mxu0 %v5069_v55  ;;  %v5070_v3 = vld [vmem:[#allocation2 + $0x708] sm:$0xff]  ;;  %v5055_v46 = vld [vmem:[#allocation2 + $0x690] sm:$0xff] }
 0x6e3   :  { %5173 = vmatprep.mubr.bf16.mxu1 %v11462_v38  ;;  %v5061_v25 = vld [vmem:[#allocation2 + $0x6c0] sm:$0xff]  ;;  %6466 = vmatpush3.bf16.msra.mxu1 %v5045_v60  ;;  %v5046_v7 = vld [vmem:[#allocation2 + $0x648] sm:$0xff]  ;;  %v5071_v20 = vld [vmem:[#allocation2 + $0x710] sm:$0xff] }
 0x6e4   :  { %5213 = vmatprep.mubr.bf16.mxu0 %v11464_v48  ;;  %6488 = vmatpush3.bf16.msra.mxu0 %v5061_v25  ;;  %v5062_v50 = vld [vmem:[#allocation2 + $0x6c8] sm:$0xff]  ;;  %v5047_v29 = vld [vmem:[#allocation2 + $0x650] sm:$0xff]  ;;  %v5056_v2 = vld [vmem:[#allocation2 + $0x698] sm:$0xff] }
 0x6e5   :  { %6467 = vmatprep.subr.bf16.mxu1 %v5054_v15  ;;  %6489 = vmatprep.subr.bf16.mxu0 %v5070_v3  ;;  %v5063_v57 = vld [vmem:[#allocation2 + $0x6d0] sm:$0xff]  ;;  %v5072_v24 = vld [vmem:[#allocation2 + $0x718] sm:$0xff]  ;;  %v5057_v23 = vld [vmem:[#allocation2 + $0x6a0] sm:$0xff] }
 0x6e6   :  { %v5048_v40 = vld [vmem:[#allocation2 + $0x658] sm:$0xff]  ;;  %v5073_v58 = vld [vmem:[#allocation2 + $0x720] sm:$0xff]  ;;  %v5058_v10 = vld [vmem:[#allocation2 + $0x6a8] sm:$0xff] }
 0x6e7   :  { %6468 = vmatpush3.bf16.msra.mxu1 %v5046_v7  ;;  %v5064_v62 = vld [vmem:[#allocation2 + $0x6d8] sm:$0xff]  ;;  %v5049_v52 = vld [vmem:[#allocation2 + $0x660] sm:$0xff]  ;;  %v5074_v34 = vld [vmem:[#allocation2 + $0x728] sm:$0xff] }
 0x6e8   :  { %6490 = vmatpush3.bf16.msra.mxu0 %v5062_v50  ;;  %6469 = vmatprep.subr.bf16.mxu1 %v5055_v46  ;;  %v5065_v42 = vld [vmem:[#allocation2 + $0x6e0] sm:$0xff]  ;;  %v5050_v11 = vld [vmem:[#allocation2 + $0x668] sm:$0xff]  ;;  %v5059_v27 = vld [vmem:[#allocation2 + $0x6b0] sm:$0xff] }
 0x6e9   :  { %6491 = vmatprep.subr.bf16.mxu0 %v5071_v20  ;;  %v5066_v9 = vld [vmem:[#allocation2 + $0x6e8] sm:$0xff]  ;;  %v5075_v45 = vld [vmem:[#allocation2 + $0x730] sm:$0xff]  ;;  %v5060_v44 = vld [vmem:[#allocation2 + $0x6b8] sm:$0xff] }
 0x6ea   :  { %v5051_v14 = vld [vmem:[#allocation2 + $0x670] sm:$0xff]  ;;  %v5076_v63 = vld [vmem:[#allocation2 + $0x738] sm:$0xff]  ;;  %v5085_v41 = vld [vmem:[#allocation2 + $0x780] sm:$0xff] }
 0x6eb   :  { %6470 = vmatpush3.bf16.msra.mxu1 %v5047_v29  ;;  %v5067_v61 = vld [vmem:[#allocation2 + $0x6f0] sm:$0xff]  ;;  %v5052_v56 = vld [vmem:[#allocation2 + $0x678] sm:$0xff]  ;;  %v5101_v32 = vld [vmem:[#allocation2 + $0x800] sm:$0xff] }
 0x6ec   :  { %6492 = vmatpush3.bf16.msra.mxu0 %v5063_v57  ;;  %6471 = vmatprep.subr.bf16.mxu1 %v5056_v2  ;;  %v5068_v28 = vld [vmem:[#allocation2 + $0x6f8] sm:$0xff]  ;;  %v5077_v37 = vld [vmem:[#allocation2 + $0x740] sm:$0xff]  ;;  %v5086_v35 = vld [vmem:[#allocation2 + $0x788] sm:$0xff] }
 0x6ed   :  { %6493 = vmatprep.subr.bf16.mxu0 %v5072_v24  ;;  %v5093_v17 = vld [vmem:[#allocation2 + $0x7c0] sm:$0xff]  ;;  %v5102_v13 = vld [vmem:[#allocation2 + $0x808] sm:$0xff]  ;;  %v5087_v0 = vld [vmem:[#allocation2 + $0x790] sm:$0xff] }
 0x6ee   :  { %v11465_v21 = vld [vmem:[#allocation47_spill] sm:$0xff]  ;;  %v5078_v54 = vld [vmem:[#allocation2 + $0x748] sm:$0xff]  ;;  %v5103_v6 = vld [vmem:[#allocation2 + $0x810] sm:$0xff] }
 0x6ef   :  { %6472 = vmatpush3.bf16.msra.mxu1 %v5048_v40  ;;  %v11466_v31 = vpack.c.bf16 %v11465_v21, %v11465_v21  ;;  %v11467_v5 = vld [vmem:[#allocation63_spill] sm:$0xff]  ;;  %v5094_v26 = vld [vmem:[#allocation2 + $0x7c8] sm:$0xff]  ;;  %v5079_v8 = vld [vmem:[#allocation2 + $0x750] sm:$0xff] }
 0x6f0   :  { %6494 = vmatpush3.bf16.msra.mxu0 %v5064_v62  ;;  %6473 = vmatprep.subr.bf16.mxu1 %v5057_v23  ;;  %v11468_v12 = vpack.c.bf16 %v11467_v5, %v11467_v5  ;;  %v11469_v39 = vld [vmem:[#allocation48_spill] sm:$0xff]  ;;  %v5095_v19 = vld [vmem:[#allocation2 + $0x7d0] sm:$0xff]  ;;  %v5088_v53 = vld [vmem:[#allocation2 + $0x798] sm:$0xff] }
 0x6f1   :  { %6495 = vmatprep.subr.bf16.mxu0 %v5073_v58  ;;  %v11470_v43 = vpack.c.bf16 %v11469_v39, %v11469_v39  ;;  %v11471_v4 = vld [vmem:[#allocation64_spill] sm:$0xff]  ;;  %v5104_v47 = vld [vmem:[#allocation2 + $0x818] sm:$0xff]  ;;  %v5091_v60 = vld [vmem:[#allocation2 + $0x7b0] sm:$0xff] }
 0x6f2   :  { %v11472_v51 = vpack.c.bf16 %v11471_v4, %v11471_v4  ;;  %v5080_v49 = vld [vmem:[#allocation2 + $0x758] sm:$0xff]  ;;  %v5089_v33 = vld [vmem:[#allocation2 + $0x7a0] sm:$0xff]  ;;  %v5090_v18 = vld [vmem:[#allocation2 + $0x7a8] sm:$0xff] }
 0x6f3   :  { %6474 = vmatpush3.bf16.msra.mxu1 %v5049_v52  ;;  %v5096_v1 = vld [vmem:[#allocation2 + $0x7d8] sm:$0xff]  ;;  %v5105_v22 = vld [vmem:[#allocation2 + $0x820] sm:$0xff]  ;;  %v5106_v48 = vld [vmem:[#allocation2 + $0x828] sm:$0xff] }
 0x6f4   :  { %6496 = vmatpush3.bf16.msra.mxu0 %v5065_v42  ;;  %6475 = vmatprep.subr.bf16.mxu1 %v5058_v10  ;;  %v5081_v30 = vld [vmem:[#allocation2 + $0x760] sm:$0xff]  ;;  %v5082_v16 = vld [vmem:[#allocation2 + $0x768] sm:$0xff]  ;;  %v5107_v25 = vld [vmem:[#allocation2 + $0x830] sm:$0xff] }
 0x6f5   :  { %6497 = vmatprep.subr.bf16.mxu0 %v5074_v34  ;;  %v5097_v38 = vld [vmem:[#allocation2 + $0x7e0] sm:$0xff]  ;;  %v5098_v55 = vld [vmem:[#allocation2 + $0x7e8] sm:$0xff]  ;;  %v5083_v15 = vld [vmem:[#allocation2 + $0x770] sm:$0xff] }
 0x6f6   :  { %v5099_v3 = vld [vmem:[#allocation2 + $0x7f0] sm:$0xff]  ;;  %v5092_v7 = vld [vmem:[#allocation2 + $0x7b8] sm:$0xff]  ;;  %v5117_v29 = vld [vmem:[#allocation2 + $0x880] sm:$0xff] }
 0x6f7   :  { %6476 = vmatpush3.bf16.msra.mxu1 %v5050_v11  ;;  %v5108_v50 = vld [vmem:[#allocation2 + $0x838] sm:$0xff]  ;;  %v5133_v57 = vld [vmem:[#allocation2 + $0x900] sm:$0xff]  ;;  %v5118_v40 = vld [vmem:[#allocation2 + $0x888] sm:$0xff] }
 0x6f8   :  { %6498 = vmatpush3.bf16.msra.mxu0 %v5066_v9  ;;  %6477 = vmatprep.subr.bf16.mxu1 %v5059_v27  ;;  %v5084_v46 = vld [vmem:[#allocation2 + $0x778] sm:$0xff]  ;;  %v5109_v2 = vld [vmem:[#allocation2 + $0x840] sm:$0xff]  ;;  %v5134_v62 = vld [vmem:[#allocation2 + $0x908] sm:$0xff] }
 0x6f9   :  { %6499 = vmatprep.subr.bf16.mxu0 %v5075_v45  ;;  %v5100_v20 = vld [vmem:[#allocation2 + $0x7f8] sm:$0xff]  ;;  %v5125_v24 = vld [vmem:[#allocation2 + $0x8c0] sm:$0xff]  ;;  %v11475_v52 = vld [vmem:[#allocation49_spill] sm:$0xff] }
 0x6fa   :  { %v11473_v23 = vld [vmem:[#allocation50_spill] sm:$0xff]  ;;  %v11476_v42 = vpack.c.bf16 %v11475_v52, %v11475_v52  ;;  %v5110_v10 = vld [vmem:[#allocation2 + $0x848] sm:$0xff] }
 0x6fb   :  { %6478 = vmatpush3.bf16.msra.mxu1 %v5051_v14  ;;  %v11474_v58 = vpack.c.bf16 %v11473_v23, %v11473_v23  ;;  %v5126_v34 = vld [vmem:[#allocation2 + $0x8c8] sm:$0xff]  ;;  %v5119_v11 = vld [vmem:[#allocation2 + $0x890] sm:$0xff]  ;;  %v5124_v39 = vld [vmem:[#allocation2 + $0x8b8] sm:$0xff] }
 0x6fc   :  { %6500 = vmatpush3.bf16.msra.mxu0 %v5067_v61  ;;  %6479 = vmatprep.subr.bf16.mxu1 %v5060_v44  ;;  %v5135_v9 = vld [vmem:[#allocation2 + $0x910] sm:$0xff]  ;;  %v11479_v14 = vld [vmem:[#allocation68_spill] sm:$0xff]  ;;  %v5116_v4 = vld [vmem:[#allocation2 + $0x878] sm:$0xff] }
 0x6fd   :  { %6501 = vmatprep.subr.bf16.mxu0 %v5076_v63  ;;  %v11477_v27 = vld [vmem:[#allocation66_spill] sm:$0xff]  ;;  %v11480_v61 = vpack.c.bf16 %v11479_v14, %v11479_v14  ;;  %v5122_v21 = vld [vmem:[#allocation2 + $0x8a8] sm:$0xff] }
 0x6fe   :  { %v11478_v45 = vpack.c.bf16 %v11477_v27, %v11477_v27  ;;  %v5111_v44 = vld [vmem:[#allocation2 + $0x850] sm:$0xff]  ;;  %v5114_v5 = vld [vmem:[#allocation2 + $0x868] sm:$0xff] }
 0x6ff   :  { %6480 = vmatpush3.bf16.msra.mxu1 %v5052_v56  ;;  %v5127_v63 = vld [vmem:[#allocation2 + $0x8d0] sm:$0xff]  ;;  %v5120_v56 = vld [vmem:[#allocation2 + $0x898] sm:$0xff] }
 0x700   :  { %6502 = vmatpush3.bf16.msra.mxu0 %v5068_v28  ;;  %6509 = vmatprep.subr.bf16.mxu1 %v5085_v41  ;;  %v5136_v28 = vld [vmem:[#allocation2 + $0x918] sm:$0xff] }
 0x701   :  { %6531 = vmatprep.subr.bf16.mxu0 %v5101_v32  ;;  %v5112_v41 = vld [vmem:[#allocation2 + $0x858] sm:$0xff] }
 0x702   :  { %5174 = vmatmul.mubr.bf16.vlgmr.msra.gmra.mrb[20].mxu1 %v11466_v31  ;;  %v5128_v32 = vld [vmem:[#allocation2 + $0x8d8] sm:$0xff]  ;;  %v5138_v31 = vld [vmem:[#allocation2 + $0x928] sm:$0xff] }
 0x703   :  { %5214 = vmatmul.mubr.bf16.vlgmr.msra.gmra.mrb[24].mxu0 %v11468_v12  ;;  %6510 = vmatpush3.bf16.msra.mxu1 %v5077_v37  ;;  %v5121_v37 = vld [vmem:[#allocation2 + $0x8a0] sm:$0xff]  ;;  %v5130_v12 = vld [vmem:[#allocation2 + $0x8e8] sm:$0xff] }
 0x704   :  { %6532 = vmatpush3.bf16.msra.mxu0 %v5093_v17  ;;  %6511 = vmatprep.subr.bf16.mxu1 %v5086_v35  ;;  %v5137_v17 = vld [vmem:[#allocation2 + $0x920] sm:$0xff] }
 0x705   :  { %6533 = vmatprep.subr.bf16.mxu0 %v5102_v13  ;;  %5253 = vmatprep.mubr.bf16.mxu1 %v11470_v43  ;;  %v5113_v35 = vld [vmem:[#allocation2 + $0x860] sm:$0xff]  ;;  %v5140_v43 = vld [vmem:[#allocation2 + $0x938] sm:$0xff] }
 0x706   :  { %5293 = vmatprep.mubr.bf16.mxu0 %v11472_v51  ;;  %v5129_v13 = vld [vmem:[#allocation2 + $0x8e0] sm:$0xff]  ;;  %v5132_v51 = vld [vmem:[#allocation2 + $0x8f8] sm:$0xff] }
 0x707   :  { %6512 = vmatpush3.bf16.msra.mxu1 %v5078_v54  ;;  %v5123_v54 = vld [vmem:[#allocation2 + $0x8b0] sm:$0xff] }
 0x708   :  { %6534 = vmatpush3.bf16.msra.mxu0 %v5094_v26  ;;  %6513 = vmatprep.subr.bf16.mxu1 %v5087_v0  ;;  %v5139_v26 = vld [vmem:[#allocation2 + $0x930] sm:$0xff] }
 0x709   :  { %6535 = vmatprep.subr.bf16.mxu0 %v5103_v6  ;;  %v5115_v0 = vld [vmem:[#allocation2 + $0x870] sm:$0xff] }
 0x70a   :  { %v5131_v6 = vld [vmem:[#allocation2 + $0x8f0] sm:$0xff] }
 0x70b   :  { %6514 = vmatpush3.bf16.msra.mxu1 %v5079_v8  ;;  %v11481_v8 = vld [vmem:[#allocation65_spill] sm:$0xff] }
 0x70c   :  { %6536 = vmatpush3.bf16.msra.mxu0 %v5095_v19  ;;  %6515 = vmatprep.subr.bf16.mxu1 %v5088_v53  ;;  %v11482_v19 = vpack.c.bf16 %v11481_v8, %v11481_v8  ;;  %v11483_v53 = vld [vmem:[#allocation67_spill] sm:$0xff] }
 0x70d   :  { %6537 = vmatprep.subr.bf16.mxu0 %v5104_v47  ;;  %v11484_v47 = vpack.c.bf16 %v11483_v53, %v11483_v53 }
 0x70f   :  { %6516 = vmatpush3.bf16.msra.mxu1 %v5080_v49 }
 0x710   :  { %6538 = vmatpush3.bf16.msra.mxu0 %v5096_v1  ;;  %6517 = vmatprep.subr.bf16.mxu1 %v5089_v33 }
 0x711   :  { %6539 = vmatprep.subr.bf16.mxu0 %v5105_v22 }
 0x713   :  { %6518 = vmatpush3.bf16.msra.mxu1 %v5081_v30 }
 0x714   :  { %6540 = vmatpush3.bf16.msra.mxu0 %v5097_v38  ;;  %6519 = vmatprep.subr.bf16.mxu1 %v5090_v18 }
 0x715   :  { %6541 = vmatprep.subr.bf16.mxu0 %v5106_v48 }
 0x717   :  { %6520 = vmatpush3.bf16.msra.mxu1 %v5082_v16 }
 0x718   :  { %6542 = vmatpush3.bf16.msra.mxu0 %v5098_v55  ;;  %6521 = vmatprep.subr.bf16.mxu1 %v5091_v60 }
 0x719   :  { %6543 = vmatprep.subr.bf16.mxu0 %v5107_v25 }
 0x71b   :  { %6522 = vmatpush3.bf16.msra.mxu1 %v5083_v15 }
 0x71c   :  { %6544 = vmatpush3.bf16.msra.mxu0 %v5099_v3  ;;  %6523 = vmatprep.subr.bf16.mxu1 %v5092_v7 }
 0x71d   :  { %6545 = vmatprep.subr.bf16.mxu0 %v5108_v50 }
 0x71f   :  { %6524 = vmatpush3.bf16.msra.mxu1 %v5084_v46 }
 0x720   :  { %6546 = vmatpush3.bf16.msra.mxu0 %v5100_v20  ;;  %6553 = vmatprep.subr.bf16.mxu1 %v5117_v29 }
 0x721   :  { %6575 = vmatprep.subr.bf16.mxu0 %v5133_v57 }
 0x722   :  { %5254 = vmatmul.mubr.bf16.vlgmr.msra.gmra.mrb[24].mxu1 %v11474_v58 }
 0x723   :  { %5294 = vmatmul.mubr.bf16.vlgmr.msra.gmra.mrb[28].mxu0 %v11476_v42  ;;  %6554 = vmatpush3.bf16.msra.mxu1 %v5109_v2 }
 0x724   :  { %6576 = vmatpush3.bf16.msra.mxu0 %v5125_v24  ;;  %6555 = vmatprep.subr.bf16.mxu1 %v5118_v40 }
 0x725   :  { %6577 = vmatprep.subr.bf16.mxu0 %v5134_v62  ;;  %5333 = vmatprep.mubr.bf16.mxu1 %v11478_v45 }
 0x726   :  { %5373 = vmatprep.mubr.bf16.mxu0 %v11480_v61 }
 0x727   :  { %6556 = vmatpush3.bf16.msra.mxu1 %v5110_v10 }
 0x728   :  { %6578 = vmatpush3.bf16.msra.mxu0 %v5126_v34  ;;  %6557 = vmatprep.subr.bf16.mxu1 %v5119_v11 }
 0x729   :  { %6579 = vmatprep.subr.bf16.mxu0 %v5135_v9 }
 0x72b   :  { %6558 = vmatpush3.bf16.msra.mxu1 %v5111_v44 }
 0x72c   :  { %6580 = vmatpush3.bf16.msra.mxu0 %v5127_v63  ;;  %6559 = vmatprep.subr.bf16.mxu1 %v5120_v56 }
 0x72d   :  { %6581 = vmatprep.subr.bf16.mxu0 %v5136_v28 }
 0x72f   :  { %6560 = vmatpush3.bf16.msra.mxu1 %v5112_v41 }
 0x730   :  { %6582 = vmatpush3.bf16.msra.mxu0 %v5128_v32  ;;  %6561 = vmatprep.subr.bf16.mxu1 %v5121_v37 }
 0x731   :  { %6583 = vmatprep.subr.bf16.mxu0 %v5137_v17 }
 0x733   :  { %6562 = vmatpush3.bf16.msra.mxu1 %v5113_v35 }
 0x734   :  { %6584 = vmatpush3.bf16.msra.mxu0 %v5129_v13  ;;  %6563 = vmatprep.subr.bf16.mxu1 %v5122_v21 }
 0x735   :  { %6585 = vmatprep.subr.bf16.mxu0 %v5138_v31 }
 0x737   :  { %6564 = vmatpush3.bf16.msra.mxu1 %v5114_v5 }
 0x738   :  { %6586 = vmatpush3.bf16.msra.mxu0 %v5130_v12  ;;  %6565 = vmatprep.subr.bf16.mxu1 %v5123_v54 }
 0x739   :  { %6587 = vmatprep.subr.bf16.mxu0 %v5139_v26 }
 0x73b   :  { %6566 = vmatpush3.bf16.msra.mxu1 %v5115_v0 }
 0x73c   :  { %6588 = vmatpush3.bf16.msra.mxu0 %v5131_v6  ;;  %6567 = vmatprep.subr.bf16.mxu1 %v5124_v39 }
 0x73d   :  { %6589 = vmatprep.subr.bf16.mxu0 %v5140_v43 }
 0x73f   :  { %6568 = vmatpush3.bf16.msra.mxu1 %v5116_v4 }
 0x740   :  { %6590 = vmatpush3.bf16.msra.mxu0 %v5132_v51 }
 0x742   :  { %5334 = vmatmul.mubr.bf16.vlgmr.msra.gmra.mrb[28].mxu1 %v11482_v19 }
 0x743   :  { %5374 = vmatmul.mubr.bf16.vlgmr.msra.gmra.mrb[32].mxu0 %v11484_v47 }
 0x7d5   :  { %v6481_v49 = vpop.f32.mrb[20].mxu1 }
 0x7d6   :  { %v6503_v1 = vpop.f32.mrb[24].mxu0  ;;  %v6482_v33 = vpop.f32.mrb[21].mxu1 }
 0x7d7   :  { %v6504_v22 = vpop.f32.mrb[25].mxu0  ;;  %v6483_v30 = vadd.f32 %v6482_v33, %v6481_v49  ;;  %v6484_v18 = vpop.f32.mrb[22].mxu1 }
 0x7d8   :  { %v6505_v38 = vadd.f32 %v6504_v22, %v6503_v1  ;;  %v6506_v48 = vpop.f32.mrb[26].mxu0  ;;  %v6485_v16 = vpop.f32.mrb[23].mxu1 }
 0x7d9   :  { %v6507_v55 = vpop.f32.mrb[27].mxu0 }
 0x7da   :  { %v5216_v60 = vadd.f32 %v6505_v38, %v6483_v30 }
 0x7f5   :  { %v6525_v25 = vpop.f32.mrb[24].mxu1 }
 0x7f6   :  { %v6547_v15 = vpop.f32.mrb[28].mxu0  ;;  %v6526_v3 = vpop.f32.mrb[25].mxu1 }
 0x7f7   :  { %v6548_v7 = vpop.f32.mrb[29].mxu0  ;;  %v6527_v50 = vadd.f32 %v6526_v3, %v6525_v25  ;;  %v6528_v20 = vpop.f32.mrb[26].mxu1 }
 0x7f8   :  { %v6549_v46 = vadd.f32 %v6548_v7, %v6547_v15  ;;  %v6550_v29 = vpop.f32.mrb[30].mxu0  ;;  %v6529_v57 = vpop.f32.mrb[27].mxu1 }
 0x7f9   :  { %v6551_v2 = vpop.f32.mrb[31].mxu0  ;;  %v5256_v24 = vadd.f32 %v6527_v50, %v5216_v60 }
 0x7fb   :  { %v5296_v40 = vadd.f32 %v6549_v46, %v5256_v24 }
 0x815   :  { %v6569_v62 = vpop.f32.mrb[28].mxu1 }
 0x816   :  { %v6591_v23 = vpop.f32.mrb[32].mxu0  ;;  %v6570_v58 = vpop.f32.mrb[29].mxu1 }
 0x817   :  { %v6592_v52 = vpop.f32.mrb[33].mxu0  ;;  %v6571_v42 = vadd.f32 %v6570_v58, %v6569_v62  ;;  %v6572_v34 = vpop.f32.mrb[30].mxu1 }
 0x818   :  { %v6593_v10 = vadd.f32 %v6592_v52, %v6591_v23  ;;  %v6594_v11 = vpop.f32.mrb[34].mxu0  ;;  %v6573_v9 = vpop.f32.mrb[31].mxu1 }
 0x819   :  { %v6595_v27 = vpop.f32.mrb[35].mxu0  ;;  %v5336_v45 = vadd.f32 %v6571_v42, %v5296_v40 }
 0x81b   :  { %v5376_v14 = vadd.f32 %v6593_v10, %v5336_v45 }
 0x81d   :  { %v10977_v61 = vadd.f32 %v5376_v14, %v10938_v59 }
 0x81e   :  { %7781 = dma.done.wait [#allocation3 + $0x3], 12288 }
 0x81f   :  { %7782 = vsyncadd [#allocation3 + $0x3], 4294955008  ;;  %v11485_v44 = vld [vmem:[#allocation69_spill] sm:$0xff]  ;;  %v11487_v56 = vld [vmem:[#allocation36_spill] sm:$0xff] }
 0x820   :  { %v11486_v63 = vpack.c.bf16 %v11485_v44, %v11485_v44  ;;  %v11488_v28 = vpack.c.bf16 %v11487_v56, %v11487_v56  ;;  %v5392_v41 = vld [vmem:[#allocation2 + $0x980] sm:$0xff]  ;;  %v5393_v35 = vld [vmem:[#allocation2 + $0x988] sm:$0xff]  ;;  %v5394_v31 = vld [vmem:[#allocation2 + $0x990] sm:$0xff] }
 0x821   :  { %v5408_v32 = vld [vmem:[#allocation2 + $0xa00] sm:$0xff]  ;;  %6597 = vmatprep.subr.bf16.mxu1 %v5392_v41  ;;  %v5409_v13 = vld [vmem:[#allocation2 + $0xa08] sm:$0xff]  ;;  %v5410_v5 = vld [vmem:[#allocation2 + $0xa10] sm:$0xff] }
 0x822   :  { %5512 = vmatprep.mubr.bf16.mxu1 %v11486_v63  ;;  %5552 = vmatprep.mubr.bf16.mxu0 %v11488_v28  ;;  %v5384_v37 = vld [vmem:[#allocation2 + $0x940] sm:$0xff]  ;;  %v5385_v59 = vld [vmem:[#allocation2 + $0x948] sm:$0xff]  ;;  %v5386_v12 = vld [vmem:[#allocation2 + $0x950] sm:$0xff] }
 0x823   :  { %6619 = vmatprep.subr.bf16.mxu0 %v5408_v32  ;;  %v5400_v17 = vld [vmem:[#allocation2 + $0x9c0] sm:$0xff]  ;;  %6598 = vmatpush3.bf16.msra.mxu1 %v5384_v37  ;;  %v5401_v21 = vld [vmem:[#allocation2 + $0x9c8] sm:$0xff]  ;;  %v5402_v54 = vld [vmem:[#allocation2 + $0x9d0] sm:$0xff] }
 0x824   :  { %6620 = vmatpush3.bf16.msra.mxu0 %v5400_v17  ;;  %6599 = vmatprep.subr.bf16.mxu1 %v5393_v35  ;;  %v5395_v26 = vld [vmem:[#allocation2 + $0x998] sm:$0xff]  ;;  %v5396_v43 = vld [vmem:[#allocation2 + $0x9a0] sm:$0xff]  ;;  %v5397_v19 = vld [vmem:[#allocation2 + $0x9a8] sm:$0xff] }
 0x825   :  { %6621 = vmatprep.subr.bf16.mxu0 %v5409_v13  ;;  %v5411_v0 = vld [vmem:[#allocation2 + $0xa18] sm:$0xff]  ;;  %v5412_v4 = vld [vmem:[#allocation2 + $0xa20] sm:$0xff]  ;;  %v5413_v53 = vld [vmem:[#allocation2 + $0xa28] sm:$0xff] }
 0x826   :  { %v5387_v6 = vld [vmem:[#allocation2 + $0x958] sm:$0xff]  ;;  %v5388_v51 = vld [vmem:[#allocation2 + $0x960] sm:$0xff]  ;;  %v5389_v47 = vld [vmem:[#allocation2 + $0x968] sm:$0xff] }
 0x827   :  { %6600 = vmatpush3.bf16.msra.mxu1 %v5385_v59  ;;  %v5403_v39 = vld [vmem:[#allocation2 + $0x9d8] sm:$0xff]  ;;  %v5404_v8 = vld [vmem:[#allocation2 + $0x9e0] sm:$0xff]  ;;  %v5405_v49 = vld [vmem:[#allocation2 + $0x9e8] sm:$0xff] }
 0x828   :  { %6622 = vmatpush3.bf16.msra.mxu0 %v5401_v21  ;;  %6601 = vmatprep.subr.bf16.mxu1 %v5394_v31  ;;  %v5398_v1 = vld [vmem:[#allocation2 + $0x9b0] sm:$0xff]  ;;  %v5399_v38 = vld [vmem:[#allocation2 + $0x9b8] sm:$0xff]  ;;  %v5424_v55 = vld [vmem:[#allocation2 + $0xa80] sm:$0xff] }
 0x829   :  { %6623 = vmatprep.subr.bf16.mxu0 %v5410_v5  ;;  %v5414_v33 = vld [vmem:[#allocation2 + $0xa30] sm:$0xff]  ;;  %v5415_v18 = vld [vmem:[#allocation2 + $0xa38] sm:$0xff]  ;;  %v5440_v60 = vld [vmem:[#allocation2 + $0xb00] sm:$0xff] }
 0x82a   :  { %v5390_v22 = vld [vmem:[#allocation2 + $0x970] sm:$0xff]  ;;  %v5391_v48 = vld [vmem:[#allocation2 + $0x978] sm:$0xff]  ;;  %v5416_v25 = vld [vmem:[#allocation2 + $0xa40] sm:$0xff] }
 0x82b   :  { %6602 = vmatpush3.bf16.msra.mxu1 %v5386_v12  ;;  %v5406_v30 = vld [vmem:[#allocation2 + $0x9f0] sm:$0xff]  ;;  %v5407_v16 = vld [vmem:[#allocation2 + $0x9f8] sm:$0xff]  ;;  %v5432_v15 = vld [vmem:[#allocation2 + $0xac0] sm:$0xff] }
 0x82c   :  { %6624 = vmatpush3.bf16.msra.mxu0 %v5402_v54  ;;  %6603 = vmatprep.subr.bf16.mxu1 %v5395_v26  ;;  %v5425_v3 = vld [vmem:[#allocation2 + $0xa88] sm:$0xff]  ;;  %v11489_v50 = vld [vmem:[#allocation70_spill] sm:$0xff]  ;;  %v11491_v20 = vld [vmem:[#allocation35_spill] sm:$0xff] }
 0x82d   :  { %6625 = vmatprep.subr.bf16.mxu0 %v5411_v0  ;;  %v5441_v7 = vld [vmem:[#allocation2 + $0xb08] sm:$0xff]  ;;  %v11490_v46 = vpack.c.bf16 %v11489_v50, %v11489_v50  ;;  %v11492_v29 = vpack.c.bf16 %v11491_v20, %v11491_v20  ;;  %v5426_v24 = vld [vmem:[#allocation2 + $0xa90] sm:$0xff]  ;;  %v11493_v62 = vld [vmem:[#allocation51_spill] sm:$0xff] }
 0x82e   :  { %v5417_v57 = vld [vmem:[#allocation2 + $0xa48] sm:$0xff]  ;;  %v5442_v40 = vld [vmem:[#allocation2 + $0xb10] sm:$0xff]  ;;  %v11494_v23 = vpack.c.bf16 %v11493_v62, %v11493_v62  ;;  %v5427_v34 = vld [vmem:[#allocation2 + $0xa98] sm:$0xff] }
 0x82f   :  { %6604 = vmatpush3.bf16.msra.mxu1 %v5387_v6  ;;  %v5433_v2 = vld [vmem:[#allocation2 + $0xac8] sm:$0xff]  ;;  %v5418_v42 = vld [vmem:[#allocation2 + $0xa50] sm:$0xff]  ;;  %v5443_v11 = vld [vmem:[#allocation2 + $0xb18] sm:$0xff] }
 0x830   :  { %6626 = vmatpush3.bf16.msra.mxu0 %v5403_v39  ;;  %6605 = vmatprep.subr.bf16.mxu1 %v5396_v43  ;;  %v11495_v58 = vld [vmem:[#allocation52_spill] sm:$0xff]  ;;  %v5434_v10 = vld [vmem:[#allocation2 + $0xad0] sm:$0xff]  ;;  %v5419_v9 = vld [vmem:[#allocation2 + $0xa58] sm:$0xff] }
 0x831   :  { %6627 = vmatprep.subr.bf16.mxu0 %v5412_v4  ;;  %v11496_v52 = vpack.c.bf16 %v11495_v58, %v11495_v58  ;;  %v5435_v27 = vld [vmem:[#allocation2 + $0xad8] sm:$0xff]  ;;  %v5428_v45 = vld [vmem:[#allocation2 + $0xaa0] sm:$0xff]  ;;  %v5429_v56 = vld [vmem:[#allocation2 + $0xaa8] sm:$0xff] }
 0x832   :  { %v5444_v14 = vld [vmem:[#allocation2 + $0xb20] sm:$0xff]  ;;  %v5445_v28 = vld [vmem:[#allocation2 + $0xb28] sm:$0xff]  ;;  %v5430_v37 = vld [vmem:[#allocation2 + $0xab0] sm:$0xff] }
 0x833   :  { %6606 = vmatpush3.bf16.msra.mxu1 %v5388_v51  ;;  %v5420_v44 = vld [vmem:[#allocation2 + $0xa60] sm:$0xff]  ;;  %v5421_v41 = vld [vmem:[#allocation2 + $0xa68] sm:$0xff]  ;;  %v5446_v17 = vld [vmem:[#allocation2 + $0xb30] sm:$0xff] }
 0x834   :  { %6628 = vmatpush3.bf16.msra.mxu0 %v5404_v8  ;;  %6607 = vmatprep.subr.bf16.mxu1 %v5397_v19  ;;  %v5436_v63 = vld [vmem:[#allocation2 + $0xae0] sm:$0xff]  ;;  %v5437_v32 = vld [vmem:[#allocation2 + $0xae8] sm:$0xff]  ;;  %v5422_v35 = vld [vmem:[#allocation2 + $0xa70] sm:$0xff] }
 0x835   :  { %6629 = vmatprep.subr.bf16.mxu0 %v5413_v53  ;;  %v5438_v13 = vld [vmem:[#allocation2 + $0xaf0] sm:$0xff]  ;;  %v5431_v59 = vld [vmem:[#allocation2 + $0xab8] sm:$0xff]  ;;  %v5456_v12 = vld [vmem:[#allocation2 + $0xb80] sm:$0xff] }
 0x836   :  { %v5447_v21 = vld [vmem:[#allocation2 + $0xb38] sm:$0xff]  ;;  %v5472_v54 = vld [vmem:[#allocation2 + $0xc00] sm:$0xff]  ;;  %v5457_v6 = vld [vmem:[#allocation2 + $0xb88] sm:$0xff] }
 0x837   :  { %6608 = vmatpush3.bf16.msra.mxu1 %v5389_v47  ;;  %v5423_v31 = vld [vmem:[#allocation2 + $0xa78] sm:$0xff]  ;;  %v5448_v26 = vld [vmem:[#allocation2 + $0xb40] sm:$0xff]  ;;  %v5473_v39 = vld [vmem:[#allocation2 + $0xc08] sm:$0xff] }
 0x838   :  { %6630 = vmatpush3.bf16.msra.mxu0 %v5405_v49  ;;  %6609 = vmatprep.subr.bf16.mxu1 %v5398_v1  ;;  %v5439_v5 = vld [vmem:[#allocation2 + $0xaf8] sm:$0xff]  ;;  %v5464_v0 = vld [vmem:[#allocation2 + $0xbc0] sm:$0xff]  ;;  %v11497_v43 = vld [vmem:[#allocation37_spill] sm:$0xff] }
 0x839   :  { %6631 = vmatprep.subr.bf16.mxu0 %v5414_v33  ;;  %v11498_v4 = vpack.c.bf16 %v11497_v43, %v11497_v43  ;;  %v11499_v51 = vld [vmem:[#allocation53_spill] sm:$0xff]  ;;  %v11501_v1 = vld [vmem:[#allocation38_spill] sm:$0xff] }
 0x83a   :  { %v11500_v8 = vpack.c.bf16 %v11499_v51, %v11499_v51  ;;  %v5449_v19 = vld [vmem:[#allocation2 + $0xb48] sm:$0xff]  ;;  %v5458_v47 = vld [vmem:[#allocation2 + $0xb90] sm:$0xff]  ;;  %v11502_v33 = vpack.c.bf16 %v11501_v1, %v11501_v1  ;;  %v5463_v62 = vld [vmem:[#allocation2 + $0xbb8] sm:$0xff] }
 0x83b   :  { %6610 = vmatpush3.bf16.msra.mxu1 %v5390_v22  ;;  %v5465_v53 = vld [vmem:[#allocation2 + $0xbc8] sm:$0xff]  ;;  %v5474_v49 = vld [vmem:[#allocation2 + $0xc10] sm:$0xff]  ;;  %v11503_v22 = vld [vmem:[#allocation55_spill] sm:$0xff] }
 0x83c   :  { %6632 = vmatpush3.bf16.msra.mxu0 %v5406_v30  ;;  %6611 = vmatprep.subr.bf16.mxu1 %v5399_v38  ;;  %v11504_v30 = vpack.c.bf16 %v11503_v22, %v11503_v22  ;;  %v5450_v38 = vld [vmem:[#allocation2 + $0xb50] sm:$0xff]  ;;  %v5461_v50 = vld [vmem:[#allocation2 + $0xba8] sm:$0xff]  ;;  %v5455_v58 = vld [vmem:[#allocation2 + $0xb78] sm:$0xff] }
 0x83d   :  { %6633 = vmatprep.subr.bf16.mxu0 %v5415_v18  ;;  %v5466_v18 = vld [vmem:[#allocation2 + $0xbd0] sm:$0xff]  ;;  %v5453_v20 = vld [vmem:[#allocation2 + $0xb68] sm:$0xff] }
 0x83f   :  { %6612 = vmatpush3.bf16.msra.mxu1 %v5391_v48  ;;  %v5459_v48 = vld [vmem:[#allocation2 + $0xb98] sm:$0xff] }
 0x840   :  { %6634 = vmatpush3.bf16.msra.mxu0 %v5407_v16  ;;  %6641 = vmatprep.subr.bf16.mxu1 %v5424_v55  ;;  %v5475_v16 = vld [vmem:[#allocation2 + $0xc18] sm:$0xff] }
 0x841   :  { %6663 = vmatprep.subr.bf16.mxu0 %v5440_v60  ;;  %v5451_v55 = vld [vmem:[#allocation2 + $0xb58] sm:$0xff] }
 0x842   :  { %5513 = vmatmul.mubr.bf16.vlgmr.msra.gmra.mrb[32].mxu1 %v11490_v46  ;;  %v5467_v60 = vld [vmem:[#allocation2 + $0xbd8] sm:$0xff]  ;;  %v5477_v46 = vld [vmem:[#allocation2 + $0xc28] sm:$0xff] }
 0x843   :  { %5553 = vmatmul.mubr.bf16.vlgmr.msra.gmra.mrb[36].mxu0 %v11492_v29  ;;  %6642 = vmatpush3.bf16.msra.mxu1 %v5416_v25  ;;  %v5460_v25 = vld [vmem:[#allocation2 + $0xba0] sm:$0xff]  ;;  %v5469_v29 = vld [vmem:[#allocation2 + $0xbe8] sm:$0xff] }
 0x844   :  { %6664 = vmatpush3.bf16.msra.mxu0 %v5432_v15  ;;  %6643 = vmatprep.subr.bf16.mxu1 %v5425_v3  ;;  %v5476_v15 = vld [vmem:[#allocation2 + $0xc20] sm:$0xff] }
 0x845   :  { %6665 = vmatprep.subr.bf16.mxu0 %v5441_v7  ;;  %5592 = vmatprep.mubr.bf16.mxu1 %v11494_v23  ;;  %v5452_v3 = vld [vmem:[#allocation2 + $0xb60] sm:$0xff]  ;;  %v5479_v23 = vld [vmem:[#allocation2 + $0xc38] sm:$0xff] }
 0x846   :  { %5632 = vmatprep.mubr.bf16.mxu0 %v11496_v52  ;;  %v5468_v7 = vld [vmem:[#allocation2 + $0xbe0] sm:$0xff]  ;;  %v5471_v52 = vld [vmem:[#allocation2 + $0xbf8] sm:$0xff] }
 0x847   :  { %6644 = vmatpush3.bf16.msra.mxu1 %v5417_v57  ;;  %v5462_v57 = vld [vmem:[#allocation2 + $0xbb0] sm:$0xff] }
 0x848   :  { %6666 = vmatpush3.bf16.msra.mxu0 %v5433_v2  ;;  %6645 = vmatprep.subr.bf16.mxu1 %v5426_v24  ;;  %v5478_v2 = vld [vmem:[#allocation2 + $0xc30] sm:$0xff] }
 0x849   :  { %6667 = vmatprep.subr.bf16.mxu0 %v5442_v40  ;;  %v5454_v24 = vld [vmem:[#allocation2 + $0xb70] sm:$0xff] }
 0x84a   :  { %v5470_v40 = vld [vmem:[#allocation2 + $0xbf0] sm:$0xff] }
 0x84b   :  { %6646 = vmatpush3.bf16.msra.mxu1 %v5418_v42  ;;  %v11505_v42 = vld [vmem:[#allocation39_spill] sm:$0xff] }
 0x84c   :  { %6668 = vmatpush3.bf16.msra.mxu0 %v5434_v10  ;;  %6647 = vmatprep.subr.bf16.mxu1 %v5427_v34  ;;  %v11506_v10 = vpack.c.bf16 %v11505_v42, %v11505_v42  ;;  %v11507_v34 = vld [vmem:[#allocation56_spill] sm:$0xff] }
 0x84d   :  { %6669 = vmatprep.subr.bf16.mxu0 %v5443_v11  ;;  %v11508_v11 = vpack.c.bf16 %v11507_v34, %v11507_v34 }
 0x84f   :  { %6648 = vmatpush3.bf16.msra.mxu1 %v5419_v9  ;;  %v7508_v9 = vld [vmem:[#allocation14] sm:$0xff]  }
 0x850   :  { %6670 = vmatpush3.bf16.msra.mxu0 %v5435_v27  ;;  %6649 = vmatprep.subr.bf16.mxu1 %v5428_v45  ;;  %v7509_v27 = vld [vmem:[#allocation14 + $0x8] sm:$0xff]   ;;  %v7510_v45 = vld [vmem:[#allocation14 + $0x10] sm:$0xff]  }
 0x851   :  { %6671 = vmatprep.subr.bf16.mxu0 %v5444_v14  ;;  %v7511_v14 = vld [vmem:[#allocation14 + $0x18] sm:$0xff]  }
 0x853   :  { %6650 = vmatpush3.bf16.msra.mxu1 %v5420_v44  ;;  %v7512_v44 = vld [vmem:[#allocation14 + $0x20] sm:$0xff]  }
 0x854   :  { %6672 = vmatpush3.bf16.msra.mxu0 %v5436_v63  ;;  %6651 = vmatprep.subr.bf16.mxu1 %v5429_v56  ;;  %v7513_v63 = vld [vmem:[#allocation14 + $0x28] sm:$0xff]   ;;  %v7514_v56 = vld [vmem:[#allocation14 + $0x30] sm:$0xff]  }
 0x855   :  { %6673 = vmatprep.subr.bf16.mxu0 %v5445_v28  ;;  %v7515_v28 = vld [vmem:[#allocation14 + $0x38] sm:$0xff]  }
 0x857   :  { %6652 = vmatpush3.bf16.msra.mxu1 %v5421_v41 }
 0x858   :  { %6674 = vmatpush3.bf16.msra.mxu0 %v5437_v32  ;;  %6653 = vmatprep.subr.bf16.mxu1 %v5430_v37 }
 0x859   :  { %6675 = vmatprep.subr.bf16.mxu0 %v5446_v17 }
 0x85b   :  { %6654 = vmatpush3.bf16.msra.mxu1 %v5422_v35 }
 0x85c   :  { %6676 = vmatpush3.bf16.msra.mxu0 %v5438_v13  ;;  %6655 = vmatprep.subr.bf16.mxu1 %v5431_v59 }
 0x85d   :  { %6677 = vmatprep.subr.bf16.mxu0 %v5447_v21 }
 0x85f   :  { %6656 = vmatpush3.bf16.msra.mxu1 %v5423_v31 }
 0x860   :  { %6678 = vmatpush3.bf16.msra.mxu0 %v5439_v5  ;;  %6685 = vmatprep.subr.bf16.mxu1 %v5456_v12 }
 0x861   :  { %6707 = vmatprep.subr.bf16.mxu0 %v5472_v54 }
 0x862   :  { %5593 = vmatmul.mubr.bf16.vlgmr.msra.gmra.mrb[36].mxu1 %v11498_v4 }
 0x863   :  { %5633 = vmatmul.mubr.bf16.vlgmr.msra.gmra.mrb[40].mxu0 %v11500_v8  ;;  %6686 = vmatpush3.bf16.msra.mxu1 %v5448_v26 }
 0x864   :  { %6708 = vmatpush3.bf16.msra.mxu0 %v5464_v0  ;;  %6687 = vmatprep.subr.bf16.mxu1 %v5457_v6 }
 0x865   :  { %6709 = vmatprep.subr.bf16.mxu0 %v5473_v39  ;;  %5672 = vmatprep.mubr.bf16.mxu1 %v11502_v33 }
 0x866   :  { %5712 = vmatprep.mubr.bf16.mxu0 %v11504_v30 }
 0x867   :  { %6688 = vmatpush3.bf16.msra.mxu1 %v5449_v19 }
 0x868   :  { %6710 = vmatpush3.bf16.msra.mxu0 %v5465_v53  ;;  %6689 = vmatprep.subr.bf16.mxu1 %v5458_v47 }
 0x869   :  { %6711 = vmatprep.subr.bf16.mxu0 %v5474_v49 }
 0x86b   :  { %6690 = vmatpush3.bf16.msra.mxu1 %v5450_v38 }
 0x86c   :  { %6712 = vmatpush3.bf16.msra.mxu0 %v5466_v18  ;;  %6691 = vmatprep.subr.bf16.mxu1 %v5459_v48 }
 0x86d   :  { %6713 = vmatprep.subr.bf16.mxu0 %v5475_v16 }
 0x86f   :  { %6692 = vmatpush3.bf16.msra.mxu1 %v5451_v55 }
 0x870   :  { %6714 = vmatpush3.bf16.msra.mxu0 %v5467_v60  ;;  %6693 = vmatprep.subr.bf16.mxu1 %v5460_v25  ;;  %v6025_v25 = vld [vmem:[#allocation13] ss:$0 sm:$0xff] }
 0x871   :  { %6715 = vmatprep.subr.bf16.mxu0 %v5476_v15 }
 0x873   :  { %6694 = vmatpush3.bf16.msra.mxu1 %v5452_v3 }
 0x874   :  { %6716 = vmatpush3.bf16.msra.mxu0 %v5468_v7  ;;  %6695 = vmatprep.subr.bf16.mxu1 %v5461_v50 }
 0x875   :  { %6717 = vmatprep.subr.bf16.mxu0 %v5477_v46  ;;  %v6026_v46 = vld [vmem:[#allocation16] ss:$0 sm:$0xff] }
 0x877   :  { %6696 = vmatpush3.bf16.msra.mxu1 %v5453_v20 }
 0x878   :  { %6718 = vmatpush3.bf16.msra.mxu0 %v5469_v29  ;;  %6697 = vmatprep.subr.bf16.mxu1 %v5462_v57 }
 0x879   :  { %6719 = vmatprep.subr.bf16.mxu0 %v5478_v2 }
 0x87b   :  { %6698 = vmatpush3.bf16.msra.mxu1 %v5454_v24 }
 0x87c   :  { %6720 = vmatpush3.bf16.msra.mxu0 %v5470_v40  ;;  %6699 = vmatprep.subr.bf16.mxu1 %v5463_v62 }
 0x87d   :  { %6721 = vmatprep.subr.bf16.mxu0 %v5479_v23 }
 0x87f   :  { %6700 = vmatpush3.bf16.msra.mxu1 %v5455_v58 }
 0x880   :  { %6722 = vmatpush3.bf16.msra.mxu0 %v5471_v52  ;;  %7316 = vmatprep.subr.bf16.mxu1 %v11446_v36 }
 0x882   :  { %5673 = vmatmul.mubr.bf16.vlgmr.msra.gmra.mrb[40].mxu1 %v11506_v10 }
 0x883   :  { %5713 = vmatmul.mubr.bf16.vlgmr.msra.gmra.mrb[44].mxu0 %v11508_v11  ;;  %7332 = vmatprep.mubr.msk.bf16.mxu1 %vm7797_vm3, %v11446_v36 }
 0x884   :  { %7317 = vmatpush3.bf16.msra.mxu1 %v7508_v9 }
 0x885   :  { %7318 = vmatprep.subr.bf16.mxu1 %v11446_v36 }
 0x888   :  { %7319 = vmatpush3.bf16.msra.mxu1 %v7509_v27 }
 0x889   :  { %7320 = vmatprep.subr.bf16.mxu1 %v11446_v36 }
 0x88c   :  { %7321 = vmatpush3.bf16.msra.mxu1 %v7510_v45 }
 0x88d   :  { %7322 = vmatprep.subr.bf16.mxu1 %v11446_v36 }
 0x890   :  { %7323 = vmatpush3.bf16.msra.mxu1 %v7511_v14 }
 0x891   :  { %7324 = vmatprep.subr.bf16.mxu1 %v11446_v36 }
 0x894   :  { %7325 = vmatpush3.bf16.msra.mxu1 %v7512_v44 }
 0x895   :  { %7326 = vmatprep.subr.bf16.mxu1 %v11446_v36 }
 0x898   :  { %7327 = vmatpush3.bf16.msra.mxu1 %v7513_v63 }
 0x899   :  { %7328 = vmatprep.subr.bf16.mxu1 %v11446_v36 }
 0x89c   :  { %7329 = vmatpush3.bf16.msra.mxu1 %v7514_v56 }
 0x89d   :  { %7330 = vmatprep.subr.bf16.mxu1 %v11446_v36 }
 0x8a0   :  { %7331 = vmatpush3.bf16.msra.mxu1 %v7515_v28 }
 0x915   :  { %v6613_v41 = vpop.f32.mrb[32].mxu1 }
 0x916   :  { %v6635_v32 = vpop.f32.mrb[36].mxu0  ;;  %v6614_v37 = vpop.f32.mrb[33].mxu1 }
 0x917   :  { %v6636_v17 = vpop.f32.mrb[37].mxu0  ;;  %v6615_v35 = vadd.f32 %v6614_v37, %v6613_v41  ;;  %v6616_v59 = vpop.f32.mrb[34].mxu1 }
 0x918   :  { %v6637_v13 = vadd.f32 %v6636_v17, %v6635_v32  ;;  %v6638_v21 = vpop.f32.mrb[38].mxu0  ;;  %v6617_v31 = vpop.f32.mrb[35].mxu1 }
 0x919   :  { %v6639_v5 = vpop.f32.mrb[39].mxu0 }
 0x91a   :  { %v5555_v12 = vadd.f32 %v6637_v13, %v6615_v35 }
 0x935   :  { %v6657_v54 = vpop.f32.mrb[36].mxu1 }
 0x936   :  { %v6679_v26 = vpop.f32.mrb[40].mxu0  ;;  %v6658_v0 = vpop.f32.mrb[37].mxu1 }
 0x937   :  { %v6680_v6 = vpop.f32.mrb[41].mxu0  ;;  %v6659_v39 = vadd.f32 %v6658_v0, %v6657_v54  ;;  %v6660_v36 = vpop.f32.mrb[38].mxu1 }
 0x938   :  { %v6681_v43 = vadd.f32 %v6680_v6, %v6679_v26  ;;  %v6682_v4 = vpop.f32.mrb[42].mxu0  ;;  %v6661_v51 = vpop.f32.mrb[39].mxu1 }
 0x939   :  { %v6683_v8 = vpop.f32.mrb[43].mxu0  ;;  %v5595_v19 = vadd.f32 %v6659_v39, %v5555_v12 }
 0x93b   :  { %v5635_v53 = vadd.f32 %v6681_v43, %v5595_v19 }
 0x955   :  { %v6701_v47 = vpop.f32.mrb[40].mxu1 }
 0x956   :  { %v6723_v49 = vpop.f32.mrb[44].mxu0  ;;  %v6702_v1 = vpop.f32.mrb[41].mxu1 }
 0x957   :  { %v6724_v33 = vpop.f32.mrb[45].mxu0  ;;  %v6703_v22 = vadd.f32 %v6702_v1, %v6701_v47  ;;  %v6704_v38 = vpop.f32.mrb[42].mxu1 }
 0x958   :  { %v6725_v30 = vadd.f32 %v6724_v33, %v6723_v49  ;;  %v6726_v18 = vpop.f32.mrb[46].mxu0  ;;  %v6705_v48 = vpop.f32.mrb[43].mxu1 }
 0x959   :  { %v6727_v16 = vpop.f32.mrb[47].mxu0  ;;  %v5675_v55 = vadd.f32 %v6703_v22, %v5635_v53 }
 0x95b   :  { %v5715_v60 = vadd.f32 %v6725_v30, %v5675_v55 }
 0x95d   :  { %v5720_v15 = vadd.f32 %v5715_v60, %v10977_v61 }
 0x95f   :  { %v5728_v3 = vadd.f32 %v6025_v25, %v5720_v15 }
 0x961   :  { %v5729_v7 = vmax.f32 %v5728_v3, 0.0 }
 0x963   :  { %5842 = vst [vmem:[%s11042_s10] sm:$0x3] %v5729_v7  ;;  %v5730_v50 = vpack.c.bf16 %v5729_v7, %v5729_v7 }
 0x965   :  { %7333 = vmatmul.mubr.bf16.vlgmr.msra.gmra.mrb[44].mxu1 %v5730_v50 }
 0xa38   :  { %v5836_v20 = vpop.f32.mrb[44].mxu1 }
 0xa39   :  { %v5837_v29 = vadd.f32 %v6026_v46, %v5836_v20  ;;  %v7334_v57 = vpop.f32.mrb[45].mxu1 }
 0xa3a   :  { %v5839_v2 = vpop.f32.mrb[46].mxu1 }
 0xa3b   :  { %5843 = vst [vmem:[%s11042_s10 + $0x2] sm:$0x3] %v5837_v29  ;;  %v7335_v24 = vpop.f32.mrb[47].mxu1 }
 0xa3c   :  { %5848 = vsyncpa [#allocation7], 1 }
 0xa3d   :  { %5849 = vsyncpa [#allocation9], 1 }
 0xa3e   :  { %5850 = vsyncpa [#allocation12], 1 }
 0xa3f   :  { %5851 = vsyncpa [#allocation15], 1 }
 0xa40   :  { %5852 = vsyncmov [#allocation3] }
 0xa43   :  { %s5853_s2 = vpop.sfrf %5852 }
 0xa44   :  { %p6035_p9 = scmp.ne.s32.totalorder %s5853_s2, 0 }
 0xa46   :  { %5857 = shalt.err (%p6035_p9)  }
 0xa47   :  { %5859 = vsyncmov [#allocation3 + $0x1] }
 0xa4a   :  { %s5860_s9 = vpop.sfrf %5859 }
 0xa4b   :  { %p6036_p4 = scmp.ne.s32.totalorder %s5860_s9, 0 }
 0xa4d   :  { %5864 = shalt.err (%p6036_p4)  }
 0xa4e   :  { %5866 = vsyncmov [#allocation3 + $0x2] }
 0xa51   :  { %s5867_s22 = vpop.sfrf %5866 }
 0xa52   :  { %p6037_p5 = scmp.ne.s32.totalorder %s5867_s22, 0 }
 0xa54   :  { %5871 = shalt.err (%p6037_p5)  }
 0xa55   :  { %5873 = vsyncmov [#allocation3 + $0x3] }
 0xa58   :  { %s5874_s18 = vpop.sfrf %5873 }
 0xa59   :  { %p6038_p6 = scmp.ne.s32.totalorder %s5874_s18, 0 }
 0xa5b   :  { %5878 = shalt.err (%p6038_p6)  }

</bundles_post_ra>
